<compile_context>
chip_gen: v6e
topology: v6e:2x2x1
jax: 0.10.0
libtpu: 0.0.40
codegen_flags: <defaults>
</compile_context>

<pallas_src>
import jax
import jax.numpy as jnp
from jax import lax
from jax.experimental import pallas as pl
from jax.experimental.pallas import tpu as pltpu

LANE = 128  # TPU lane width: channel axis is padded to this.


def _decoder_block_kernel(x_ref, skip_ref, w1_ref, sb1_ref, w2_ref, sb2_ref,
                          o_ref, xpad_ref, acc_ref):
    # x_ref   : (1, H,  W,  Cx)     bf16  pre-upsample features
    # skip_ref: (1, Ho, Wo, Cs)     bf16  encoder skip (Ho=2H, Wo=2W)
    # w1_ref  : (9, LANE, LANE)     bf16  conv1 taps (tap = ky*3+kx), zero-padded
    # sb1_ref : (2, LANE)           f32   folded BN scale / bias (conv1)
    # w2_ref  : (9, LANE, LANE)     bf16  conv2 taps
    # sb2_ref : (2, LANE)           f32   folded BN scale / bias (conv2)
    # o_ref   : (1, Ho*Wo, LANE)    f32   lane-dense output (padded channels)
    # xpad_ref: (Ho+2, Wo+2, LANE)  bf16  scratch: padded activation (halo = 0)
    # acc_ref : (Ho*Wo, LANE)       f32   scratch: MXU accumulator
    H, W, Cx = x_ref.shape[1], x_ref.shape[2], x_ref.shape[3]
    Ho, Wo, Cs = skip_ref.shape[1], skip_ref.shape[2], skip_ref.shape[3]
    C = xpad_ref.shape[2]

    # Zero halo + zero channel padding in one shot.
    xpad_ref[...] = jnp.zeros_like(xpad_ref)

    # Fused nearest 2x upsample of x into the padded scratch.
    # Row doubling: concat along a new leading dim + merge leading dims
    # (minor dims untouched -> layout-trivial). Column doubling: static
    # per-source-column stores (avoids sublane-interleave reshapes).
    xv = x_ref[0]                                               # (H, W, Cx)
    xe = xv[:, None, :, :]                                      # (H, 1, W, Cx)
    rows2 = jnp.concatenate([xe, xe], axis=1).reshape(Ho, W, Cx)
    for wc in range(W):
        col = rows2[:, wc:wc + 1, :]                            # (Ho, 1, Cx)
        xpad_ref[1:Ho + 1, 1 + 2 * wc:2 + 2 * wc, 0:Cx] = col
        xpad_ref[1:Ho + 1, 2 + 2 * wc:3 + 2 * wc, 0:Cx] = col

    # Fused channel concat with the skip connection (no HBM concat pass).
    xpad_ref[1:Ho + 1, 1:Wo + 1, Cx:Cx + Cs] = skip_ref[0]

    def conv3x3_bn_relu(w_ref, sb_ref):
        # 9 taps, each a (Ho*Wo, 128) x (128, 128) bf16 MXU matmul with f32
        # accumulation in VMEM.  dy indexes the untiled leading dim (free);
        # dx is a small sublane shift.  The reshape keeps the 128-lane minor
        # dim, so it is a relabel, not a relayout.
        acc_ref[...] = jnp.zeros_like(acc_ref)
        for dy in range(3):
            for dx in range(3):
                patch = xpad_ref[dy:dy + Ho, dx:dx + Wo, :]
                acc_ref[...] += jnp.dot(
                    patch.reshape(Ho * Wo, C), w_ref[dy * 3 + dx],
                    preferred_element_type=jnp.float32)
        scale = sb_ref[0:1, :]
        bias = sb_ref[1:2, :]
        return jnp.maximum(acc_ref[...] * scale + bias, 0.0)

    # conv1: intermediate stays in VMEM; padded channels come out exactly 0,
    # halo is still 0, so the same scratch feeds conv2.
    y1 = conv3x3_bn_relu(w1_ref, sb1_ref)                       # (Ho*Wo, C) f32
    xpad_ref[1:Ho + 1, 1:Wo + 1, :] = (
        y1.astype(xpad_ref.dtype).reshape(Ho, Wo, C))

    # conv2: lane-dense, unmasked HBM store.
    y2 = conv3x3_bn_relu(w2_ref, sb2_ref)                       # (Ho*Wo, C) f32
    o_ref[0] = y2.astype(o_ref.dtype)


def fold_bn(gamma, beta, running_mean, running_var, eps=1e-5):
    scale = gamma / jnp.sqrt(running_var + eps)
    bias = beta - running_mean * scale
    return scale, bias


def _pad_last(a, size):
    pad = size - a.shape[-1]
    return a if pad == 0 else jnp.pad(a, [(0, 0)] * (a.ndim - 1) + [(0, pad)])


def make_params(key, in_channels, skip_channels, out_channels):
    c1_in = in_channels + skip_channels
    k = jax.random.split(key, 10)

    def conv_w(key, cin, cout):
        # PyTorch layout (Cout, Cin, 3, 3) -> taps (9, Cin, Cout), tap = ky*3+kx
        w = jax.random.normal(key, (cout, cin, 3, 3), jnp.float32) * 0.1
        return jnp.transpose(w, (2, 3, 1, 0)).reshape(9, cin, cout)

    params = {}
    params["w1"] = conv_w(k[0], c1_in, out_channels)
    g1 = 1.0 + 0.1 * jax.random.normal(k[1], (out_channels,), jnp.float32)
    b1 = 0.1 * jax.random.normal(k[2], (out_channels,), jnp.float32)
    m1 = 0.1 * jax.random.normal(k[3], (out_channels,), jnp.float32)
    v1 = jnp.abs(jax.random.normal(k[4], (out_channels,), jnp.float32)) + 0.5
    params["scale1"], params["bias1"] = fold_bn(g1, b1, m1, v1)

    params["w2"] = conv_w(k[5], out_channels, out_channels)
    g2 = 1.0 + 0.1 * jax.random.normal(k[6], (out_channels,), jnp.float32)
    b2 = 0.1 * jax.random.normal(k[7], (out_channels,), jnp.float32)
    m2 = 0.1 * jax.random.normal(k[8], (out_channels,), jnp.float32)
    v2 = jnp.abs(jax.random.normal(k[9], (out_channels,), jnp.float32)) + 0.5
    params["scale2"], params["bias2"] = fold_bn(g2, b2, m2, v2)
    return params


def decoder_block_forward(params, x_nchw, skip_nchw=None):
    N, Cx, H, W = x_nchw.shape
    Ho, Wo = 2 * H, 2 * W
    if skip_nchw is None:
        # Dummy zero skip: its weight rows are zero-padded, so it contributes
        # nothing (matches the module's skip=None path).
        skip_nchw = jnp.zeros((N, 8, Ho, Wo), x_nchw.dtype)
    Cs = skip_nchw.shape[1]
    Cout = params["scale1"].shape[0]
    assert skip_nchw.shape[2] == Ho and skip_nchw.shape[3] == Wo
    assert Cx + Cs <= LANE and Cout <= LANE and params["w1"].shape[1] <= LANE

    # NCHW -> NHWC (tiny tensors) and bf16 cast for the MXU.
    x = jnp.transpose(x_nchw, (0, 2, 3, 1)).astype(jnp.bfloat16)
    skip = jnp.transpose(skip_nchw, (0, 2, 3, 1)).astype(jnp.bfloat16)

    def prep_w(w_taps):                      # (9, cin, cout) -> (9, LANE, LANE)
        t, cin, cout = w_taps.shape
        wp = jnp.zeros((t, LANE, LANE), jnp.float32)
        wp = wp.at[:, :cin, :cout].set(w_taps)
        return wp.astype(jnp.bfloat16)

    def prep_sb(scale, bias):                # -> (2, LANE) f32
        return jnp.stack([_pad_last(scale, LANE), _pad_last(bias, LANE)])

    w1p, w2p = prep_w(params["w1"]), prep_w(params["w2"])
    sb1 = prep_sb(params["scale1"], params["bias1"])
    sb2 = prep_sb(params["scale2"], params["bias2"])

    out = pl.pallas_call(
        _decoder_block_kernel,
        out_shape=jax.ShapeDtypeStruct((N, Ho * Wo, LANE), jnp.float32),
        grid=(N,),
        in_specs=[
            pl.BlockSpec((1, H, W, Cx), lambda n: (n, 0, 0, 0)),
            pl.BlockSpec((1, Ho, Wo, Cs), lambda n: (n, 0, 0, 0)),
            pl.BlockSpec((9, LANE, LANE), lambda n: (0, 0, 0)),
            pl.BlockSpec((2, LANE), lambda n: (0, 0)),
            pl.BlockSpec((9, LANE, LANE), lambda n: (0, 0, 0)),
            pl.BlockSpec((2, LANE), lambda n: (0, 0)),
        ],
        out_specs=pl.BlockSpec((1, Ho * Wo, LANE), lambda n: (n, 0, 0)),
        scratch_shapes=[
            pltpu.VMEM((Ho + 2, Wo + 2, LANE), jnp.bfloat16),
            pltpu.VMEM((Ho * Wo, LANE), jnp.float32),
        ],
        compiler_params=pltpu.CompilerParams(
            dimension_semantics=("parallel",)),
    )(x, skip, w1p, sb1, w2p, sb2)

    # Strip channel padding, back to NCHW (tiny XLA post-pass).
    out = out[:, :, :Cout].reshape(N, Ho, Wo, Cout)
    return jnp.transpose(out, (0, 3, 1, 2))


def decoder_block_reference(params, x_nchw, skip_nchw=None):
    """Pure-JAX reference mirroring the kernel's precision choices
    (bf16 conv inputs / weights, f32 accumulation, bf16 intermediate)."""
    x = jnp.repeat(jnp.repeat(x_nchw, 2, axis=2), 2, axis=3)
    if skip_nchw is not None:
        x = jnp.concatenate([x, skip_nchw], axis=1)
    x = x.astype(jnp.bfloat16)

    def conv_block(x, w_taps, scale, bias):
        cin, cout = w_taps.shape[1], w_taps.shape[2]
        w = jnp.transpose(w_taps.reshape(3, 3, cin, cout), (3, 2, 0, 1))
        y = lax.conv_general_dilated(
            x, w.astype(jnp.bfloat16), window_strides=(1, 1),
            padding=((1, 1), (1, 1)),
            dimension_numbers=("NCHW", "OIHW", "NCHW"),
            preferred_element_type=jnp.float32)
        y = y * scale[None, :, None, None] + bias[None, :, None, None]
        return jnp.maximum(y, 0.0)

    y1 = conv_block(x, params["w1"], params["scale1"], params["bias1"])
    y2 = conv_block(y1.astype(jnp.bfloat16), params["w2"],
                    params["scale2"], params["bias2"])
    return y2


if __name__ == "__main__":
    in_channels, skip_channels, out_channels = 4, 4, 8
    N, H, W = 2, 8, 8  # x is upsampled to 16x16; skip is 16x16

    key = jax.random.PRNGKey(0)
    kx, ks, kp = jax.random.split(key, 3)
    x = jax.random.normal(kx, (N, in_channels, H, W), jnp.float32)
    skip = jax.random.normal(ks, (N, skip_channels, 2 * H, 2 * W), jnp.float32)
    params = make_params(kp, in_channels, skip_channels, out_channels)

    fwd = jax.jit(decoder_block_forward)
    out = jax.block_until_ready(fwd(params, x, skip))
    ref = decoder_block_reference(params, x, skip)

    assert out.shape == (N, out_channels, 2 * H, 2 * W)
    assert jnp.allclose(out, ref, atol=5e-3, rtol=5e-3), float(
        jnp.max(jnp.abs(out - ref)))

    print("KERNEL_OK")
</pallas_src>

<mosaic_0001>
module attributes {stable_mosaic.version = 11 : i64} {
  func.func @_decoder_block_kernel(%arg0: i32, %arg1: memref<1x8x8x4xbf16, #tpu.memory_space<vmem>>, %arg2: memref<1x16x16x4xbf16, #tpu.memory_space<vmem>>, %arg3: memref<9x128x128xbf16, #tpu.memory_space<vmem>>, %arg4: memref<2x128xf32, #tpu.memory_space<vmem>>, %arg5: memref<9x128x128xbf16, #tpu.memory_space<vmem>>, %arg6: memref<2x128xf32, #tpu.memory_space<vmem>>, %arg7: memref<1x256x128xf32, #tpu.memory_space<vmem>>, %arg8: memref<18x18x128xbf16, #tpu.memory_space<vmem>>, %arg9: memref<256x128xf32, #tpu.memory_space<vmem>>) attributes {dimension_semantics = [#tpu.dimension_semantics<parallel>], iteration_bounds = array<i64: 2>, scalar_prefetch = 0 : i64, scratch_operands = 2 : i64, tpu.core_type = #tpu.core_type<tc>, window_params = [{transform_indices = @transform_0, window_bounds = array<i64: 1, 8, 8, 4>}, {transform_indices = @transform_1, window_bounds = array<i64: 1, 16, 16, 4>}, {pipeline_mode = #tpu.pipeline_mode<synchronous>, transform_indices = @transform_2, window_bounds = array<i64: 9, 128, 128>}, {pipeline_mode = #tpu.pipeline_mode<synchronous>, transform_indices = @transform_3, window_bounds = array<i64: 2, 128>}, {pipeline_mode = #tpu.pipeline_mode<synchronous>, transform_indices = @transform_4, window_bounds = array<i64: 9, 128, 128>}, {pipeline_mode = #tpu.pipeline_mode<synchronous>, transform_indices = @transform_5, window_bounds = array<i64: 2, 128>}, {transform_indices = @transform_6, window_bounds = array<i64: 1, 256, 128>}]} {
    %cst = arith.constant 0.000000e+00 : bf16
    %0 = vector.broadcast %cst : bf16 to vector<18x18x128xbf16>
    %c0 = arith.constant 0 : index
    %c0_0 = arith.constant 0 : index
    %c0_1 = arith.constant 0 : index
    %1 = vector.load %arg8[%c0, %c0_0, %c0_1] : memref<18x18x128xbf16, #tpu.memory_space<vmem>>, vector<18x18x128xbf16>
    tpu.vector_store %arg8[%c0, %c0_0, %c0_1], %0 {strides = array<i32>} : memref<18x18x128xbf16, #tpu.memory_space<vmem>>, vector<18x18x128xbf16>,
    %c0_2 = arith.constant 0 : index
    %c0_3 = arith.constant 0 : index
    %c0_4 = arith.constant 0 : index
    %c0_5 = arith.constant 0 : index
    %2 = vector.load %arg1[%c0_2, %c0_3, %c0_4, %c0_5] : memref<1x8x8x4xbf16, #tpu.memory_space<vmem>>, vector<1x8x8x4xbf16>
    %3 = vector.shape_cast %2 : vector<1x8x8x4xbf16> to vector<8x8x4xbf16>
    %4 = vector.shape_cast %3 : vector<8x8x4xbf16> to vector<8x1x8x4xbf16>
    %5 = tpu.concatenate %4, %4 in 1 : vector<8x1x8x4xbf16>, vector<8x1x8x4xbf16> -> vector<8x2x8x4xbf16>
    %6 = vector.shape_cast %5 : vector<8x2x8x4xbf16> to vector<16x8x4xbf16>
    %7 = vector.extract_strided_slice %6 {offsets = [0, 0, 0], sizes = [16, 1, 4], strides = [1, 1, 1]} : vector<16x8x4xbf16> to vector<16x1x4xbf16>
    %c1 = arith.constant 1 : index
    %c1_6 = arith.constant 1 : index
    %c0_7 = arith.constant 0 : index
    %8 = vector.load %arg8[%c1, %c1_6, %c0_7] : memref<18x18x128xbf16, #tpu.memory_space<vmem>>, vector<16x1x4xbf16>
    tpu.vector_store %arg8[%c1, %c1_6, %c0_7], %7 {strides = array<i32>} : memref<18x18x128xbf16, #tpu.memory_space<vmem>>, vector<16x1x4xbf16>,
    %c1_8 = arith.constant 1 : index
    %c2 = arith.constant 2 : index
    %c0_9 = arith.constant 0 : index
    %9 = vector.load %arg8[%c1_8, %c2, %c0_9] : memref<18x18x128xbf16, #tpu.memory_space<vmem>>, vector<16x1x4xbf16>
    tpu.vector_store %arg8[%c1_8, %c2, %c0_9], %7 {strides = array<i32>} : memref<18x18x128xbf16, #tpu.memory_space<vmem>>, vector<16x1x4xbf16>,
    %10 = vector.extract_strided_slice %6 {offsets = [0, 1, 0], sizes = [16, 1, 4], strides = [1, 1, 1]} : vector<16x8x4xbf16> to vector<16x1x4xbf16>
    %c1_10 = arith.constant 1 : index
    %c3 = arith.constant 3 : index
    %c0_11 = arith.constant 0 : index
    %11 = vector.load %arg8[%c1_10, %c3, %c0_11] : memref<18x18x128xbf16, #tpu.memory_space<vmem>>, vector<16x1x4xbf16>
    tpu.vector_store %arg8[%c1_10, %c3, %c0_11], %10 {strides = array<i32>} : memref<18x18x128xbf16, #tpu.memory_space<vmem>>, vector<16x1x4xbf16>,
    %c1_12 = arith.constant 1 : index
    %c4 = arith.constant 4 : index
    %c0_13 = arith.constant 0 : index
    %12 = vector.load %arg8[%c1_12, %c4, %c0_13] : memref<18x18x128xbf16, #tpu.memory_space<vmem>>, vector<16x1x4xbf16>
    tpu.vector_store %arg8[%c1_12, %c4, %c0_13], %10 {strides = array<i32>} : memref<18x18x128xbf16, #tpu.memory_space<vmem>>, vector<16x1x4xbf16>,
    %13 = vector.extract_strided_slice %6 {offsets = [0, 2, 0], sizes = [16, 1, 4], strides = [1, 1, 1]} : vector<16x8x4xbf16> to vector<16x1x4xbf16>
    %c1_14 = arith.constant 1 : index
    %c5 = arith.constant 5 : index
    %c0_15 = arith.constant 0 : index
    %14 = vector.load %arg8[%c1_14, %c5, %c0_15] : memref<18x18x128xbf16, #tpu.memory_space<vmem>>, vector<16x1x4xbf16>
    tpu.vector_store %arg8[%c1_14, %c5, %c0_15], %13 {strides = array<i32>} : memref<18x18x128xbf16, #tpu.memory_space<vmem>>, vector<16x1x4xbf16>,
    %c1_16 = arith.constant 1 : index
    %c6 = arith.constant 6 : index
    %c0_17 = arith.constant 0 : index
    %15 = vector.load %arg8[%c1_16, %c6, %c0_17] : memref<18x18x128xbf16, #tpu.memory_space<vmem>>, vector<16x1x4xbf16>
    tpu.vector_store %arg8[%c1_16, %c6, %c0_17], %13 {strides = array<i32>} : memref<18x18x128xbf16, #tpu.memory_space<vmem>>, vector<16x1x4xbf16>,
    %16 = vector.extract_strided_slice %6 {offsets = [0, 3, 0], sizes = [16, 1, 4], strides = [1, 1, 1]} : vector<16x8x4xbf16> to vector<16x1x4xbf16>
    %c1_18 = arith.constant 1 : index
    %c7 = arith.constant 7 : index
    %c0_19 = arith.constant 0 : index
    %17 = vector.load %arg8[%c1_18, %c7, %c0_19] : memref<18x18x128xbf16, #tpu.memory_space<vmem>>, vector<16x1x4xbf16>
    tpu.vector_store %arg8[%c1_18, %c7, %c0_19], %16 {strides = array<i32>} : memref<18x18x128xbf16, #tpu.memory_space<vmem>>, vector<16x1x4xbf16>,
    %c1_20 = arith.constant 1 : index
    %c8 = arith.constant 8 : index
    %c0_21 = arith.constant 0 : index
    %18 = vector.load %arg8[%c1_20, %c8, %c0_21] : memref<18x18x128xbf16, #tpu.memory_space<vmem>>, vector<16x1x4xbf16>
    tpu.vector_store %arg8[%c1_20, %c8, %c0_21], %16 {strides = array<i32>} : memref<18x18x128xbf16, #tpu.memory_space<vmem>>, vector<16x1x4xbf16>,
    %19 = vector.extract_strided_slice %6 {offsets = [0, 4, 0], sizes = [16, 1, 4], strides = [1, 1, 1]} : vector<16x8x4xbf16> to vector<16x1x4xbf16>
    %c1_22 = arith.constant 1 : index
    %c9 = arith.constant 9 : index
    %c0_23 = arith.constant 0 : index
    %20 = vector.load %arg8[%c1_22, %c9, %c0_23] : memref<18x18x128xbf16, #tpu.memory_space<vmem>>, vector<16x1x4xbf16>
    tpu.vector_store %arg8[%c1_22, %c9, %c0_23], %19 {strides = array<i32>} : memref<18x18x128xbf16, #tpu.memory_space<vmem>>, vector<16x1x4xbf16>,
    %c1_24 = arith.constant 1 : index
    %c10 = arith.constant 10 : index
    %c0_25 = arith.constant 0 : index
    %21 = vector.load %arg8[%c1_24, %c10, %c0_25] : memref<18x18x128xbf16, #tpu.memory_space<vmem>>, vector<16x1x4xbf16>
    tpu.vector_store %arg8[%c1_24, %c10, %c0_25], %19 {strides = array<i32>} : memref<18x18x128xbf16, #tpu.memory_space<vmem>>, vector<16x1x4xbf16>,
    %22 = vector.extract_strided_slice %6 {offsets = [0, 5, 0], sizes = [16, 1, 4], strides = [1, 1, 1]} : vector<16x8x4xbf16> to vector<16x1x4xbf16>
    %c1_26 = arith.constant 1 : index
    %c11 = arith.constant 11 : index
    %c0_27 = arith.constant 0 : index
    %23 = vector.load %arg8[%c1_26, %c11, %c0_27] : memref<18x18x128xbf16, #tpu.memory_space<vmem>>, vector<16x1x4xbf16>
    tpu.vector_store %arg8[%c1_26, %c11, %c0_27], %22 {strides = array<i32>} : memref<18x18x128xbf16, #tpu.memory_space<vmem>>, vector<16x1x4xbf16>,
    %c1_28 = arith.constant 1 : index
    %c12 = arith.constant 12 : index
    %c0_29 = arith.constant 0 : index
    %24 = vector.load %arg8[%c1_28, %c12, %c0_29] : memref<18x18x128xbf16, #tpu.memory_space<vmem>>, vector<16x1x4xbf16>
    tpu.vector_store %arg8[%c1_28, %c12, %c0_29], %22 {strides = array<i32>} : memref<18x18x128xbf16, #tpu.memory_space<vmem>>, vector<16x1x4xbf16>,
    %25 = vector.extract_strided_slice %6 {offsets = [0, 6, 0], sizes = [16, 1, 4], strides = [1, 1, 1]} : vector<16x8x4xbf16> to vector<16x1x4xbf16>
    %c1_30 = arith.constant 1 : index
    %c13 = arith.constant 13 : index
    %c0_31 = arith.constant 0 : index
    %26 = vector.load %arg8[%c1_30, %c13, %c0_31] : memref<18x18x128xbf16, #tpu.memory_space<vmem>>, vector<16x1x4xbf16>
    tpu.vector_store %arg8[%c1_30, %c13, %c0_31], %25 {strides = array<i32>} : memref<18x18x128xbf16, #tpu.memory_space<vmem>>, vector<16x1x4xbf16>,
    %c1_32 = arith.constant 1 : index
    %c14 = arith.constant 14 : index
    %c0_33 = arith.constant 0 : index
    %27 = vector.load %arg8[%c1_32, %c14, %c0_33] : memref<18x18x128xbf16, #tpu.memory_space<vmem>>, vector<16x1x4xbf16>
    tpu.vector_store %arg8[%c1_32, %c14, %c0_33], %25 {strides = array<i32>} : memref<18x18x128xbf16, #tpu.memory_space<vmem>>, vector<16x1x4xbf16>,
    %28 = vector.extract_strided_slice %6 {offsets = [0, 7, 0], sizes = [16, 1, 4], strides = [1, 1, 1]} : vector<16x8x4xbf16> to vector<16x1x4xbf16>
    %c1_34 = arith.constant 1 : index
    %c15 = arith.constant 15 : index
    %c0_35 = arith.constant 0 : index
    %29 = vector.load %arg8[%c1_34, %c15, %c0_35] : memref<18x18x128xbf16, #tpu.memory_space<vmem>>, vector<16x1x4xbf16>
    tpu.vector_store %arg8[%c1_34, %c15, %c0_35], %28 {strides = array<i32>} : memref<18x18x128xbf16, #tpu.memory_space<vmem>>, vector<16x1x4xbf16>,
    %c1_36 = arith.constant 1 : index
    %c16 = arith.constant 16 : index
    %c0_37 = arith.constant 0 : index
    %30 = vector.load %arg8[%c1_36, %c16, %c0_37] : memref<18x18x128xbf16, #tpu.memory_space<vmem>>, vector<16x1x4xbf16>
    tpu.vector_store %arg8[%c1_36, %c16, %c0_37], %28 {strides = array<i32>} : memref<18x18x128xbf16, #tpu.memory_space<vmem>>, vector<16x1x4xbf16>,
    %c0_38 = arith.constant 0 : index
    %c0_39 = arith.constant 0 : index
    %c0_40 = arith.constant 0 : index
    %c0_41 = arith.constant 0 : index
    %31 = vector.load %arg2[%c0_38, %c0_39, %c0_40, %c0_41] : memref<1x16x16x4xbf16, #tpu.memory_space<vmem>>, vector<1x16x16x4xbf16>
    %32 = vector.shape_cast %31 : vector<1x16x16x4xbf16> to vector<16x16x4xbf16>
    %c1_42 = arith.constant 1 : index
    %c1_43 = arith.constant 1 : index
    %c4_44 = arith.constant 4 : index
    %33 = vector.load %arg8[%c1_42, %c1_43, %c4_44] : memref<18x18x128xbf16, #tpu.memory_space<vmem>>, vector<16x16x4xbf16>
    tpu.vector_store %arg8[%c1_42, %c1_43, %c4_44], %32 {strides = array<i32>} : memref<18x18x128xbf16, #tpu.memory_space<vmem>>, vector<16x16x4xbf16>,
    %cst_45 = arith.constant 0.000000e+00 : f32
    %34 = vector.broadcast %cst_45 : f32 to vector<256x128xf32>
    %c0_46 = arith.constant 0 : index
    %c0_47 = arith.constant 0 : index
    %35 = vector.load %arg9[%c0_46, %c0_47] : memref<256x128xf32, #tpu.memory_space<vmem>>, vector<256x128xf32>
    tpu.vector_store %arg9[%c0_46, %c0_47], %34 {strides = array<i32>} : memref<256x128xf32, #tpu.memory_space<vmem>>, vector<256x128xf32>,
    %c0_48 = arith.constant 0 : index
    %c0_49 = arith.constant 0 : index
    %c0_50 = arith.constant 0 : index
    %36 = vector.load %arg8[%c0_48, %c0_49, %c0_50] : memref<18x18x128xbf16, #tpu.memory_space<vmem>>, vector<16x16x128xbf16>
    %c0_51 = arith.constant 0 : index
    %c0_52 = arith.constant 0 : index
    %37 = vector.load %arg9[%c0_51, %c0_52] : memref<256x128xf32, #tpu.memory_space<vmem>>, vector<256x128xf32>
    %38 = vector.shape_cast %36 : vector<16x16x128xbf16> to vector<256x128xbf16>
    %c0_53 = arith.constant 0 : index
    %c0_54 = arith.constant 0 : index
    %c0_55 = arith.constant 0 : index
    %39 = vector.load %arg3[%c0_53, %c0_54, %c0_55] : memref<9x128x128xbf16, #tpu.memory_space<vmem>>, vector<1x128x128xbf16>
    %40 = vector.shape_cast %39 : vector<1x128x128xbf16> to vector<128x128xbf16>
    %cst_56 = arith.constant dense<0.000000e+00> : vector<256x128xf32>
    %41 = tpu.matmul %38, %40, %cst_56 {dimension_numbers = #tpu.dot_dimension_numbers<[1], [0], [0], [1], [0, 0, 1, 1], [], []>} : vector<256x128xbf16>, vector<128x128xbf16>, vector<256x128xf32> -> vector<256x128xf32>
    %42 = arith.addf %37, %41 : vector<256x128xf32>
    %c0_57 = arith.constant 0 : index
    %c0_58 = arith.constant 0 : index
    %43 = vector.load %arg9[%c0_57, %c0_58] : memref<256x128xf32, #tpu.memory_space<vmem>>, vector<256x128xf32>
    tpu.vector_store %arg9[%c0_57, %c0_58], %42 {strides = array<i32>} : memref<256x128xf32, #tpu.memory_space<vmem>>, vector<256x128xf32>,
    %c0_59 = arith.constant 0 : index
    %c1_60 = arith.constant 1 : index
    %c0_61 = arith.constant 0 : index
    %44 = vector.load %arg8[%c0_59, %c1_60, %c0_61] : memref<18x18x128xbf16, #tpu.memory_space<vmem>>, vector<16x16x128xbf16>
    %c0_62 = arith.constant 0 : index
    %c0_63 = arith.constant 0 : index
    %45 = vector.load %arg9[%c0_62, %c0_63] : memref<256x128xf32, #tpu.memory_space<vmem>>, vector<256x128xf32>
    %46 = vector.shape_cast %44 : vector<16x16x128xbf16> to vector<256x128xbf16>
    %c1_64 = arith.constant 1 : index
    %c0_65 = arith.constant 0 : index
    %c0_66 = arith.constant 0 : index
    %47 = vector.load %arg3[%c1_64, %c0_65, %c0_66] : memref<9x128x128xbf16, #tpu.memory_space<vmem>>, vector<1x128x128xbf16>
    %48 = vector.shape_cast %47 : vector<1x128x128xbf16> to vector<128x128xbf16>
    %cst_67 = arith.constant dense<0.000000e+00> : vector<256x128xf32>
    %49 = tpu.matmul %46, %48, %cst_67 {dimension_numbers = #tpu.dot_dimension_numbers<[1], [0], [0], [1], [0, 0, 1, 1], [], []>} : vector<256x128xbf16>, vector<128x128xbf16>, vector<256x128xf32> -> vector<256x128xf32>
    %50 = arith.addf %45, %49 : vector<256x128xf32>
    %c0_68 = arith.constant 0 : index
    %c0_69 = arith.constant 0 : index
    %51 = vector.load %arg9[%c0_68, %c0_69] : memref<256x128xf32, #tpu.memory_space<vmem>>, vector<256x128xf32>
    tpu.vector_store %arg9[%c0_68, %c0_69], %50 {strides = array<i32>} : memref<256x128xf32, #tpu.memory_space<vmem>>, vector<256x128xf32>,
    %c0_70 = arith.constant 0 : index
    %c2_71 = arith.constant 2 : index
    %c0_72 = arith.constant 0 : index
    %52 = vector.load %arg8[%c0_70, %c2_71, %c0_72] : memref<18x18x128xbf16, #tpu.memory_space<vmem>>, vector<16x16x128xbf16>
    %c0_73 = arith.constant 0 : index
    %c0_74 = arith.constant 0 : index
    %53 = vector.load %arg9[%c0_73, %c0_74] : memref<256x128xf32, #tpu.memory_space<vmem>>, vector<256x128xf32>
    %54 = vector.shape_cast %52 : vector<16x16x128xbf16> to vector<256x128xbf16>
    %c2_75 = arith.constant 2 : index
    %c0_76 = arith.constant 0 : index
    %c0_77 = arith.constant 0 : index
    %55 = vector.load %arg3[%c2_75, %c0_76, %c0_77] : memref<9x128x128xbf16, #tpu.memory_space<vmem>>, vector<1x128x128xbf16>
    %56 = vector.shape_cast %55 : vector<1x128x128xbf16> to vector<128x128xbf16>
    %cst_78 = arith.constant dense<0.000000e+00> : vector<256x128xf32>
    %57 = tpu.matmul %54, %56, %cst_78 {dimension_numbers = #tpu.dot_dimension_numbers<[1], [0], [0], [1], [0, 0, 1, 1], [], []>} : vector<256x128xbf16>, vector<128x128xbf16>, vector<256x128xf32> -> vector<256x128xf32>
    %58 = arith.addf %53, %57 : vector<256x128xf32>
    %c0_79 = arith.constant 0 : index
    %c0_80 = arith.constant 0 : index
    %59 = vector.load %arg9[%c0_79, %c0_80] : memref<256x128xf32, #tpu.memory_space<vmem>>, vector<256x128xf32>
    tpu.vector_store %arg9[%c0_79, %c0_80], %58 {strides = array<i32>} : memref<256x128xf32, #tpu.memory_space<vmem>>, vector<256x128xf32>,
    %c1_81 = arith.constant 1 : index
    %c0_82 = arith.constant 0 : index
    %c0_83 = arith.constant 0 : index
    %60 = vector.load %arg8[%c1_81, %c0_82, %c0_83] : memref<18x18x128xbf16, #tpu.memory_space<vmem>>, vector<16x16x128xbf16>
    %c0_84 = arith.constant 0 : index
    %c0_85 = arith.constant 0 : index
    %61 = vector.load %arg9[%c0_84, %c0_85] : memref<256x128xf32, #tpu.memory_space<vmem>>, vector<256x128xf32>
    %62 = vector.shape_cast %60 : vector<16x16x128xbf16> to vector<256x128xbf16>
    %c3_86 = arith.constant 3 : index
    %c0_87 = arith.constant 0 : index
    %c0_88 = arith.constant 0 : index
    %63 = vector.load %arg3[%c3_86, %c0_87, %c0_88] : memref<9x128x128xbf16, #tpu.memory_space<vmem>>, vector<1x128x128xbf16>
    %64 = vector.shape_cast %63 : vector<1x128x128xbf16> to vector<128x128xbf16>
    %cst_89 = arith.constant dense<0.000000e+00> : vector<256x128xf32>
    %65 = tpu.matmul %62, %64, %cst_89 {dimension_numbers = #tpu.dot_dimension_numbers<[1], [0], [0], [1], [0, 0, 1, 1], [], []>} : vector<256x128xbf16>, vector<128x128xbf16>, vector<256x128xf32> -> vector<256x128xf32>
    %66 = arith.addf %61, %65 : vector<256x128xf32>
    %c0_90 = arith.constant 0 : index
    %c0_91 = arith.constant 0 : index
    %67 = vector.load %arg9[%c0_90, %c0_91] : memref<256x128xf32, #tpu.memory_space<vmem>>, vector<256x128xf32>
    tpu.vector_store %arg9[%c0_90, %c0_91], %66 {strides = array<i32>} : memref<256x128xf32, #tpu.memory_space<vmem>>, vector<256x128xf32>,
    %c1_92 = arith.constant 1 : index
    %c1_93 = arith.constant 1 : index
    %c0_94 = arith.constant 0 : index
    %68 = vector.load %arg8[%c1_92, %c1_93, %c0_94] : memref<18x18x128xbf16, #tpu.memory_space<vmem>>, vector<16x16x128xbf16>
    %c0_95 = arith.constant 0 : index
    %c0_96 = arith.constant 0 : index
    %69 = vector.load %arg9[%c0_95, %c0_96] : memref<256x128xf32, #tpu.memory_space<vmem>>, vector<256x128xf32>
    %70 = vector.shape_cast %68 : vector<16x16x128xbf16> to vector<256x128xbf16>
    %c4_97 = arith.constant 4 : index
    %c0_98 = arith.constant 0 : index
    %c0_99 = arith.constant 0 : index
    %71 = vector.load %arg3[%c4_97, %c0_98, %c0_99] : memref<9x128x128xbf16, #tpu.memory_space<vmem>>, vector<1x128x128xbf16>
    %72 = vector.shape_cast %71 : vector<1x128x128xbf16> to vector<128x128xbf16>
    %cst_100 = arith.constant dense<0.000000e+00> : vector<256x128xf32>
    %73 = tpu.matmul %70, %72, %cst_100 {dimension_numbers = #tpu.dot_dimension_numbers<[1], [0], [0], [1], [0, 0, 1, 1], [], []>} : vector<256x128xbf16>, vector<128x128xbf16>, vector<256x128xf32> -> vector<256x128xf32>
    %74 = arith.addf %69, %73 : vector<256x128xf32>
    %c0_101 = arith.constant 0 : index
    %c0_102 = arith.constant 0 : index
    %75 = vector.load %arg9[%c0_101, %c0_102] : memref<256x128xf32, #tpu.memory_space<vmem>>, vector<256x128xf32>
    tpu.vector_store %arg9[%c0_101, %c0_102], %74 {strides = array<i32>} : memref<256x128xf32, #tpu.memory_space<vmem>>, vector<256x128xf32>,
    %c1_103 = arith.constant 1 : index
    %c2_104 = arith.constant 2 : index
    %c0_105 = arith.constant 0 : index
    %76 = vector.load %arg8[%c1_103, %c2_104, %c0_105] : memref<18x18x128xbf16, #tpu.memory_space<vmem>>, vector<16x16x128xbf16>
    %c0_106 = arith.constant 0 : index
    %c0_107 = arith.constant 0 : index
    %77 = vector.load %arg9[%c0_106, %c0_107] : memref<256x128xf32, #tpu.memory_space<vmem>>, vector<256x128xf32>
    %78 = vector.shape_cast %76 : vector<16x16x128xbf16> to vector<256x128xbf16>
    %c5_108 = arith.constant 5 : index
    %c0_109 = arith.constant 0 : index
    %c0_110 = arith.constant 0 : index
    %79 = vector.load %arg3[%c5_108, %c0_109, %c0_110] : memref<9x128x128xbf16, #tpu.memory_space<vmem>>, vector<1x128x128xbf16>
    %80 = vector.shape_cast %79 : vector<1x128x128xbf16> to vector<128x128xbf16>
    %cst_111 = arith.constant dense<0.000000e+00> : vector<256x128xf32>
    %81 = tpu.matmul %78, %80, %cst_111 {dimension_numbers = #tpu.dot_dimension_numbers<[1], [0], [0], [1], [0, 0, 1, 1], [], []>} : vector<256x128xbf16>, vector<128x128xbf16>, vector<256x128xf32> -> vector<256x128xf32>
    %82 = arith.addf %77, %81 : vector<256x128xf32>
    %c0_112 = arith.constant 0 : index
    %c0_113 = arith.constant 0 : index
    %83 = vector.load %arg9[%c0_112, %c0_113] : memref<256x128xf32, #tpu.memory_space<vmem>>, vector<256x128xf32>
    tpu.vector_store %arg9[%c0_112, %c0_113], %82 {strides = array<i32>} : memref<256x128xf32, #tpu.memory_space<vmem>>, vector<256x128xf32>,
    %c2_114 = arith.constant 2 : index
    %c0_115 = arith.constant 0 : index
    %c0_116 = arith.constant 0 : index
    %84 = vector.load %arg8[%c2_114, %c0_115, %c0_116] : memref<18x18x128xbf16, #tpu.memory_space<vmem>>, vector<16x16x128xbf16>
    %c0_117 = arith.constant 0 : index
    %c0_118 = arith.constant 0 : index
    %85 = vector.load %arg9[%c0_117, %c0_118] : memref<256x128xf32, #tpu.memory_space<vmem>>, vector<256x128xf32>
    %86 = vector.shape_cast %84 : vector<16x16x128xbf16> to vector<256x128xbf16>
    %c6_119 = arith.constant 6 : index
    %c0_120 = arith.constant 0 : index
    %c0_121 = arith.constant 0 : index
    %87 = vector.load %arg3[%c6_119, %c0_120, %c0_121] : memref<9x128x128xbf16, #tpu.memory_space<vmem>>, vector<1x128x128xbf16>
    %88 = vector.shape_cast %87 : vector<1x128x128xbf16> to vector<128x128xbf16>
    %cst_122 = arith.constant dense<0.000000e+00> : vector<256x128xf32>
    %89 = tpu.matmul %86, %88, %cst_122 {dimension_numbers = #tpu.dot_dimension_numbers<[1], [0], [0], [1], [0, 0, 1, 1], [], []>} : vector<256x128xbf16>, vector<128x128xbf16>, vector<256x128xf32> -> vector<256x128xf32>
    %90 = arith.addf %85, %89 : vector<256x128xf32>
    %c0_123 = arith.constant 0 : index
    %c0_124 = arith.constant 0 : index
    %91 = vector.load %arg9[%c0_123, %c0_124] : memref<256x128xf32, #tpu.memory_space<vmem>>, vector<256x128xf32>
    tpu.vector_store %arg9[%c0_123, %c0_124], %90 {strides = array<i32>} : memref<256x128xf32, #tpu.memory_space<vmem>>, vector<256x128xf32>,
    %c2_125 = arith.constant 2 : index
    %c1_126 = arith.constant 1 : index
    %c0_127 = arith.constant 0 : index
    %92 = vector.load %arg8[%c2_125, %c1_126, %c0_127] : memref<18x18x128xbf16, #tpu.memory_space<vmem>>, vector<16x16x128xbf16>
    %c0_128 = arith.constant 0 : index
    %c0_129 = arith.constant 0 : index
    %93 = vector.load %arg9[%c0_128, %c0_129] : memref<256x128xf32, #tpu.memory_space<vmem>>, vector<256x128xf32>
    %94 = vector.shape_cast %92 : vector<16x16x128xbf16> to vector<256x128xbf16>
    %c7_130 = arith.constant 7 : index
    %c0_131 = arith.constant 0 : index
    %c0_132 = arith.constant 0 : index
    %95 = vector.load %arg3[%c7_130, %c0_131, %c0_132] : memref<9x128x128xbf16, #tpu.memory_space<vmem>>, vector<1x128x128xbf16>
    %96 = vector.shape_cast %95 : vector<1x128x128xbf16> to vector<128x128xbf16>
    %cst_133 = arith.constant dense<0.000000e+00> : vector<256x128xf32>
    %97 = tpu.matmul %94, %96, %cst_133 {dimension_numbers = #tpu.dot_dimension_numbers<[1], [0], [0], [1], [0, 0, 1, 1], [], []>} : vector<256x128xbf16>, vector<128x128xbf16>, vector<256x128xf32> -> vector<256x128xf32>
    %98 = arith.addf %93, %97 : vector<256x128xf32>
    %c0_134 = arith.constant 0 : index
    %c0_135 = arith.constant 0 : index
    %99 = vector.load %arg9[%c0_134, %c0_135] : memref<256x128xf32, #tpu.memory_space<vmem>>, vector<256x128xf32>
    tpu.vector_store %arg9[%c0_134, %c0_135], %98 {strides = array<i32>} : memref<256x128xf32, #tpu.memory_space<vmem>>, vector<256x128xf32>,
    %c2_136 = arith.constant 2 : index
    %c2_137 = arith.constant 2 : index
    %c0_138 = arith.constant 0 : index
    %100 = vector.load %arg8[%c2_136, %c2_137, %c0_138] : memref<18x18x128xbf16, #tpu.memory_space<vmem>>, vector<16x16x128xbf16>
    %c0_139 = arith.constant 0 : index
    %c0_140 = arith.constant 0 : index
    %101 = vector.load %arg9[%c0_139, %c0_140] : memref<256x128xf32, #tpu.memory_space<vmem>>, vector<256x128xf32>
    %102 = vector.shape_cast %100 : vector<16x16x128xbf16> to vector<256x128xbf16>
    %c8_141 = arith.constant 8 : index
    %c0_142 = arith.constant 0 : index
    %c0_143 = arith.constant 0 : index
    %103 = vector.load %arg3[%c8_141, %c0_142, %c0_143] : memref<9x128x128xbf16, #tpu.memory_space<vmem>>, vector<1x128x128xbf16>
    %104 = vector.shape_cast %103 : vector<1x128x128xbf16> to vector<128x128xbf16>
    %cst_144 = arith.constant dense<0.000000e+00> : vector<256x128xf32>
    %105 = tpu.matmul %102, %104, %cst_144 {dimension_numbers = #tpu.dot_dimension_numbers<[1], [0], [0], [1], [0, 0, 1, 1], [], []>} : vector<256x128xbf16>, vector<128x128xbf16>, vector<256x128xf32> -> vector<256x128xf32>
    %106 = arith.addf %101, %105 : vector<256x128xf32>
    %c0_145 = arith.constant 0 : index
    %c0_146 = arith.constant 0 : index
    %107 = vector.load %arg9[%c0_145, %c0_146] : memref<256x128xf32, #tpu.memory_space<vmem>>, vector<256x128xf32>
    tpu.vector_store %arg9[%c0_145, %c0_146], %106 {strides = array<i32>} : memref<256x128xf32, #tpu.memory_space<vmem>>, vector<256x128xf32>,
    %c0_147 = arith.constant 0 : index
    %c0_148 = arith.constant 0 : index
    %108 = vector.load %arg4[%c0_147, %c0_148] : memref<2x128xf32, #tpu.memory_space<vmem>>, vector<1x128xf32>
    %c1_149 = arith.constant 1 : index
    %c0_150 = arith.constant 0 : index
    %109 = vector.load %arg4[%c1_149, %c0_150] : memref<2x128xf32, #tpu.memory_space<vmem>>, vector<1x128xf32>
    %c0_151 = arith.constant 0 : index
    %c0_152 = arith.constant 0 : index
    %110 = vector.load %arg9[%c0_151, %c0_152] : memref<256x128xf32, #tpu.memory_space<vmem>>, vector<256x128xf32>
    %111 = vector.broadcast %108 : vector<1x128xf32> to vector<256x128xf32>
    %112 = arith.mulf %110, %111 : vector<256x128xf32>
    %113 = vector.broadcast %109 : vector<1x128xf32> to vector<256x128xf32>
    %114 = arith.addf %112, %113 : vector<256x128xf32>
    %cst_153 = arith.constant 0.000000e+00 : f32
    %115 = vector.broadcast %cst_153 : f32 to vector<256x128xf32>
    %116 = arith.maximumf %114, %115 : vector<256x128xf32>
    %117 = arith.truncf %116 : vector<256x128xf32> to vector<256x128xbf16>
    %118 = vector.shape_cast %117 : vector<256x128xbf16> to vector<16x16x128xbf16>
    %c1_154 = arith.constant 1 : index
    %c1_155 = arith.constant 1 : index
    %c0_156 = arith.constant 0 : index
    %119 = vector.load %arg8[%c1_154, %c1_155, %c0_156] : memref<18x18x128xbf16, #tpu.memory_space<vmem>>, vector<16x16x128xbf16>
    tpu.vector_store %arg8[%c1_154, %c1_155, %c0_156], %118 {strides = array<i32>} : memref<18x18x128xbf16, #tpu.memory_space<vmem>>, vector<16x16x128xbf16>,
    %cst_157 = arith.constant 0.000000e+00 : f32
    %120 = vector.broadcast %cst_157 : f32 to vector<256x128xf32>
    %c0_158 = arith.constant 0 : index
    %c0_159 = arith.constant 0 : index
    %121 = vector.load %arg9[%c0_158, %c0_159] : memref<256x128xf32, #tpu.memory_space<vmem>>, vector<256x128xf32>
    tpu.vector_store %arg9[%c0_158, %c0_159], %120 {strides = array<i32>} : memref<256x128xf32, #tpu.memory_space<vmem>>, vector<256x128xf32>,
    %c0_160 = arith.constant 0 : index
    %c0_161 = arith.constant 0 : index
    %c0_162 = arith.constant 0 : index
    %122 = vector.load %arg8[%c0_160, %c0_161, %c0_162] : memref<18x18x128xbf16, #tpu.memory_space<vmem>>, vector<16x16x128xbf16>
    %c0_163 = arith.constant 0 : index
    %c0_164 = arith.constant 0 : index
    %123 = vector.load %arg9[%c0_163, %c0_164] : memref<256x128xf32, #tpu.memory_space<vmem>>, vector<256x128xf32>
    %124 = vector.shape_cast %122 : vector<16x16x128xbf16> to vector<256x128xbf16>
    %c0_165 = arith.constant 0 : index
    %c0_166 = arith.constant 0 : index
    %c0_167 = arith.constant 0 : index
    %125 = vector.load %arg5[%c0_165, %c0_166, %c0_167] : memref<9x128x128xbf16, #tpu.memory_space<vmem>>, vector<1x128x128xbf16>
    %126 = vector.shape_cast %125 : vector<1x128x128xbf16> to vector<128x128xbf16>
    %cst_168 = arith.constant dense<0.000000e+00> : vector<256x128xf32>
    %127 = tpu.matmul %124, %126, %cst_168 {dimension_numbers = #tpu.dot_dimension_numbers<[1], [0], [0], [1], [0, 0, 1, 1], [], []>} : vector<256x128xbf16>, vector<128x128xbf16>, vector<256x128xf32> -> vector<256x128xf32>
    %128 = arith.addf %123, %127 : vector<256x128xf32>
    %c0_169 = arith.constant 0 : index
    %c0_170 = arith.constant 0 : index
    %129 = vector.load %arg9[%c0_169, %c0_170] : memref<256x128xf32, #tpu.memory_space<vmem>>, vector<256x128xf32>
    tpu.vector_store %arg9[%c0_169, %c0_170], %128 {strides = array<i32>} : memref<256x128xf32, #tpu.memory_space<vmem>>, vector<256x128xf32>,
    %c0_171 = arith.constant 0 : index
    %c1_172 = arith.constant 1 : index
    %c0_173 = arith.constant 0 : index
    %130 = vector.load %arg8[%c0_171, %c1_172, %c0_173] : memref<18x18x128xbf16, #tpu.memory_space<vmem>>, vector<16x16x128xbf16>
    %c0_174 = arith.constant 0 : index
    %c0_175 = arith.constant 0 : index
    %131 = vector.load %arg9[%c0_174, %c0_175] : memref<256x128xf32, #tpu.memory_space<vmem>>, vector<256x128xf32>
    %132 = vector.shape_cast %130 : vector<16x16x128xbf16> to vector<256x128xbf16>
    %c1_176 = arith.constant 1 : index
    %c0_177 = arith.constant 0 : index
    %c0_178 = arith.constant 0 : index
    %133 = vector.load %arg5[%c1_176, %c0_177, %c0_178] : memref<9x128x128xbf16, #tpu.memory_space<vmem>>, vector<1x128x128xbf16>
    %134 = vector.shape_cast %133 : vector<1x128x128xbf16> to vector<128x128xbf16>
    %cst_179 = arith.constant dense<0.000000e+00> : vector<256x128xf32>
    %135 = tpu.matmul %132, %134, %cst_179 {dimension_numbers = #tpu.dot_dimension_numbers<[1], [0], [0], [1], [0, 0, 1, 1], [], []>} : vector<256x128xbf16>, vector<128x128xbf16>, vector<256x128xf32> -> vector<256x128xf32>
    %136 = arith.addf %131, %135 : vector<256x128xf32>
    %c0_180 = arith.constant 0 : index
    %c0_181 = arith.constant 0 : index
    %137 = vector.load %arg9[%c0_180, %c0_181] : memref<256x128xf32, #tpu.memory_space<vmem>>, vector<256x128xf32>
    tpu.vector_store %arg9[%c0_180, %c0_181], %136 {strides = array<i32>} : memref<256x128xf32, #tpu.memory_space<vmem>>, vector<256x128xf32>,
    %c0_182 = arith.constant 0 : index
    %c2_183 = arith.constant 2 : index
    %c0_184 = arith.constant 0 : index
    %138 = vector.load %arg8[%c0_182, %c2_183, %c0_184] : memref<18x18x128xbf16, #tpu.memory_space<vmem>>, vector<16x16x128xbf16>
    %c0_185 = arith.constant 0 : index
    %c0_186 = arith.constant 0 : index
    %139 = vector.load %arg9[%c0_185, %c0_186] : memref<256x128xf32, #tpu.memory_space<vmem>>, vector<256x128xf32>
    %140 = vector.shape_cast %138 : vector<16x16x128xbf16> to vector<256x128xbf16>
    %c2_187 = arith.constant 2 : index
    %c0_188 = arith.constant 0 : index
    %c0_189 = arith.constant 0 : index
    %141 = vector.load %arg5[%c2_187, %c0_188, %c0_189] : memref<9x128x128xbf16, #tpu.memory_space<vmem>>, vector<1x128x128xbf16>
    %142 = vector.shape_cast %141 : vector<1x128x128xbf16> to vector<128x128xbf16>
    %cst_190 = arith.constant dense<0.000000e+00> : vector<256x128xf32>
    %143 = tpu.matmul %140, %142, %cst_190 {dimension_numbers = #tpu.dot_dimension_numbers<[1], [0], [0], [1], [0, 0, 1, 1], [], []>} : vector<256x128xbf16>, vector<128x128xbf16>, vector<256x128xf32> -> vector<256x128xf32>
    %144 = arith.addf %139, %143 : vector<256x128xf32>
    %c0_191 = arith.constant 0 : index
    %c0_192 = arith.constant 0 : index
    %145 = vector.load %arg9[%c0_191, %c0_192] : memref<256x128xf32, #tpu.memory_space<vmem>>, vector<256x128xf32>
    tpu.vector_store %arg9[%c0_191, %c0_192], %144 {strides = array<i32>} : memref<256x128xf32, #tpu.memory_space<vmem>>, vector<256x128xf32>,
    %c1_193 = arith.constant 1 : index
    %c0_194 = arith.constant 0 : index
    %c0_195 = arith.constant 0 : index
    %146 = vector.load %arg8[%c1_193, %c0_194, %c0_195] : memref<18x18x128xbf16, #tpu.memory_space<vmem>>, vector<16x16x128xbf16>
    %c0_196 = arith.constant 0 : index
    %c0_197 = arith.constant 0 : index
    %147 = vector.load %arg9[%c0_196, %c0_197] : memref<256x128xf32, #tpu.memory_space<vmem>>, vector<256x128xf32>
    %148 = vector.shape_cast %146 : vector<16x16x128xbf16> to vector<256x128xbf16>
    %c3_198 = arith.constant 3 : index
    %c0_199 = arith.constant 0 : index
    %c0_200 = arith.constant 0 : index
    %149 = vector.load %arg5[%c3_198, %c0_199, %c0_200] : memref<9x128x128xbf16, #tpu.memory_space<vmem>>, vector<1x128x128xbf16>
    %150 = vector.shape_cast %149 : vector<1x128x128xbf16> to vector<128x128xbf16>
    %cst_201 = arith.constant dense<0.000000e+00> : vector<256x128xf32>
    %151 = tpu.matmul %148, %150, %cst_201 {dimension_numbers = #tpu.dot_dimension_numbers<[1], [0], [0], [1], [0, 0, 1, 1], [], []>} : vector<256x128xbf16>, vector<128x128xbf16>, vector<256x128xf32> -> vector<256x128xf32>
    %152 = arith.addf %147, %151 : vector<256x128xf32>
    %c0_202 = arith.constant 0 : index
    %c0_203 = arith.constant 0 : index
    %153 = vector.load %arg9[%c0_202, %c0_203] : memref<256x128xf32, #tpu.memory_space<vmem>>, vector<256x128xf32>
    tpu.vector_store %arg9[%c0_202, %c0_203], %152 {strides = array<i32>} : memref<256x128xf32, #tpu.memory_space<vmem>>, vector<256x128xf32>,
    %c1_204 = arith.constant 1 : index
    %c1_205 = arith.constant 1 : index
    %c0_206 = arith.constant 0 : index
    %154 = vector.load %arg8[%c1_204, %c1_205, %c0_206] : memref<18x18x128xbf16, #tpu.memory_space<vmem>>, vector<16x16x128xbf16>
    %c0_207 = arith.constant 0 : index
    %c0_208 = arith.constant 0 : index
    %155 = vector.load %arg9[%c0_207, %c0_208] : memref<256x128xf32, #tpu.memory_space<vmem>>, vector<256x128xf32>
    %156 = vector.shape_cast %154 : vector<16x16x128xbf16> to vector<256x128xbf16>
    %c4_209 = arith.constant 4 : index
    %c0_210 = arith.constant 0 : index
    %c0_211 = arith.constant 0 : index
    %157 = vector.load %arg5[%c4_209, %c0_210, %c0_211] : memref<9x128x128xbf16, #tpu.memory_space<vmem>>, vector<1x128x128xbf16>
    %158 = vector.shape_cast %157 : vector<1x128x128xbf16> to vector<128x128xbf16>
    %cst_212 = arith.constant dense<0.000000e+00> : vector<256x128xf32>
    %159 = tpu.matmul %156, %158, %cst_212 {dimension_numbers = #tpu.dot_dimension_numbers<[1], [0], [0], [1], [0, 0, 1, 1], [], []>} : vector<256x128xbf16>, vector<128x128xbf16>, vector<256x128xf32> -> vector<256x128xf32>
    %160 = arith.addf %155, %159 : vector<256x128xf32>
    %c0_213 = arith.constant 0 : index
    %c0_214 = arith.constant 0 : index
    %161 = vector.load %arg9[%c0_213, %c0_214] : memref<256x128xf32, #tpu.memory_space<vmem>>, vector<256x128xf32>
    tpu.vector_store %arg9[%c0_213, %c0_214], %160 {strides = array<i32>} : memref<256x128xf32, #tpu.memory_space<vmem>>, vector<256x128xf32>,
    %c1_215 = arith.constant 1 : index
    %c2_216 = arith.constant 2 : index
    %c0_217 = arith.constant 0 : index
    %162 = vector.load %arg8[%c1_215, %c2_216, %c0_217] : memref<18x18x128xbf16, #tpu.memory_space<vmem>>, vector<16x16x128xbf16>
    %c0_218 = arith.constant 0 : index
    %c0_219 = arith.constant 0 : index
    %163 = vector.load %arg9[%c0_218, %c0_219] : memref<256x128xf32, #tpu.memory_space<vmem>>, vector<256x128xf32>
    %164 = vector.shape_cast %162 : vector<16x16x128xbf16> to vector<256x128xbf16>
    %c5_220 = arith.constant 5 : index
    %c0_221 = arith.constant 0 : index
    %c0_222 = arith.constant 0 : index
    %165 = vector.load %arg5[%c5_220, %c0_221, %c0_222] : memref<9x128x128xbf16, #tpu.memory_space<vmem>>, vector<1x128x128xbf16>
    %166 = vector.shape_cast %165 : vector<1x128x128xbf16> to vector<128x128xbf16>
    %cst_223 = arith.constant dense<0.000000e+00> : vector<256x128xf32>
    %167 = tpu.matmul %164, %166, %cst_223 {dimension_numbers = #tpu.dot_dimension_numbers<[1], [0], [0], [1], [0, 0, 1, 1], [], []>} : vector<256x128xbf16>, vector<128x128xbf16>, vector<256x128xf32> -> vector<256x128xf32>
    %168 = arith.addf %163, %167 : vector<256x128xf32>
    %c0_224 = arith.constant 0 : index
    %c0_225 = arith.constant 0 : index
    %169 = vector.load %arg9[%c0_224, %c0_225] : memref<256x128xf32, #tpu.memory_space<vmem>>, vector<256x128xf32>
    tpu.vector_store %arg9[%c0_224, %c0_225], %168 {strides = array<i32>} : memref<256x128xf32, #tpu.memory_space<vmem>>, vector<256x128xf32>,
    %c2_226 = arith.constant 2 : index
    %c0_227 = arith.constant 0 : index
    %c0_228 = arith.constant 0 : index
    %170 = vector.load %arg8[%c2_226, %c0_227, %c0_228] : memref<18x18x128xbf16, #tpu.memory_space<vmem>>, vector<16x16x128xbf16>
    %c0_229 = arith.constant 0 : index
    %c0_230 = arith.constant 0 : index
    %171 = vector.load %arg9[%c0_229, %c0_230] : memref<256x128xf32, #tpu.memory_space<vmem>>, vector<256x128xf32>
    %172 = vector.shape_cast %170 : vector<16x16x128xbf16> to vector<256x128xbf16>
    %c6_231 = arith.constant 6 : index
    %c0_232 = arith.constant 0 : index
    %c0_233 = arith.constant 0 : index
    %173 = vector.load %arg5[%c6_231, %c0_232, %c0_233] : memref<9x128x128xbf16, #tpu.memory_space<vmem>>, vector<1x128x128xbf16>
    %174 = vector.shape_cast %173 : vector<1x128x128xbf16> to vector<128x128xbf16>
    %cst_234 = arith.constant dense<0.000000e+00> : vector<256x128xf32>
    %175 = tpu.matmul %172, %174, %cst_234 {dimension_numbers = #tpu.dot_dimension_numbers<[1], [0], [0], [1], [0, 0, 1, 1], [], []>} : vector<256x128xbf16>, vector<128x128xbf16>, vector<256x128xf32> -> vector<256x128xf32>
    %176 = arith.addf %171, %175 : vector<256x128xf32>
    %c0_235 = arith.constant 0 : index
    %c0_236 = arith.constant 0 : index
    %177 = vector.load %arg9[%c0_235, %c0_236] : memref<256x128xf32, #tpu.memory_space<vmem>>, vector<256x128xf32>
    tpu.vector_store %arg9[%c0_235, %c0_236], %176 {strides = array<i32>} : memref<256x128xf32, #tpu.memory_space<vmem>>, vector<256x128xf32>,
    %c2_237 = arith.constant 2 : index
    %c1_238 = arith.constant 1 : index
    %c0_239 = arith.constant 0 : index
    %178 = vector.load %arg8[%c2_237, %c1_238, %c0_239] : memref<18x18x128xbf16, #tpu.memory_space<vmem>>, vector<16x16x128xbf16>
    %c0_240 = arith.constant 0 : index
    %c0_241 = arith.constant 0 : index
    %179 = vector.load %arg9[%c0_240, %c0_241] : memref<256x128xf32, #tpu.memory_space<vmem>>, vector<256x128xf32>
    %180 = vector.shape_cast %178 : vector<16x16x128xbf16> to vector<256x128xbf16>
    %c7_242 = arith.constant 7 : index
    %c0_243 = arith.constant 0 : index
    %c0_244 = arith.constant 0 : index
    %181 = vector.load %arg5[%c7_242, %c0_243, %c0_244] : memref<9x128x128xbf16, #tpu.memory_space<vmem>>, vector<1x128x128xbf16>
    %182 = vector.shape_cast %181 : vector<1x128x128xbf16> to vector<128x128xbf16>
    %cst_245 = arith.constant dense<0.000000e+00> : vector<256x128xf32>
    %183 = tpu.matmul %180, %182, %cst_245 {dimension_numbers = #tpu.dot_dimension_numbers<[1], [0], [0], [1], [0, 0, 1, 1], [], []>} : vector<256x128xbf16>, vector<128x128xbf16>, vector<256x128xf32> -> vector<256x128xf32>
    %184 = arith.addf %179, %183 : vector<256x128xf32>
    %c0_246 = arith.constant 0 : index
    %c0_247 = arith.constant 0 : index
    %185 = vector.load %arg9[%c0_246, %c0_247] : memref<256x128xf32, #tpu.memory_space<vmem>>, vector<256x128xf32>
    tpu.vector_store %arg9[%c0_246, %c0_247], %184 {strides = array<i32>} : memref<256x128xf32, #tpu.memory_space<vmem>>, vector<256x128xf32>,
    %c2_248 = arith.constant 2 : index
    %c2_249 = arith.constant 2 : index
    %c0_250 = arith.constant 0 : index
    %186 = vector.load %arg8[%c2_248, %c2_249, %c0_250] : memref<18x18x128xbf16, #tpu.memory_space<vmem>>, vector<16x16x128xbf16>
    %c0_251 = arith.constant 0 : index
    %c0_252 = arith.constant 0 : index
    %187 = vector.load %arg9[%c0_251, %c0_252] : memref<256x128xf32, #tpu.memory_space<vmem>>, vector<256x128xf32>
    %188 = vector.shape_cast %186 : vector<16x16x128xbf16> to vector<256x128xbf16>
    %c8_253 = arith.constant 8 : index
    %c0_254 = arith.constant 0 : index
    %c0_255 = arith.constant 0 : index
    %189 = vector.load %arg5[%c8_253, %c0_254, %c0_255] : memref<9x128x128xbf16, #tpu.memory_space<vmem>>, vector<1x128x128xbf16>
    %190 = vector.shape_cast %189 : vector<1x128x128xbf16> to vector<128x128xbf16>
    %cst_256 = arith.constant dense<0.000000e+00> : vector<256x128xf32>
    %191 = tpu.matmul %188, %190, %cst_256 {dimension_numbers = #tpu.dot_dimension_numbers<[1], [0], [0], [1], [0, 0, 1, 1], [], []>} : vector<256x128xbf16>, vector<128x128xbf16>, vector<256x128xf32> -> vector<256x128xf32>
    %192 = arith.addf %187, %191 : vector<256x128xf32>
    %c0_257 = arith.constant 0 : index
    %c0_258 = arith.constant 0 : index
    %193 = vector.load %arg9[%c0_257, %c0_258] : memref<256x128xf32, #tpu.memory_space<vmem>>, vector<256x128xf32>
    tpu.vector_store %arg9[%c0_257, %c0_258], %192 {strides = array<i32>} : memref<256x128xf32, #tpu.memory_space<vmem>>, vector<256x128xf32>,
    %c0_259 = arith.constant 0 : index
    %c0_260 = arith.constant 0 : index
    %194 = vector.load %arg6[%c0_259, %c0_260] : memref<2x128xf32, #tpu.memory_space<vmem>>, vector<1x128xf32>
    %c1_261 = arith.constant 1 : index
    %c0_262 = arith.constant 0 : index
    %195 = vector.load %arg6[%c1_261, %c0_262] : memref<2x128xf32, #tpu.memory_space<vmem>>, vector<1x128xf32>
    %c0_263 = arith.constant 0 : index
    %c0_264 = arith.constant 0 : index
    %196 = vector.load %arg9[%c0_263, %c0_264] : memref<256x128xf32, #tpu.memory_space<vmem>>, vector<256x128xf32>
    %197 = vector.broadcast %194 : vector<1x128xf32> to vector<256x128xf32>
    %198 = arith.mulf %196, %197 : vector<256x128xf32>
    %199 = vector.broadcast %195 : vector<1x128xf32> to vector<256x128xf32>
    %200 = arith.addf %198, %199 : vector<256x128xf32>
    %cst_265 = arith.constant 0.000000e+00 : f32
    %201 = vector.broadcast %cst_265 : f32 to vector<256x128xf32>
    %202 = arith.maximumf %200, %201 : vector<256x128xf32>
    %c0_266 = arith.constant 0 : index
    %c0_267 = arith.constant 0 : index
    %c0_268 = arith.constant 0 : index
    %203 = vector.load %arg7[%c0_266, %c0_267, %c0_268] : memref<1x256x128xf32, #tpu.memory_space<vmem>>, vector<1x256x128xf32>
    %204 = vector.shape_cast %203 : vector<1x256x128xf32> to vector<256x128xf32>
    %205 = vector.shape_cast %202 : vector<256x128xf32> to vector<1x256x128xf32>
    tpu.vector_store %arg7[%c0_266, %c0_267, %c0_268], %205 {strides = array<i32>} : memref<1x256x128xf32, #tpu.memory_space<vmem>>, vector<1x256x128xf32>,
    return
  }
  func.func @transform_0(%arg0: i32) -> (i32, i32, i32, i32) {
    %c0_i32 = arith.constant 0 : i32
    %c0_i32_0 = arith.constant 0 : i32
    %c0_i32_1 = arith.constant 0 : i32
    %c0_i32_2 = arith.constant 0 : i32
    return %arg0, %c0_i32, %c0_i32_0, %c0_i32_1 : i32, i32, i32, i32
  }
  func.func @transform_1(%arg0: i32) -> (i32, i32, i32, i32) {
    %c0_i32 = arith.constant 0 : i32
    %c0_i32_0 = arith.constant 0 : i32
    %c0_i32_1 = arith.constant 0 : i32
    %c0_i32_2 = arith.constant 0 : i32
    return %arg0, %c0_i32, %c0_i32_0, %c0_i32_1 : i32, i32, i32, i32
  }
  func.func @transform_2(%arg0: i32) -> (i32, i32, i32) {
    %c0_i32 = arith.constant 0 : i32
    %c0_i32_0 = arith.constant 0 : i32
    %c0_i32_1 = arith.constant 0 : i32
    %c0_i32_2 = arith.constant 0 : i32
    return %c0_i32, %c0_i32_0, %c0_i32_1 : i32, i32, i32
  }
  func.func @transform_3(%arg0: i32) -> (i32, i32) {
    %c0_i32 = arith.constant 0 : i32
    %c0_i32_0 = arith.constant 0 : i32
    %c0_i32_1 = arith.constant 0 : i32
    return %c0_i32, %c0_i32_0 : i32, i32
  }
  func.func @transform_4(%arg0: i32) -> (i32, i32, i32) {
    %c0_i32 = arith.constant 0 : i32
    %c0_i32_0 = arith.constant 0 : i32
    %c0_i32_1 = arith.constant 0 : i32
    %c0_i32_2 = arith.constant 0 : i32
    return %c0_i32, %c0_i32_0, %c0_i32_1 : i32, i32, i32
  }
  func.func @transform_5(%arg0: i32) -> (i32, i32) {
    %c0_i32 = arith.constant 0 : i32
    %c0_i32_0 = arith.constant 0 : i32
    %c0_i32_1 = arith.constant 0 : i32
    return %c0_i32, %c0_i32_0 : i32, i32
  }
  func.func @transform_6(%arg0: i32) -> (i32, i32, i32) {
    %c0_i32 = arith.constant 0 : i32
    %c0_i32_0 = arith.constant 0 : i32
    %c0_i32_1 = arith.constant 0 : i32
    return %arg0, %c0_i32, %c0_i32_0 : i32, i32, i32
  }
}

</mosaic_0001>

<bundles_post_ra>
// kernel: decoder_block_forward.1
= control target key start
LH: loop header
LB: loop body
LE: loop exit
PB: predicated region body
PF: predicated region fallthrough
CT: control target
= control target key end

     0   :  { %s16567_s21 = smov 0   ;;  %s21687_s0 = inlined_call_operand.vmem [shape: bf16[2,8,8,4], index: 0, kind: input, shape index: {}]   ;;  %s21688_s1 = inlined_call_operand.vmem [shape: bf16[2,16,16,4], index: 1, kind: input, shape index: {}]   ;;  %s21689_s2 = inlined_call_operand.vmem [shape: bf16[9,128,128], index: 2, kind: input, shape index: {}]   ;;  %s21690_s3 = inlined_call_operand.vmem [shape: f32[2,128], index: 3, kind: input, shape index: {}]   ;;  %s21691_s4 = inlined_call_operand.vmem [shape: bf16[9,128,128], index: 4, kind: input, shape index: {}]   ;;  %s21692_s5 = inlined_call_operand.vmem [shape: f32[2,128], index: 5, kind: input, shape index: {}]   ;;  %s21693_s6 = inlined_call_operand.vmem [shape: f32[2,256,128], index: 6, kind: output, shape index: {}]  }
   0x1 LB: > { %s14102_s22 = sadd.s32 4294967295, %s16528_s21   ;;  %p14106_p0 = scmp.ge.s32.totalorder %s16528_s21, 1  ;;  %s16528_s21 = sphi %s16567_s21, %s16_s21  }
   0x2   : > { %p222_p1 = scmp.lt.s32.totalorder %s16528_s21, 3 }
   0x4   : > { %p223_p2 = pnand %p14106_p0, %p222_p1 }
   0x6   : > { %226 = sbr.rel (%p223_p2) target bundleno = 1382 (0x566), region = 44 }
   0xb   : > { %p257_p3 = scmp.lt.s32.totalorder %s14102_s22, 1  ;;  %v16276_v0 = vld [vmem:[%s21689_s2 + $0x38] sm:$0xff]   ;;  %vm21700_vm0 = vsmask.f32 256  ;;  %v16583_v1 = vld [vmem:[%s21689_s2 + $0x30] sm:$0xff]   ;;  %v16530_v2 = vmov 0  }
   0xc   : > { %15402 = vmatprep.subr.bf16.mxu0 %v16276_v0  ;;  %277 = vst [vmem:[#allocation2 + $0x10] sm:$0xf] %v16530_v2  ;;  %279 = vst [vmem:[#allocation2 + $0x18] sm:$0xf] %v16530_v2  ;;  %v16278_v3 = vld [vmem:[%s21689_s2 + $0x28] sm:$0xff]   ;;  %v16279_v7 = vld [vmem:[%s21689_s2 + $0x20] sm:$0xff]  }
   0xd   : > { %s22070_s22 = smov (!%p257_p3, %s14102_s22), 1  ;;  %15403 = vmatpush3.bf16.msra.mxu0 %v16276_v0  ;;  %280 = vst [vmem:[#allocation2 + $0x1c] sm:$0xf] %v16530_v2  ;;  %273 = vst [vmem:[#allocation2] sm:$0xf] %v16530_v2  ;;  %v21715_v32 = vmov 0 }
   0xe   : > { %274 = vst [vmem:[#allocation2 + $0x4] sm:$0xf] %v16530_v2  ;;  %275 = vst [vmem:[#allocation2 + $0x8] sm:$0x1] %v16530_v2  ;;  %s14936_s27 = sshll.u32 %s22070_s22, 7  ;;  %15404 = vmatprep.subr.bf16.mxu0 %v16583_v1  ;;  %s16531_s11 = smov 4  }
   0xf   : > { %276 = vst [vmem:[#allocation2 + $0xc] sm:$0xf] %v16530_v2  ;;  %278 = vst [vmem:[#allocation2 + $0x14] sm:$0x1] %v16530_v2  ;;  %s16592_s8 = scalar_lea.vmem %s21688_s1, %s14936_s27  ;;  %vm1420_vm1 = vsmask.f32 4368 }
  0x10   : > { %281 = vst [vmem:[#allocation2 + $0x20] sm:$0x1] %v16530_v2  ;;  %282 = vst [vmem:[#allocation2 + $0x24] sm:$0xf] %v16530_v2  ;;  %v1390_v4 = vld [vmem:[%s16592_s8 + $0x8] sm:$0xf] }
  0x11   : > { %283 = vst [vmem:[#allocation2 + $0x28] sm:$0xf] %v16530_v2  ;;  %284 = vst [vmem:[#allocation2 + $0x2c] sm:$0x1] %v16530_v2  ;;  %v1388_v5 = vld [vmem:[%s16592_s8] sm:$0xf]  ;;  %15405 = vmatpush3.bf16.msra.mxu0 %v16583_v1 }
  0x12   : > { %285 = vst [vmem:[#allocation2 + $0x30] sm:$0xf] %v16530_v2  ;;  %286 = vst [vmem:[#allocation2 + $0x34] sm:$0xf] %v16530_v2  ;;  %v1391_v6 = vld [vmem:[%s16592_s8 + $0xc] sm:$0xf]  ;;  %15406 = vmatprep.subr.bf16.mxu0 %v16278_v3 }
  0x13   : > { %287 = vst [vmem:[#allocation2 + $0x38] sm:$0x1] %v16530_v2  ;;  %288 = vst [vmem:[#allocation2 + $0x3c] sm:$0xf] %v16530_v2  ;;  %v1440_v8 = vshrl.u32 %v1390_v4, 16  ;;  %v1443_v9 = vshll.u32 %v1390_v4, 16 }
  0x14   : > { %289 = vst [vmem:[#allocation2 + $0x40] sm:$0xf] %v16530_v2  ;;  %290 = vst [vmem:[#allocation2 + $0x44] sm:$0x1] %v16530_v2  ;;  %v1423_v10 = vshrl.u32 %v1388_v5, 16  ;;  %v1426_v11 = vshll.u32 %v1388_v5, 16 }
  0x15   : > { %291 = vst [vmem:[#allocation2 + $0x48] sm:$0xf] %v16530_v2  ;;  %292 = vst [vmem:[#allocation2 + $0x4c] sm:$0xf] %v16530_v2  ;;  %v1389_v12 = vld [vmem:[%s16592_s8 + $0x4] sm:$0xf]  ;;  %15407 = vmatpush3.bf16.msra.mxu0 %v16278_v3 }
  0x16   : > { %293 = vst [vmem:[#allocation2 + $0x50] sm:$0x1] %v16530_v2  ;;  %294 = vst [vmem:[#allocation2 + $0x54] sm:$0xf] %v16530_v2  ;;  %v1448_v13 = vshrl.u32 %v1391_v6, 16  ;;  %v1451_v14 = vshll.u32 %v1391_v6, 16  ;;  %15408 = vmatprep.subr.bf16.mxu0 %v16279_v7 }
  0x17   : > { %295 = vst [vmem:[#allocation2 + $0x58] sm:$0xf] %v16530_v2  ;;  %296 = vst [vmem:[#allocation2 + $0x5c] sm:$0x1] %v16530_v2  ;;  %v1431_v15 = vshrl.u32 %v1389_v12, 16  ;;  %v1434_v16 = vshll.u32 %v1389_v12, 16 }
  0x18   : > { %297 = vst [vmem:[#allocation2 + $0x60] sm:$0xf] %v16530_v2  ;;  %298 = vst [vmem:[#allocation2 + $0x64] sm:$0xf] %v16530_v2  ;;  %v1392_v17 = vld [vmem:[%s16592_s8 + $0x10] sm:$0xf] }
  0x19   : > { %299 = vst [vmem:[#allocation2 + $0x68] sm:$0x1] %v16530_v2  ;;  %300 = vst [vmem:[#allocation2 + $0x6c] sm:$0xf] %v16530_v2  ;;  %v1442_v18 = vrot.slane %v1440_v8, 7  ;;  %v1425_v19 = vrot.slane %v1423_v10, 7  ;;  %15409 = vmatpush3.bf16.msra.mxu0 %v16279_v7 }
  0x1a   : > { %301 = vst [vmem:[#allocation2 + $0x70] sm:$0xf] %v16530_v2  ;;  %302 = vst [vmem:[#allocation2 + $0x74] sm:$0x1] %v16530_v2  ;;  %v1393_v20 = vld [vmem:[%s16592_s8 + $0x14] sm:$0xf] }
  0x1b   : > { %303 = vst [vmem:[#allocation2 + $0x78] sm:$0xf] %v16530_v2  ;;  %304 = vst [vmem:[#allocation2 + $0x7c] sm:$0xf] %v16530_v2  ;;  %v1457_v21 = vshrl.u32 %v1392_v17, 16  ;;  %v1460_v22 = vshll.u32 %v1392_v17, 16  ;;  %v1445_v28 = vor.u32 %v1443_v9, %v1442_v18  ;;  %v1428_v30 = vor.u32 %v1426_v11, %v1425_v19 }
  0x1c   : > { %305 = vst [vmem:[#allocation2 + $0x80] sm:$0x1] %v16530_v2  ;;  %306 = vst [vmem:[#allocation2 + $0x84] sm:$0xf] %v16530_v2  ;;  %v16605_v23 = vrot.slane %v1448_v13, 7  ;;  %v16607_v24 = vrot.slane %v1431_v15, 7 }
  0x1d   : > { %307 = vst [vmem:[#allocation2 + $0x88] sm:$0xf] %v16530_v2  ;;  %308 = vst [vmem:[#allocation2 + $0x8c] sm:$0x1] %v16530_v2  ;;  %v1465_v25 = vshrl.u32 %v1393_v20, 16  ;;  %v1468_v26 = vshll.u32 %v1393_v20, 16  ;;  %1700 = vrot.lane.b32.xlu1 %v1445_v28, %s16531_s11  ;;  %1694 = vrot.lane.b32.xlu0 %v1428_v30, %s16531_s11 }
  0x1e   : > { %309 = vst [vmem:[#allocation2 + $0x90] sm:$0xf] %v16530_v2  ;;  %310 = vst [vmem:[#allocation2 + $0x94] sm:$0xf] %v16530_v2  ;;  %v1394_v27 = vld [vmem:[%s16592_s8 + $0x18] sm:$0xf]  ;;  %v1453_v34 = vor.u32 %v1451_v14, %v16605_v23  ;;  %v1436_v35 = vor.u32 %v1434_v16, %v16607_v24 }
  0x1f   : > { %311 = vst [vmem:[#allocation2 + $0x98] sm:$0x1] %v16530_v2  ;;  %312 = vst [vmem:[#allocation2 + $0x9c] sm:$0xf] %v16530_v2  ;;  %v1446_v29 = vrot.slane %v1442_v18, 4  ;;  %v1429_v31 = vrot.slane %v1425_v19, 4 }
  0x20   : > { %313 = vst [vmem:[#allocation2 + $0xa0] sm:$0xf] %v16530_v2  ;;  %314 = vst [vmem:[#allocation2 + $0xa4] sm:$0x1] %v16530_v2  ;;  %v1395_v33 = vld [vmem:[%s16592_s8 + $0x1c] sm:$0xf] }
  0x21   : > { %315 = vst [vmem:[#allocation2 + $0xa8] sm:$0xf] %v16530_v2  ;;  %316 = vst [vmem:[#allocation2 + $0xac] sm:$0xf] %v16530_v2  ;;  %v1459_v36 = vrot.slane %v1457_v21, 7  ;;  %v16619_v37 = vrot.slane %v1465_v25, 7 }
  0x22   : > { %317 = vst [vmem:[#allocation2 + $0xb0] sm:$0x1] %v16530_v2  ;;  %318 = vst [vmem:[#allocation2 + $0xb4] sm:$0xf] %v16530_v2  ;;  %v16622_v38 = vld [vmem:[%s16592_s8 + $0x20] sm:$0xf] }
  0x23   : > { %319 = vst [vmem:[#allocation2 + $0xb8] sm:$0xf] %v16530_v2  ;;  %320 = vst [vmem:[#allocation2 + $0xbc] sm:$0x1] %v16530_v2  ;;  %v1474_v39 = vshrl.u32 %v1394_v27, 16  ;;  %v1482_v40 = vshrl.u32 %v1395_v33, 16  ;;  %v1470_v46 = vor.u32 %v1468_v26, %v16619_v37  ;;  %v1462_v53 = vor.u32 %v1460_v22, %v1459_v36 }
  0x24   : > { %321 = vst [vmem:[#allocation2 + $0xc0] sm:$0xf] %v16530_v2  ;;  %322 = vst [vmem:[#allocation2 + $0xc4] sm:$0xf] %v16530_v2  ;;  %v1485_v41 = vshll.u32 %v1395_v33, 16  ;;  %v1463_v45 = vrot.slane %v1459_v36, 4 }
  0x25   : > { %323 = vst [vmem:[#allocation2 + $0xc8] sm:$0x1] %v16530_v2  ;;  %324 = vst [vmem:[#allocation2 + $0xcc] sm:$0xf] %v16530_v2  ;;  %v1397_v42 = vld [vmem:[%s16592_s8 + $0x24] sm:$0xf] }
  0x26   : > { %325 = vst [vmem:[#allocation2 + $0xd0] sm:$0xf] %v16530_v2  ;;  %326 = vst [vmem:[#allocation2 + $0xd4] sm:$0x1] %v16530_v2  ;;  %v16633_v47 = vld [vmem:[%s16592_s8 + $0x28] sm:$0xf] }
  0x27   : > { %vm16612_vm2 = vmor %vm21700_vm0, %vm1420_vm1  ;;  %v16280_v48 = vld [vmem:[%s21689_s2 + $0x18] sm:$0xff]   ;;  %v1476_v49 = vrot.slane %v1474_v39, 7  ;;  %v16638_v50 = vrot.slane %v1482_v40, 7  ;;  %v1491_v51 = vshrl.u32 %v16622_v38, 16  ;;  %v1399_v52 = vld [vmem:[%s16592_s8 + $0x2c] sm:$0xf] }
  0x28   : > { %v21716_v32 = vsel %vm16612_vm2, 4294967295, %v21715_v32  ;;  %v1454_v43 = vsel %vm16612_vm2, %v1446_v29, %v1453_v34  ;;  %v1437_v44 = vsel %vm16612_vm2, %v1429_v31, %v1436_v35  ;;  %v1477_v54 = vshll.u32 %v1394_v27, 16  ;;  %15410 = vmatprep.subr.bf16.mxu0 %v16280_v48  ;;  %v16281_v56 = vld [vmem:[%s21689_s2 + $0x10] sm:$0xff]   ;;  %v16660_v5 = vld [vmem:[%s16592_s8 + $0x38] sm:$0xf]  ;;  %v16282_v6 = vld [vmem:[%s21689_s2 + $0x8] sm:$0xff]  }
  0x29   : > { %21717 = vst [vmem:[#allocation4_spill] sm:$0xff] %v21716_v32  ;;  %v1499_v55 = vshrl.u32 %v1397_v42, 16  ;;  %1702 = vrot.lane.b32.xlu1 %v1454_v43, %s16531_s11  ;;  %1696 = vrot.lane.b32.xlu0 %v1437_v44, %s16531_s11  ;;  %v1471_v57 = vsel %vm16612_vm2, %v1463_v45, %v1470_v46  ;;  %v1480_v58 = vrot.slane %v1476_v49, 4  ;;  %v1487_v59 = vor.u32 %v1485_v41, %v16638_v50  ;;  %v16651_v61 = vld [vmem:[%s16592_s8 + $0x30] sm:$0xf]  ;;  %v16283_v22 = vld [vmem:[%s21689_s2] sm:$0xff]  }
  0x2a   : > { %v1502_v60 = vshll.u32 %v1397_v42, 16  ;;  %v1493_v62 = vrot.slane %v1491_v51, 7  ;;  %v1508_v0 = vshrl.u32 %v16633_v47, 16  ;;  %v1516_v1 = vshrl.u32 %v1399_v52, 16  ;;  %v1401_v2 = vld [vmem:[%s16592_s8 + $0x34] sm:$0xf]  ;;  %15411 = vmatpush3.bf16.msra.mxu0 %v16280_v48 }
  0x2b   : > { %v16653_v63 = vrot.slane %v1499_v55, 7  ;;  %v1494_v3 = vshll.u32 %v16622_v38, 16  ;;  %v1525_v4 = vshrl.u32 %v16651_v61, 16  ;;  %15412 = vmatprep.subr.bf16.mxu0 %v16281_v56  ;;  %v1488_v7 = vsel %vm16612_vm2, %v1480_v58, %v1487_v59  ;;  %v16670_v11 = vld [vmem:[%s16592_s8 + $0x3c] sm:$0xf]  ;;  %v16284_v25 = vld [vmem:[#allocation2] sm:$0xff]  }
  0x2c   : > { %v1479_v8 = vor.u32 %v1477_v54, %v1476_v49  ;;  %v1519_v9 = vshll.u32 %v1399_v52, 16  ;;  %v1533_v10 = vshrl.u32 %v1401_v2, 16  ;;  %v1497_v12 = vrot.slane %v1493_v62, 4  ;;  %v16676_v16 = vld [vmem:[%s16592_s8 + $0x40] sm:$0xf]  ;;  %15418 = vmatprep.mubr.bf16.mxu0 %v16284_v25  ;;  %v16285_v45 = vld [vmem:[%s21689_s2 + $0xb8] sm:$0xff]  }
  0x2d   : > { %1708 = vrot.lane.b32.xlu1 %v1471_v57, %s16531_s11  ;;  %1706 = vrot.lane.b32.xlu0 %v1462_v53, %s16531_s11  ;;  %v1504_v13 = vor.u32 %v1502_v60, %v16653_v63  ;;  %v1510_v14 = vrot.slane %v1508_v0, 7  ;;  %v16673_v15 = vrot.slane %v1516_v1, 7  ;;  %v1542_v17 = vshrl.u32 %v16660_v5, 16  ;;  %v1405_v18 = vld [vmem:[%s16592_s8 + $0x44] sm:$0xf]  ;;  %s14935_s24 = sshll.u32 %s22070_s22, 5 }
  0x2e   : > { %15413 = vmatpush3.bf16.msra.mxu0 %v16281_v56  ;;  %v1527_v19 = vrot.slane %v1525_v4, 7  ;;  %v16680_v20 = vrot.slane %v1533_v10, 7  ;;  %v1536_v21 = vshll.u32 %v1401_v2, 16  ;;  %v1496_v26 = vor.u32 %v1494_v3, %v1493_v62  ;;  %v16694_v35 = vld [vmem:[%s16592_s8 + $0x48] sm:$0xf]  ;;  %s16791_s29 = scalar_lea.vmem %s21687_s0, %s14935_s24  ;;  %s14937_s14 = sshll.u32 %s22070_s22, 8 }
  0x2f   : > { %15414 = vmatprep.subr.bf16.mxu0 %v16282_v6  ;;  %v1511_v27 = vshll.u32 %v16633_v47, 16  ;;  %v1550_v28 = vshrl.u32 %v16670_v11, 16  ;;  %v1559_v29 = vshrl.u32 %v16676_v16, 16  ;;  %v1505_v30 = vsel %vm16612_vm2, %v1497_v12, %v1504_v13  ;;  %v16698_v39 = vld [vmem:[%s16592_s8 + $0x4c] sm:$0xf]  ;;  %s21466_s17 = scalar_lea.vmem %s21693_s6, %s14937_s14 }
  0x30   : > { %v1514_v31 = vrot.slane %v1510_v14, 4  ;;  %v1521_v33 = vor.u32 %v1519_v9, %v16673_v15  ;;  %v1567_v34 = vshrl.u32 %v1405_v18, 16  ;;  %v1528_v36 = vshll.u32 %v16651_v61, 16  ;;  %v16701_v40 = vld [vmem:[%s16592_s8 + $0x50] sm:$0xf] }
  0x31   : > { %1714 = vrot.lane.b32.xlu1 %v1488_v7, %s16531_s11  ;;  %1712 = vrot.lane.b32.xlu0 %v1479_v8, %s16531_s11  ;;  %v1544_v38 = vrot.slane %v1542_v17, 7  ;;  %v1531_v41 = vrot.slane %v1527_v19, 4  ;;  %v1538_v42 = vor.u32 %v1536_v21, %v16680_v20  ;;  %v1545_v43 = vshll.u32 %v16660_v5, 16  ;;  %v16706_v44 = vld [vmem:[%s16592_s8 + $0x54] sm:$0xf] }
  0x32   : > { %15415 = vmatpush3.bf16.msra.mxu0 %v16282_v6  ;;  %v1513_v46 = vor.u32 %v1511_v27, %v1510_v14  ;;  %v16713_v47 = vrot.slane %v1550_v28, 7  ;;  %v1553_v48 = vshll.u32 %v16670_v11, 16  ;;  %v1561_v49 = vrot.slane %v1559_v29, 7  ;;  %v16717_v51 = vld [vmem:[%s16592_s8 + $0x58] sm:$0xf] }
  0x33   : > { %15416 = vmatprep.subr.bf16.mxu0 %v16283_v22  ;;  %v1522_v52 = vsel %vm16612_vm2, %v1514_v31, %v1521_v33  ;;  %v16721_v53 = vrot.slane %v1567_v34, 7  ;;  %v1570_v54 = vshll.u32 %v1405_v18, 16  ;;  %v1576_v55 = vshrl.u32 %v16694_v35, 16  ;;  %v1411_v56 = vld [vmem:[%s16592_s8 + $0x5c] sm:$0xf] }
  0x34   : > { %v1530_v57 = vor.u32 %v1528_v36, %v1527_v19  ;;  %v1548_v58 = vrot.slane %v1544_v38, 4  ;;  %v1584_v59 = vshrl.u32 %v16698_v39, 16  ;;  %v1593_v60 = vshrl.u32 %v16701_v40, 16  ;;  %v16732_v2 = vld [vmem:[%s16592_s8 + $0x60] sm:$0xf] }
  0x35   : > { %1720 = vrot.lane.b32.xlu1 %v1505_v30, %s16531_s11  ;;  %1718 = vrot.lane.b32.xlu0 %v1496_v26, %s16531_s11  ;;  %v1539_v61 = vsel %vm16612_vm2, %v1531_v41, %v1538_v42  ;;  %v1547_v62 = vor.u32 %v1545_v43, %v1544_v38  ;;  %v1562_v0 = vshll.u32 %v16676_v16, 16  ;;  %v1601_v1 = vshrl.u32 %v16706_v44, 16  ;;  %v1413_v7 = vld [vmem:[%s16592_s8 + $0x64] sm:$0xf]  ;;  %v16743_v12 = vld [vmem:[%s16592_s8 + $0x68] sm:$0xf] }
  0x36   : > { %15417 = vmatpush3.bf16.msra.mxu0 %v16283_v22  ;;  %v1555_v3 = vor.u32 %v1553_v48, %v16713_v47  ;;  %v1565_v4 = vrot.slane %v1561_v49, 4  ;;  %v1610_v5 = vshrl.u32 %v16717_v51, 16  ;;  %v1618_v6 = vshrl.u32 %v1411_v56, 16  ;;  %v1415_v18 = vld [vmem:[%s16592_s8 + $0x6c] sm:$0xf] }
  0x37   : > { %15498 = vmatprep.subr.bf16.mxu0 %v16285_v45  ;;  %v1572_v8 = vor.u32 %v1570_v54, %v16721_v53  ;;  %v1578_v9 = vrot.slane %v1576_v55, 7  ;;  %v1587_v10 = vshll.u32 %v16698_v39, 16  ;;  %v1579_v11 = vshll.u32 %v16694_v35, 16  ;;  %v16768_v45 = vld [vmem:[%s16592_s8 + $0x70] sm:$0xf] }
  0x38   : > { %v16745_v13 = vrot.slane %v1584_v59, 7  ;;  %v1595_v14 = vrot.slane %v1593_v60, 7  ;;  %v1604_v16 = vshll.u32 %v16706_v44, 16  ;;  %v1627_v17 = vshrl.u32 %v16732_v2, 16 }
  0x39   : > { %1726 = vrot.lane.b32.xlu1 %v1522_v52, %s16531_s11  ;;  %1724 = vrot.lane.b32.xlu0 %v1513_v46, %s16531_s11  ;;  %v16750_v19 = vrot.slane %v1601_v1, 7  ;;  %v1612_v21 = vrot.slane %v1610_v5, 7  ;;  %v1621_v22 = vshll.u32 %v1411_v56, 16  ;;  %v1635_v25 = vshrl.u32 %v1413_v7, 16  ;;  %v16777_v52 = vld [vmem:[%s16592_s8 + $0x74] sm:$0xf] }
  0x3a   : > { %v1556_v26 = vsel %vm16612_vm2, %v1548_v58, %v1555_v3  ;;  %v1564_v27 = vor.u32 %v1562_v0, %v1561_v49  ;;  %v16756_v28 = vrot.slane %v1618_v6, 7  ;;  %v1644_v29 = vshrl.u32 %v16743_v12, 16 }
  0x3b   : > { %v1629_v30 = vrot.slane %v1627_v17, 7  ;;  %v16759_v31 = vrot.slane %v1635_v25, 7  ;;  %v1638_v33 = vshll.u32 %v1413_v7, 16  ;;  %v1652_v34 = vshrl.u32 %v1415_v18, 16  ;;  %v16907_v25 = vld [vmem:[%s16791_s29 + $0x4] sm:$0xf] }
  0x3c   : > { %v1573_v35 = vsel %vm16612_vm2, %v1565_v4, %v1572_v8  ;;  %v1582_v36 = vrot.slane %v1578_v9, 4  ;;  %v1589_v38 = vor.u32 %v1587_v10, %v16745_v13  ;;  %v1596_v39 = vshll.u32 %v16701_v40, 16 }
  0x3d   : > { %1732 = vrot.lane.b32.xlu1 %v1539_v61, %s16531_s11  ;;  %1730 = vrot.lane.b32.xlu0 %v1530_v57, %s16531_s11  ;;  %21718 = vst [vmem:[#allocation5_spill] sm:$0xff] %v16759_v31  ;;  %vm368_vm3 = vcmask 24576   ;;  %v1599_v41 = vrot.slane %v1595_v14, 4  ;;  %v1606_v42 = vor.u32 %v1604_v16, %v16750_v19  ;;  %v1616_v43 = vrot.slane %v1612_v21, 4  ;;  %v16298_v61 = vld [vmem:[%s21689_s2 + $0x70] sm:$0xff]  }
  0x3e   : > { %v1613_v44 = vshll.u32 %v16717_v51, 16  ;;  %v1623_v46 = vor.u32 %v1621_v22, %v16756_v28  ;;  %v1646_v48 = vrot.slane %v1644_v29, 7  ;;  %v16774_v49 = vrot.slane %v1652_v34, 7  ;;  %v16297_v51 = vld [vmem:[%s21689_s2 + $0x78] sm:$0xff]   ;;  %vm16839_vm9 = vmand %vm368_vm3, %vm21700_vm0  ;;  %v452_v29 = vld [vmem:[#allocation2 + $0x24] sm:$0x2] }
  0x3f   : > { %v1655_v40 = vshll.u32 %v1415_v18, 16  ;;  %vm443_vm4 = vcmask 25601   ;;  %v1633_v54 = vrot.slane %v1629_v30, 4  ;;  %v1640_v55 = vor.u32 %v1638_v33, %v16759_v31  ;;  %15450 = vmatprep.subr.bf16.mxu1 %v16297_v51  ;;  %v374_v18 = vld [vmem:[#allocation2 + $0x18] sm:$0x1] }
  0x40   : > { %v1630_v56 = vshll.u32 %v16732_v2, 16  ;;  %v1647_v57 = vshll.u32 %v16743_v12, 16  ;;  %v1590_v58 = vsel %vm16612_vm2, %v1582_v36, %v1589_v38  ;;  %v1581_v59 = vor.u32 %v1579_v11, %v1578_v9  ;;  %15451 = vmatpush3.bf16.msra.mxu1 %v16297_v51  ;;  %v16819_v11 = vld [vmem:[%s16791_s29] sm:$0xf]  ;;  %v582_v34 = vld [vmem:[#allocation2 + $0x18] sm:$0x4] }
  0x41   : > { %1738 = vrot.lane.b32.xlu1 %v1556_v26, %s16531_s11  ;;  %1736 = vrot.lane.b32.xlu0 %v1547_v62, %s16531_s11  ;;  %v1661_v60 = vshrl.u32 %v16768_v45, 16  ;;  %vm576_vm5 = vcmask 26626   ;;  %v1607_v62 = vsel %vm16612_vm2, %v1599_v41, %v1606_v42  ;;  %v1598_v0 = vor.u32 %v1596_v39, %v1595_v14  ;;  %v449_v26 = vld [vmem:[#allocation2 + $0x18] sm:$0x2]  ;;  %v446_v38 = vld [vmem:[#allocation2 + $0xc] sm:$0x2] }
  0x42   : > { %v16798_v1 = vor.u32 %v1613_v44, %v1612_v21  ;;  %v1669_v2 = vshrl.u32 %v16777_v52, 16  ;;  %v16805_v3 = vsel %vm16612_vm2, %v1616_v43, %v1623_v46  ;;  %v1650_v4 = vrot.slane %v1646_v48, 4  ;;  %15452 = vmatprep.subr.bf16.mxu1 %v16298_v61  ;;  %v579_v44 = vld [vmem:[#allocation2 + $0xc] sm:$0x4] }
  0x43   : > { %v1657_v5 = vor.u32 %v1655_v40, %v16774_v49  ;;  %v16811_v7 = vsel %vm16612_vm2, %v1633_v54, %v1640_v55  ;;  %v16813_v8 = vor.u32 %v1630_v56, %v1629_v30  ;;  %v16815_v9 = vor.u32 %v1647_v57, %v1646_v48  ;;  %v371_v30 = vld [vmem:[#allocation2 + $0xc] sm:$0x1]  ;;  %v836_v48 = vld [vmem:[#allocation2 + $0x10] sm:$0x1]  ;;  %v839_v40 = vld [vmem:[#allocation2 + $0x1c] sm:$0x1] }
  0x44   : > { %v1664_v10 = vshll.u32 %v16768_v45, 16  ;;  %v16821_v12 = vrot.slane %v1661_v60, 7  ;;  %v1672_v16 = vshll.u32 %v16777_v52, 16  ;;  %v16826_v21 = vrot.slane %v1669_v2, 7  ;;  %15453 = vmatpush3.bf16.msra.mxu1 %v16298_v61  ;;  %v712_v45 = vld [vmem:[#allocation2 + $0xc] sm:$0x8] }
  0x45   : > { %1744 = vrot.lane.b32.xlu1 %v1573_v35, %s16531_s11  ;;  %1742 = vrot.lane.b32.xlu0 %v1564_v27, %s16531_s11  ;;  %vm21701_vm6 = vsmask.f32 7938  ;;  %v16834_v27 = vsel %vm16612_vm2, %v1650_v4, %v1657_v5  ;;  %vm444_vm7 = vsmask.f32 1280  ;;  %vm494_vm8 = vsmask.f32 7942 }
  0x46   : > { %21719 = vst [vmem:[#allocation6_spill] sm:$0xff] %v16826_v21  ;;  %vm577_vm10 = vsmask.f32 2304  ;;  %vm643_vm11 = vsmask.f32 7946  ;;  %vm709_vm12 = vcmask 27651   ;;  %v16847_v39 = vor.u32 %v1664_v10, %v16821_v12  ;;  %vm16851_vm13 = vmand %vm368_vm3, %vm21701_vm6 }
  0x47   : > { %v715_v35 = vld [vmem:[#allocation2 + $0x18] sm:$0x8]  ;;  %v16844_v36 = vshll.u32 %v16819_v11, 16  ;;  %vm710_vm14 = vsmask.f32 3328  ;;  %v16856_v42 = vrot.slane %v16819_v11, 7  ;;  %vm16863_vm15 = vmand %vm443_vm4, %vm444_vm7 }
  0x48   : > { %v16859_v43 = vshrl.u32 %v16819_v11, 16  ;;  %vm760_vm1 = vsmask.f32 7950  ;;  %v16871_v54 = vrot.slane %v16819_v11, 6  ;;  %v956_v55 = vrot.slane %v16819_v11, 5  ;;  %v16302_v56 = vld [vmem:[%s21689_s2 + $0x68] sm:$0xff]   ;;  %vm16881_vm3 = vmand %vm576_vm5, %vm577_vm10 }
  0x49   : > { %1750 = vrot.lane.b32.xlu1 %v1590_v58, %s16531_s11  ;;  %1748 = vrot.lane.b32.xlu0 %v1581_v59, %s16531_s11  ;;  %v375_v51 = vsel %vm16851_vm13, %v16844_v36, %v374_v18  ;;  %v1100_v58 = vld [vmem:[#allocation2 + $0x10] sm:$0x4]  ;;  %v1103_v59 = vld [vmem:[#allocation2 + $0x1c] sm:$0x4]  ;;  %v450_v60 = vsel %vm16863_vm15, %v16856_v42, %v449_v26  ;;  %v377_v2 = vld [vmem:[#allocation2 + $0x24] sm:$0x1]  ;;  %v447_v14 = vsel %vm16863_vm15, %v16856_v42, %v446_v38 }
  0x4a   : > { %21724 = vst [vmem:[#allocation7_spill] sm:$0xff] %v16859_v43  ;;  %376 = vst [vmem:[#allocation2 + $0x18] sm:$0x1] %v375_v51  ;;  %v546_v61 = vrot.slane %v16859_v43, 6  ;;  %v16303_v4 = vld [vmem:[%s21689_s2 + $0x60] sm:$0xff]   ;;  %v884_v10 = vrot.slane %v16844_v36, 6  ;;  %v372_v51 = vsel %vm16851_vm13, %v16844_v36, %v371_v30  ;;  %15454 = vmatprep.subr.bf16.mxu1 %v16302_v56 }
  0x4b   : > { %vm16896_vm7 = vmand %vm709_vm12, %vm710_vm14  ;;  %451 = vst [vmem:[#allocation2 + $0x18] sm:$0x2] %v450_v60  ;;  %v1076_v18 = vrot.slane %v16859_v43, 4  ;;  %v1148_v26 = vrot.slane %v16844_v36, 5  ;;  %15455 = vmatpush3.bf16.msra.mxu1 %v16302_v56  ;;  %v718_v38 = vld [vmem:[#allocation2 + $0x24] sm:$0x8] }
  0x4c   : > { %v583_v22 = vsel %vm16881_vm3, %v546_v61, %v582_v34  ;;  %v716_v60 = vsel %vm16896_vm7, %v16871_v54, %v715_v35  ;;  %373 = vst [vmem:[#allocation2 + $0xc] sm:$0x1] %v372_v51  ;;  %448 = vst [vmem:[#allocation2 + $0xc] sm:$0x2] %v447_v14  ;;  %v580_v6 = vsel %vm16881_vm3, %v546_v61, %v579_v44  ;;  %v585_v35 = vld [vmem:[#allocation2 + $0x24] sm:$0x4]  ;;  %15456 = vmatprep.subr.bf16.mxu1 %v16303_v4 }
  0x4d   : > { %1756 = vrot.lane.b32.xlu1 %v1607_v62, %s16531_s11  ;;  %1754 = vrot.lane.b32.xlu0 %v1598_v0, %s16531_s11  ;;  %v810_v0 = vrot.slane %v16859_v43, 5  ;;  %584 = vst [vmem:[#allocation2 + $0x18] sm:$0x4] %v583_v22  ;;  %717 = vst [vmem:[#allocation2 + $0x18] sm:$0x8] %v716_v60  ;;  %v1077_v30 = vrot.slane %v1076_v18, 4  ;;  %v713_v34 = vsel %vm16896_vm7, %v16871_v54, %v712_v45 }
  0x4e   : > { %581 = vst [vmem:[#allocation2 + $0xc] sm:$0x4] %v580_v6  ;;  %714 = vst [vmem:[#allocation2 + $0xc] sm:$0x8] %v713_v34  ;;  %v16934_v44 = vrot.slane %v16907_v25, 7  ;;  %v16937_v45 = vshrl.u32 %v16907_v25, 16  ;;  %v16964_v60 = vor.u32 %v1672_v16, %v16826_v21 }
  0x4f   : > { %v811_v17 = vrot.slane %v810_v0, 4  ;;  %v16923_v0 = vshll.u32 %v16907_v25, 16  ;;  %v845_v6 = vld [vmem:[#allocation2 + $0x34] sm:$0x1]  ;;  %v380_v56 = vld [vmem:[#allocation2 + $0x30] sm:$0x1]  ;;  %15457 = vmatpush3.bf16.msra.mxu1 %v16303_v4  ;;  %vm16968_vm10 = vmand %vm443_vm4, %vm494_vm8 }
  0x50   : > { %21731 = vst [vmem:[#allocation8_spill] sm:$0xff] %v16937_v45  ;;  %v16307_v61 = vld [vmem:[%s21689_s2 + $0x58] sm:$0xff]   ;;  %v16958_v18 = vrot.slane %v16907_v25, 6  ;;  %v455_v51 = vld [vmem:[#allocation2 + $0x30] sm:$0x2]  ;;  %v16974_v34 = vrot.slane %v1148_v26, 4  ;;  %vm16990_vm4 = vmand %vm576_vm5, %vm643_vm11 }
  0x51   : > { %1762 = vrot.lane.b32.xlu1 %v16805_v3, %s16531_s11  ;;  %1760 = vrot.lane.b32.xlu0 %v16798_v1, %s16531_s11  ;;  %v837_v14 = vsel %vm16839_vm9, %v811_v17, %v836_v48  ;;  %v840_v22 = vsel %vm16839_vm9, %v811_v17, %v839_v40  ;;  %v16939_v3 = vrot.slane %v956_v55, 4  ;;  %v1101_v1 = vsel %vm16881_vm3, %v1077_v30, %v1100_v58  ;;  %v842_v17 = vld [vmem:[#allocation2 + $0x28] sm:$0x1]  ;;  %v16951_v55 = vld [vmem:[#allocation2 + $0x28] sm:$0x4]  ;;  %v16982_v52 = vld [vmem:[%s21689_s2 + $0x50] sm:$0xff]  }
  0x52   : > { %838 = vst [vmem:[#allocation2 + $0x10] sm:$0x1] %v837_v14  ;;  %841 = vst [vmem:[#allocation2 + $0x1c] sm:$0x1] %v840_v22  ;;  %v1104_v48 = vsel %vm16881_vm3, %v1077_v30, %v1103_v59  ;;  %v378_v40 = vsel %vm16851_vm13, %v16923_v0, %v377_v2  ;;  %v453_v58 = vsel %vm16863_vm15, %v16934_v44, %v452_v29  ;;  %v549_v59 = vrot.slane %v16937_v45, 6  ;;  %v18362_v57 = vld [vmem:[%s21689_s2 + $0x238] sm:$0xff]  }
  0x53   : > { %1102 = vst [vmem:[#allocation2 + $0x10] sm:$0x4] %v1101_v1  ;;  %1105 = vst [vmem:[#allocation2 + $0x1c] sm:$0x4] %v1104_v48  ;;  %v812_v2 = vrot.slane %v16937_v45, 5  ;;  %v16972_v29 = vrot.slane %v884_v10, 4  ;;  %15458 = vmatprep.subr.bf16.mxu1 %v16307_v61  ;;  %v719_v1 = vsel %vm16896_vm7, %v16958_v18, %v718_v38 }
  0x54   : > { %379 = vst [vmem:[#allocation2 + $0x24] sm:$0x1] %v378_v40  ;;  %v16976_v14 = vld [vmem:[#allocation2 + $0x34] sm:$0x4]  ;;  %454 = vst [vmem:[#allocation2 + $0x24] sm:$0x2] %v453_v58  ;;  %v586_v26 = vsel %vm16881_vm3, %v549_v59, %v585_v35  ;;  %15459 = vmatpush3.bf16.msra.mxu1 %v16307_v61 }
  0x55   : > { %v1078_v4 = vrot.slane %v16937_v45, 4  ;;  %v588_v22 = vld [vmem:[#allocation2 + $0x30] sm:$0x4]  ;;  %1768 = vrot.lane.b32.xlu1 %v16811_v7, %s16531_s11  ;;  %1766 = vrot.lane.b32.xlu0 %v16813_v8, %s16531_s11  ;;  %v499_v10 = vld [vmem:[#allocation2 + $0x18] sm:$0x2]  ;;  %v813_v48 = vrot.slane %v812_v2, 4  ;;  %v381_v7 = vsel %vm16851_vm13, %v16923_v0, %v380_v56  ;;  %vm17004_vm5 = vmand %vm709_vm12, %vm760_vm1 }
  0x56   : > { %v721_v40 = vld [vmem:[#allocation2 + $0x30] sm:$0x8]  ;;  %v500_v35 = vsel %vm16968_vm10, %v16856_v42, %v499_v10  ;;  %587 = vst [vmem:[#allocation2 + $0x24] sm:$0x4] %v586_v26  ;;  %720 = vst [vmem:[#allocation2 + $0x24] sm:$0x8] %v719_v1  ;;  %v456_v10 = vsel %vm16863_vm15, %v16934_v44, %v455_v51  ;;  %15460 = vmatprep.subr.bf16.mxu1 %v16982_v52 }
  0x57   : > { %v886_v38 = vrot.slane %v16923_v0, 6  ;;  %v1079_v58 = vrot.slane %v1078_v4, 4  ;;  %v1150_v2 = vrot.slane %v16923_v0, 5  ;;  %382 = vst [vmem:[#allocation2 + $0x30] sm:$0x1] %v381_v7  ;;  %v843_v21 = vsel %vm16839_vm9, %v813_v48, %v842_v17 }
  0x58   : > { %v980_v62 = vld [vmem:[#allocation2 + $0x10] sm:$0x2]  ;;  %501 = vst [vmem:[#allocation2 + $0x18] sm:$0x2] %v500_v35  ;;  %v648_v56 = vld [vmem:[#allocation2 + $0x18] sm:$0x4]  ;;  %v846_v31 = vsel %vm16839_vm9, %v813_v48, %v845_v6  ;;  %v589_v4 = vsel %vm16881_vm3, %v549_v59, %v588_v22  ;;  %15461 = vmatpush3.bf16.msra.mxu1 %v16982_v52 }
  0x59   : > { %v765_v45 = vld [vmem:[#allocation2 + $0x18] sm:$0x8]  ;;  %v496_v43 = vld [vmem:[#allocation2 + $0xc] sm:$0x2]  ;;  %v21738_v26 = vrot.slane %v16844_v36, 7  ;;  %v1107_v61 = vsel %vm16881_vm3, %v1079_v58, %v16951_v55  ;;  %1774 = vrot.lane.b32.xlu1 %v16834_v27, %s16531_s11  ;;  %1772 = vrot.lane.b32.xlu0 %v16815_v9, %s16531_s11  ;;  %v628_v55 = vrot.slane %v16923_v0, 7  ;;  %v1110_v9 = vsel %vm16881_vm3, %v1079_v58, %v16976_v14 }
  0x5a   : > { %v766_v17 = vsel %vm17004_vm5, %v16871_v54, %v765_v45  ;;  %v497_v6 = vsel %vm16968_vm10, %v16856_v42, %v496_v43  ;;  %v645_v48 = vld [vmem:[#allocation2 + $0xc] sm:$0x4]  ;;  %v762_v7 = vld [vmem:[#allocation2 + $0xc] sm:$0x8]  ;;  %844 = vst [vmem:[#allocation2 + $0x28] sm:$0x1] %v843_v21  ;;  %v981_v14 = vsel %vm16863_vm15, %v16939_v3, %v980_v62 }
  0x5b   : > { %v649_v1 = vsel %vm16990_vm4, %v21738_v26, %v648_v56  ;;  %847 = vst [vmem:[#allocation2 + $0x34] sm:$0x1] %v846_v31  ;;  %457 = vst [vmem:[#allocation2 + $0x30] sm:$0x2] %v456_v10  ;;  %v1220_v59 = vld [vmem:[#allocation2 + $0x10] sm:$0x8]  ;;  %v21739_v31 = vmov %v21738_v26  ;;  %v763_v45 = vsel %vm17004_vm5, %v16871_v54, %v762_v7  ;;  %v722_v54 = vsel %vm16896_vm7, %v16958_v18, %v721_v40 }
  0x5c   : > { %590 = vst [vmem:[#allocation2 + $0x30] sm:$0x4] %v589_v4  ;;  %650 = vst [vmem:[#allocation2 + $0x18] sm:$0x4] %v649_v1  ;;  %v908_v42 = vld [vmem:[#allocation2 + $0x10] sm:$0x1]  ;;  %v646_v43 = vsel %vm16990_vm4, %v21739_v31, %v645_v48  ;;  %v1221_v40 = vsel %vm16896_vm7, %v16819_v11, %v1220_v59 }
  0x5d   : > { %767 = vst [vmem:[#allocation2 + $0x18] sm:$0x8] %v766_v17  ;;  %v911_v21 = vld [vmem:[#allocation2 + $0x1c] sm:$0x1]  ;;  %498 = vst [vmem:[#allocation2 + $0xc] sm:$0x2] %v497_v6  ;;  %v909_v27 = vsel %vm16851_vm13, %v16972_v29, %v908_v42  ;;  %1778 = vrot.lane.b32.xlu0 %v16847_v39, %s16531_s11 }
  0x5e   : > { %1108 = vst [vmem:[#allocation2 + $0x28] sm:$0x4] %v1107_v61  ;;  %v912_v36 = vsel %vm16851_vm13, %v16972_v29, %v911_v21  ;;  %v1172_v51 = vld [vmem:[#allocation2 + $0x10] sm:$0x4]  ;;  %v1175_v22 = vld [vmem:[#allocation2 + $0x1c] sm:$0x4] }
  0x5f   : > { %647 = vst [vmem:[#allocation2 + $0xc] sm:$0x4] %v646_v43  ;;  %764 = vst [vmem:[#allocation2 + $0xc] sm:$0x8] %v763_v45  ;;  %v383_v35 = vld [vmem:[#allocation2 + $0x3c] sm:$0x1]  ;;  %v1173_v29 = vsel %vm16990_vm4, %v16974_v34, %v1172_v51  ;;  %v1176_v58 = vsel %vm16990_vm4, %v16974_v34, %v1175_v22 }
  0x60   : > { %1111 = vst [vmem:[#allocation2 + $0x34] sm:$0x4] %v1110_v9  ;;  %910 = vst [vmem:[#allocation2 + $0x10] sm:$0x1] %v909_v27  ;;  %v502_v56 = vld [vmem:[#allocation2 + $0x24] sm:$0x2] }
  0x61   : > { %913 = vst [vmem:[#allocation2 + $0x1c] sm:$0x1] %v912_v36  ;;  %723 = vst [vmem:[#allocation2 + $0x30] sm:$0x8] %v722_v54  ;;  %v458_v62 = vld [vmem:[#allocation2 + $0x3c] sm:$0x2]  ;;  %v503_v4 = vsel %vm16968_vm10, %v16934_v44, %v502_v56 }
  0x62   : > { %982 = vst [vmem:[#allocation2 + $0x10] sm:$0x2] %v981_v14  ;;  %v724_v10 = vld [vmem:[#allocation2 + $0x3c] sm:$0x8]  ;;  %1174 = vst [vmem:[#allocation2 + $0x10] sm:$0x4] %v1173_v29 }
  0x63   : > { %1177 = vst [vmem:[#allocation2 + $0x1c] sm:$0x4] %v1176_v58  ;;  %v887_v34 = vrot.slane %v886_v38, 4  ;;  %v1151_v26 = vrot.slane %v1150_v2, 4  ;;  %1222 = vst [vmem:[#allocation2 + $0x10] sm:$0x8] %v1221_v40 }
  0x64   : > { %v17079_v1 = vld [vmem:[%s16791_s29 + $0x8] sm:$0xf]  ;;  %v983_v17 = vld [vmem:[#allocation2 + $0x1c] sm:$0x2]  ;;  %v21740_v6 = vrot.slane %v16607_v24, 4  ;;  %v21741_v52 = vrot.slane %v16821_v12, 4 }
  0x65   : > { %504 = vst [vmem:[#allocation2 + $0x24] sm:$0x2] %v503_v4  ;;  %v651_v38 = vld [vmem:[#allocation2 + $0x24] sm:$0x4]  ;;  %v768_v2 = vld [vmem:[#allocation2 + $0x24] sm:$0x8]  ;;  %v984_v24 = vsel %vm16863_vm15, %v16939_v3, %v983_v17 }
  0x66   : > { %1698 = vrot.lane.b32.xlu1 %v21740_v6, %s16531_s11  ;;  %v1675_v48 = vsel %vm16612_vm2, %v21741_v52, %v16964_v60  ;;  %v17092_v7 = vshll.u32 %v17079_v1, 16  ;;  %v17095_v61 = vrot.slane %v17079_v1, 7  ;;  %v652_v12 = vsel %vm16990_vm4, %v628_v55, %v651_v38  ;;  %985 = vst [vmem:[#allocation2 + $0x1c] sm:$0x2] %v984_v24  ;;  %v1223_v42 = vld [vmem:[#allocation2 + $0x1c] sm:$0x8] }
  0x67   : > { %v769_v39 = vsel %vm17004_vm5, %v16958_v18, %v768_v2  ;;  %v17108_v60 = vshrl.u32 %v17079_v1, 16  ;;  %v17111_v59 = vrot.slane %v17079_v1, 6  ;;  %v386_v21 = vld [vmem:[#allocation2 + $0x48] sm:$0x1]  ;;  %653 = vst [vmem:[#allocation2 + $0x24] sm:$0x4] %v652_v12  ;;  %v1224_v36 = vsel %vm16896_vm7, %v16819_v11, %v1223_v42  ;;  %1780 = vrot.lane.b32.xlu0 %v1675_v48, %s16531_s11 }
  0x68   : > { %770 = vst [vmem:[#allocation2 + $0x24] sm:$0x8] %v769_v39  ;;  %v914_v31 = vld [vmem:[#allocation2 + $0x28] sm:$0x1]  ;;  %v917_v43 = vld [vmem:[#allocation2 + $0x34] sm:$0x1]  ;;  %v384_v9 = vsel %vm16851_vm13, %v17092_v7, %v383_v35  ;;  %v459_v27 = vsel %vm16863_vm15, %v17095_v61, %v458_v62  ;;  %v387_v51 = vsel %vm16851_vm13, %v17092_v7, %v386_v21 }
  0x69   : > { %v505_v45 = vld [vmem:[#allocation2 + $0x30] sm:$0x2]  ;;  %v915_v22 = vsel %vm16851_vm13, %v887_v34, %v914_v31  ;;  %v918_v54 = vsel %vm16851_vm13, %v887_v34, %v917_v43  ;;  %v1178_v14 = vld [vmem:[#allocation2 + $0x28] sm:$0x4]  ;;  %v654_v29 = vld [vmem:[#allocation2 + $0x30] sm:$0x4]  ;;  %v725_v56 = vsel %vm16896_vm7, %v17111_v59, %v724_v10 }
  0x6a   : > { %v506_v35 = vsel %vm16968_vm10, %v16934_v44, %v505_v45  ;;  %v591_v58 = vld [vmem:[#allocation2 + $0x3c] sm:$0x4]  ;;  %385 = vst [vmem:[#allocation2 + $0x3c] sm:$0x1] %v384_v9  ;;  %460 = vst [vmem:[#allocation2 + $0x3c] sm:$0x2] %v459_v27  ;;  %v1179_v62 = vsel %vm16990_vm4, %v1151_v26, %v1178_v14  ;;  %v655_v10 = vsel %vm16990_vm4, %v628_v55, %v654_v29 }
  0x6b   : > { %1225 = vst [vmem:[#allocation2 + $0x1c] sm:$0x8] %v1224_v36  ;;  %388 = vst [vmem:[#allocation2 + $0x48] sm:$0x1] %v387_v51  ;;  %v21742_v40 = vrot.slane %v16605_v23, 4  ;;  %v958_v44 = vrot.slane %v16907_v25, 5 }
  0x6c   : > { %916 = vst [vmem:[#allocation2 + $0x28] sm:$0x1] %v915_v22  ;;  %919 = vst [vmem:[#allocation2 + $0x34] sm:$0x1] %v918_v54  ;;  %v1181_v4 = vld [vmem:[#allocation2 + $0x34] sm:$0x4] }
  0x6d   : > { %1704 = vrot.lane.b32.xlu1 %v21742_v40, %s16531_s11  ;;  %507 = vst [vmem:[#allocation2 + $0x30] sm:$0x2] %v506_v35  ;;  %v848_v34 = vld [vmem:[#allocation2 + $0x40] sm:$0x1]  ;;  %v851_v17 = vld [vmem:[#allocation2 + $0x4c] sm:$0x1]  ;;  %v1182_v52 = vsel %vm16990_vm4, %v1151_v26, %v1181_v4 }
  0x6e   : > { %v552_v23 = vrot.slane %v17108_v60, 6  ;;  %726 = vst [vmem:[#allocation2 + $0x3c] sm:$0x8] %v725_v56  ;;  %v1506_v6 = vrot.slane %v16653_v63, 4  ;;  %1180 = vst [vmem:[#allocation2 + $0x28] sm:$0x4] %v1179_v62 }
  0x6f   : > { %656 = vst [vmem:[#allocation2 + $0x30] sm:$0x4] %v655_v10  ;;  %v771_v48 = vld [vmem:[#allocation2 + $0x30] sm:$0x8]  ;;  %v1028_v38 = vld [vmem:[#allocation2 + $0x10] sm:$0x2] }
  0x70   : > { %v814_v2 = vrot.slane %v17108_v60, 5  ;;  %v1557_v0 = vrot.slane %v16713_v47, 4  ;;  %1183 = vst [vmem:[#allocation2 + $0x34] sm:$0x4] %v1182_v52  ;;  %v772_v55 = vsel %vm17004_vm5, %v16958_v18, %v771_v48  ;;  %v1029_v63 = vsel %vm16968_vm10, %v16939_v3, %v1028_v38  ;;  %v1268_v24 = vld [vmem:[#allocation2 + $0x10] sm:$0x8] }
  0x71   : > { %v1112_v12 = vld [vmem:[#allocation2 + $0x40] sm:$0x4]  ;;  %v1115_v39 = vld [vmem:[#allocation2 + $0x4c] sm:$0x4]  ;;  %v592_v26 = vsel %vm16881_vm3, %v552_v23, %v591_v58  ;;  %v461_v42 = vld [vmem:[#allocation2 + $0x48] sm:$0x2]  ;;  %v1269_v18 = vsel %vm17004_vm5, %v16819_v11, %v1268_v24 }
  0x72   : > { %v16312_v21 = vld [vmem:[%s21689_s2 + $0x48] sm:$0xff]   ;;  %v1540_v31 = vrot.slane %v16680_v20, 4  ;;  %773 = vst [vmem:[#allocation2 + $0x30] sm:$0x8] %v772_v55  ;;  %1030 = vst [vmem:[#allocation2 + $0x10] sm:$0x2] %v1029_v63  ;;  %v462_v29 = vsel %vm16863_vm15, %v17095_v61, %v461_v42 }
  0x73   : > { %593 = vst [vmem:[#allocation2 + $0x3c] sm:$0x4] %v592_v26  ;;  %v815_v43 = vrot.slane %v814_v2, 4  ;;  %v1080_v45 = vrot.slane %v17108_v60, 4  ;;  %v594_v9 = vld [vmem:[#allocation2 + $0x48] sm:$0x4]  ;;  %15462 = vmatprep.subr.bf16.mxu1 %v16312_v21 }
  0x74   : > { %v16313_v27 = vld [vmem:[%s21689_s2 + $0x40] sm:$0xff]   ;;  %v21743_v36 = vrot.slane %v16638_v50, 4  ;;  %v21744_v51 = vrot.slane %v16619_v37, 4  ;;  %v17177_v22 = vrot.slane %v958_v44, 4  ;;  %1270 = vst [vmem:[#allocation2 + $0x10] sm:$0x8] %v1269_v18  ;;  %v595_v58 = vsel %vm16881_vm3, %v552_v23, %v594_v9  ;;  %15463 = vmatpush3.bf16.msra.mxu1 %v16312_v21 }
  0x75   : > { %v629_v54 = vrot.slane %v17092_v7, 7  ;;  %v1031_v14 = vld [vmem:[#allocation2 + $0x1c] sm:$0x2]  ;;  %v727_v35 = vld [vmem:[#allocation2 + $0x48] sm:$0x8]  ;;  %v849_v50 = vsel %vm16839_vm9, %v815_v43, %v848_v34  ;;  %v852_v37 = vsel %vm16839_vm9, %v815_v43, %v851_v17  ;;  %v1081_v56 = vrot.slane %v1080_v45, 4  ;;  %15464 = vmatprep.subr.bf16.mxu1 %v16313_v27 }
  0x76   : > { %1716 = vrot.lane.b32.xlu1 %v21743_v36, %s16531_s11  ;;  %1710 = vrot.lane.b32.xlu0 %v21744_v51, %s16531_s11  ;;  %v1032_v40 = vsel %vm16968_vm10, %v16939_v3, %v1031_v14  ;;  %463 = vst [vmem:[#allocation2 + $0x48] sm:$0x2] %v462_v29  ;;  %596 = vst [vmem:[#allocation2 + $0x48] sm:$0x4] %v595_v58  ;;  %v508_v44 = vld [vmem:[#allocation2 + $0x3c] sm:$0x2]  ;;  %v728_v34 = vsel %vm16896_vm7, %v17111_v59, %v727_v35 }
  0x77   : > { %850 = vst [vmem:[#allocation2 + $0x40] sm:$0x1] %v849_v50  ;;  %853 = vst [vmem:[#allocation2 + $0x4c] sm:$0x1] %v852_v37  ;;  %v888_v62 = vrot.slane %v17092_v7, 6  ;;  %v1152_v4 = vrot.slane %v17092_v7, 5  ;;  %v509_v3 = vsel %vm16968_vm10, %v17095_v61, %v508_v44  ;;  %v1113_v23 = vsel %vm16881_vm3, %v1081_v56, %v1112_v12 }
  0x78   : > { %1033 = vst [vmem:[#allocation2 + $0x1c] sm:$0x2] %v1032_v40  ;;  %v1271_v10 = vld [vmem:[#allocation2 + $0x1c] sm:$0x8]  ;;  %v1116_v52 = vsel %vm16881_vm3, %v1081_v56, %v1115_v39  ;;  %729 = vst [vmem:[#allocation2 + $0x48] sm:$0x8] %v728_v34  ;;  %15465 = vmatpush3.bf16.msra.mxu1 %v16313_v27 }
  0x79   : > { %v774_v17 = vld [vmem:[#allocation2 + $0x3c] sm:$0x8]  ;;  %v1272_v48 = vsel %vm17004_vm5, %v16819_v11, %v1271_v10  ;;  %v986_v38 = vld [vmem:[#allocation2 + $0x28] sm:$0x2]  ;;  %v21745_v2 = vrot.slane %v16673_v15, 4  ;;  %v1591_v55 = vrot.slane %v16745_v13, 4 }
  0x7a   : > { %1722 = vrot.lane.b32.xlu0 %v1506_v6, %s16531_s11  ;;  %v1574_v63 = vrot.slane %v16721_v53, 4  ;;  %510 = vst [vmem:[#allocation2 + $0x3c] sm:$0x2] %v509_v3  ;;  %v775_v24 = vsel %vm17004_vm5, %v17111_v59, %v774_v17  ;;  %1114 = vst [vmem:[#allocation2 + $0x40] sm:$0x4] %v1113_v23  ;;  %v987_v11 = vsel %vm16863_vm15, %v17177_v22, %v986_v38  ;;  %v1625_v6 = vrot.slane %v16756_v28, 4 }
  0x7b   : > { %1728 = vrot.lane.b32.xlu1 %v21745_v2, %s16531_s11  ;;  %1117 = vst [vmem:[#allocation2 + $0x4c] sm:$0x4] %v1116_v52  ;;  %1273 = vst [vmem:[#allocation2 + $0x1c] sm:$0x8] %v1272_v48  ;;  %v1226_v15 = vld [vmem:[#allocation2 + $0x28] sm:$0x8] }
  0x7c   : > { %v1608_v13 = vrot.slane %v16750_v19, 4  ;;  %776 = vst [vmem:[#allocation2 + $0x3c] sm:$0x8] %v775_v24  ;;  %v960_v53 = vrot.slane %v17079_v1, 5  ;;  %988 = vst [vmem:[#allocation2 + $0x28] sm:$0x2] %v987_v11  ;;  %v1227_v12 = vsel %vm16896_vm7, %v16907_v25, %v1226_v15 }
  0x7d   : > { %v657_v39 = vld [vmem:[#allocation2 + $0x3c] sm:$0x4]  ;;  %v889_v26 = vrot.slane %v888_v62, 4  ;;  %v1153_v42 = vrot.slane %v1152_v4, 4  ;;  %1228 = vst [vmem:[#allocation2 + $0x28] sm:$0x8] %v1227_v12 }
  0x7e   : > { %v389_v21 = vld [vmem:[#allocation2 + $0x54] sm:$0x1]  ;;  %v658_v18 = vsel %vm16990_vm4, %v629_v54, %v657_v39  ;;  %v464_v43 = vld [vmem:[#allocation2 + $0x54] sm:$0x2]  ;;  %v730_v45 = vld [vmem:[#allocation2 + $0x54] sm:$0x8]  ;;  %1734 = vrot.lane.b32.xlu0 %v1540_v31, %s16531_s11 }
  0x7f   : > { %v17230_v9 = vld [vmem:[%s16791_s29 + $0xc] sm:$0xf]  ;;  %1740 = vrot.lane.b32.xlu1 %v1557_v0, %s16531_s11  ;;  %659 = vst [vmem:[#allocation2 + $0x3c] sm:$0x4] %v658_v18  ;;  %v511_v36 = vld [vmem:[#allocation2 + $0x48] sm:$0x2] }
  0x80   : > { %v660_v27 = vld [vmem:[#allocation2 + $0x48] sm:$0x4]  ;;  %v17239_v51 = vshll.u32 %v17230_v9, 16  ;;  %v17242_v14 = vrot.slane %v17230_v9, 7  ;;  %v920_v35 = vld [vmem:[#allocation2 + $0x40] sm:$0x1]  ;;  %v512_v47 = vsel %vm16968_vm10, %v17095_v61, %v511_v36 }
  0x81   : > { %v923_v29 = vld [vmem:[#allocation2 + $0x4c] sm:$0x1]  ;;  %v661_v20 = vsel %vm16990_vm4, %v629_v54, %v660_v27  ;;  %v17252_v0 = vshrl.u32 %v17230_v9, 16  ;;  %v17255_v31 = vrot.slane %v17230_v9, 6  ;;  %v921_v58 = vsel %vm16851_vm13, %v889_v26, %v920_v35  ;;  %513 = vst [vmem:[#allocation2 + $0x48] sm:$0x2] %v512_v47 }
  0x82   : > { %v924_v50 = vsel %vm16851_vm13, %v889_v26, %v923_v29  ;;  %662 = vst [vmem:[#allocation2 + $0x48] sm:$0x4] %v661_v20  ;;  %v777_v61 = vld [vmem:[#allocation2 + $0x48] sm:$0x8]  ;;  %v597_v37 = vld [vmem:[#allocation2 + $0x54] sm:$0x4]  ;;  %v390_v7 = vsel %vm16851_vm13, %v17239_v51, %v389_v21  ;;  %v465_v54 = vsel %vm16863_vm15, %v17242_v14, %v464_v43  ;;  %1746 = vrot.lane.b32.xlu0 %v1574_v63, %s16531_s11 }
  0x83   : > { %v989_v56 = vld [vmem:[#allocation2 + $0x34] sm:$0x2]  ;;  %v1659_v40 = vrot.slane %v16774_v49, 4  ;;  %922 = vst [vmem:[#allocation2 + $0x40] sm:$0x1] %v921_v58  ;;  %v778_v4 = vsel %vm17004_vm5, %v17111_v59, %v777_v61  ;;  %v555_v3 = vrot.slane %v17252_v0, 6  ;;  %v731_v17 = vsel %vm16896_vm7, %v17255_v31, %v730_v45  ;;  %1752 = vrot.lane.b32.xlu1 %v1591_v55, %s16531_s11 }
  0x84   : > { %925 = vst [vmem:[#allocation2 + $0x4c] sm:$0x1] %v924_v50  ;;  %v1184_v44 = vld [vmem:[#allocation2 + $0x40] sm:$0x4]  ;;  %v1187_v62 = vld [vmem:[#allocation2 + $0x4c] sm:$0x4]  ;;  %v990_v35 = vsel %vm16863_vm15, %v17177_v22, %v989_v56 }
  0x85   : > { %v854_v10 = vld [vmem:[#allocation2 + $0x58] sm:$0x1]  ;;  %v857_v34 = vld [vmem:[#allocation2 + $0x64] sm:$0x1]  ;;  %391 = vst [vmem:[#allocation2 + $0x54] sm:$0x1] %v390_v7  ;;  %v1185_v48 = vsel %vm16990_vm4, %v1153_v42, %v1184_v44  ;;  %v1188_v59 = vsel %vm16990_vm4, %v1153_v42, %v1187_v62  ;;  %v598_v39 = vsel %vm16881_vm3, %v555_v3, %v597_v37 }
  0x86   : > { %466 = vst [vmem:[#allocation2 + $0x54] sm:$0x2] %v465_v54  ;;  %v21746_v23 = vld [vmem:[#allocation5_spill] sm:$0xff]  ;;  %779 = vst [vmem:[#allocation2 + $0x48] sm:$0x8] %v778_v4  ;;  %v816_v11 = vrot.slane %v17252_v0, 5  ;;  %1758 = vrot.lane.b32.xlu0 %v1608_v13, %s16531_s11 }
  0x87   : > { %v1642_v52 = vrot.slane %v21746_v23, 4  ;;  %v1034_v38 = vld [vmem:[#allocation2 + $0x28] sm:$0x2]  ;;  %v1118_v2 = vld [vmem:[#allocation2 + $0x58] sm:$0x4]  ;;  %v17283_v12 = vrot.slane %v960_v53, 4  ;;  %1764 = vrot.lane.b32.xlu1 %v1625_v6, %s16531_s11 }
  0x88   : > { %v1121_v24 = vld [vmem:[#allocation2 + $0x64] sm:$0x4]  ;;  %732 = vst [vmem:[#allocation2 + $0x54] sm:$0x8] %v731_v17  ;;  %v1229_v15 = vld [vmem:[#allocation2 + $0x34] sm:$0x8]  ;;  %v1035_v55 = vsel %vm16968_vm10, %v17177_v22, %v1034_v38 }
  0x89   : > { %1186 = vst [vmem:[#allocation2 + $0x40] sm:$0x4] %v1185_v48  ;;  %1189 = vst [vmem:[#allocation2 + $0x4c] sm:$0x4] %v1188_v59  ;;  %v1274_v63 = vld [vmem:[#allocation2 + $0x28] sm:$0x8]  ;;  %v1230_v29 = vsel %vm16896_vm7, %v16907_v25, %v1229_v15 }
  0x8a   : > { %v1082_v26 = vrot.slane %v17252_v0, 4  ;;  %v392_v42 = vld [vmem:[#allocation2 + $0x60] sm:$0x1]  ;;  %1036 = vst [vmem:[#allocation2 + $0x28] sm:$0x2] %v1035_v55  ;;  %v1275_v21 = vsel %vm17004_vm5, %v16907_v25, %v1274_v63  ;;  %v817_v53 = vrot.slane %v816_v11, 4  ;;  %1770 = vrot.lane.b32.xlu0 %v1642_v52, %s16531_s11 }
  0x8b   : > { %599 = vst [vmem:[#allocation2 + $0x54] sm:$0x4] %v598_v39  ;;  %v467_v18 = vld [vmem:[#allocation2 + $0x60] sm:$0x2]  ;;  %v600_v43 = vld [vmem:[#allocation2 + $0x60] sm:$0x4]  ;;  %v393_v61 = vsel %vm16851_vm13, %v17239_v51, %v392_v42  ;;  %1776 = vrot.lane.b32.xlu1 %v1659_v40, %s16531_s11 }
  0x8c   : > { %v16316_v45 = vld [vmem:[%s21689_s2 + $0xf8] sm:$0xff]   ;;  %1276 = vst [vmem:[#allocation2 + $0x28] sm:$0x8] %v1275_v21  ;;  %v890_v36 = vrot.slane %v17239_v51, 6  ;;  %v1083_v27 = vrot.slane %v1082_v26, 4  ;;  %v855_v20 = vsel %vm16839_vm9, %v817_v53, %v854_v10  ;;  %v858_v58 = vsel %vm16839_vm9, %v817_v53, %v857_v34  ;;  %v21747_v10 = vld [vmem:[#allocation6_spill] sm:$0xff] }
  0x8d   : > { %v733_v47 = vld [vmem:[#allocation2 + $0x60] sm:$0x8]  ;;  %v1154_v50 = vrot.slane %v17239_v51, 5  ;;  %991 = vst [vmem:[#allocation2 + $0x34] sm:$0x2] %v990_v35  ;;  %v468_v6 = vsel %vm16863_vm15, %v17242_v14, %v467_v18  ;;  %v601_v13 = vsel %vm16881_vm3, %v555_v3, %v600_v43  ;;  %15546 = vmatprep.subr.bf16.mxu1 %v16316_v45  ;;  %v630_v56 = vrot.slane %v17239_v51, 7 }
  0x8e   : > { %1231 = vst [vmem:[#allocation2 + $0x34] sm:$0x8] %v1230_v29  ;;  %856 = vst [vmem:[#allocation2 + $0x58] sm:$0x1] %v855_v20  ;;  %v1119_v19 = vsel %vm16881_vm3, %v1083_v27, %v1118_v2  ;;  %v1122_v28 = vsel %vm16881_vm3, %v1083_v27, %v1121_v24  ;;  %v992_v37 = vld [vmem:[#allocation2 + $0x40] sm:$0x2]  ;;  %v734_v44 = vsel %vm16896_vm7, %v17255_v31, %v733_v47 }
  0x8f   : > { %859 = vst [vmem:[#allocation2 + $0x64] sm:$0x1] %v858_v58  ;;  %394 = vst [vmem:[#allocation2 + $0x60] sm:$0x1] %v393_v61  ;;  %v1232_v7 = vld [vmem:[#allocation2 + $0x40] sm:$0x8]  ;;  %v993_v62 = vsel %vm16863_vm15, %v17283_v12, %v992_v37 }
  0x90   : > { %v514_v54 = vld [vmem:[#allocation2 + $0x54] sm:$0x2]  ;;  %1120 = vst [vmem:[#allocation2 + $0x58] sm:$0x4] %v1119_v19  ;;  %1123 = vst [vmem:[#allocation2 + $0x64] sm:$0x4] %v1122_v28  ;;  %v1233_v4 = vsel %vm16896_vm7, %v17079_v1, %v1232_v7 }
  0x91   : > { %469 = vst [vmem:[#allocation2 + $0x60] sm:$0x2] %v468_v6  ;;  %602 = vst [vmem:[#allocation2 + $0x60] sm:$0x4] %v601_v13  ;;  %v1676_v34 = vrot.slane %v21747_v10, 4  ;;  %v515_v3 = vsel %vm16968_vm10, %v17242_v14, %v514_v54  ;;  %v891_v59 = vrot.slane %v890_v36, 4 }
  0x92   : > { %v780_v17 = vld [vmem:[#allocation2 + $0x54] sm:$0x8]  ;;  %735 = vst [vmem:[#allocation2 + $0x60] sm:$0x8] %v734_v44  ;;  %994 = vst [vmem:[#allocation2 + $0x40] sm:$0x2] %v993_v62 }
  0x93   : > { %1234 = vst [vmem:[#allocation2 + $0x40] sm:$0x8] %v1233_v4  ;;  %516 = vst [vmem:[#allocation2 + $0x54] sm:$0x2] %v515_v3  ;;  %v781_v48 = vsel %vm17004_vm5, %v17255_v31, %v780_v17  ;;  %v962_v38 = vrot.slane %v17230_v9, 5  ;;  %v1155_v2 = vrot.slane %v1154_v50, 4  ;;  %1782 = vrot.lane.b32.xlu0 %v1676_v34, %s16531_s11 }
  0x94   : > { %v395_v24 = vld [vmem:[#allocation2 + $0x6c] sm:$0x1]  ;;  %v663_v11 = vld [vmem:[#allocation2 + $0x54] sm:$0x4]  ;;  %782 = vst [vmem:[#allocation2 + $0x54] sm:$0x8] %v781_v48 }
  0x95   : > { %v470_v15 = vld [vmem:[#allocation2 + $0x6c] sm:$0x2]  ;;  %v17352_v55 = vld [vmem:[%s16791_s29 + $0x10] sm:$0xf]  ;;  %v664_v49 = vsel %vm16990_vm4, %v630_v56, %v663_v11  ;;  %v736_v40 = vld [vmem:[#allocation2 + $0x6c] sm:$0x8] }
  0x96   : > { %v17359_v23 = vshll.u32 %v17352_v55, 16  ;;  %v17362_v52 = vrot.slane %v17352_v55, 7  ;;  %v995_v63 = vld [vmem:[#allocation2 + $0x4c] sm:$0x2]  ;;  %665 = vst [vmem:[#allocation2 + $0x54] sm:$0x4] %v664_v49 }
  0x97   : > { %v1037_v39 = vld [vmem:[#allocation2 + $0x34] sm:$0x2]  ;;  %v1277_v26 = vld [vmem:[#allocation2 + $0x34] sm:$0x8]  ;;  %v17365_v42 = vshrl.u32 %v17352_v55, 16  ;;  %v17368_v21 = vrot.slane %v17352_v55, 6  ;;  %v996_v53 = vsel %vm16863_vm15, %v17283_v12, %v995_v63 }
  0x98   : > { %v926_v18 = vld [vmem:[#allocation2 + $0x58] sm:$0x1]  ;;  %v929_v43 = vld [vmem:[#allocation2 + $0x64] sm:$0x1]  ;;  %v1038_v45 = vsel %vm16968_vm10, %v17177_v22, %v1037_v39  ;;  %v1278_v36 = vsel %vm17004_vm5, %v16907_v25, %v1277_v26  ;;  %v603_v27 = vld [vmem:[#allocation2 + $0x6c] sm:$0x4]  ;;  %v396_v35 = vsel %vm16851_vm13, %v17359_v23, %v395_v24  ;;  %v471_v29 = vsel %vm16863_vm15, %v17362_v52, %v470_v15 }
  0x99   : > { %997 = vst [vmem:[#allocation2 + $0x4c] sm:$0x2] %v996_v53  ;;  %v1235_v47 = vld [vmem:[#allocation2 + $0x4c] sm:$0x8]  ;;  %v927_v20 = vsel %vm16851_vm13, %v891_v59, %v926_v18  ;;  %v930_v22 = vsel %vm16851_vm13, %v891_v59, %v929_v43  ;;  %v1190_v58 = vld [vmem:[#allocation2 + $0x58] sm:$0x4]  ;;  %v737_v61 = vsel %vm16896_vm7, %v17368_v21, %v736_v40 }
  0x9a   : > { %v1193_v50 = vld [vmem:[#allocation2 + $0x64] sm:$0x4]  ;;  %1039 = vst [vmem:[#allocation2 + $0x34] sm:$0x2] %v1038_v45  ;;  %1279 = vst [vmem:[#allocation2 + $0x34] sm:$0x8] %v1278_v36  ;;  %v1236_v19 = vsel %vm16896_vm7, %v17079_v1, %v1235_v47  ;;  %v1191_v28 = vsel %vm16990_vm4, %v1155_v2, %v1190_v58 }
  0x9b   : > { %v517_v25 = vld [vmem:[#allocation2 + $0x60] sm:$0x2]  ;;  %397 = vst [vmem:[#allocation2 + $0x6c] sm:$0x1] %v396_v35  ;;  %472 = vst [vmem:[#allocation2 + $0x6c] sm:$0x2] %v471_v29  ;;  %v1194_v6 = vsel %vm16990_vm4, %v1155_v2, %v1193_v50 }
  0x9c   : > { %928 = vst [vmem:[#allocation2 + $0x58] sm:$0x1] %v927_v20  ;;  %931 = vst [vmem:[#allocation2 + $0x64] sm:$0x1] %v930_v22  ;;  %v518_v13 = vsel %vm16968_vm10, %v17242_v14, %v517_v25  ;;  %v666_v37 = vld [vmem:[#allocation2 + $0x60] sm:$0x4] }
  0x9d   : > { %v783_v7 = vld [vmem:[#allocation2 + $0x60] sm:$0x8]  ;;  %v1040_v54 = vld [vmem:[#allocation2 + $0x40] sm:$0x2]  ;;  %738 = vst [vmem:[#allocation2 + $0x6c] sm:$0x8] %v737_v61  ;;  %v667_v44 = vsel %vm16990_vm4, %v630_v56, %v666_v37 }
  0x9e   : > { %1237 = vst [vmem:[#allocation2 + $0x4c] sm:$0x8] %v1236_v19  ;;  %1192 = vst [vmem:[#allocation2 + $0x58] sm:$0x4] %v1191_v28  ;;  %v784_v62 = vsel %vm17004_vm5, %v17255_v31, %v783_v7  ;;  %v1041_v14 = vsel %vm16968_vm10, %v17283_v12, %v1040_v54  ;;  %v1280_v4 = vld [vmem:[#allocation2 + $0x40] sm:$0x8] }
  0x9f   : > { %1195 = vst [vmem:[#allocation2 + $0x64] sm:$0x4] %v1194_v6  ;;  %519 = vst [vmem:[#allocation2 + $0x60] sm:$0x2] %v518_v13  ;;  %v860_v10 = vld [vmem:[#allocation2 + $0x70] sm:$0x1]  ;;  %v1281_v51 = vsel %vm17004_vm5, %v17079_v1, %v1280_v4 }
  0xa0   : > { %v558_v34 = vrot.slane %v17365_v42, 6  ;;  %v398_v3 = vld [vmem:[#allocation2 + $0x78] sm:$0x1]  ;;  %668 = vst [vmem:[#allocation2 + $0x60] sm:$0x4] %v667_v44  ;;  %v818_v17 = vrot.slane %v17365_v42, 5 }
  0xa1   : > { %785 = vst [vmem:[#allocation2 + $0x60] sm:$0x8] %v784_v62  ;;  %1042 = vst [vmem:[#allocation2 + $0x40] sm:$0x2] %v1041_v14  ;;  %v863_v56 = vld [vmem:[#allocation2 + $0x7c] sm:$0x1]  ;;  %v399_v39 = vsel %vm16851_vm13, %v17359_v23, %v398_v3 }
  0xa2   : > { %v473_v31 = vld [vmem:[#allocation2 + $0x78] sm:$0x2]  ;;  %v17420_v48 = vrot.slane %v962_v38, 4  ;;  %1282 = vst [vmem:[#allocation2 + $0x40] sm:$0x8] %v1281_v51  ;;  %v604_v2 = vsel %vm16881_vm3, %v558_v34, %v603_v27  ;;  %v1084_v24 = vrot.slane %v17365_v42, 4 }
  0xa3   : > { %v1124_v59 = vld [vmem:[#allocation2 + $0x70] sm:$0x4]  ;;  %v606_v11 = vld [vmem:[#allocation2 + $0x78] sm:$0x4]  ;;  %v1127_v15 = vld [vmem:[#allocation2 + $0x7c] sm:$0x4]  ;;  %v474_v38 = vsel %vm16863_vm15, %v17362_v52, %v473_v31 }
  0xa4   : > { %605 = vst [vmem:[#allocation2 + $0x6c] sm:$0x4] %v604_v2  ;;  %v819_v49 = vrot.slane %v818_v17, 4  ;;  %v892_v40 = vrot.slane %v17359_v23, 6  ;;  %v739_v63 = vld [vmem:[#allocation2 + $0x78] sm:$0x8]  ;;  %v607_v43 = vsel %vm16881_vm3, %v558_v34, %v606_v11 }
  0xa5   : > { %v1085_v26 = vrot.slane %v1084_v24, 4  ;;  %v1156_v53 = vrot.slane %v17359_v23, 5  ;;  %v1043_v18 = vld [vmem:[#allocation2 + $0x4c] sm:$0x2]  ;;  %400 = vst [vmem:[#allocation2 + $0x78] sm:$0x1] %v399_v39  ;;  %v740_v45 = vsel %vm16896_vm7, %v17368_v21, %v739_v63 }
  0xa6   : > { %475 = vst [vmem:[#allocation2 + $0x78] sm:$0x2] %v474_v38  ;;  %v520_v36 = vld [vmem:[#allocation2 + $0x6c] sm:$0x2]  ;;  %v861_v27 = vsel %vm16839_vm9, %v819_v49, %v860_v10  ;;  %v864_v35 = vsel %vm16839_vm9, %v819_v49, %v863_v56  ;;  %v1044_v29 = vsel %vm16968_vm10, %v17283_v12, %v1043_v18  ;;  %608 = vst [vmem:[#allocation2 + $0x78] sm:$0x4] %v607_v43 }
  0xa7   : > { %741 = vst [vmem:[#allocation2 + $0x78] sm:$0x8] %v740_v45  ;;  %v998_v47 = vld [vmem:[#allocation2 + $0x58] sm:$0x2]  ;;  %v521_v20 = vsel %vm16968_vm10, %v17362_v52, %v520_v36  ;;  %v786_v22 = vld [vmem:[#allocation2 + $0x6c] sm:$0x8]  ;;  %v1125_v58 = vsel %vm16881_vm3, %v1085_v26, %v1124_v59  ;;  %v1128_v50 = vsel %vm16881_vm3, %v1085_v26, %v1127_v15 }
  0xa8   : > { %862 = vst [vmem:[#allocation2 + $0x70] sm:$0x1] %v861_v27  ;;  %865 = vst [vmem:[#allocation2 + $0x7c] sm:$0x1] %v864_v35  ;;  %v1283_v25 = vld [vmem:[#allocation2 + $0x4c] sm:$0x8]  ;;  %v999_v12 = vsel %vm16863_vm15, %v17420_v48, %v998_v47  ;;  %v787_v28 = vsel %vm17004_vm5, %v17368_v21, %v786_v22 }
  0xa9   : > { %1045 = vst [vmem:[#allocation2 + $0x4c] sm:$0x2] %v1044_v29  ;;  %v1238_v61 = vld [vmem:[#allocation2 + $0x58] sm:$0x8]  ;;  %522 = vst [vmem:[#allocation2 + $0x6c] sm:$0x2] %v521_v20  ;;  %v1284_v6 = vsel %vm17004_vm5, %v17079_v1, %v1283_v25 }
  0xaa   : > { %v631_v19 = vrot.slane %v17359_v23, 7  ;;  %1126 = vst [vmem:[#allocation2 + $0x70] sm:$0x4] %v1125_v58  ;;  %1129 = vst [vmem:[#allocation2 + $0x7c] sm:$0x4] %v1128_v50  ;;  %v1239_v13 = vsel %vm16896_vm7, %v17230_v9, %v1238_v61  ;;  %v893_v37 = vrot.slane %v892_v40, 4 }
  0xab   : > { %1000 = vst [vmem:[#allocation2 + $0x58] sm:$0x2] %v999_v12  ;;  %788 = vst [vmem:[#allocation2 + $0x6c] sm:$0x8] %v787_v28  ;;  %v1157_v7 = vrot.slane %v1156_v53, 4  ;;  %v964_v56 = vrot.slane %v17352_v55, 5 }
  0xac   : > { %1285 = vst [vmem:[#allocation2 + $0x4c] sm:$0x8] %v1284_v6  ;;  %1240 = vst [vmem:[#allocation2 + $0x58] sm:$0x8] %v1239_v13  ;;  %v401_v23 = vld [vmem:[#allocation2 + $0x84] sm:$0x1] }
  0xad   : > { %v476_v54 = vld [vmem:[#allocation2 + $0x84] sm:$0x2]  ;;  %v742_v44 = vld [vmem:[#allocation2 + $0x84] sm:$0x8]  ;;  %v669_v62 = vld [vmem:[#allocation2 + $0x6c] sm:$0x4] }
  0xae   : > { %v17466_v14 = vld [vmem:[%s16791_s29 + $0x14] sm:$0xf]  ;;  %v1001_v4 = vld [vmem:[#allocation2 + $0x64] sm:$0x2]  ;;  %v670_v1 = vsel %vm16990_vm4, %v631_v19, %v669_v62  ;;  %v523_v10 = vld [vmem:[#allocation2 + $0x78] sm:$0x2] }
  0xaf   : > { %v17471_v34 = vshll.u32 %v17466_v14, 16  ;;  %v17474_v3 = vrot.slane %v17466_v14, 7  ;;  %v17477_v51 = vshrl.u32 %v17466_v14, 16  ;;  %671 = vst [vmem:[#allocation2 + $0x6c] sm:$0x4] %v670_v1  ;;  %v524_v17 = vsel %vm16968_vm10, %v17362_v52, %v523_v10 }
  0xb0   : > { %v672_v31 = vld [vmem:[#allocation2 + $0x78] sm:$0x4]  ;;  %v789_v59 = vld [vmem:[#allocation2 + $0x78] sm:$0x8]  ;;  %v609_v2 = vld [vmem:[#allocation2 + $0x84] sm:$0x4]  ;;  %v1002_v11 = vsel %vm16863_vm15, %v17420_v48, %v1001_v4 }
  0xb1   : > { %v17484_v24 = vrot.slane %v17466_v14, 6  ;;  %v932_v15 = vld [vmem:[#allocation2 + $0x70] sm:$0x1]  ;;  %v935_v49 = vld [vmem:[#allocation2 + $0x7c] sm:$0x1]  ;;  %v673_v40 = vsel %vm16990_vm4, %v631_v19, %v672_v31  ;;  %v790_v52 = vsel %vm17004_vm5, %v17368_v21, %v789_v59  ;;  %v402_v63 = vsel %vm16851_vm13, %v17471_v34, %v401_v23 }
  0xb2   : > { %525 = vst [vmem:[#allocation2 + $0x78] sm:$0x2] %v524_v17  ;;  %v477_v39 = vsel %vm16863_vm15, %v17474_v3, %v476_v54  ;;  %1003 = vst [vmem:[#allocation2 + $0x64] sm:$0x2] %v1002_v11  ;;  %v1241_v38 = vld [vmem:[#allocation2 + $0x64] sm:$0x8]  ;;  %v933_v26 = vsel %vm16851_vm13, %v893_v37, %v932_v15  ;;  %v936_v53 = vsel %vm16851_vm13, %v893_v37, %v935_v49 }
  0xb3   : > { %v1196_v18 = vld [vmem:[#allocation2 + $0x70] sm:$0x4]  ;;  %v1199_v43 = vld [vmem:[#allocation2 + $0x7c] sm:$0x4]  ;;  %674 = vst [vmem:[#allocation2 + $0x78] sm:$0x4] %v673_v40  ;;  %v743_v45 = vsel %vm16896_vm7, %v17484_v24, %v742_v44  ;;  %v1242_v36 = vsel %vm16896_vm7, %v17230_v9, %v1241_v38 }
  0xb4   : > { %791 = vst [vmem:[#allocation2 + $0x78] sm:$0x8] %v790_v52  ;;  %v1046_v21 = vld [vmem:[#allocation2 + $0x58] sm:$0x2]  ;;  %403 = vst [vmem:[#allocation2 + $0x84] sm:$0x1] %v402_v63  ;;  %v1197_v27 = vsel %vm16990_vm4, %v1157_v7, %v1196_v18  ;;  %v1200_v35 = vsel %vm16990_vm4, %v1157_v7, %v1199_v43  ;;  %v1701_v43 = vpop.permute.xlu1 %1700 }
  0xb5   : > { %478 = vst [vmem:[#allocation2 + $0x84] sm:$0x2] %v477_v39  ;;  %934 = vst [vmem:[#allocation2 + $0x70] sm:$0x1] %v933_v26  ;;  %v1047_v29 = vsel %vm16968_vm10, %v17420_v48, %v1046_v21  ;;  %v1286_v47 = vld [vmem:[#allocation2 + $0x58] sm:$0x8]  ;;  %v1695_v21 = vpop.permute.xlu0 %1694 }
  0xb6   : > { %937 = vst [vmem:[#allocation2 + $0x7c] sm:$0x1] %v936_v53  ;;  %v866_v20 = vld [vmem:[#allocation2 + $0x88] sm:$0x1]  ;;  %v869_v22 = vld [vmem:[#allocation2 + $0x94] sm:$0x1]  ;;  %v1287_v50 = vsel %vm17004_vm5, %v17230_v9, %v1286_v47 }
  0xb7   : > { %v561_v58 = vrot.slane %v17477_v51, 6  ;;  %744 = vst [vmem:[#allocation2 + $0x84] sm:$0x8] %v743_v45  ;;  %1243 = vst [vmem:[#allocation2 + $0x64] sm:$0x8] %v1242_v36  ;;  %vm1838_vm8 = vcmask 60448  }
  0xb8   : > { %1198 = vst [vmem:[#allocation2 + $0x70] sm:$0x4] %v1197_v27  ;;  %1201 = vst [vmem:[#allocation2 + $0x7c] sm:$0x4] %v1200_v35  ;;  %v1130_v25 = vld [vmem:[#allocation2 + $0x88] sm:$0x4] }
  0xb9   : > { %1048 = vst [vmem:[#allocation2 + $0x58] sm:$0x2] %v1047_v29  ;;  %v820_v12 = vrot.slane %v17477_v51, 5  ;;  %v17522_v61 = vrot.slane %v964_v56, 4  ;;  %1288 = vst [vmem:[#allocation2 + $0x58] sm:$0x8] %v1287_v50  ;;  %v610_v28 = vsel %vm16881_vm3, %v561_v58, %v609_v2 }
  0xba   : > { %v1133_v19 = vld [vmem:[#allocation2 + $0x94] sm:$0x4]  ;;  %v1086_v6 = vrot.slane %v17477_v51, 4  ;;  %v404_v13 = vld [vmem:[#allocation2 + $0x90] sm:$0x1]  ;;  %v632_v37 = vrot.slane %v17471_v34, 7  ;;  %vm17546_vm11 = vmand %vm1838_vm8, %vm21701_vm6 }
  0xbb   : > { %611 = vst [vmem:[#allocation2 + $0x84] sm:$0x4] %v610_v28  ;;  %v821_v7 = vrot.slane %v820_v12, 4  ;;  %v479_v23 = vld [vmem:[#allocation2 + $0x90] sm:$0x2]  ;;  %v405_v44 = vsel %vm16851_vm13, %v17471_v34, %v404_v13  ;;  %v894_v1 = vrot.slane %v17471_v34, 6  ;;  %v1703_v13 = vpop.permute.xlu1 %1702 }
  0xbc   : > { %v612_v54 = vld [vmem:[#allocation2 + $0x90] sm:$0x4]  ;;  %v1850_v62 = vld [vmem:[#allocation2 + $0x18] sm:$0xf]  ;;  %v1840_v4 = vld [vmem:[#allocation2 + $0xc] sm:$0xf]  ;;  %v480_v17 = vsel %vm16863_vm15, %v17474_v3, %v479_v23 }
  0xbd   : > { %v1087_v10 = vrot.slane %v1086_v6, 4  ;;  %v745_v56 = vld [vmem:[#allocation2 + $0x90] sm:$0x8]  ;;  %406 = vst [vmem:[#allocation2 + $0x90] sm:$0x1] %v405_v44  ;;  %v613_v31 = vsel %vm16881_vm3, %v561_v58, %v612_v54  ;;  %v867_v59 = vsel %vm16839_vm9, %v821_v7, %v866_v20  ;;  %v870_v2 = vsel %vm16839_vm9, %v821_v7, %v869_v22  ;;  %v1697_v7 = vpop.permute.xlu0 %1696 }
  0xbe   : > { %v1049_v11 = vld [vmem:[#allocation2 + $0x64] sm:$0x2]  ;;  %481 = vst [vmem:[#allocation2 + $0x90] sm:$0x2] %v480_v17  ;;  %614 = vst [vmem:[#allocation2 + $0x90] sm:$0x4] %v613_v31  ;;  %v746_v15 = vsel %vm16896_vm7, %v17484_v24, %v745_v56  ;;  %v1851_v35 = vsel %vm17546_vm11, %v1701_v43, %v1850_v62  ;;  %v1841_v29 = vsel %vm17546_vm11, %v1695_v21, %v1840_v4 }
  0xbf   : > { %v526_v40 = vld [vmem:[#allocation2 + $0x84] sm:$0x2]  ;;  %868 = vst [vmem:[#allocation2 + $0x88] sm:$0x1] %v867_v59  ;;  %871 = vst [vmem:[#allocation2 + $0x94] sm:$0x1] %v870_v2  ;;  %v1131_v52 = vsel %vm16881_vm3, %v1087_v10, %v1130_v25  ;;  %v1134_v63 = vsel %vm16881_vm3, %v1087_v10, %v1133_v19  ;;  %v1050_v38 = vsel %vm16968_vm10, %v17420_v48, %v1049_v11 }
  0xc0   : > { %v1158_v39 = vrot.slane %v17471_v34, 5  ;;  %747 = vst [vmem:[#allocation2 + $0x90] sm:$0x8] %v746_v15  ;;  %v527_v26 = vsel %vm16968_vm10, %v17474_v3, %v526_v40  ;;  %v792_v53 = vld [vmem:[#allocation2 + $0x84] sm:$0x8]  ;;  %v895_v22 = vrot.slane %v894_v1, 4 }
  0xc1   : > { %1132 = vst [vmem:[#allocation2 + $0x88] sm:$0x4] %v1131_v52  ;;  %1135 = vst [vmem:[#allocation2 + $0x94] sm:$0x4] %v1134_v63  ;;  %v1289_v18 = vld [vmem:[#allocation2 + $0x64] sm:$0x8]  ;;  %v793_v45 = vsel %vm17004_vm5, %v17484_v24, %v792_v53  ;;  %v1707_v53 = vpop.permute.xlu0 %1706 }
  0xc2   : > { %1051 = vst [vmem:[#allocation2 + $0x64] sm:$0x2] %v1050_v38  ;;  %528 = vst [vmem:[#allocation2 + $0x84] sm:$0x2] %v527_v26  ;;  %v1290_v48 = vsel %vm17004_vm5, %v17230_v9, %v1289_v18  ;;  %v1004_v36 = vld [vmem:[#allocation2 + $0x70] sm:$0x2]  ;;  %v1709_v26 = vpop.permute.xlu1 %1708 }
  0xc3   : > { %v1244_v27 = vld [vmem:[#allocation2 + $0x70] sm:$0x8]  ;;  %794 = vst [vmem:[#allocation2 + $0x84] sm:$0x8] %v793_v45  ;;  %1291 = vst [vmem:[#allocation2 + $0x64] sm:$0x8] %v1290_v48  ;;  %v1005_v47 = vsel %vm16863_vm15, %v17522_v61, %v1004_v36 }
  0xc4   : > { %v1245_v20 = vsel %vm16896_vm7, %v17352_v55, %v1244_v27  ;;  %1852 = vst [vmem:[#allocation2 + $0x18] sm:$0xf] %v1851_v35  ;;  %1842 = vst [vmem:[#allocation2 + $0xc] sm:$0xf] %v1841_v29  ;;  %v675_v9 = vld [vmem:[#allocation2 + $0x84] sm:$0x4] }
  0xc5   : > { %v1159_v58 = vrot.slane %v1158_v39, 4  ;;  %1006 = vst [vmem:[#allocation2 + $0x70] sm:$0x2] %v1005_v47  ;;  %1246 = vst [vmem:[#allocation2 + $0x70] sm:$0x8] %v1245_v20  ;;  %v21750_v50 = vld [vmem:[#allocation7_spill] sm:$0xff]  ;;  %v676_v12 = vsel %vm16990_vm4, %v632_v37, %v675_v9 }
  0xc6   : > { %v1316_v25 = vrot.slane %v21750_v50, 7  ;;  %v407_v19 = vld [vmem:[#allocation2 + $0x9c] sm:$0x1]  ;;  %v482_v28 = vld [vmem:[#allocation2 + $0x9c] sm:$0x2]  ;;  %v966_v43 = vrot.slane %v17466_v14, 5 }
  0xc7   : > { %v17583_v6 = vld [vmem:[%s16791_s29 + $0x18] sm:$0xf]  ;;  %v1857_v23 = vld [vmem:[#allocation2 + $0x24] sm:$0xf]  ;;  %677 = vst [vmem:[#allocation2 + $0x84] sm:$0x4] %v676_v12 }
  0xc8   : > { %v529_v54 = vld [vmem:[#allocation2 + $0x90] sm:$0x2]  ;;  %v678_v44 = vld [vmem:[#allocation2 + $0x90] sm:$0x4]  ;;  %v17586_v62 = vshll.u32 %v17583_v6, 16  ;;  %v17589_v4 = vrot.slane %v17583_v6, 7  ;;  %v1858_v48 = vsel %vm17546_vm11, %v1707_v53, %v1857_v23 }
  0xc9   : > { %1844 = vst.msk [vmem:[#allocation2 + $0x10] sm:$0xf] %vm1838_vm8, %v1697_v7  ;;  %1853 = vst.msk [vmem:[#allocation2 + $0x1c] sm:$0xf] %vm1838_vm8, %v1703_v13  ;;  %v938_v1 = vld [vmem:[#allocation2 + $0x88] sm:$0x1]  ;;  %v530_v56 = vsel %vm16968_vm10, %v17474_v3, %v529_v54  ;;  %v679_v17 = vsel %vm16990_vm4, %v632_v37, %v678_v44  ;;  %v1715_v44 = vpop.permute.xlu1 %1714 }
  0xca   : > { %v941_v10 = vld [vmem:[#allocation2 + $0x94] sm:$0x1]  ;;  %v795_v31 = vld [vmem:[#allocation2 + $0x90] sm:$0x8]  ;;  %v748_v59 = vld [vmem:[#allocation2 + $0x9c] sm:$0x8]  ;;  %v939_v2 = vsel %vm16851_vm13, %v895_v22, %v938_v1  ;;  %v408_v34 = vsel %vm16851_vm13, %v17586_v62, %v407_v19  ;;  %v483_v39 = vsel %vm16863_vm15, %v17589_v4, %v482_v28  ;;  %v1713_v1 = vpop.permute.xlu0 %1712 }
  0xcb   : > { %v942_v11 = vsel %vm16851_vm13, %v895_v22, %v941_v10  ;;  %v1202_v15 = vld [vmem:[#allocation2 + $0x88] sm:$0x4]  ;;  %v1205_v40 = vld [vmem:[#allocation2 + $0x94] sm:$0x4]  ;;  %531 = vst [vmem:[#allocation2 + $0x90] sm:$0x2] %v530_v56  ;;  %v796_v3 = vsel %vm17004_vm5, %v17484_v24, %v795_v31 }
  0xcc   : > { %680 = vst [vmem:[#allocation2 + $0x90] sm:$0x4] %v679_v17  ;;  %v1007_v37 = vld [vmem:[#allocation2 + $0x7c] sm:$0x2]  ;;  %940 = vst [vmem:[#allocation2 + $0x88] sm:$0x1] %v939_v2  ;;  %v1203_v52 = vsel %vm16990_vm4, %v1159_v58, %v1202_v15  ;;  %v1206_v63 = vsel %vm16990_vm4, %v1159_v58, %v1205_v40 }
  0xcd   : > { %943 = vst [vmem:[#allocation2 + $0x94] sm:$0x1] %v942_v11  ;;  %797 = vst [vmem:[#allocation2 + $0x90] sm:$0x8] %v796_v3  ;;  %v17618_v24 = vshrl.u32 %v17583_v6, 16  ;;  %v17622_v45 = vrot.slane %v17583_v6, 6  ;;  %v1008_v29 = vsel %vm16863_vm15, %v17522_v61, %v1007_v37 }
  0xce   : > { %409 = vst [vmem:[#allocation2 + $0x9c] sm:$0x1] %v408_v34  ;;  %v1247_v38 = vld [vmem:[#allocation2 + $0x7c] sm:$0x8]  ;;  %v1864_v18 = vld [vmem:[#allocation2 + $0x30] sm:$0xf] }
  0xcf   : > { %1204 = vst [vmem:[#allocation2 + $0x88] sm:$0x4] %v1203_v52  ;;  %1207 = vst [vmem:[#allocation2 + $0x94] sm:$0x4] %v1206_v63  ;;  %v615_v21 = vld [vmem:[#allocation2 + $0x9c] sm:$0x4]  ;;  %v1248_v47 = vsel %vm16896_vm7, %v17352_v55, %v1247_v38  ;;  %v749_v58 = vsel %vm16896_vm7, %v17622_v45, %v748_v59  ;;  %v1865_v2 = vsel %vm17546_vm11, %v1713_v1, %v1864_v18 }
  0xd0   : > { %484 = vst [vmem:[#allocation2 + $0x9c] sm:$0x2] %v483_v39  ;;  %1860 = vst.msk [vmem:[#allocation2 + $0x28] sm:$0xf] %vm1838_vm8, %v1709_v26  ;;  %v1052_v36 = vld [vmem:[#allocation2 + $0x70] sm:$0x2] }
  0xd1   : > { %v872_v27 = vld [vmem:[#allocation2 + $0xa0] sm:$0x1]  ;;  %v875_v35 = vld [vmem:[#allocation2 + $0xac] sm:$0x1]  ;;  %1859 = vst [vmem:[#allocation2 + $0x24] sm:$0xf] %v1858_v48  ;;  %v1053_v20 = vsel %vm16968_vm10, %v17522_v61, %v1052_v36  ;;  %v1721_v36 = vpop.permute.xlu1 %1720 }
  0xd2   : > { %v1292_v9 = vld [vmem:[#allocation2 + $0x70] sm:$0x8]  ;;  %v564_v22 = vrot.slane %v17618_v24, 6  ;;  %v822_v12 = vrot.slane %v17618_v24, 5  ;;  %1009 = vst [vmem:[#allocation2 + $0x7c] sm:$0x2] %v1008_v29 }
  0xd3   : > { %1249 = vst [vmem:[#allocation2 + $0x7c] sm:$0x8] %v1248_v47  ;;  %v410_v19 = vld [vmem:[#allocation2 + $0xa8] sm:$0x1]  ;;  %v17644_v28 = vld [vmem:[%s21689_s2 + $0xb0] sm:$0xff]   ;;  %v1293_v13 = vsel %vm17004_vm5, %v17352_v55, %v1292_v9  ;;  %v1088_v54 = vrot.slane %v17618_v24, 4 }
  0xd4   : > { %1054 = vst [vmem:[#allocation2 + $0x70] sm:$0x2] %v1053_v20  ;;  %v1136_v7 = vld [vmem:[#allocation2 + $0xa0] sm:$0x4]  ;;  %v1139_v23 = vld [vmem:[#allocation2 + $0xac] sm:$0x4]  ;;  %v616_v17 = vsel %vm16881_vm3, %v564_v22, %v615_v21  ;;  %v411_v59 = vsel %vm16851_vm13, %v17586_v62, %v410_v19 }
  0xd5   : > { %750 = vst [vmem:[#allocation2 + $0x9c] sm:$0x8] %v749_v58  ;;  %v16286_v10 = vld [vmem:[#allocation2 + $0xc] sm:$0xff]   ;;  %v1871_v56 = vld [vmem:[#allocation2 + $0x3c] sm:$0xf]  ;;  %v823_v31 = vrot.slane %v822_v12, 4 }
  0xd6   : > { %1294 = vst [vmem:[#allocation2 + $0x70] sm:$0x8] %v1293_v13  ;;  %v16287_v11 = vld [vmem:[#allocation2 + $0x18] sm:$0xff]   ;;  %1867 = vst.msk [vmem:[#allocation2 + $0x34] sm:$0xf] %vm1838_vm8, %v1715_v44  ;;  %v896_v15 = vrot.slane %v17586_v62, 6  ;;  %15419 = vmatmul.mubr.bf16.vlgmr.msra.gmra.mxu0 %v16286_v10  ;;  %v1727_v10 = vpop.permute.xlu1 %1726 }
  0xd7   : > { %617 = vst [vmem:[#allocation2 + $0x9c] sm:$0x4] %v616_v17  ;;  %v1089_v40 = vrot.slane %v1088_v54, 4  ;;  %v485_v3 = vld [vmem:[#allocation2 + $0xa8] sm:$0x2]  ;;  %v17661_v34 = vrot.slane %v1316_v25, 4  ;;  %v873_v52 = vsel %vm16839_vm9, %v823_v31, %v872_v27  ;;  %v876_v63 = vsel %vm16839_vm9, %v823_v31, %v875_v35  ;;  %15422 = vmatprep.mubr.bf16.mxu0 %v16287_v11  ;;  %v1719_v27 = vpop.permute.xlu0 %1718 }
  0xd8   : > { %412 = vst [vmem:[#allocation2 + $0xa8] sm:$0x1] %v411_v59  ;;  %1866 = vst [vmem:[#allocation2 + $0x30] sm:$0xf] %v1865_v2  ;;  %v17663_v37 = vrot.slane %v966_v43, 4  ;;  %v486_v26 = vsel %vm16863_vm15, %v17589_v4, %v485_v3  ;;  %v16516_v50 = vld [vmem:[%s21689_s2 + $0xb8] sm:$0xff]   ;;  %v1872_v20 = vsel %vm17546_vm11, %v1719_v27, %v1871_v56 }
  0xd9   : > { %v618_v39 = vld [vmem:[#allocation2 + $0xa8] sm:$0x4]  ;;  %v751_v38 = vld [vmem:[#allocation2 + $0xa8] sm:$0x8]  ;;  %15499 = vmatpush3.bf16.msra.mxu0 %v16516_v50  ;;  %v532_v53 = vld [vmem:[#allocation2 + $0x9c] sm:$0x2]  ;;  %v1137_v18 = vsel %vm16881_vm3, %v1089_v40, %v1136_v7  ;;  %v1140_v43 = vsel %vm16881_vm3, %v1089_v40, %v1139_v23 }
  0xda   : > { %v17678_v25 = vld [vmem:[%s21689_s2 + $0xa8] sm:$0xff]   ;;  %874 = vst [vmem:[#allocation2 + $0xa0] sm:$0x1] %v873_v52  ;;  %877 = vst [vmem:[#allocation2 + $0xac] sm:$0x1] %v876_v63  ;;  %v1160_v21 = vrot.slane %v17586_v62, 5  ;;  %v619_v48 = vsel %vm16881_vm3, %v564_v22, %v618_v39  ;;  %15500 = vmatprep.subr.bf16.mxu0 %v17644_v28  ;;  %v533_v29 = vsel %vm16968_vm10, %v17589_v4, %v532_v53 }
  0xdb   : > { %487 = vst [vmem:[#allocation2 + $0xa8] sm:$0x2] %v486_v26  ;;  %v1878_v35 = vld [vmem:[#allocation2 + $0x48] sm:$0xf]  ;;  %1138 = vst [vmem:[#allocation2 + $0xa0] sm:$0x4] %v1137_v18  ;;  %v752_v47 = vsel %vm16896_vm7, %v17622_v45, %v751_v38  ;;  %v1725_v56 = vpop.permute.xlu0 %1724 }
  0xdc   : > { %1141 = vst [vmem:[#allocation2 + $0xac] sm:$0x4] %v1140_v43  ;;  %620 = vst [vmem:[#allocation2 + $0xa8] sm:$0x4] %v619_v48  ;;  %v633_v9 = vrot.slane %v17586_v62, 7  ;;  %v897_v22 = vrot.slane %v896_v15, 4  ;;  %v1879_v2 = vsel %vm17546_vm11, %v1725_v56, %v1878_v35 }
  0xdd   : > { %1874 = vst.msk [vmem:[#allocation2 + $0x40] sm:$0xf] %vm1838_vm8, %v1721_v36  ;;  %534 = vst [vmem:[#allocation2 + $0x9c] sm:$0x2] %v533_v29  ;;  %v1055_v58 = vld [vmem:[#allocation2 + $0x7c] sm:$0x2]  ;;  %15501 = vmatpush3.bf16.msra.mxu0 %v17644_v28 }
  0xde   : > { %753 = vst [vmem:[#allocation2 + $0xa8] sm:$0x8] %v752_v47  ;;  %1873 = vst [vmem:[#allocation2 + $0x3c] sm:$0xf] %v1872_v20  ;;  %v17701_v12 = vld [vmem:[%s21689_s2 + $0xa0] sm:$0xff]   ;;  %v1056_v13 = vsel %vm16968_vm10, %v17522_v61, %v1055_v58  ;;  %15502 = vmatprep.subr.bf16.mxu0 %v17678_v25  ;;  %v1161_v28 = vrot.slane %v1160_v21, 4  ;;  %v1733_v21 = vpop.permute.xlu1 %1732 }
  0xdf   : > { %v798_v19 = vld [vmem:[#allocation2 + $0x9c] sm:$0x8]  ;;  %1057 = vst [vmem:[#allocation2 + $0x7c] sm:$0x2] %v1056_v13  ;;  %v1010_v54 = vld [vmem:[#allocation2 + $0x88] sm:$0x2]  ;;  %v1731_v48 = vpop.permute.xlu0 %1730 }
  0xe0   : > { %v1295_v7 = vld [vmem:[#allocation2 + $0x7c] sm:$0x8]  ;;  %v799_v62 = vsel %vm17004_vm5, %v17622_v45, %v798_v19  ;;  %v1250_v44 = vld [vmem:[#allocation2 + $0x88] sm:$0x8]  ;;  %v1340_v1 = vld [vmem:[#allocation2 + $0x14] sm:$0x1]  ;;  %v1011_v31 = vsel %vm16863_vm15, %v17663_v37, %v1010_v54 }
  0xe1   : > { %v1296_v23 = vsel %vm17004_vm5, %v17352_v55, %v1295_v7  ;;  %v16289_v17 = vld [vmem:[#allocation2 + $0x24] sm:$0xff]   ;;  %v681_v61 = vld [vmem:[#allocation2 + $0x9c] sm:$0x4]  ;;  %800 = vst [vmem:[#allocation2 + $0x9c] sm:$0x8] %v799_v62  ;;  %v1251_v55 = vsel %vm16896_vm7, %v17466_v14, %v1250_v44  ;;  %v1341_v59 = vsel %vm16839_vm9, %v17661_v34, %v1340_v1  ;;  %v16290_v15 = vld [vmem:[#allocation2 + $0x30] sm:$0xff]   ;;  %15503 = vmatpush3.bf16.msra.mxu0 %v17678_v25 }
  0xe2   : > { %1297 = vst [vmem:[#allocation2 + $0x7c] sm:$0x8] %v1296_v23  ;;  %v1885_v11 = vld [vmem:[#allocation2 + $0x54] sm:$0xf]  ;;  %1881 = vst.msk [vmem:[#allocation2 + $0x4c] sm:$0xf] %vm1838_vm8, %v1727_v10  ;;  %v682_v40 = vsel %vm16990_vm4, %v633_v9, %v681_v61  ;;  %15423 = vmatmul.mubr.bf16.gmra.mxu0 %v16289_v17  ;;  %15504 = vmatprep.subr.bf16.mxu0 %v17701_v12  ;;  %v1739_v44 = vpop.permute.xlu1 %1738 }
  0xe3   : > { %v968_v3 = vrot.slane %v17583_v6, 5  ;;  %1012 = vst [vmem:[#allocation2 + $0x88] sm:$0x2] %v1011_v31  ;;  %1252 = vst [vmem:[#allocation2 + $0x88] sm:$0x8] %v1251_v55  ;;  %15426 = vmatprep.mubr.bf16.mxu0 %v16290_v15  ;;  %v16299_v25 = vld [vmem:[%s21689_s2 + $0x98] sm:$0xff]   ;;  %v1886_v29 = vsel %vm17546_vm11, %v1731_v48, %v1885_v11  ;;  %v1737_v1 = vpop.permute.xlu0 %1736 }
  0xe4   : > { %1342 = vst [vmem:[#allocation2 + $0x14] sm:$0x1] %v1341_v59  ;;  %1880 = vst [vmem:[#allocation2 + $0x48] sm:$0xf] %v1879_v2  ;;  %v944_v52 = vld [vmem:[#allocation2 + $0xa0] sm:$0x1] }
  0xe5   : > { %683 = vst [vmem:[#allocation2 + $0x9c] sm:$0x4] %v682_v40  ;;  %v947_v63 = vld [vmem:[#allocation2 + $0xac] sm:$0x1]  ;;  %v535_v39 = vld [vmem:[#allocation2 + $0xa8] sm:$0x2]  ;;  %v945_v38 = vsel %vm16851_vm13, %v897_v22, %v944_v52  ;;  %15505 = vmatpush3.bf16.msra.mxu0 %v17701_v12 }
  0xe6   : > { %v948_v26 = vsel %vm16851_vm13, %v897_v22, %v947_v63  ;;  %v1208_v50 = vld [vmem:[#allocation2 + $0xa0] sm:$0x4]  ;;  %v1211_v53 = vld [vmem:[#allocation2 + $0xac] sm:$0x4]  ;;  %v536_v18 = vsel %vm16968_vm10, %v17589_v4, %v535_v39  ;;  %v684_v43 = vld [vmem:[#allocation2 + $0xa8] sm:$0x4]  ;;  %15506 = vmatprep.subr.bf16.mxu0 %v16299_v25 }
  0xe7   : > { %946 = vst [vmem:[#allocation2 + $0xa0] sm:$0x1] %v945_v38  ;;  %949 = vst [vmem:[#allocation2 + $0xac] sm:$0x1] %v948_v26  ;;  %v1209_v36 = vsel %vm16990_vm4, %v1161_v28, %v1208_v50  ;;  %v1212_v27 = vsel %vm16990_vm4, %v1161_v28, %v1211_v53  ;;  %v685_v4 = vsel %vm16990_vm4, %v633_v9, %v684_v43  ;;  %v801_v35 = vld [vmem:[#allocation2 + $0xa8] sm:$0x8]  ;;  %v1743_v43 = vpop.permute.xlu0 %1742 }
  0xe8   : > { %537 = vst [vmem:[#allocation2 + $0xa8] sm:$0x2] %v536_v18  ;;  %1888 = vst.msk [vmem:[#allocation2 + $0x58] sm:$0xf] %vm1838_vm8, %v1733_v21  ;;  %v802_v47 = vsel %vm17004_vm5, %v17622_v45, %v801_v35  ;;  %v1892_v20 = vld [vmem:[#allocation2 + $0x60] sm:$0xf]  ;;  %v1745_v18 = vpop.permute.xlu1 %1744 }
  0xe9   : > { %1210 = vst [vmem:[#allocation2 + $0xa0] sm:$0x4] %v1209_v36  ;;  %1213 = vst [vmem:[#allocation2 + $0xac] sm:$0x4] %v1212_v27  ;;  %v17753_v22 = vrot.slane %v968_v3, 4  ;;  %v17758_v9 = vld [vmem:[%s21689_s2 + $0x90] sm:$0xff]   ;;  %v1893_v28 = vsel %vm17546_vm11, %v1737_v1, %v1892_v20  ;;  %15507 = vmatpush3.bf16.msra.mxu0 %v16299_v25 }
  0xea   : > { %686 = vst [vmem:[#allocation2 + $0xa8] sm:$0x4] %v685_v4  ;;  %1887 = vst [vmem:[#allocation2 + $0x54] sm:$0xf] %v1886_v29  ;;  %v413_v58 = vld [vmem:[#allocation2 + $0xb4] sm:$0x1]  ;;  %15508 = vmatprep.subr.bf16.mxu0 %v17758_v9 }
  0xeb   : > { %803 = vst [vmem:[#allocation2 + $0xa8] sm:$0x8] %v802_v47  ;;  %v21751_v19 = vld [vmem:[#allocation8_spill] sm:$0xff]  ;;  %v488_v62 = vld [vmem:[#allocation2 + $0xb4] sm:$0x2]  ;;  %v1320_v54 = vrot.slane %v17108_v60, 7 }
  0xec   : > { %v1318_v13 = vrot.slane %v21751_v19, 7  ;;  %v16292_v7 = vld [vmem:[#allocation2 + $0x3c] sm:$0xff]   ;;  %v1013_v45 = vld [vmem:[#allocation2 + $0x94] sm:$0x2]  ;;  %v1899_v10 = vld [vmem:[#allocation2 + $0x6c] sm:$0xf] }
  0xed   : > { %v17763_v23 = vld [vmem:[%s16791_s29 + $0x1c] sm:$0xf]  ;;  %v1058_v56 = vld [vmem:[#allocation2 + $0x88] sm:$0x2]  ;;  %v1298_v17 = vld [vmem:[#allocation2 + $0x88] sm:$0x8]  ;;  %v1014_v61 = vsel %vm16863_vm15, %v17663_v37, %v1013_v45  ;;  %15427 = vmatmul.mubr.bf16.gmra.mxu0 %v16292_v7  ;;  %v1900_v4 = vsel %vm17546_vm11, %v1743_v43, %v1899_v10 }
  0xee   : > { %v16293_v12 = vld [vmem:[#allocation2 + $0x48] sm:$0xff]   ;;  %1895 = vst.msk [vmem:[#allocation2 + $0x64] sm:$0xf] %vm1838_vm8, %v1739_v44  ;;  %v1059_v60 = vsel %vm16968_vm10, %v17663_v37, %v1058_v56  ;;  %v1299_v31 = vsel %vm17004_vm5, %v17466_v14, %v1298_v17  ;;  %v754_v55 = vld [vmem:[#allocation2 + $0xb4] sm:$0x8]  ;;  %v17779_v59 = vshll.u32 %v17763_v23, 16  ;;  %15509 = vmatpush3.bf16.msra.mxu0 %v17758_v9  ;;  %v1751_v17 = vpop.permute.xlu1 %1750 }
  0xef   : > { %1015 = vst [vmem:[#allocation2 + $0x94] sm:$0x2] %v1014_v61  ;;  %1894 = vst [vmem:[#allocation2 + $0x60] sm:$0xf] %v1893_v28  ;;  %v621_v2 = vld [vmem:[#allocation2 + $0xb4] sm:$0x4]  ;;  %15430 = vmatprep.mubr.bf16.mxu0 %v16293_v12  ;;  %v1749_v61 = vpop.permute.xlu0 %1748 }
  0xf0   : > { %1060 = vst [vmem:[#allocation2 + $0x88] sm:$0x2] %v1059_v60  ;;  %1300 = vst [vmem:[#allocation2 + $0x88] sm:$0x8] %v1299_v31  ;;  %v17782_v11 = vrot.slane %v17763_v23, 7  ;;  %v17785_v15 = vshrl.u32 %v17763_v23, 16  ;;  %v414_v38 = vsel %vm16851_vm13, %v17779_v59, %v413_v58 }
  0xf1   : > { %v17788_v40 = vrot.slane %v17763_v23, 6  ;;  %v17793_v3 = vld [vmem:[%s21689_s2 + $0x88] sm:$0xff]   ;;  %v17795_v52 = vrot.slane %v1318_v13, 4  ;;  %v878_v63 = vld [vmem:[#allocation2 + $0xb8] sm:$0x1]  ;;  %v898_v26 = vrot.slane %v17779_v59, 6 }
  0xf2   : > { %v881_v39 = vld [vmem:[#allocation2 + $0xc4] sm:$0x1]  ;;  %v970_v50 = vrot.slane %v17763_v23, 5  ;;  %v1253_v53 = vld [vmem:[#allocation2 + $0x94] sm:$0x8]  ;;  %v489_v48 = vsel %vm16863_vm15, %v17782_v11, %v488_v62  ;;  %v567_v25 = vrot.slane %v17785_v15, 6  ;;  %15510 = vmatprep.subr.bf16.mxu0 %v17793_v3 }
  0xf3   : > { %v1906_v21 = vld [vmem:[#allocation2 + $0x78] sm:$0xf]  ;;  %415 = vst [vmem:[#allocation2 + $0xb4] sm:$0x1] %v414_v38  ;;  %v755_v36 = vsel %vm16896_vm7, %v17788_v40, %v754_v55  ;;  %v824_v27 = vrot.slane %v17785_v15, 5  ;;  %v634_v47 = vrot.slane %v17779_v59, 7  ;;  %v1254_v20 = vsel %vm16896_vm7, %v17466_v14, %v1253_v53  ;;  %15511 = vmatpush3.bf16.msra.mxu0 %v17793_v3 }
  0xf4   : > { %1902 = vst.msk [vmem:[#allocation2 + $0x70] sm:$0xf] %vm1838_vm8, %v1745_v18  ;;  %v1142_v35 = vld [vmem:[#allocation2 + $0xb8] sm:$0x4]  ;;  %v1145_v29 = vld [vmem:[#allocation2 + $0xc4] sm:$0x4]  ;;  %v622_v13 = vsel %vm16881_vm3, %v567_v25, %v621_v2  ;;  %v1907_v9 = vsel %vm17546_vm11, %v1749_v61, %v1906_v21 }
  0xf5   : > { %490 = vst [vmem:[#allocation2 + $0xb4] sm:$0x2] %v489_v48  ;;  %756 = vst [vmem:[#allocation2 + $0xb4] sm:$0x8] %v755_v36  ;;  %v17818_v58 = vrot.slane %v1320_v54, 4  ;;  %v16295_v19 = vld [vmem:[#allocation2 + $0x54] sm:$0xff]   ;;  %v1757_v36 = vpop.permute.xlu1 %1756 }
  0xf6   : > { %1901 = vst [vmem:[#allocation2 + $0x6c] sm:$0xf] %v1900_v4  ;;  %v825_v7 = vrot.slane %v824_v27, 4  ;;  %v1090_v62 = vrot.slane %v17785_v15, 4  ;;  %v1162_v45 = vrot.slane %v17779_v59, 5  ;;  %v17829_v44 = vld [vmem:[%s21689_s2 + $0x80] sm:$0xff]   ;;  %15431 = vmatmul.mubr.bf16.gmra.mxu0 %v16295_v19  ;;  %v1755_v27 = vpop.permute.xlu0 %1754 }
  0xf7   : > { %1255 = vst [vmem:[#allocation2 + $0x94] sm:$0x8] %v1254_v20  ;;  %623 = vst [vmem:[#allocation2 + $0xb4] sm:$0x4] %v622_v13  ;;  %v17832_v54 = vrot.slane %v898_v26, 4  ;;  %v17834_v1 = vrot.slane %v970_v50, 4  ;;  %15512 = vmatprep.subr.bf16.mxu0 %v17829_v44 }
  0xf8   : > { %v1418_v10 = vld [vmem:[%s16592_s8 + $0x78] sm:$0xf]  ;;  %v1343_v56 = vld [vmem:[#allocation2 + $0x20] sm:$0x1]  ;;  %v1913_v28 = vld [vmem:[#allocation2 + $0x84] sm:$0xf]  ;;  %v879_v12 = vsel %vm16839_vm9, %v825_v7, %v878_v63  ;;  %v882_v60 = vsel %vm16839_vm9, %v825_v7, %v881_v39  ;;  %15513 = vmatpush3.bf16.msra.mxu0 %v17829_v44 }
  0xf9   : > { %v1091_v31 = vrot.slane %v1090_v62, 4  ;;  %v1061_v55 = vld [vmem:[#allocation2 + $0x94] sm:$0x2]  ;;  %v1678_v2 = vshrl.u32 %v1418_v10, 16  ;;  %v16296_v38 = vld [vmem:[#allocation2 + $0x60] sm:$0xff]   ;;  %v1681_v26 = vshll.u32 %v1418_v10, 16  ;;  %v1344_v39 = vsel %vm16839_vm9, %v17661_v34, %v1343_v56 }
  0xfa   : > { %1909 = vst.msk [vmem:[#allocation2 + $0x7c] sm:$0xf] %vm1838_vm8, %v1751_v17  ;;  %880 = vst [vmem:[#allocation2 + $0xb8] sm:$0x1] %v879_v12  ;;  %v1062_v63 = vsel %vm16968_vm10, %v17663_v37, %v1061_v55  ;;  %v17855_v18 = vrot.slane %v1162_v45, 4  ;;  %v17863_v21 = vld [vmem:[%s21689_s2 + $0x138] sm:$0xff]   ;;  %15434 = vmatprep.mubr.bf16.mxu0 %v16296_v38  ;;  %v1914_v19 = vsel %vm17546_vm11, %v1755_v27, %v1913_v28 }
  0xfb   : > { %883 = vst [vmem:[#allocation2 + $0xc4] sm:$0x1] %v882_v60  ;;  %1908 = vst [vmem:[#allocation2 + $0x78] sm:$0xf] %v1907_v9  ;;  %v1143_v50 = vsel %vm16881_vm3, %v1091_v31, %v1142_v35  ;;  %v1146_v53 = vsel %vm16881_vm3, %v1091_v31, %v1145_v29  ;;  %v17857_v43 = vrot.slane %v1678_v2, 7  ;;  %vm1845_vm12 = vcmask 57376   ;;  %v1761_v9 = vpop.permute.xlu0 %1760  ;;  %15594 = vmatprep.subr.bf16.mxu0 %v17863_v21 }
  0xfc   : > { %1063 = vst [vmem:[#allocation2 + $0x94] sm:$0x2] %v1062_v63  ;;  %1345 = vst [vmem:[#allocation2 + $0x20] sm:$0x1] %v1344_v39  ;;  %v1419_v37 = vld [vmem:[%s16592_s8 + $0x7c] sm:$0xf] }
  0xfd   : > { %1144 = vst [vmem:[#allocation2 + $0xb8] sm:$0x4] %v1143_v50  ;;  %1147 = vst [vmem:[#allocation2 + $0xc4] sm:$0x4] %v1146_v53  ;;  %v1686_v34 = vshrl.u32 %v1419_v37, 16  ;;  %v1689_v48 = vshll.u32 %v1419_v37, 16  ;;  %v1683_v20 = vor.u32 %v1681_v26, %v17857_v43 }
  0xfe   : > { %v1920_v4 = vld [vmem:[#allocation2 + $0x90] sm:$0xf]  ;;  %v538_v35 = vld [vmem:[#allocation2 + $0xb4] sm:$0x2]  ;;  %v804_v29 = vld [vmem:[#allocation2 + $0xb4] sm:$0x8] }
  0xff   : > { %1916 = vst.msk [vmem:[#allocation2 + $0x88] sm:$0xf] %vm1838_vm8, %v1757_v36  ;;  %v539_v13 = vsel %vm16968_vm10, %v17782_v11, %v538_v35  ;;  %v805_v3 = vsel %vm17004_vm5, %v17788_v40, %v804_v29  ;;  %v1301_v7 = vld [vmem:[#allocation2 + $0x94] sm:$0x8]  ;;  %v1322_v62 = vrot.slane %v17252_v0, 7  ;;  %v16300_v45 = vld [vmem:[#allocation2 + $0x6c] sm:$0xff]   ;;  %1784 = vrot.lane.b32.xlu1 %v1683_v20, %s16531_s11  ;;  %v1921_v44 = vsel %vm17546_vm11, %v1761_v9, %v1920_v4  ;;  %vm17936_vm1 = vmand %vm1845_vm12, %vm21700_vm0 }
 0x100   : > { %1915 = vst [vmem:[#allocation2 + $0x84] sm:$0xf] %v1914_v19  ;;  %540 = vst [vmem:[#allocation2 + $0xb4] sm:$0x2] %v539_v13  ;;  %v687_v10 = vld [vmem:[#allocation2 + $0xb4] sm:$0x4]  ;;  %v1302_v56 = vsel %vm17004_vm5, %v17466_v14, %v1301_v7  ;;  %v1763_v14 = vpop.permute.xlu1 %1762  ;;  %15435 = vmatmul.mubr.bf16.gmra.mxu0 %v16300_v45 }
 0x101   : > { %806 = vst [vmem:[#allocation2 + $0xb4] sm:$0x8] %v805_v3  ;;  %v1684_v17 = vrot.slane %v17857_v43, 4  ;;  %v1688_v61 = vrot.slane %v1686_v34, 7  ;;  %v1016_v28 = vld [vmem:[#allocation2 + $0xa0] sm:$0x2]  ;;  %v688_v12 = vsel %vm16990_vm4, %v634_v47, %v687_v10  ;;  %v1767_v3 = vpop.permute.xlu0 %1766 }
 0x102   : > { %1303 = vst [vmem:[#allocation2 + $0x94] sm:$0x8] %v1302_v56  ;;  %v1017_v60 = vsel %vm16863_vm15, %v17753_v22, %v1016_v28  ;;  %v1256_v31 = vld [vmem:[#allocation2 + $0xa0] sm:$0x8]  ;;  %v1349_v55 = vld [vmem:[#allocation2 + $0x38] sm:$0x1] }
 0x103   : > { %v1346_v2 = vld [vmem:[#allocation2 + $0x2c] sm:$0x1]  ;;  %689 = vst [vmem:[#allocation2 + $0xb4] sm:$0x4] %v688_v12  ;;  %v950_v38 = vld [vmem:[#allocation2 + $0xb8] sm:$0x1]  ;;  %v1691_v26 = vor.u32 %v1689_v48, %v1688_v61  ;;  %v1257_v39 = vsel %vm16896_vm7, %v17583_v6, %v1256_v31  ;;  %v1350_v50 = vsel %vm16839_vm9, %v17795_v52, %v1349_v55 }
 0x104   : > { %v953_v63 = vld [vmem:[#allocation2 + $0xc4] sm:$0x1]  ;;  %1018 = vst [vmem:[#allocation2 + $0xa0] sm:$0x2] %v1017_v60  ;;  %v1347_v53 = vsel %vm16839_vm9, %v17795_v52, %v1346_v2  ;;  %v1927_v43 = vld [vmem:[#allocation2 + $0x9c] sm:$0xf]  ;;  %v951_v34 = vsel %vm16851_vm13, %v17832_v54, %v950_v38  ;;  %v1769_v13 = vpop.permute.xlu1 %1768 }
 0x105   : > { %v16301_v37 = vld [vmem:[#allocation2 + $0x78] sm:$0xff]   ;;  %v954_v48 = vsel %vm16851_vm13, %v17832_v54, %v953_v63  ;;  %1923 = vst.msk [vmem:[#allocation2 + $0x94] sm:$0xf] %vm1838_vm8, %v1763_v14  ;;  %1258 = vst [vmem:[#allocation2 + $0xa0] sm:$0x8] %v1257_v39  ;;  %v1693_v36 = vrot.slane %v1688_v61, 4  ;;  %v1692_v4 = vsel %vm16612_vm2, %v1684_v17, %v1691_v26  ;;  %v1928_v10 = vsel %vm17546_vm11, %v1767_v3, %v1927_v43  ;;  %v1773_v55 = vpop.permute.xlu0 %1772 }
 0x106   : > { %1351 = vst [vmem:[#allocation2 + $0x38] sm:$0x1] %v1350_v50  ;;  %1348 = vst [vmem:[#allocation2 + $0x2c] sm:$0x1] %v1347_v53  ;;  %v1214_v52 = vld [vmem:[#allocation2 + $0xb8] sm:$0x4]  ;;  %15438 = vmatprep.mubr.bf16.mxu0 %v16301_v37  ;;  %1786 = vrot.lane.b32.xlu0 %v1692_v4, %s16531_s11 }
 0x107   : > { %1922 = vst [vmem:[#allocation2 + $0x90] sm:$0xf] %v1921_v44  ;;  %952 = vst [vmem:[#allocation2 + $0xb8] sm:$0x1] %v951_v34  ;;  %v1217_v27 = vld [vmem:[#allocation2 + $0xc4] sm:$0x4]  ;;  %v1215_v54 = vsel %vm16990_vm4, %v17855_v18, %v1214_v52  ;;  %1788 = vrot.lane.b32.xlu1 %v1693_v36, %s16531_s11 }
 0x108   : > { %955 = vst [vmem:[#allocation2 + $0xc4] sm:$0x1] %v954_v48  ;;  %v1019_v35 = vld [vmem:[#allocation2 + $0xac] sm:$0x2]  ;;  %v1218_v29 = vsel %vm16990_vm4, %v17855_v18, %v1217_v27  ;;  %v1259_v19 = vld [vmem:[#allocation2 + $0xac] sm:$0x8]  ;;  %v1775_v31 = vpop.permute.xlu1 %1774 }
 0x109   : > { %v1020_v20 = vsel %vm16863_vm15, %v17753_v22, %v1019_v35  ;;  %1216 = vst [vmem:[#allocation2 + $0xb8] sm:$0x4] %v1215_v54  ;;  %1219 = vst [vmem:[#allocation2 + $0xc4] sm:$0x4] %v1218_v29  ;;  %v1260_v7 = vsel %vm16896_vm7, %v17583_v6, %v1259_v19  ;;  %v1355_v45 = vld [vmem:[#allocation2 + $0x50] sm:$0x1]  ;;  %v1779_v4 = vpop.permute.xlu0 %1778 }
 0x10a   : > { %1021 = vst [vmem:[#allocation2 + $0xac] sm:$0x2] %v1020_v20  ;;  %v1352_v18 = vld [vmem:[#allocation2 + $0x44] sm:$0x1]  ;;  %v1934_v56 = vld [vmem:[#allocation2 + $0xa8] sm:$0xf]  ;;  %v1356_v17 = vsel %vm16839_vm9, %v17818_v58, %v1355_v45 }
 0x10b   : > { %1261 = vst [vmem:[#allocation2 + $0xac] sm:$0x8] %v1260_v7  ;;  %v1353_v61 = vsel %vm16839_vm9, %v17818_v58, %v1352_v18  ;;  %1929 = vst [vmem:[#allocation2 + $0x9c] sm:$0xf] %v1928_v10  ;;  %v1064_v12 = vld [vmem:[#allocation2 + $0xa0] sm:$0x2]  ;;  %v1935_v26 = vsel %vm17546_vm11, %v1773_v55, %v1934_v56 }
 0x10c   : > { %1357 = vst [vmem:[#allocation2 + $0x50] sm:$0x1] %v1356_v17  ;;  %1354 = vst [vmem:[#allocation2 + $0x44] sm:$0x1] %v1353_v61  ;;  %v1022_v60 = vld [vmem:[#allocation2 + $0xb8] sm:$0x2]  ;;  %v1065_v9 = vsel %vm16968_vm10, %v17753_v22, %v1064_v12  ;;  %v1699_v27 = vpop.permute.xlu1 %1698 }
 0x10d   : > { %v16305_v2 = vld [vmem:[#allocation2 + $0x84] sm:$0xff]   ;;  %v1847_v14 = vld [vmem:[#allocation2 + $0x14] sm:$0x1]  ;;  %v1304_v58 = vld [vmem:[#allocation2 + $0xa0] sm:$0x8]  ;;  %v1023_v38 = vsel %vm16863_vm15, %v17834_v1, %v1022_v60  ;;  %v17948_v63 = vrot.slane %v1322_v62, 4 }
 0x10e   : > { %v1941_v39 = vld [vmem:[#allocation2 + $0xb4] sm:$0xf]  ;;  %1066 = vst [vmem:[#allocation2 + $0xa0] sm:$0x2] %v1065_v9  ;;  %v1305_v53 = vsel %vm17004_vm5, %v17583_v6, %v1304_v58  ;;  %1024 = vst [vmem:[#allocation2 + $0xb8] sm:$0x2] %v1023_v38  ;;  %15439 = vmatmul.mubr.bf16.gmra.mxu0 %v16305_v2  ;;  %v1848_v19 = vsel %vm17936_vm1, %v1699_v27, %v1847_v14 }
 0x10f   : > { %v16306_v50 = vld [vmem:[#allocation2 + $0x90] sm:$0xff]   ;;  %v1324_v44 = vrot.slane %v17365_v42, 7  ;;  %1936 = vst [vmem:[#allocation2 + $0xa8] sm:$0xf] %v1935_v26  ;;  %1306 = vst [vmem:[#allocation2 + $0xa0] sm:$0x8] %v1305_v53 }
 0x110   : > { %v1262_v43 = vld [vmem:[#allocation2 + $0xb8] sm:$0x8]  ;;  %v2436_v0 = vld [vmem:[#allocation2] sm:$0xf]  ;;  %v2437_v62 = vld [vmem:[#allocation2 + $0x4] sm:$0xf]  ;;  %15442 = vmatprep.mubr.bf16.mxu0 %v16306_v50  ;;  %v1705_v2 = vpop.permute.xlu1 %1704 }
 0x111   : > { %1930 = vst.msk [vmem:[#allocation2 + $0xa0] sm:$0xf] %vm1838_vm8, %v1769_v13  ;;  %v1067_v37 = vld [vmem:[#allocation2 + $0xac] sm:$0x2]  ;;  %v1263_v34 = vsel %vm16896_vm7, %v17763_v23, %v1262_v43  ;;  %v2438_v48 = vld [vmem:[#allocation2 + $0x8] sm:$0x1]  ;;  %v1942_v13 = vsel %vm17546_vm11, %v1779_v4, %v1941_v39 }
 0x112   : > { %v2519_v36 = vshrl.u32 %v2436_v0, 16  ;;  %v2522_v52 = vshll.u32 %v2436_v0, 16  ;;  %v1068_v42 = vsel %vm16968_vm10, %v17753_v22, %v1067_v37  ;;  %v1307_v35 = vld [vmem:[#allocation2 + $0xac] sm:$0x8]  ;;  %1264 = vst [vmem:[#allocation2 + $0xb8] sm:$0x8] %v1263_v34 }
 0x113   : > { %v2528_v54 = vshll.u32 %v2437_v62, 16  ;;  %v2532_v29 = vshrl.u32 %v2437_v62, 16  ;;  %v2538_v20 = vshll.u32 %v2438_v48, 16  ;;  %vm2516_vm12 = vsmask.f32 7440  ;;  %v16368_v32 = vld [vmem:[#allocation2 + $0x30] sm:$0xff]  }
 0x114   : > { %v1854_v3 = vld [vmem:[#allocation2 + $0x20] sm:$0x1]  ;;  %1069 = vst [vmem:[#allocation2 + $0xac] sm:$0x2] %v1068_v42  ;;  %v1308_v7 = vsel %vm17004_vm5, %v17583_v6, %v1307_v35  ;;  %1849 = vst [vmem:[#allocation2 + $0x14] sm:$0x1] %v1848_v19  ;;  %v1781_v6 = vpop.permute.xlu0 %1780  ;;  %v1717_v42 = vpop.permute.xlu1 %1716 }
 0x115   : > { %1943 = vst [vmem:[#allocation2 + $0xb4] sm:$0xf] %v1942_v13  ;;  %1309 = vst [vmem:[#allocation2 + $0xac] sm:$0x8] %v1308_v7  ;;  %v2521_v22 = vrot.slane %v2519_v36, 4  ;;  %v2524_v45 = vrot.slane %v2522_v52, 5  ;;  %v1855_v53 = vsel %vm17936_vm1, %v1705_v2, %v1854_v3 }
 0x116   : > { %v2530_v18 = vrot.slane %v2528_v54, 5  ;;  %v2534_v10 = vrot.slane %v2532_v29, 4  ;;  %v1361_v56 = vld [vmem:[#allocation2 + $0x68] sm:$0x1]  ;;  %1937 = vst.msk [vmem:[#allocation2 + $0xac] sm:$0xf] %vm1838_vm8, %v1775_v31  ;;  %vm17984_vm0 = vmor %vm710_vm14, %vm2516_vm12 }
 0x117   : > { %v2540_v17 = vrot.slane %v2538_v20, 5  ;;  %v1362_v61 = vsel %vm16839_vm9, %v17948_v63, %v1361_v56  ;;  %v1358_v12 = vld [vmem:[#allocation2 + $0x5c] sm:$0x1]  ;;  %v2439_v60 = vld [vmem:[#allocation2 + $0xc] sm:$0xf]  ;;  %v1325_v55 = vrot.slane %v1324_v44, 4  ;;  %v2525_v38 = vor.u32 %v2524_v45, %v2521_v22 }
 0x118   : > { %v1868_v14 = vld [vmem:[#allocation2 + $0x38] sm:$0x1]  ;;  %v1861_v9 = vld [vmem:[#allocation2 + $0x2c] sm:$0x1]  ;;  %v1070_v58 = vld [vmem:[#allocation2 + $0xb8] sm:$0x2]  ;;  %v2535_v26 = vor.u32 %v2534_v10, %v2530_v18  ;;  %v1359_v31 = vsel %vm16839_vm9, %v17948_v63, %v1358_v12  ;;  %v1711_v35 = vpop.permute.xlu0 %1710 }
 0x119   : > { %1363 = vst [vmem:[#allocation2 + $0x68] sm:$0x1] %v1362_v61  ;;  %v2440_v39 = vld [vmem:[#allocation2 + $0x10] sm:$0xf]  ;;  %v2543_v50 = vshrl.u32 %v2439_v60, 16  ;;  %v1071_v44 = vsel %vm16968_vm10, %v17834_v1, %v1070_v58  ;;  %v2546_v43 = vshll.u32 %v2439_v60, 16  ;;  %v1869_v22 = vsel %vm17936_vm1, %v1717_v42, %v1868_v14 }
 0x11a   : > { %1360 = vst [vmem:[#allocation2 + $0x5c] sm:$0x1] %v1359_v31  ;;  %v2552_v0 = vshll.u32 %v2440_v39, 16  ;;  %1856 = vst [vmem:[#allocation2 + $0x20] sm:$0x1] %v1855_v53  ;;  %v16310_v62 = vld [vmem:[#allocation2 + $0x9c] sm:$0xff]   ;;  %v1862_v45 = vsel %vm17936_vm1, %v1711_v35, %v1861_v9 }
 0x11b   : > { %1072 = vst [vmem:[#allocation2 + $0xb8] sm:$0x2] %v1071_v44  ;;  %v2526_v37 = vrot.slane %v2525_v38, 4  ;;  %v2536_v34 = vrot.slane %v2535_v26, 4  ;;  %v2545_v48 = vrot.slane %v2543_v50, 4  ;;  %v21754_v63 = vmov 0  ;;  %15443 = vmatmul.mubr.bf16.gmra.mxu0 %v16310_v62  ;;  %v1729_v26 = vpop.permute.xlu1 %1728 }
 0x11c   : > { %v21755_v63 = vsel %vm17984_vm0, 4294967295, %v21754_v63  ;;  %v1310_v36 = vld [vmem:[#allocation2 + $0xb8] sm:$0x8]  ;;  %v2548_v52 = vrot.slane %v2546_v43, 5  ;;  %v17988_v27 = vrot.slane %v2552_v0, 5  ;;  %v2556_v4 = vshrl.u32 %v2440_v39, 16 }
 0x11d   : > { %21756 = vst [vmem:[#allocation5_spill] sm:$0xff] %v21755_v63  ;;  %vm3384_vm6 = vcmask 1042432   ;;  %v1882_v54 = vld [vmem:[#allocation2 + $0x50] sm:$0x1]  ;;  %v1875_v29 = vld [vmem:[#allocation2 + $0x44] sm:$0x1]  ;;  %v1311_v20 = vsel %vm17004_vm5, %v17763_v23, %v1310_v36  ;;  %v2531_v19 = vsel %vm17984_vm0, %v2526_v37, %v2530_v18  ;;  %v2541_v13 = vsel %vm17984_vm0, %v2536_v34, %v2540_v17 }
 0x11e   : > { %v1367_v3 = vld [vmem:[#allocation2 + $0x80] sm:$0x1]  ;;  %v1364_v7 = vld [vmem:[#allocation2 + $0x74] sm:$0x1]  ;;  %1312 = vst [vmem:[#allocation2 + $0xb8] sm:$0x8] %v1311_v20  ;;  %v14153_v10 = vcombine.low %v2531_v19, %v2541_v13  ;;  %v2549_v61 = vor.u32 %v2548_v52, %v2545_v48 }
 0x11f   : > { %v2441_v56 = vld [vmem:[#allocation2 + $0x14] sm:$0x1]  ;;  %v2442_v12 = vld [vmem:[#allocation2 + $0x18] sm:$0xf]  ;;  %1870 = vst [vmem:[#allocation2 + $0x38] sm:$0x1] %v1869_v22  ;;  %v1368_v60 = vsel %vm16839_vm9, %v1325_v55, %v1367_v3  ;;  %v1365_v2 = vsel %vm16839_vm9, %v1325_v55, %v1364_v7  ;;  %v1883_v55 = vsel %vm17936_vm1, %v1729_v26, %v1882_v54  ;;  %v1741_v13 = vpop.permute.xlu1 %1740 }
 0x120   : > { %1863 = vst [vmem:[#allocation2 + $0x2c] sm:$0x1] %v1862_v45  ;;  %v16311_v23 = vld [vmem:[#allocation2 + $0xa8] sm:$0xff]   ;;  %1944 = vst.msk [vmem:[#allocation2 + $0xb8] sm:$0xf] %vm1838_vm8, %v1781_v6  ;;  %v2558_v18 = vrot.slane %v2556_v4, 4  ;;  %15466 = vmatprep.mubr.bf16.mxu1 %v14153_v10  ;;  %v1723_v6 = vpop.permute.xlu0 %1722 }
 0x121   : > { %v2562_v17 = vshll.u32 %v2441_v56, 16  ;;  %v2550_v14 = vrot.slane %v2549_v61, 4  ;;  %1369 = vst [vmem:[#allocation2 + $0x80] sm:$0x1] %v1368_v60  ;;  %1366 = vst [vmem:[#allocation2 + $0x74] sm:$0x1] %v1365_v2  ;;  %15446 = vmatprep.mubr.bf16.mxu0 %v16311_v23  ;;  %v1876_v0 = vsel %vm17936_vm1, %v1723_v6, %v1875_v29 }
 0x122   : > { %v2443_v9 = vld [vmem:[#allocation2 + $0x1c] sm:$0xf]  ;;  %v2567_v58 = vshrl.u32 %v2442_v12, 16  ;;  %vm3385_vm14 = vcmask 1046532   ;;  %v1326_v38 = vrot.slane %v17477_v51, 7  ;;  %v2559_v50 = vor.u32 %v2558_v18, %v17988_v27 }
 0x123   : > { %v1896_v31 = vld [vmem:[#allocation2 + $0x68] sm:$0x1]  ;;  %v1889_v39 = vld [vmem:[#allocation2 + $0x5c] sm:$0x1]  ;;  %v2564_v53 = vrot.slane %v2562_v17, 5  ;;  %v2570_v44 = vshll.u32 %v2442_v12, 16  ;;  %v2555_v51 = vsel %vm17984_vm0, %v2550_v14, %v17988_v27  ;;  %vm18028_vm12 = vmor %vm3384_vm6, %vm3385_vm14 }
 0x124   : > { %v2576_v43 = vshll.u32 %v2443_v9, 16  ;;  %v2444_v62 = vld [vmem:[#allocation2 + $0x20] sm:$0x1]  ;;  %v2569_v37 = vrot.slane %v2567_v58, 4  ;;  %v3256_v34 = vld [vmem:[#allocation2] sm:$0xe]  ;;  %v1735_v3 = vpop.permute.xlu0 %1734  ;;  %v1897_v12 = vsel %vm17936_vm1, %v1741_v13, %v1896_v31 }
 0x125   : > { %1884 = vst [vmem:[#allocation2 + $0x50] sm:$0x1] %v1883_v55  ;;  %1877 = vst [vmem:[#allocation2 + $0x44] sm:$0x1] %v1876_v0  ;;  %v2560_v48 = vrot.slane %v2559_v50, 4  ;;  %v2572_v36 = vrot.slane %v2570_v44, 5  ;;  %v1890_v23 = vsel %vm17936_vm1, %v1735_v3, %v1889_v39 }
 0x126   : > { %v18015_v52 = vrot.slane %v2576_v43, 5  ;;  %v2580_v4 = vshrl.u32 %v2443_v9, 16  ;;  %v3257_v42 = vld [vmem:[#allocation2 + $0x4] sm:$0xf]  ;;  %v2586_v35 = vshll.u32 %v2444_v62, 16  ;;  %v14177_v20 = vrot.slane %v3256_v34, 9 }
 0x127   : > { %v3258_v54 = vld [vmem:[#allocation2 + $0x8] sm:$0x1]  ;;  %v3389_v19 = vrot.slane %v3257_v42, 5  ;;  %v18017_v29 = vrot.slane %v1326_v38, 4  ;;  %v18022_v27 = vld [vmem:[%s21689_s2 + $0xf0] sm:$0xff]   ;;  %v2565_v7 = vsel %vm17984_vm0, %v2560_v48, %v2564_v53  ;;  %v2573_v22 = vor.u32 %v2572_v36, %v2569_v37  ;;  %v1753_v53 = vpop.permute.xlu1 %1752  ;;  %v16517_v0 = vld [vmem:[%s21689_s2 + $0xf8] sm:$0xff]  }
 0x128   : > { %v2582_v45 = vrot.slane %v2580_v4, 4  ;;  %v21757_v10 = vmov 0  ;;  %v3392_v56 = vrot.slane %v3258_v54, 5  ;;  %v16315_v61 = vld [vmem:[#allocation2 + $0xb4] sm:$0xff]   ;;  %v14154_v18 = vcombine.low %v2555_v51, %v2565_v7  ;;  %v3259_v60 = vld [vmem:[#allocation2 + $0xc] sm:$0xe]  ;;  %v1747_v44 = vpop.permute.xlu0 %1746 }
 0x129   : > { %v21758_v10 = vsel %vm18028_vm12, 4294967295, %v21757_v10  ;;  %v2588_v17 = vrot.slane %v2586_v35, 5  ;;  %1898 = vst [vmem:[#allocation2 + $0x68] sm:$0x1] %v1897_v12  ;;  %1891 = vst [vmem:[#allocation2 + $0x5c] sm:$0x1] %v1890_v23  ;;  %v3390_v38 = vsel %vm18028_vm12, %v14177_v20, %v3389_v19  ;;  %15447 = vmatmul.mubr.bf16.gmra.mxu0 %v16315_v61 }
 0x12a   : > { %21759 = vst [vmem:[#allocation6_spill] sm:$0xff] %v21758_v10  ;;  %v1910_v2 = vld [vmem:[#allocation2 + $0x80] sm:$0x1]  ;;  %v1903_v14 = vld [vmem:[#allocation2 + $0x74] sm:$0x1]  ;;  %v2574_v9 = vrot.slane %v2573_v22, 4  ;;  %v2583_v58 = vor.u32 %v2582_v45, %v18015_v52  ;;  %15467 = vmatmul.mubr.bf16.vlgmr.msra.gmra.mxu1 %v14154_v18 }
 0x12b   : > { %v3391_v26 = vrot.slane %v3389_v19, 4  ;;  %v3260_v6 = vld [vmem:[#allocation2 + $0x10] sm:$0xf]  ;;  %v3261_v31 = vld [vmem:[#allocation2 + $0x14] sm:$0x1]  ;;  %v14178_v50 = vrot.slane %v3259_v60, 9  ;;  %15547 = vmatpush3.bf16.msra.mxu1 %v16517_v0  ;;  %v1911_v48 = vsel %vm17936_vm1, %v1753_v53, %v1910_v2  ;;  %v1904_v36 = vsel %vm17936_vm1, %v1747_v44, %v1903_v14 }
 0x12c   : > { %v1328_v39 = vrot.slane %v17618_v24, 7  ;;  %v2579_v43 = vsel %vm17984_vm0, %v2574_v9, %v18015_v52  ;;  %v2584_v55 = vrot.slane %v2583_v58, 4  ;;  %v3396_v62 = vrot.slane %v3260_v6, 5  ;;  %v1373_v37 = vld [vmem:[#allocation2 + $0x98] sm:$0x1]  ;;  %15548 = vmatprep.subr.bf16.mxu1 %v18022_v27  ;;  %v16320_v54 = vld [vmem:[%s21689_s2 + $0xe8] sm:$0xff]  }
 0x12d   : > { %v3393_v51 = vsel %vm18028_vm12, %v3391_v26, %v3392_v56  ;;  %v1370_v34 = vld [vmem:[#allocation2 + $0x8c] sm:$0x1]  ;;  %v3399_v52 = vrot.slane %v3261_v31, 5  ;;  %v3262_v42 = vld [vmem:[#allocation2 + $0x18] sm:$0xe]  ;;  %v1374_v3 = vsel %vm16839_vm9, %v18017_v29, %v1373_v37  ;;  %v16319_v6 = vld [vmem:[%s21689_s2 + $0x130] sm:$0xff]  }
 0x12e   : > { %v14209_v4 = vcombine.low %v3390_v38, %v3393_v51  ;;  %v3263_v35 = vld [vmem:[#allocation2 + $0x1c] sm:$0xf]  ;;  %1912 = vst [vmem:[#allocation2 + $0x80] sm:$0x1] %v1911_v48  ;;  %1905 = vst [vmem:[#allocation2 + $0x74] sm:$0x1] %v1904_v36  ;;  %v2589_v20 = vsel %vm17984_vm0, %v2584_v55, %v2588_v17  ;;  %v3397_v19 = vsel %vm18028_vm12, %v14178_v50, %v3396_v62  ;;  %v1765_v36 = vpop.permute.xlu1 %1764 }
 0x12f   : > { %v3398_v13 = vrot.slane %v3396_v62, 4  ;;  %v3264_v7 = vld [vmem:[#allocation2 + $0x20] sm:$0x1]  ;;  %v2445_v22 = vld [vmem:[#allocation2 + $0x24] sm:$0xf]  ;;  %v14155_v45 = vcombine.low %v2579_v43, %v2589_v20  ;;  %v1371_v56 = vsel %vm16839_vm9, %v18017_v29, %v1370_v34  ;;  %v14179_v61 = vrot.slane %v3262_v42, 9  ;;  %15549 = vmatpush3.bf16.msra.mxu1 %v18022_v27 }
 0x130   : > { %15514 = vmatprep.mubr.bf16.mxu0 %v14209_v4  ;;  %1375 = vst [vmem:[#allocation2 + $0x98] sm:$0x1] %v1374_v3  ;;  %v3403_v12 = vrot.slane %v3263_v35, 5  ;;  %v2446_v23 = vld [vmem:[#allocation2 + $0x28] sm:$0xf]  ;;  %v3406_v60 = vrot.slane %v3264_v7, 5  ;;  %15550 = vmatprep.subr.bf16.mxu1 %v16320_v54 }
 0x131   : > { %v2447_v18 = vld [vmem:[#allocation2 + $0x2c] sm:$0x1]  ;;  %v3400_v17 = vsel %vm18028_vm12, %v3398_v13, %v3399_v52  ;;  %1372 = vst [vmem:[#allocation2 + $0x8c] sm:$0x1] %v1371_v56  ;;  %v2591_v2 = vshrl.u32 %v2445_v22, 16  ;;  %v2594_v14 = vshll.u32 %v2445_v22, 16  ;;  %15470 = vmatprep.mubr.bf16.mxu1 %v14155_v45  ;;  %v1759_v13 = vpop.permute.xlu0 %1758 }
 0x132   : > { %v2448_v9 = vld [vmem:[#allocation2 + $0x30] sm:$0xf]  ;;  %v14210_v58 = vcombine.low %v3397_v19, %v3400_v17  ;;  %v3404_v38 = vsel %vm18028_vm12, %v14179_v61, %v3403_v12  ;;  %v3405_v29 = vrot.slane %v3403_v12, 4  ;;  %v2600_v26 = vshll.u32 %v2446_v23, 16  ;;  %v16322_v31 = vld [vmem:[%s21689_s2 + $0xe0] sm:$0xff]   ;;  %v18082_v34 = vld [vmem:[%s21689_s2 + $0x128] sm:$0xff]  }
 0x133   : > { %v2593_v50 = vrot.slane %v2591_v2, 4  ;;  %v2596_v53 = vrot.slane %v2594_v14, 5  ;;  %v2604_v44 = vshrl.u32 %v2446_v23, 16  ;;  %v2610_v27 = vshll.u32 %v2447_v18, 16  ;;  %v2449_v43 = vld [vmem:[#allocation2 + $0x34] sm:$0xf]  ;;  %15551 = vmatpush3.bf16.msra.mxu1 %v16320_v54 }
 0x134   : > { %15515 = vmatmul.mubr.bf16.vlgmr.msra.gmra.mxu0 %v14210_v58  ;;  %v3407_v55 = vsel %vm18028_vm12, %v3405_v29, %v3406_v60  ;;  %v2602_v0 = vrot.slane %v2600_v26, 5  ;;  %v2450_v51 = vld [vmem:[#allocation2 + $0x38] sm:$0x1]  ;;  %v2615_v62 = vshrl.u32 %v2448_v9, 16  ;;  %v2618_v37 = vshll.u32 %v2448_v9, 16  ;;  %15552 = vmatprep.subr.bf16.mxu1 %v16322_v31 }
 0x135   : > { %v18087_v48 = vld [vmem:[%s21689_s2 + $0xd8] sm:$0xff]   ;;  %15595 = vmatpush3.bf16.msra.mxu0 %v17863_v21  ;;  %v14211_v4 = vcombine.low %v3404_v38, %v3407_v55  ;;  %v2597_v52 = vor.u32 %v2596_v53, %v2593_v50  ;;  %v2606_v42 = vrot.slane %v2604_v44, 4  ;;  %v2612_v35 = vrot.slane %v2610_v27, 5  ;;  %v1379_v20 = vld [vmem:[#allocation2 + $0xb0] sm:$0x1]  ;;  %v16323_v27 = vld [vmem:[%s21689_s2 + $0x120] sm:$0xff]  }
 0x136   : > { %v1376_v19 = vld [vmem:[#allocation2 + $0xa4] sm:$0x1]  ;;  %v2617_v3 = vrot.slane %v2615_v62, 4  ;;  %v2620_v7 = vrot.slane %v2618_v37, 5  ;;  %v2624_v22 = vshll.u32 %v2449_v43, 16  ;;  %v2628_v45 = vshrl.u32 %v2449_v43, 16  ;;  %15596 = vmatprep.subr.bf16.mxu0 %v16319_v6 }
 0x137   : > { %v1924_v56 = vld [vmem:[#allocation2 + $0x98] sm:$0x1]  ;;  %15518 = vmatprep.mubr.bf16.mxu0 %v14211_v4  ;;  %v2598_v61 = vrot.slane %v2597_v52, 4  ;;  %v2607_v12 = vor.u32 %v2606_v42, %v2602_v0  ;;  %v2634_v21 = vshll.u32 %v2450_v51, 16  ;;  %v1329_v23 = vrot.slane %v1328_v39, 4  ;;  %15553 = vmatpush3.bf16.msra.mxu1 %v16322_v31  ;;  %v16326_v62 = vld [vmem:[%s21689_s2 + $0xd0] sm:$0xff]  }
 0x138   : > { %v1925_v18 = vsel %vm17936_vm1, %v1765_v36, %v1924_v56  ;;  %v1917_v17 = vld [vmem:[#allocation2 + $0x8c] sm:$0x1]  ;;  %v2621_v54 = vor.u32 %v2620_v7, %v2617_v3  ;;  %v2626_v60 = vrot.slane %v2624_v22, 5  ;;  %v2630_v2 = vrot.slane %v2628_v45, 4  ;;  %v3265_v29 = vld [vmem:[#allocation2 + $0x24] sm:$0xe]  ;;  %15554 = vmatprep.subr.bf16.mxu1 %v18087_v48 }
 0x139   : > { %1926 = vst [vmem:[#allocation2 + $0x98] sm:$0x1] %v1925_v18  ;;  %v1918_v14 = vsel %vm17936_vm1, %v1759_v13, %v1917_v17  ;;  %v2603_v9 = vsel %vm17984_vm0, %v2598_v61, %v2602_v0  ;;  %v2608_v58 = vrot.slane %v2607_v12, 4  ;;  %v2636_v38 = vrot.slane %v2634_v21, 5  ;;  %v3266_v26 = vld [vmem:[#allocation2 + $0x28] sm:$0xf]  ;;  %15597 = vmatpush3.bf16.msra.mxu0 %v16319_v6 }
 0x13a   : > { %1919 = vst [vmem:[#allocation2 + $0x8c] sm:$0x1] %v1918_v14  ;;  %v2622_v24 = vrot.slane %v2621_v54, 4  ;;  %v2631_v39 = vor.u32 %v2630_v2, %v2626_v60  ;;  %v1380_v50 = vsel %vm16839_vm9, %v1329_v23, %v1379_v20  ;;  %v1377_v53 = vsel %vm16839_vm9, %v1329_v23, %v1376_v19  ;;  %v3267_v44 = vld [vmem:[#allocation2 + $0x2c] sm:$0x1]  ;;  %15598 = vmatprep.subr.bf16.mxu0 %v18082_v34  ;;  %v16325_v7 = vld [vmem:[%s21689_s2 + $0x118] sm:$0xff]   ;;  %v1771_v2 = vpop.permute.xlu0 %1770 }
 0x13b   : > { %v2613_v6 = vsel %vm17984_vm0, %v2608_v58, %v2612_v35  ;;  %1381 = vst [vmem:[#allocation2 + $0xb0] sm:$0x1] %v1380_v50  ;;  %1378 = vst [vmem:[#allocation2 + $0xa4] sm:$0x1] %v1377_v53  ;;  %v14180_v31 = vrot.slane %v3265_v29, 9  ;;  %v3410_v43 = vrot.slane %v3266_v26, 5  ;;  %15555 = vmatpush3.bf16.msra.mxu1 %v18087_v48 }
 0x13c   : > { %v3413_v55 = vrot.slane %v3267_v44, 5  ;;  %v1382_v0 = vld [vmem:[#allocation2 + $0xbc] sm:$0x1]  ;;  %v3268_v51 = vld [vmem:[#allocation2 + $0x30] sm:$0xe]  ;;  %v14156_v37 = vcombine.low %v2603_v9, %v2613_v6  ;;  %v2632_v36 = vrot.slane %v2631_v39, 4  ;;  %v2627_v35 = vsel %vm17984_vm0, %v2622_v24, %v2626_v60  ;;  %15556 = vmatprep.subr.bf16.mxu1 %v16326_v62  ;;  %v1777_v60 = vpop.permute.xlu1 %1776 }
 0x13d   : > { %v1330_v4 = vrot.slane %v17785_v15, 7  ;;  %v3269_v52 = vld [vmem:[#allocation2 + $0x34] sm:$0xf]  ;;  %v3270_v42 = vld [vmem:[#allocation2 + $0x38] sm:$0x1]  ;;  %v3412_v20 = vrot.slane %v3410_v43, 4  ;;  %15599 = vmatpush3.bf16.msra.mxu0 %v18082_v34  ;;  %v3411_v45 = vsel %vm18028_vm12, %v14180_v31, %v3410_v43 }
 0x13e   : > { %v14181_v19 = vrot.slane %v3268_v51, 9  ;;  %v3417_v13 = vrot.slane %v3269_v52, 5  ;;  %v2451_v3 = vld [vmem:[#allocation2 + $0x3c] sm:$0xf]  ;;  %15471 = vmatmul.mubr.bf16.gmra.mxu1 %v14156_v37  ;;  %v2637_v22 = vsel %vm17984_vm0, %v2632_v36, %v2636_v38  ;;  %v3420_v61 = vrot.slane %v3270_v42, 5  ;;  %15600 = vmatprep.subr.bf16.mxu0 %v16323_v27  ;;  %v16328_v54 = vld [vmem:[%s21689_s2 + $0xc8] sm:$0xff]  }
 0x13f   : > { %v18124_v56 = vrot.slane %v1330_v4, 4  ;;  %v2452_v12 = vld [vmem:[#allocation2 + $0x40] sm:$0xf]  ;;  %v2453_v21 = vld [vmem:[#allocation2 + $0x44] sm:$0x1]  ;;  %v14157_v34 = vcombine.low %v2627_v35, %v2637_v22  ;;  %v3414_v48 = vsel %vm18028_vm12, %v3412_v20, %v3413_v55  ;;  %v2639_v58 = vshrl.u32 %v2451_v3, 16  ;;  %15557 = vmatpush3.bf16.msra.mxu1 %v16326_v62 }
 0x140   : > { %v3418_v23 = vsel %vm18028_vm12, %v14181_v19, %v3417_v13  ;;  %v3419_v18 = vrot.slane %v3417_v13, 4  ;;  %v2454_v17 = vld [vmem:[#allocation2 + $0x48] sm:$0xf]  ;;  %v14212_v14 = vcombine.low %v3411_v45, %v3414_v48  ;;  %v2642_v38 = vshll.u32 %v2451_v3, 16  ;;  %v2455_v29 = vld [vmem:[#allocation2 + $0x4c] sm:$0xf]  ;;  %15558 = vmatprep.subr.bf16.mxu1 %v16328_v54 }
 0x141   : > { %v1383_v9 = vsel %vm16839_vm9, %v18124_v56, %v1382_v0  ;;  %v2456_v26 = vld [vmem:[#allocation2 + $0x50] sm:$0x1]  ;;  %15474 = vmatprep.mubr.bf16.mxu1 %v14157_v34  ;;  %v2648_v39 = vshll.u32 %v2452_v12, 16  ;;  %v2652_v50 = vshrl.u32 %v2452_v12, 16  ;;  %v2658_v53 = vshll.u32 %v2453_v21, 16  ;;  %15601 = vmatpush3.bf16.msra.mxu0 %v16323_v27  ;;  %v16331_v19 = vld [vmem:[%s21689_s2 + $0xc0] sm:$0xff]   ;;  %v1783_v12 = vpop.permute.xlu0 %1782 }
 0x142   : > { %1384 = vst [vmem:[#allocation2 + $0xbc] sm:$0x1] %v1383_v9  ;;  %v3421_v24 = vsel %vm18028_vm12, %v3419_v18, %v3420_v61  ;;  %v16327_v44 = vld [vmem:[%s21689_s2 + $0x110] sm:$0xff]   ;;  %v1931_v31 = vld [vmem:[#allocation2 + $0xa4] sm:$0x1]  ;;  %15519 = vmatmul.mubr.bf16.gmra.mxu0 %v14212_v14  ;;  %v2641_v55 = vrot.slane %v2639_v58, 4  ;;  %15602 = vmatprep.subr.bf16.mxu0 %v16325_v7 }
 0x143   : > { %v1938_v6 = vld [vmem:[#allocation2 + $0xb0] sm:$0x1]  ;;  %v14213_v43 = vcombine.low %v3418_v23, %v3421_v24  ;;  %v2644_v0 = vrot.slane %v2642_v38, 5  ;;  %v1932_v37 = vsel %vm17936_vm1, %v1771_v2, %v1931_v31  ;;  %v2650_v36 = vrot.slane %v2648_v39, 5  ;;  %v3271_v20 = vld [vmem:[#allocation2 + $0x3c] sm:$0xe]  ;;  %15559 = vmatpush3.bf16.msra.mxu1 %v16328_v54 }
 0x144   : > { %v1939_v51 = vsel %vm17936_vm1, %v1777_v60, %v1938_v6  ;;  %v2654_v4 = vrot.slane %v2652_v50, 4  ;;  %1933 = vst [vmem:[#allocation2 + $0xa4] sm:$0x1] %v1932_v37  ;;  %v2660_v52 = vrot.slane %v2658_v53, 5  ;;  %v2663_v42 = vshrl.u32 %v2454_v17, 16  ;;  %v16329_v62 = vld [vmem:[%s21689_s2 + $0x108] sm:$0xff]   ;;  %15560 = vmatprep.subr.bf16.mxu1 %v16331_v19 }
 0x145   : > { %1940 = vst [vmem:[#allocation2 + $0xb0] sm:$0x1] %v1939_v51  ;;  %15522 = vmatprep.mubr.bf16.mxu0 %v14213_v43  ;;  %v2645_v27 = vor.u32 %v2644_v0, %v2641_v55  ;;  %v2666_v35 = vshll.u32 %v2454_v17, 16  ;;  %v2672_v3 = vshll.u32 %v2455_v29, 16  ;;  %v2676_v22 = vshrl.u32 %v2455_v29, 16  ;;  %15603 = vmatpush3.bf16.msra.mxu0 %v16325_v7  ;;  %v18154_v17 = vld [vmem:[%s21689_s2 + $0x178] sm:$0xff]  }
 0x146   : > { %v2655_v13 = vor.u32 %v2654_v4, %v2650_v36  ;;  %v2682_v45 = vshll.u32 %v2456_v26, 16  ;;  %v3272_v61 = vld [vmem:[#allocation2 + $0x40] sm:$0xf]  ;;  %v2665_v34 = vrot.slane %v2663_v42, 4  ;;  %v3273_v23 = vld [vmem:[#allocation2 + $0x44] sm:$0x1]  ;;  %15604 = vmatprep.subr.bf16.mxu0 %v16327_v44 }
 0x147   : > { %v2646_v21 = vrot.slane %v2645_v27, 4  ;;  %v2668_v48 = vrot.slane %v2666_v35, 5  ;;  %v14182_v18 = vrot.slane %v3271_v20, 9  ;;  %v2674_v2 = vrot.slane %v2672_v3, 5  ;;  %v3274_v9 = vld [vmem:[#allocation2 + $0x48] sm:$0xe]  ;;  %15561 = vmatpush3.bf16.msra.mxu1 %v16331_v19 }
 0x148   : > { %v2656_v60 = vrot.slane %v2655_v13, 4  ;;  %v2678_v14 = vrot.slane %v2676_v22, 4  ;;  %v2684_v7 = vrot.slane %v2682_v45, 5  ;;  %v3424_v26 = vrot.slane %v3272_v61, 5  ;;  %v3275_v39 = vld [vmem:[#allocation2 + $0x4c] sm:$0xf]  ;;  %15642 = vmatprep.subr.bf16.mxu1 %v18154_v17 }
 0x149   : > { %v1945_v58 = vld [vmem:[#allocation2 + $0xbc] sm:$0x1]  ;;  %v2651_v38 = vsel %vm17984_vm0, %v2646_v21, %v2650_v36  ;;  %v2669_v29 = vor.u32 %v2668_v48, %v2665_v34  ;;  %v3427_v24 = vrot.slane %v3273_v23, 5  ;;  %v3276_v31 = vld [vmem:[#allocation2 + $0x50] sm:$0x1]  ;;  %v14183_v43 = vrot.slane %v3274_v9, 9  ;;  %15605 = vmatpush3.bf16.msra.mxu0 %v16327_v44 }
 0x14a   : > { %v1946_v50 = vsel %vm17936_vm1, %v1783_v12, %v1945_v58  ;;  %v2661_v53 = vsel %vm17984_vm0, %v2656_v60, %v2660_v52  ;;  %v2679_v6 = vor.u32 %v2678_v14, %v2674_v2  ;;  %v2457_v55 = vld [vmem:[#allocation2 + $0x54] sm:$0xf]  ;;  %v3425_v51 = vsel %vm18028_vm12, %v14182_v18, %v3424_v26  ;;  %v2458_v36 = vld [vmem:[#allocation2 + $0x58] sm:$0xf]  ;;  %15606 = vmatprep.subr.bf16.mxu0 %v16329_v62  ;;  %v16332_v4 = vld [vmem:[%s21689_s2 + $0x100] sm:$0xff]  }
 0x14b   : > { %1947 = vst [vmem:[#allocation2 + $0xbc] sm:$0x1] %v1946_v50  ;;  %v14158_v54 = vcombine.low %v2651_v38, %v2661_v53  ;;  %v2670_v0 = vrot.slane %v2669_v29, 4  ;;  %v3426_v37 = vrot.slane %v3424_v26, 4  ;;  %v3431_v52 = vrot.slane %v3275_v39, 5  ;;  %v18179_v14 = vld [vmem:[%s21689_s2 + $0x1b8] sm:$0xff]  }
 0x14c   : > { %v2680_v27 = vrot.slane %v2679_v6, 4  ;;  %v3434_v42 = vrot.slane %v3276_v31, 5  ;;  %v2459_v35 = vld [vmem:[#allocation2 + $0x5c] sm:$0x1]  ;;  %v2687_v20 = vshrl.u32 %v2457_v55, 16  ;;  %v2690_v3 = vshll.u32 %v2457_v55, 16 }
 0x14d   : > { %15475 = vmatmul.mubr.bf16.gmra.mxu1 %v14158_v54  ;;  %v2675_v44 = vsel %vm17984_vm0, %v2670_v0, %v2674_v2  ;;  %v3428_v13 = vsel %vm18028_vm12, %v3426_v37, %v3427_v24  ;;  %v2696_v22 = vshll.u32 %v2458_v36, 16  ;;  %v2460_v45 = vld [vmem:[#allocation2 + $0x60] sm:$0xf]  ;;  %v2461_v61 = vld [vmem:[#allocation2 + $0x64] sm:$0xf]  ;;  %v3432_v19 = vsel %vm18028_vm12, %v14183_v43, %v3431_v52  ;;  %15607 = vmatpush3.bf16.msra.mxu0 %v16329_v62 }
 0x14e   : > { %v2685_v12 = vsel %vm17984_vm0, %v2680_v27, %v2684_v7  ;;  %v14214_v21 = vcombine.low %v3425_v51, %v3428_v13  ;;  %v3433_v34 = vrot.slane %v3431_v52, 4  ;;  %v2462_v48 = vld [vmem:[#allocation2 + $0x68] sm:$0x1]  ;;  %v2689_v18 = vrot.slane %v2687_v20, 4  ;;  %15608 = vmatprep.subr.bf16.mxu0 %v16332_v4  ;;  %v3277_v39 = vld [vmem:[#allocation2 + $0x54] sm:$0xe] }
 0x14f   : > { %v14159_v23 = vcombine.low %v2675_v44, %v2685_v12  ;;  %v2692_v60 = vrot.slane %v2690_v3, 5  ;;  %v2698_v2 = vrot.slane %v2696_v22, 5  ;;  %v2700_v9 = vshrl.u32 %v2458_v36, 16  ;;  %v3278_v50 = vld [vmem:[#allocation2 + $0x58] sm:$0xf]  ;;  %v16350_v15 = vld [vmem:[#allocation2 + $0x84] sm:$0xff]  }
 0x150   : > { %15523 = vmatmul.mubr.bf16.gmra.mxu0 %v14214_v21  ;;  %v3435_v7 = vsel %vm18028_vm12, %v3433_v34, %v3434_v42  ;;  %v2706_v58 = vshll.u32 %v2459_v35, 16  ;;  %v2711_v38 = vshrl.u32 %v2460_v45, 16  ;;  %v2714_v26 = vshll.u32 %v2460_v45, 16  ;;  %v3279_v55 = vld [vmem:[#allocation2 + $0x5c] sm:$0x1] }
 0x151   : > { %15478 = vmatprep.mubr.bf16.mxu1 %v14159_v23  ;;  %v14215_v29 = vcombine.low %v3432_v19, %v3435_v7  ;;  %v2693_v62 = vor.u32 %v2692_v60, %v2689_v18  ;;  %v2720_v24 = vshll.u32 %v2461_v61, 16  ;;  %v2702_v53 = vrot.slane %v2700_v9, 4  ;;  %15609 = vmatpush3.bf16.msra.mxu0 %v16332_v4  ;;  %v3280_v36 = vld [vmem:[#allocation2 + $0x60] sm:$0xe]  ;;  %v3281_v20 = vld [vmem:[#allocation2 + $0x64] sm:$0xf] }
 0x152   : > { %v2708_v6 = vrot.slane %v2706_v58, 5  ;;  %v2713_v31 = vrot.slane %v2711_v38, 4  ;;  %v2724_v43 = vshrl.u32 %v2461_v61, 16  ;;  %v2716_v0 = vrot.slane %v2714_v26, 5  ;;  %15690 = vmatprep.subr.bf16.mxu0 %v18179_v14  ;;  %v3282_v4 = vld [vmem:[#allocation2 + $0x68] sm:$0x1] }
 0x153   : > { %15526 = vmatprep.mubr.bf16.mxu0 %v14215_v29  ;;  %v2694_v54 = vrot.slane %v2693_v62, 4  ;;  %v2722_v51 = vrot.slane %v2720_v24, 5  ;;  %v2730_v37 = vshll.u32 %v2462_v48, 16  ;;  %v2703_v27 = vor.u32 %v2702_v53, %v2698_v2  ;;  %v2463_v45 = vld [vmem:[#allocation2 + $0x6c] sm:$0xf] }
 0x154   : > { %v2726_v52 = vrot.slane %v2724_v43, 4  ;;  %v14184_v42 = vrot.slane %v3277_v39, 9  ;;  %v3438_v35 = vrot.slane %v3278_v50, 5  ;;  %v2717_v13 = vor.u32 %v2716_v0, %v2713_v31  ;;  %v2464_v60 = vld [vmem:[#allocation2 + $0x70] sm:$0xf] }
 0x155   : > { %v2699_v44 = vsel %vm17984_vm0, %v2694_v54, %v2698_v2  ;;  %v2732_v3 = vrot.slane %v2730_v37, 5  ;;  %v3441_v22 = vrot.slane %v3279_v55, 5  ;;  %v2704_v61 = vrot.slane %v2703_v27, 4  ;;  %v2465_v58 = vld [vmem:[#allocation2 + $0x74] sm:$0x1] }
 0x156   : > { %v2727_v12 = vor.u32 %v2726_v52, %v2722_v51  ;;  %v3439_v21 = vsel %vm18028_vm12, %v14184_v42, %v3438_v35  ;;  %v3440_v19 = vrot.slane %v3438_v35, 4  ;;  %v2718_v34 = vrot.slane %v2717_v13, 4  ;;  %v2466_v29 = vld [vmem:[#allocation2 + $0x78] sm:$0xf]  ;;  %v2467_v50 = vld [vmem:[#allocation2 + $0x7c] sm:$0xf] }
 0x157   : > { %v14185_v48 = vrot.slane %v3280_v36, 9  ;;  %v3445_v23 = vrot.slane %v3281_v20, 5  ;;  %v3448_v18 = vrot.slane %v3282_v4, 5  ;;  %v2709_v7 = vsel %vm17984_vm0, %v2704_v61, %v2708_v6  ;;  %v2468_v36 = vld [vmem:[#allocation2 + $0x80] sm:$0x1] }
 0x158   : > { %v2728_v2 = vrot.slane %v2727_v12, 4  ;;  %v3442_v9 = vsel %vm18028_vm12, %v3440_v19, %v3441_v22  ;;  %v2735_v38 = vshrl.u32 %v2463_v45, 16  ;;  %v14160_v62 = vcombine.low %v2699_v44, %v2709_v7  ;;  %v3283_v35 = vld [vmem:[#allocation2 + $0x6c] sm:$0xe]  ;;  %v3284_v22 = vld [vmem:[#allocation2 + $0x70] sm:$0xf] }
 0x159   : > { %v2723_v26 = vsel %vm17984_vm0, %v2718_v34, %v2722_v51  ;;  %v14216_v24 = vcombine.low %v3439_v21, %v3442_v9  ;;  %v3446_v39 = vsel %vm18028_vm12, %v14185_v48, %v3445_v23  ;;  %v3447_v6 = vrot.slane %v3445_v23, 4  ;;  %v3285_v21 = vld [vmem:[#allocation2 + $0x74] sm:$0x1]  ;;  %v5127_v30 = vld [vmem:[#allocation2 + $0x24] sm:$0xe] }
 0x15a   : > { %v2733_v53 = vsel %vm17984_vm0, %v2728_v2, %v2732_v3  ;;  %v2737_v31 = vrot.slane %v2735_v38, 4  ;;  %v2738_v43 = vshll.u32 %v2463_v45, 16  ;;  %15479 = vmatmul.mubr.bf16.gmra.mxu1 %v14160_v62  ;;  %v2744_v54 = vshll.u32 %v2464_v60, 16 }
 0x15b   : > { %v14161_v55 = vcombine.low %v2723_v26, %v2733_v53  ;;  %15527 = vmatmul.mubr.bf16.gmra.mxu0 %v14216_v24  ;;  %v2748_v0 = vshrl.u32 %v2464_v60, 16  ;;  %v2754_v37 = vshll.u32 %v2465_v58, 16  ;;  %v3449_v51 = vsel %vm18028_vm12, %v3447_v6, %v3448_v18  ;;  %v3286_v18 = vld [vmem:[#allocation2 + $0x78] sm:$0xe]  ;;  %v3287_v58 = vld [vmem:[#allocation2 + $0x7c] sm:$0xf] }
 0x15c   : > { %v2740_v27 = vrot.slane %v2738_v43, 5  ;;  %v2759_v52 = vshrl.u32 %v2466_v29, 16  ;;  %v2762_v42 = vshll.u32 %v2466_v29, 16  ;;  %v14217_v20 = vcombine.low %v3446_v39, %v3449_v51  ;;  %v3288_v24 = vld [vmem:[#allocation2 + $0x80] sm:$0x1] }
 0x15d   : > { %15482 = vmatprep.mubr.bf16.mxu1 %v14161_v55  ;;  %v2746_v44 = vrot.slane %v2744_v54, 5  ;;  %v2750_v13 = vrot.slane %v2748_v0, 4  ;;  %v2756_v3 = vrot.slane %v2754_v37, 5  ;;  %v2768_v12 = vshll.u32 %v2467_v50, 16  ;;  %v2470_v37 = vld [vmem:[#allocation2 + $0x88] sm:$0xf] }
 0x15e   : > { %v2741_v4 = vor.u32 %v2740_v27, %v2737_v31  ;;  %v2761_v45 = vrot.slane %v2759_v52, 4  ;;  %v2764_v61 = vrot.slane %v2762_v42, 5  ;;  %15530 = vmatprep.mubr.bf16.mxu0 %v14217_v20  ;;  %v2772_v34 = vshrl.u32 %v2467_v50, 16  ;;  %v2469_v31 = vld [vmem:[#allocation2 + $0x84] sm:$0xf] }
 0x15f   : > { %v2751_v19 = vor.u32 %v2750_v13, %v2746_v44  ;;  %v2778_v48 = vshll.u32 %v2468_v36, 16  ;;  %v14186_v23 = vrot.slane %v3283_v35, 9  ;;  %v2770_v2 = vrot.slane %v2768_v12, 5  ;;  %v2471_v36 = vld [vmem:[#allocation2 + $0x8c] sm:$0x1] }
 0x160   : > { %v2742_v60 = vrot.slane %v2741_v4, 4  ;;  %v2765_v7 = vor.u32 %v2764_v61, %v2761_v45  ;;  %v3452_v9 = vrot.slane %v3284_v22, 5  ;;  %v2774_v29 = vrot.slane %v2772_v34, 4  ;;  %v2472_v35 = vld [vmem:[#allocation2 + $0x90] sm:$0xf] }
 0x161   : > { %v2752_v38 = vrot.slane %v2751_v19, 4  ;;  %v2780_v62 = vrot.slane %v2778_v48, 5  ;;  %v3455_v26 = vrot.slane %v3285_v21, 5  ;;  %v14187_v54 = vrot.slane %v3286_v18, 9  ;;  %v2473_v34 = vld [vmem:[#allocation2 + $0x94] sm:$0xf] }
 0x162   : > { %v2747_v39 = vsel %vm17984_vm0, %v2742_v60, %v2746_v44  ;;  %v2766_v53 = vrot.slane %v2765_v7, 4  ;;  %v3453_v50 = vsel %vm18028_vm12, %v14186_v23, %v3452_v9  ;;  %v3454_v6 = vrot.slane %v3452_v9, 4  ;;  %v2474_v48 = vld [vmem:[#allocation2 + $0x98] sm:$0x1]  ;;  %v3289_v9 = vld [vmem:[#allocation2 + $0x84] sm:$0xe] }
 0x163   : > { %v2757_v43 = vsel %vm17984_vm0, %v2752_v38, %v2756_v3  ;;  %v2775_v55 = vor.u32 %v2774_v29, %v2770_v2  ;;  %v3459_v0 = vrot.slane %v3287_v58, 5  ;;  %v3462_v42 = vrot.slane %v3288_v24, 5  ;;  %v3290_v58 = vld [vmem:[#allocation2 + $0x88] sm:$0xf] }
 0x164   : > { %v14162_v51 = vcombine.low %v2747_v39, %v2757_v43  ;;  %v2771_v27 = vsel %vm17984_vm0, %v2766_v53, %v2770_v2  ;;  %v3456_v52 = vsel %vm18028_vm12, %v3454_v6, %v3455_v26  ;;  %v2783_v22 = vshrl.u32 %v2469_v31, 16  ;;  %v3291_v39 = vld [vmem:[#allocation2 + $0x8c] sm:$0x1] }
 0x165   : > { %v2776_v20 = vrot.slane %v2775_v55, 4  ;;  %v14218_v44 = vcombine.low %v3453_v50, %v3456_v52  ;;  %v3460_v13 = vsel %vm18028_vm12, %v14187_v54, %v3459_v0  ;;  %v3461_v3 = vrot.slane %v3459_v0, 4 }
 0x166   : > { %15483 = vmatmul.mubr.bf16.gmra.mxu1 %v14162_v51  ;;  %v2786_v4 = vshll.u32 %v2469_v31, 16  ;;  %v2792_v45 = vshll.u32 %v2470_v37, 16  ;;  %v2796_v61 = vshrl.u32 %v2470_v37, 16  ;;  %v2802_v19 = vshll.u32 %v2471_v36, 16  ;;  %v3292_v31 = vld [vmem:[#allocation2 + $0x90] sm:$0xe] }
 0x167   : > { %v2781_v12 = vsel %vm17984_vm0, %v2776_v20, %v2780_v62  ;;  %15531 = vmatmul.mubr.bf16.gmra.mxu0 %v14218_v44  ;;  %v3463_v21 = vsel %vm18028_vm12, %v3461_v3, %v3462_v42  ;;  %v2807_v23 = vshrl.u32 %v2472_v35, 16  ;;  %v2785_v7 = vrot.slane %v2783_v22, 4  ;;  %v3293_v37 = vld [vmem:[#allocation2 + $0x94] sm:$0xf]  ;;  %v3294_v42 = vld [vmem:[#allocation2 + $0x98] sm:$0x1] }
 0x168   : > { %v14163_v18 = vcombine.low %v2771_v27, %v2781_v12  ;;  %v14219_v60 = vcombine.low %v3460_v13, %v3463_v21  ;;  %v2788_v2 = vrot.slane %v2786_v4, 5  ;;  %v2794_v38 = vrot.slane %v2792_v45, 5  ;;  %v2476_v12 = vld [vmem:[#allocation2 + $0xa0] sm:$0xf] }
 0x169   : > { %v2798_v29 = vrot.slane %v2796_v61, 4  ;;  %v2804_v26 = vrot.slane %v2802_v19, 5  ;;  %v2809_v24 = vrot.slane %v2807_v23, 4  ;;  %v2810_v53 = vshll.u32 %v2472_v35, 16  ;;  %v2475_v61 = vld [vmem:[#allocation2 + $0x9c] sm:$0xf] }
 0x16a   : > { %15486 = vmatprep.mubr.bf16.mxu1 %v14163_v18  ;;  %15534 = vmatprep.mubr.bf16.mxu0 %v14219_v60  ;;  %v2789_v62 = vor.u32 %v2788_v2, %v2785_v7  ;;  %v2816_v50 = vshll.u32 %v2473_v34, 16  ;;  %v2820_v6 = vshrl.u32 %v2473_v34, 16  ;;  %v2826_v55 = vshll.u32 %v2474_v48, 16  ;;  %v2477_v23 = vld [vmem:[#allocation2 + $0xa4] sm:$0x1] }
 0x16b   : > { %v2799_v43 = vor.u32 %v2798_v29, %v2794_v38  ;;  %v14188_v54 = vrot.slane %v3289_v9, 9  ;;  %v3466_v0 = vrot.slane %v3290_v58, 5  ;;  %v2812_v51 = vrot.slane %v2810_v53, 5  ;;  %v2478_v53 = vld [vmem:[#allocation2 + $0xa8] sm:$0xf] }
 0x16c   : > { %v2790_v36 = vrot.slane %v2789_v62, 4  ;;  %v2818_v27 = vrot.slane %v2816_v50, 5  ;;  %v2822_v52 = vrot.slane %v2820_v6, 4  ;;  %v2828_v44 = vrot.slane %v2826_v55, 5  ;;  %v2479_v50 = vld [vmem:[#allocation2 + $0xac] sm:$0xf] }
 0x16d   : > { %v2800_v20 = vrot.slane %v2799_v43, 4  ;;  %v3467_v13 = vsel %vm18028_vm12, %v14188_v54, %v3466_v0  ;;  %v3468_v3 = vrot.slane %v3466_v0, 4  ;;  %v2813_v22 = vor.u32 %v2812_v51, %v2809_v24  ;;  %v2480_v54 = vld [vmem:[#allocation2 + $0xb0] sm:$0x1]  ;;  %v3295_v0 = vld [vmem:[#allocation2 + $0x9c] sm:$0xe] }
 0x16e   : > { %v2795_v35 = vsel %vm17984_vm0, %v2790_v36, %v2794_v38  ;;  %v2823_v4 = vor.u32 %v2822_v52, %v2818_v27  ;;  %v3469_v45 = vrot.slane %v3291_v39, 5  ;;  %v14189_v19 = vrot.slane %v3292_v31, 9  ;;  %v3296_v52 = vld [vmem:[#allocation2 + $0xa0] sm:$0xf] }
 0x16f   : > { %v2805_v21 = vsel %vm17984_vm0, %v2800_v20, %v2804_v26  ;;  %v3473_v34 = vrot.slane %v3293_v37, 5  ;;  %v3476_v48 = vrot.slane %v3294_v42, 5  ;;  %v2814_v60 = vrot.slane %v2813_v22, 4 }
 0x170   : > { %v14164_v18 = vcombine.low %v2795_v35, %v2805_v21  ;;  %v2824_v7 = vrot.slane %v2823_v4, 4  ;;  %v3470_v2 = vsel %vm18028_vm12, %v3468_v3, %v3469_v45  ;;  %v2831_v29 = vshrl.u32 %v2475_v61, 16  ;;  %v3297_v3 = vld [vmem:[#allocation2 + $0xa4] sm:$0x1] }
 0x171   : > { %v14220_v9 = vcombine.low %v3467_v13, %v3470_v2  ;;  %v3474_v58 = vsel %vm18028_vm12, %v14189_v19, %v3473_v34  ;;  %v3475_v38 = vrot.slane %v3473_v34, 4  ;;  %v2819_v26 = vsel %vm17984_vm0, %v2814_v60, %v2818_v27  ;;  %v3300_v2 = vld [vmem:[#allocation2 + $0xb0] sm:$0x1] }
 0x172   : > { %15487 = vmatmul.mubr.bf16.gmra.mxu1 %v14164_v18  ;;  %v2829_v24 = vsel %vm17984_vm0, %v2824_v7, %v2828_v44  ;;  %v2834_v39 = vshll.u32 %v2475_v61, 16  ;;  %v2840_v62 = vshll.u32 %v2476_v12, 16  ;;  %v2833_v43 = vrot.slane %v2831_v29, 4  ;;  %v3298_v61 = vld [vmem:[#allocation2 + $0xa8] sm:$0xe] }
 0x173   : > { %v14165_v6 = vcombine.low %v2819_v26, %v2829_v24  ;;  %15535 = vmatmul.mubr.bf16.gmra.mxu0 %v14220_v9  ;;  %v3477_v31 = vsel %vm18028_vm12, %v3475_v38, %v3476_v48  ;;  %v2844_v55 = vshrl.u32 %v2476_v12, 16  ;;  %v2850_v27 = vshll.u32 %v2477_v23, 16  ;;  %v3299_v48 = vld [vmem:[#allocation2 + $0xac] sm:$0xf]  ;;  %v2481_v9 = vld [vmem:[#allocation2 + $0xb4] sm:$0xf] }
 0x174   : > { %v14221_v37 = vcombine.low %v3474_v58, %v3477_v31  ;;  %v2836_v36 = vrot.slane %v2834_v39, 5  ;;  %v2842_v51 = vrot.slane %v2840_v62, 5  ;;  %v2855_v20 = vshrl.u32 %v2478_v53, 16  ;;  %v2482_v24 = vld [vmem:[#allocation2 + $0xb8] sm:$0xf] }
 0x175   : > { %15490 = vmatprep.mubr.bf16.mxu1 %v14165_v6  ;;  %v2846_v42 = vrot.slane %v2844_v55, 4  ;;  %v2858_v44 = vshll.u32 %v2478_v53, 16  ;;  %v2864_v13 = vshll.u32 %v2479_v50, 16  ;;  %v2852_v22 = vrot.slane %v2850_v27, 5  ;;  %v2483_v27 = vld [vmem:[#allocation2 + $0xbc] sm:$0x1] }
 0x176   : > { %15538 = vmatprep.mubr.bf16.mxu0 %v14221_v37  ;;  %v2837_v35 = vor.u32 %v2836_v36, %v2833_v43  ;;  %v2868_v4 = vshrl.u32 %v2479_v50, 16  ;;  %v2874_v45 = vshll.u32 %v2480_v54, 16  ;;  %v2857_v21 = vrot.slane %v2855_v20, 4 }
 0x177   : > { %v2847_v12 = vor.u32 %v2846_v42, %v2842_v51  ;;  %v2860_v19 = vrot.slane %v2858_v44, 5  ;;  %v2866_v34 = vrot.slane %v2864_v13, 5  ;;  %v14190_v7 = vrot.slane %v3295_v0, 9  ;;  %v3301_v44 = vld [vmem:[#allocation2 + $0xb4] sm:$0xe] }
 0x178   : > { %v2838_v18 = vrot.slane %v2837_v35, 4  ;;  %v2870_v23 = vrot.slane %v2868_v4, 4  ;;  %v2876_v60 = vrot.slane %v2874_v45, 5  ;;  %v3480_v29 = vrot.slane %v3296_v52, 5  ;;  %v3302_v13 = vld [vmem:[#allocation2 + $0xb8] sm:$0xf] }
 0x179   : > { %v2848_v58 = vrot.slane %v2847_v12, 4  ;;  %v2861_v38 = vor.u32 %v2860_v19, %v2857_v21  ;;  %v3483_v26 = vrot.slane %v3297_v3, 5  ;;  %v14191_v53 = vrot.slane %v3298_v61, 9  ;;  %v3303_v45 = vld [vmem:[#allocation2 + $0xbc] sm:$0x1] }
 0x17a   : > { %v2843_v39 = vsel %vm17984_vm0, %v2838_v18, %v2842_v51  ;;  %v2871_v62 = vor.u32 %v2870_v23, %v2866_v34  ;;  %v3487_v50 = vrot.slane %v3299_v48, 5  ;;  %v3481_v43 = vsel %vm18028_vm12, %v14190_v7, %v3480_v29  ;;  %v4303_v61 = vld [vmem:[#allocation2 + $0xc] sm:$0xf]  ;;  %v4304_v48 = vld [vmem:[#allocation2 + $0x10] sm:$0xf] }
 0x17b   : > { %v2853_v6 = vsel %vm17984_vm0, %v2848_v58, %v2852_v22  ;;  %v2862_v31 = vrot.slane %v2861_v38, 4  ;;  %v3482_v55 = vrot.slane %v3480_v29, 4  ;;  %v3490_v42 = vrot.slane %v3300_v2, 5  ;;  %v4305_v58 = vld [vmem:[#allocation2 + $0x14] sm:$0x1] }
 0x17c   : > { %v14166_v54 = vcombine.low %v2843_v39, %v2853_v6  ;;  %v2872_v0 = vrot.slane %v2871_v62, 4  ;;  %v3488_v37 = vsel %vm18028_vm12, %v14191_v53, %v3487_v50  ;;  %v3489_v36 = vrot.slane %v3487_v50, 4 }
 0x17d   : > { %v2867_v51 = vsel %vm17984_vm0, %v2862_v31, %v2866_v34  ;;  %v3484_v52 = vsel %vm18028_vm12, %v3482_v55, %v3483_v26  ;;  %v2879_v20 = vshrl.u32 %v2481_v9, 16  ;;  %v2882_v22 = vshll.u32 %v2481_v9, 16 }
 0x17e   : > { %15491 = vmatmul.mubr.bf16.gmra.mxu1 %v14166_v54  ;;  %v2877_v3 = vsel %vm17984_vm0, %v2872_v0, %v2876_v60  ;;  %v14222_v35 = vcombine.low %v3481_v43, %v3484_v52  ;;  %v2888_v4 = vshll.u32 %v2482_v24, 16  ;;  %v3491_v21 = vsel %vm18028_vm12, %v3489_v36, %v3490_v42 }
 0x17f   : > { %v14167_v12 = vcombine.low %v2867_v51, %v2877_v3  ;;  %v2881_v19 = vrot.slane %v2879_v20, 4  ;;  %v2892_v34 = vshrl.u32 %v2482_v24, 16  ;;  %v14223_v18 = vcombine.low %v3488_v37, %v3491_v21  ;;  %v4307_v3 = vld [vmem:[#allocation2 + $0x1c] sm:$0xf] }
 0x180   : > { %15539 = vmatmul.mubr.bf16.gmra.mxu0 %v14222_v35  ;;  %v2884_v23 = vrot.slane %v2882_v22, 5  ;;  %v2890_v7 = vrot.slane %v2888_v4, 5  ;;  %v2898_v2 = vshll.u32 %v2483_v27, 16  ;;  %v14192_v38 = vrot.slane %v3301_v44, 9  ;;  %v16330_v22 = vld [vmem:[#allocation2 + $0xc] sm:$0xff]  }
 0x181   : > { %15494 = vmatprep.mubr.bf16.mxu1 %v14167_v12  ;;  %v2894_v60 = vrot.slane %v2892_v34, 4  ;;  %v3494_v9 = vrot.slane %v3302_v13, 5  ;;  %v3497_v29 = vrot.slane %v3303_v45, 5  ;;  %15542 = vmatprep.mubr.bf16.mxu0 %v14223_v18  ;;  %v4384_v62 = vshrl.u32 %v4303_v61, 16  ;;  %v4306_v13 = vld [vmem:[#allocation2 + $0x18] sm:$0xf] }
 0x182   : > { %v2885_v26 = vor.u32 %v2884_v23, %v2881_v19  ;;  %v2900_v39 = vrot.slane %v2898_v2, 5  ;;  %v4387_v53 = vshll.u32 %v4303_v61, 16  ;;  %v4393_v31 = vshll.u32 %v4304_v48, 16  ;;  %v4308_v45 = vld [vmem:[#allocation2 + $0x20] sm:$0x1] }
 0x183   : > { %v2895_v50 = vor.u32 %v2894_v60, %v2890_v7  ;;  %v3495_v24 = vsel %vm18028_vm12, %v14192_v38, %v3494_v9  ;;  %v3496_v6 = vrot.slane %v3494_v9, 4  ;;  %v4386_v55 = vrot.slane %v4384_v62, 4  ;;  %v4309_v18 = vld [vmem:[#allocation2 + $0x24] sm:$0xf]  ;;  %v4310_v23 = vld [vmem:[#allocation2 + $0x28] sm:$0xf] }
 0x184   : > { %v2886_v43 = vrot.slane %v2885_v26, 4  ;;  %v4389_v54 = vrot.slane %v4387_v53, 5  ;;  %v4397_v0 = vshrl.u32 %v4304_v48, 16  ;;  %v4395_v27 = vrot.slane %v4393_v31, 5  ;;  %v4311_v38 = vld [vmem:[#allocation2 + $0x2c] sm:$0x1] }
 0x185   : > { %v2896_v37 = vrot.slane %v2895_v50, 4  ;;  %v3498_v36 = vsel %vm18028_vm12, %v3496_v6, %v3497_v29  ;;  %v4403_v51 = vshll.u32 %v4305_v58, 16  ;;  %v4408_v61 = vshrl.u32 %v4306_v13, 16 }
 0x186   : > { %v2891_v52 = vsel %vm17984_vm0, %v2886_v43, %v2890_v7  ;;  %v14224_v42 = vcombine.low %v3495_v24, %v3498_v36  ;;  %v4390_v20 = vor.u32 %v4389_v54, %v4386_v55  ;;  %v4399_v44 = vrot.slane %v4397_v0, 4 }
 0x187   : > { %v2901_v35 = vsel %vm17984_vm0, %v2896_v37, %v2900_v39  ;;  %v4405_v4 = vrot.slane %v4403_v51, 5  ;;  %v4411_v12 = vshll.u32 %v4306_v13, 16  ;;  %v4417_v48 = vshll.u32 %v4307_v3, 16 }
 0x188   : > { %v14168_v21 = vcombine.low %v2891_v52, %v2901_v35  ;;  %15543 = vmatmul.mubr.bf16.gmra.mxu0 %v14224_v42  ;;  %v4391_v19 = vrot.slane %v4390_v20, 4  ;;  %v4400_v34 = vor.u32 %v4399_v44, %v4395_v27  ;;  %v4410_v7 = vrot.slane %v4408_v61, 4  ;;  %v16333_v42 = vld [vmem:[#allocation2 + $0x18] sm:$0xff]   ;;  %v16334_v61 = vld [vmem:[#allocation2 + $0x24] sm:$0xff]  }
 0x189   : > { %v4413_v2 = vrot.slane %v4411_v12, 5  ;;  %v4421_v58 = vshrl.u32 %v4307_v3, 16  ;;  %v4427_v60 = vshll.u32 %v4308_v45, 16  ;;  %v4419_v26 = vrot.slane %v4417_v48, 5  ;;  %v4313_v45 = vld [vmem:[#allocation2 + $0x34] sm:$0xf] }
 0x18a   : > { %15495 = vmatmul.mubr.bf16.gmra.mxu1 %v14168_v21  ;;  %v4396_v9 = vsel %vm17984_vm0, %v4391_v19, %v4395_v27  ;;  %v4401_v29 = vrot.slane %v4400_v34, 4  ;;  %v4432_v39 = vshrl.u32 %v4309_v18, 16  ;;  %v4435_v24 = vshll.u32 %v4309_v18, 16  ;;  %v4314_v19 = vld [vmem:[#allocation2 + $0x38] sm:$0x1] }
 0x18b   : > { %15562 = vmatprep.mubr.bf16.mxu1 %v16330_v22  ;;  %v4414_v62 = vor.u32 %v4413_v2, %v4410_v7  ;;  %v4423_v53 = vrot.slane %v4421_v58, 4  ;;  %v4429_v50 = vrot.slane %v4427_v60, 5  ;;  %v4441_v43 = vshll.u32 %v4310_v23, 16  ;;  %v16339_v22 = vld [vmem:[%s21689_s2 + $0x170] sm:$0xff]   ;;  %v4315_v60 = vld [vmem:[#allocation2 + $0x3c] sm:$0xf] }
 0x18c   : > { %v4406_v6 = vsel %vm17984_vm0, %v4401_v29, %v4405_v4  ;;  %v4434_v31 = vrot.slane %v4432_v39, 4  ;;  %v4445_v55 = vshrl.u32 %v4310_v23, 16  ;;  %v4437_v36 = vrot.slane %v4435_v24, 5  ;;  %v4312_v4 = vld [vmem:[#allocation2 + $0x30] sm:$0xf] }
 0x18d   : > { %v14289_v54 = vcombine.low %v4396_v9, %v4406_v6  ;;  %v4415_v0 = vrot.slane %v4414_v62, 4  ;;  %v4424_v37 = vor.u32 %v4423_v53, %v4419_v26  ;;  %v4443_v51 = vrot.slane %v4441_v43, 5  ;;  %v16340_v7 = vld [vmem:[%s21689_s2 + $0x1b0] sm:$0xff]   ;;  %v4316_v39 = vld [vmem:[#allocation2 + $0x40] sm:$0xf] }
 0x18e   : > { %v4447_v27 = vrot.slane %v4445_v55, 4  ;;  %v4451_v52 = vshll.u32 %v4311_v38, 16  ;;  %v4438_v44 = vor.u32 %v4437_v36, %v4434_v31  ;;  %v4456_v34 = vshrl.u32 %v4312_v4, 16  ;;  %v4317_v24 = vld [vmem:[#allocation2 + $0x44] sm:$0x1] }
 0x18f   : > { %15610 = vmatprep.mubr.bf16.mxu0 %v14289_v54  ;;  %v4425_v20 = vrot.slane %v4424_v37, 4  ;;  %v4420_v13 = vsel %vm17984_vm0, %v4415_v0, %v4419_v26  ;;  %v4459_v48 = vshll.u32 %v4312_v4, 16  ;;  %v4465_v2 = vshll.u32 %v4313_v45, 16  ;;  %v16337_v0 = vld [vmem:[#allocation2 + $0x30] sm:$0xff]   ;;  %v16347_v4 = vld [vmem:[%s21689_s2 + $0x160] sm:$0xff]  }
 0x190   : > { %v4448_v3 = vor.u32 %v4447_v27, %v4443_v51  ;;  %v4453_v35 = vrot.slane %v4451_v52, 5  ;;  %v4439_v21 = vrot.slane %v4438_v44, 4  ;;  %v4469_v58 = vshrl.u32 %v4313_v45, 16  ;;  %v16344_v52 = vld [vmem:[%s21689_s2 + $0x1a8] sm:$0xff]  }
 0x191   : > { %v4430_v12 = vsel %vm17984_vm0, %v4425_v20, %v4429_v50  ;;  %v4458_v9 = vrot.slane %v4456_v34, 4  ;;  %v4461_v29 = vrot.slane %v4459_v48, 5  ;;  %v4475_v26 = vshll.u32 %v4314_v19, 16  ;;  %v4318_v34 = vld [vmem:[#allocation2 + $0x48] sm:$0xf] }
 0x192   : > { %15563 = vmatmul.mubr.bf16.vlgmr.msra.gmra.mxu1 %v16333_v42  ;;  %v14290_v18 = vcombine.low %v4420_v13, %v4430_v12  ;;  %v4449_v23 = vrot.slane %v4448_v3, 4  ;;  %v4444_v38 = vsel %vm17984_vm0, %v4439_v21, %v4443_v51  ;;  %v4467_v53 = vrot.slane %v4465_v2, 5  ;;  %v16338_v42 = vld [vmem:[#allocation2 + $0x3c] sm:$0xff]   ;;  %v4319_v48 = vld [vmem:[#allocation2 + $0x4c] sm:$0xf] }
 0x193   : > { %15566 = vmatprep.mubr.bf16.mxu1 %v16334_v61  ;;  %15643 = vmatpush3.bf16.msra.mxu1 %v18154_v17  ;;  %v4471_v50 = vrot.slane %v4469_v58, 4  ;;  %v4480_v6 = vshrl.u32 %v4315_v60, 16  ;;  %v16343_v17 = vld [vmem:[%s21689_s2 + $0x168] sm:$0xff]   ;;  %v4462_v43 = vor.u32 %v4461_v29, %v4458_v9  ;;  %v4477_v55 = vrot.slane %v4475_v26, 5  ;;  %v16348_v12 = vld [vmem:[%s21689_s2 + $0x1a0] sm:$0xff]  }
 0x194   : > { %15611 = vmatmul.mubr.bf16.vlgmr.msra.gmra.mxu0 %v14290_v18  ;;  %v4454_v62 = vsel %vm17984_vm0, %v4449_v23, %v4453_v35  ;;  %15644 = vmatprep.subr.bf16.mxu1 %v16339_v22  ;;  %v4483_v54 = vshll.u32 %v4315_v60, 16  ;;  %v4489_v51 = vshll.u32 %v4316_v39, 16  ;;  %v4493_v27 = vshrl.u32 %v4316_v39, 16  ;;  %v16351_v60 = vld [vmem:[%s21689_s2 + $0x158] sm:$0xff]   ;;  %v4321_v39 = vld [vmem:[#allocation2 + $0x54] sm:$0xf] }
 0x195   : > { %15691 = vmatpush3.bf16.msra.mxu0 %v18179_v14  ;;  %v14291_v31 = vcombine.low %v4444_v38, %v4454_v62  ;;  %v4472_v37 = vor.u32 %v4471_v50, %v4467_v53  ;;  %v4482_v36 = vrot.slane %v4480_v6, 4  ;;  %v4463_v20 = vrot.slane %v4462_v43, 4  ;;  %v4323_v6 = vld [vmem:[#allocation2 + $0x5c] sm:$0x1] }
 0x196   : > { %15692 = vmatprep.subr.bf16.mxu0 %v16340_v7  ;;  %v4485_v44 = vrot.slane %v4483_v54, 5  ;;  %v4499_v14 = vshll.u32 %v4317_v24, 16  ;;  %v4491_v3 = vrot.slane %v4489_v51, 5  ;;  %v4495_v35 = vrot.slane %v4493_v27, 4  ;;  %v4322_v24 = vld [vmem:[#allocation2 + $0x58] sm:$0xf] }
 0x197   : > { %15614 = vmatprep.mubr.bf16.mxu0 %v14291_v31  ;;  %15645 = vmatpush3.bf16.msra.mxu1 %v16339_v22  ;;  %v4473_v13 = vrot.slane %v4472_v37, 4  ;;  %v4468_v22 = vsel %vm17984_vm0, %v4463_v20, %v4467_v53  ;;  %v4504_v2 = vshrl.u32 %v4318_v34, 16  ;;  %v4507_v58 = vshll.u32 %v4318_v34, 16  ;;  %v16341_v31 = vld [vmem:[#allocation2 + $0x48] sm:$0xff]  }
 0x198   : > { %15646 = vmatprep.subr.bf16.mxu1 %v16343_v17  ;;  %v4486_v45 = vor.u32 %v4485_v44, %v4482_v36  ;;  %v4501_v61 = vrot.slane %v4499_v14, 5  ;;  %v4496_v19 = vor.u32 %v4495_v35, %v4491_v3  ;;  %v4513_v9 = vshll.u32 %v4319_v48, 16  ;;  %v18311_v34 = vld [vmem:[%s21689_s2 + $0x148] sm:$0xff]  }
 0x199   : > { %15693 = vmatpush3.bf16.msra.mxu0 %v16340_v7  ;;  %v4478_v21 = vsel %vm17984_vm0, %v4473_v13, %v4477_v55  ;;  %v4320_v7 = vld [vmem:[#allocation2 + $0x50] sm:$0x1]  ;;  %v4517_v29 = vshrl.u32 %v4319_v48, 16  ;;  %v4506_v53 = vrot.slane %v4504_v2, 4  ;;  %v4509_v50 = vrot.slane %v4507_v58, 5 }
 0x19a   : > { %15567 = vmatmul.mubr.bf16.gmra.mxu1 %v16337_v0  ;;  %15694 = vmatprep.subr.bf16.mxu0 %v16344_v52  ;;  %v14292_v18 = vcombine.low %v4468_v22, %v4478_v21  ;;  %v4487_v23 = vrot.slane %v4486_v45, 4  ;;  %v4497_v38 = vrot.slane %v4496_v19, 4  ;;  %v4523_v26 = vshll.u32 %v4320_v7, 16  ;;  %v16352_v0 = vld [vmem:[%s21689_s2 + $0x198] sm:$0xff]   ;;  %v16355_v13 = vld [vmem:[%s21689_s2 + $0x150] sm:$0xff]  }
 0x19b   : > { %15570 = vmatprep.mubr.bf16.mxu1 %v16338_v42  ;;  %15647 = vmatpush3.bf16.msra.mxu1 %v16343_v17  ;;  %v4515_v43 = vrot.slane %v4513_v9, 5  ;;  %v4519_v55 = vrot.slane %v4517_v29, 4  ;;  %v4510_v36 = vor.u32 %v4509_v50, %v4506_v53  ;;  %v4528_v51 = vshrl.u32 %v4321_v39, 16  ;;  %v16356_v19 = vld [vmem:[%s21689_s2 + $0x190] sm:$0xff]   ;;  %v4325_v2 = vld [vmem:[#allocation2 + $0x64] sm:$0xf] }
 0x19c   : > { %15648 = vmatprep.subr.bf16.mxu1 %v16347_v4  ;;  %15615 = vmatmul.mubr.bf16.gmra.mxu0 %v14292_v18  ;;  %v4492_v62 = vsel %vm17984_vm0, %v4487_v23, %v4491_v3  ;;  %v4502_v17 = vsel %vm17984_vm0, %v4497_v38, %v4501_v61  ;;  %v4525_v54 = vrot.slane %v4523_v26, 5  ;;  %v4531_v27 = vshll.u32 %v4321_v39, 16  ;;  %v4324_v23 = vld [vmem:[#allocation2 + $0x60] sm:$0xf]  ;;  %v4326_v58 = vld [vmem:[#allocation2 + $0x68] sm:$0x1] }
 0x19d   : > { %15695 = vmatpush3.bf16.msra.mxu0 %v16344_v52  ;;  %v14293_v37 = vcombine.low %v4492_v62, %v4502_v17  ;;  %v4520_v42 = vor.u32 %v4519_v55, %v4515_v43  ;;  %v4537_v20 = vshll.u32 %v4322_v24, 16  ;;  %v4541_v44 = vshrl.u32 %v4322_v24, 16  ;;  %v16342_v52 = vld [vmem:[#allocation2 + $0x54] sm:$0xff]   ;;  %v4327_v53 = vld [vmem:[#allocation2 + $0x6c] sm:$0xf]  ;;  %v16345_v24 = vld [vmem:[#allocation2 + $0x60] sm:$0xff]  }
 0x19e   : > { %15696 = vmatprep.subr.bf16.mxu0 %v16348_v12  ;;  %v4547_v14 = vshll.u32 %v4323_v6, 16  ;;  %v4511_v3 = vrot.slane %v4510_v36, 4  ;;  %v4530_v35 = vrot.slane %v4528_v51, 4  ;;  %v4533_v45 = vrot.slane %v4531_v27, 5  ;;  %v4329_v51 = vld [vmem:[#allocation2 + $0x74] sm:$0x1] }
 0x19f   : > { %15649 = vmatpush3.bf16.msra.mxu1 %v16347_v4  ;;  %15618 = vmatprep.mubr.bf16.mxu0 %v14293_v37  ;;  %v4521_v61 = vrot.slane %v4520_v42, 4  ;;  %v4539_v22 = vrot.slane %v4537_v20, 5  ;;  %v4543_v21 = vrot.slane %v4541_v44, 4  ;;  %v4552_v38 = vshrl.u32 %v4324_v23, 16  ;;  %v18325_v42 = vld [vmem:[%s21689_s2 + $0x140] sm:$0xff]  }
 0x1a0   : > { %15650 = vmatprep.subr.bf16.mxu1 %v16351_v60  ;;  %v4549_v4 = vrot.slane %v4547_v14, 5  ;;  %v4516_v48 = vsel %vm17984_vm0, %v4511_v3, %v4515_v43  ;;  %v4534_v18 = vor.u32 %v4533_v45, %v4530_v35  ;;  %v4555_v9 = vshll.u32 %v4324_v23, 16  ;;  %v16360_v43 = vld [vmem:[%s21689_s2 + $0x188] sm:$0xff]   ;;  %v416_v23 = vld [vmem:[#allocation2 + $0xc0] sm:$0x1] }
 0x1a1   : > { %15697 = vmatpush3.bf16.msra.mxu0 %v16348_v12  ;;  %v4526_v7 = vsel %vm17984_vm0, %v4521_v61, %v4525_v54  ;;  %v4544_v12 = vor.u32 %v4543_v21, %v4539_v22  ;;  %v4561_v39 = vshll.u32 %v4325_v2, 16  ;;  %v4565_v62 = vshrl.u32 %v4325_v2, 16  ;;  %v16346_v54 = vld [vmem:[#allocation2 + $0x6c] sm:$0xff]  }
 0x1a2   : > { %15571 = vmatmul.mubr.bf16.gmra.mxu1 %v16341_v31  ;;  %15698 = vmatprep.subr.bf16.mxu0 %v16352_v0  ;;  %v14294_v29 = vcombine.low %v4516_v48, %v4526_v7  ;;  %v4535_v26 = vrot.slane %v4534_v18, 4  ;;  %v4554_v6 = vrot.slane %v4552_v38, 4  ;;  %v4557_v17 = vrot.slane %v4555_v9, 5  ;;  %v4328_v31 = vld [vmem:[#allocation2 + $0x70] sm:$0xf]  ;;  %v18338_v7 = vld [vmem:[%s21689_s2 + $0x1f8] sm:$0xff]  }
 0x1a3   : > { %15574 = vmatprep.mubr.bf16.mxu1 %v16342_v52  ;;  %15651 = vmatpush3.bf16.msra.mxu1 %v16351_v60  ;;  %v4545_v50 = vrot.slane %v4544_v12, 4  ;;  %v4571_v60 = vshll.u32 %v4326_v58, 16  ;;  %v4563_v37 = vrot.slane %v4561_v39, 5  ;;  %v4567_v36 = vrot.slane %v4565_v62, 4  ;;  %v491_v9 = vld [vmem:[#allocation2 + $0xc0] sm:$0x2] }
 0x1a4   : > { %15652 = vmatprep.subr.bf16.mxu1 %v16355_v13  ;;  %15619 = vmatmul.mubr.bf16.gmra.mxu0 %v14294_v29  ;;  %v4540_v55 = vsel %vm17984_vm0, %v4535_v26, %v4539_v22  ;;  %v4576_v27 = vshrl.u32 %v4327_v53, 16  ;;  %v4558_v20 = vor.u32 %v4557_v17, %v4554_v6  ;;  %v4579_v14 = vshll.u32 %v4327_v53, 16  ;;  %v624_v29 = vld [vmem:[#allocation2 + $0xc0] sm:$0x4]  ;;  %v757_v26 = vld [vmem:[#allocation2 + $0xc0] sm:$0x8] }
 0x1a5   : > { %15699 = vmatpush3.bf16.msra.mxu0 %v16352_v0  ;;  %v4550_v0 = vsel %vm17984_vm0, %v4545_v50, %v4549_v4  ;;  %v4573_v44 = vrot.slane %v4571_v60, 5  ;;  %v4568_v3 = vor.u32 %v4567_v36, %v4563_v37  ;;  %v4585_v45 = vshll.u32 %v4328_v31, 16  ;;  %v16349_v6 = vld [vmem:[#allocation2 + $0x78] sm:$0xff]  }
 0x1a6   : > { %15700 = vmatprep.subr.bf16.mxu0 %v16356_v19  ;;  %v14295_v52 = vcombine.low %v4540_v55, %v4550_v0  ;;  %v4578_v35 = vrot.slane %v4576_v27, 4  ;;  %v4559_v61 = vrot.slane %v4558_v20, 4  ;;  %v4581_v22 = vrot.slane %v4579_v14, 5  ;;  %v4330_v17 = vld [vmem:[#allocation2 + $0x78] sm:$0xf]  ;;  %v18368_v20 = vpop.f32.mrf.mxu0 }
 0x1a7   : > { %15653 = vmatpush3.bf16.msra.mxu1 %v16355_v13  ;;  %v18333_v13 = vld [vmem:[%s21689_s2 + $0x180] sm:$0xff]   ;;  %v4589_v21 = vshrl.u32 %v4328_v31, 16  ;;  %v4595_v4 = vshll.u32 %v4329_v51, 16  ;;  %v4569_v48 = vrot.slane %v4568_v3, 4  ;;  %v4587_v18 = vrot.slane %v4585_v45, 5 }
 0x1a8   : > { %15654 = vmatprep.subr.bf16.mxu1 %v18311_v34  ;;  %15622 = vmatprep.mubr.bf16.mxu0 %v14295_v52  ;;  %v4564_v12 = vsel %vm17984_vm0, %v4559_v61, %v4563_v37  ;;  %v4582_v2 = vor.u32 %v4581_v22, %v4578_v35  ;;  %v417_v39 = vsel %vm16851_vm13, %v17779_v59, %v416_v23  ;;  %v4331_v60 = vld [vmem:[#allocation2 + $0x7c] sm:$0xf]  ;;  %v4600_v31 = vshrl.u32 %v4330_v17, 16  ;;  %v4333_v27 = vld [vmem:[#allocation2 + $0x84] sm:$0xf] }
 0x1a9   : > { %15701 = vmatpush3.bf16.msra.mxu0 %v16356_v19  ;;  %v4591_v58 = vrot.slane %v4589_v21, 4  ;;  %v4597_v38 = vrot.slane %v4595_v4, 5  ;;  %v4574_v19 = vsel %vm17984_vm0, %v4569_v48, %v4573_v44  ;;  %v492_v62 = vsel %vm16863_vm15, %v17782_v11, %v491_v9  ;;  %418 = vst [vmem:[#allocation2 + $0xc0] sm:$0x1] %v417_v39  ;;  %v4334_v0 = vld [vmem:[#allocation2 + $0x88] sm:$0xf]  ;;  %v18374_v4 = vpop.f32.mrf.mxu0 }
 0x1aa   : > { %15575 = vmatmul.mubr.bf16.gmra.mxu1 %v16345_v24  ;;  %15702 = vmatprep.subr.bf16.mxu0 %v16360_v43  ;;  %v625_v53 = vsel %vm16881_vm3, %v567_v25, %v624_v29  ;;  %v4583_v50 = vrot.slane %v4582_v2, 4  ;;  %493 = vst [vmem:[#allocation2 + $0xc0] sm:$0x2] %v492_v62  ;;  %v758_v41 = vsel %vm16896_vm7, %v17788_v40, %v757_v26  ;;  %v4332_v25 = vld [vmem:[#allocation2 + $0x80] sm:$0x1]  ;;  %v4603_v55 = vshll.u32 %v4330_v17, 16 }
 0x1ab   : > { %15578 = vmatprep.mubr.bf16.mxu1 %v16346_v54  ;;  %15655 = vmatpush3.bf16.msra.mxu1 %v18311_v34  ;;  %v14296_v34 = vcombine.low %v4564_v12, %v4574_v19  ;;  %v4592_v24 = vor.u32 %v4591_v58, %v4587_v18  ;;  %626 = vst [vmem:[#allocation2 + $0xc0] sm:$0x4] %v625_v53  ;;  %759 = vst [vmem:[#allocation2 + $0xc0] sm:$0x8] %v758_v41  ;;  %v4609_v54 = vshll.u32 %v4331_v60, 16  ;;  %v18377_v29 = vpop.f32.mrf.mxu0  ;;  %v18379_v19 = vpop.permute.xlu1 %1784  ;;  %v16353_v17 = vld [vmem:[#allocation2 + $0x90] sm:$0xff]  }
 0x1ac   : > { %15656 = vmatprep.subr.bf16.mxu1 %v18325_v42  ;;  %v4613_v37 = vshrl.u32 %v4331_v60, 16  ;;  %v4588_v36 = vsel %vm17984_vm0, %v4583_v50, %v4587_v18  ;;  %v4602_v44 = vrot.slane %v4600_v31, 4  ;;  %v4605_v14 = vrot.slane %v4603_v55, 5  ;;  %v4335_v35 = vld [vmem:[#allocation2 + $0x8c] sm:$0x1] }
 0x1ad   : > { %15703 = vmatpush3.bf16.msra.mxu0 %v16360_v43  ;;  %v4593_v51 = vrot.slane %v4592_v24, 4  ;;  %v4619_v43 = vshll.u32 %v4332_v25, 16  ;;  %v4611_v52 = vrot.slane %v4609_v54, 5  ;;  %v4624_v22 = vshrl.u32 %v4333_v27, 16  ;;  %v1385_v12 = vld [vmem:[#allocation2 + $0xc8] sm:$0x1]  ;;  %v18391_v60 = vpop.f32.mrf.mxu0 }
 0x1ae   : > { %15704 = vmatprep.subr.bf16.mxu0 %v18333_v13  ;;  %15623 = vmatmul.mubr.bf16.gmra.mxu0 %v14296_v34  ;;  %v4615_v3 = vrot.slane %v4613_v37, 4  ;;  %v4627_v21 = vshll.u32 %v4333_v27, 16  ;;  %v4606_v48 = vor.u32 %v4605_v14, %v4602_v44  ;;  %v4633_v23 = vshll.u32 %v4334_v0, 16  ;;  %21760 = vst [vmem:[#allocation7_spill] sm:$0xff] %v18391_v60  ;;  %v4336_v54 = vld [vmem:[#allocation2 + $0x90] sm:$0xf] }
 0x1af   : > { %15657 = vmatpush3.bf16.msra.mxu1 %v18325_v42  ;;  %v4598_v45 = vsel %vm17984_vm0, %v4593_v51, %v4597_v38  ;;  %v4621_v61 = vrot.slane %v4619_v43, 5  ;;  %v4626_v2 = vrot.slane %v4624_v22, 4  ;;  %v4637_v9 = vshrl.u32 %v4334_v0, 16  ;;  %v18400_v31 = vpop.f32.mrf.mxu0  ;;  %v4337_v37 = vld [vmem:[#allocation2 + $0x94] sm:$0xf] }
 0x1b0   : > { %15738 = vmatprep.subr.bf16.mxu1 %v18338_v7  ;;  %v14297_v42 = vcombine.low %v4588_v36, %v4598_v45  ;;  %v4616_v18 = vor.u32 %v4615_v3, %v4611_v52  ;;  %v4629_v58 = vrot.slane %v4627_v21, 5  ;;  %v4643_v38 = vshll.u32 %v4335_v35, 16  ;;  %v4338_v36 = vld [vmem:[#allocation2 + $0x98] sm:$0x1]  ;;  %v4339_v0 = vld [vmem:[#allocation2 + $0x9c] sm:$0xf] }
 0x1b1   : > { %15705 = vmatpush3.bf16.msra.mxu0 %v18333_v13  ;;  %v541_v13 = vld [vmem:[#allocation2 + $0xc0] sm:$0x2]  ;;  %v4607_v39 = vrot.slane %v4606_v48, 4  ;;  %v1386_v53 = vsel %vm16839_vm9, %v18124_v56, %v1385_v12  ;;  %v4635_v41 = vrot.slane %v4633_v23, 5  ;;  %v4639_v59 = vrot.slane %v4637_v9, 4  ;;  %v18404_v44 = vpop.f32.mrf.mxu0 }
 0x1b2   : > { %15579 = vmatmul.mubr.bf16.gmra.mxu1 %v16349_v6  ;;  %15786 = vmatprep.subr.bf16.mxu0 %v18362_v57  ;;  %v690_v26 = vld [vmem:[#allocation2 + $0xc0] sm:$0x4]  ;;  %v4617_v62 = vrot.slane %v4616_v18, 4  ;;  %v542_v34 = vsel %vm16968_vm10, %v17782_v11, %v541_v13  ;;  %v807_v24 = vld [vmem:[#allocation2 + $0xc0] sm:$0x8]  ;;  %v4630_v6 = vor.u32 %v4629_v58, %v4626_v2  ;;  %v4645_v25 = vrot.slane %v4643_v38, 5 }
 0x1b3   : > { %15582 = vmatprep.mubr.bf16.mxu1 %v16350_v15  ;;  %15626 = vmatprep.mubr.bf16.mxu0 %v14297_v42  ;;  %v691_v50 = vsel %vm16990_vm4, %v634_v47, %v690_v26  ;;  %1387 = vst [vmem:[#allocation2 + $0xc8] sm:$0x1] %v1386_v53  ;;  %543 = vst [vmem:[#allocation2 + $0xc0] sm:$0x2] %v542_v34  ;;  %v808_v33 = vsel %vm17004_vm5, %v17788_v40, %v807_v24  ;;  %v16354_v47 = vld [vmem:[#allocation2 + $0x9c] sm:$0xff]   ;;  %v4648_v51 = vshrl.u32 %v4336_v54, 16  ;;  %v18406_v23 = vpop.f32.mrf.mxu0 }
 0x1b4   : > { %692 = vst [vmem:[#allocation2 + $0xc0] sm:$0x4] %v691_v50  ;;  %v4612_v11 = vsel %vm17984_vm0, %v4607_v39, %v4611_v52  ;;  %v4622_v16 = vsel %vm17984_vm0, %v4617_v62, %v4621_v61  ;;  %809 = vst [vmem:[#allocation2 + $0xc0] sm:$0x8] %v808_v33  ;;  %v4631_v15 = vrot.slane %v4630_v6, 4  ;;  %v4640_v55 = vor.u32 %v4639_v59, %v4635_v41  ;;  %v1789_v52 = vpop.permute.xlu1 %1788 }
 0x1b5   : > { %v14298_v56 = vcombine.low %v4612_v11, %v4622_v16  ;;  %v4651_v43 = vshll.u32 %v4336_v54, 16  ;;  %v4657_v27 = vshll.u32 %v4337_v37, 16  ;;  %v4661_v3 = vshrl.u32 %v4337_v37, 16  ;;  %v4340_v45 = vld [vmem:[#allocation2 + $0xa0] sm:$0xf]  ;;  %v18412_v53 = vpop.f32.mrf.mxu0  ;;  %v16357_v16 = vld [vmem:[#allocation2 + $0xa8] sm:$0xff]  }
 0x1b6   : > { %v4636_v40 = vsel %vm17984_vm0, %v4631_v15, %v4635_v41  ;;  %v4641_v14 = vrot.slane %v4640_v55, 4  ;;  %v4667_v35 = vshll.u32 %v4338_v36, 16  ;;  %v4672_v61 = vshrl.u32 %v4339_v0, 16  ;;  %v4341_v48 = vld [vmem:[#allocation2 + $0xa4] sm:$0x1]  ;;  %21761 = vst [vmem:[#allocation8_spill] sm:$0xff] %v18412_v53 }
 0x1b7   : > { %15627 = vmatmul.mubr.bf16.gmra.mxu0 %v14298_v56  ;;  %v4650_v22 = vrot.slane %v4648_v51, 4  ;;  %v4653_v21 = vrot.slane %v4651_v43, 5  ;;  %v4659_v42 = vrot.slane %v4657_v27, 5  ;;  %v4675_v18 = vshll.u32 %v4339_v0, 16  ;;  %v18417_v28 = vpop.f32.mrf.mxu0  ;;  %v16358_v15 = vld [vmem:[#allocation2 + $0xb4] sm:$0xff]  }
 0x1b8   : > { %v4646_v12 = vsel %vm17984_vm0, %v4641_v14, %v4645_v25  ;;  %v4663_v58 = vrot.slane %v4661_v3, 4  ;;  %v4669_v9 = vrot.slane %v4667_v35, 5  ;;  %v4674_v38 = vrot.slane %v4672_v61, 4  ;;  %v4342_v36 = vld [vmem:[#allocation2 + $0xa8] sm:$0xf] }
 0x1b9   : > { %v14299_v13 = vcombine.low %v4636_v40, %v4646_v12  ;;  %v4654_v39 = vor.u32 %v4653_v21, %v4650_v22  ;;  %v4677_v62 = vrot.slane %v4675_v18, 5  ;;  %v4681_v24 = vshll.u32 %v4340_v45, 16  ;;  %v18419_v54 = vpop.f32.mrf.mxu0  ;;  %v4343_v40 = vld [vmem:[#allocation2 + $0xac] sm:$0xf]  ;;  %v4344_v27 = vld [vmem:[#allocation2 + $0xb0] sm:$0x1] }
 0x1ba   : > { %15583 = vmatmul.mubr.bf16.gmra.mxu1 %v16353_v17  ;;  %v1952_v2 = vld [vmem:[#allocation2 + $0xc8] sm:$0x1]  ;;  %v4664_v50 = vor.u32 %v4663_v58, %v4659_v42  ;;  %v4685_v6 = vshrl.u32 %v4340_v45, 16  ;;  %v4691_v41 = vshll.u32 %v4341_v48, 16  ;;  %v4696_v0 = vshrl.u32 %v4342_v36, 16 }
 0x1bb   : > { %15586 = vmatprep.mubr.bf16.mxu1 %v16354_v47  ;;  %v1953_v26 = vsel %vm17936_vm1, %v1789_v52, %v1952_v2  ;;  %v1948_v34 = vld [vmem:[#allocation2 + $0xc0] sm:$0xf]  ;;  %15630 = vmatprep.mubr.bf16.mxu0 %v14299_v13  ;;  %v4655_v33 = vrot.slane %v4654_v39, 4  ;;  %v4678_v11 = vor.u32 %v4677_v62, %v4674_v38  ;;  %v4683_v47 = vrot.slane %v4681_v24, 5  ;;  %v4345_v52 = vld [vmem:[#allocation2 + $0xb4] sm:$0xf]  ;;  %v18427_v3 = vpop.f32.mrf.mxu0 }
 0x1bc   : > { %1954 = vst [vmem:[#allocation2 + $0xc8] sm:$0x1] %v1953_v26  ;;  %v1949_v17 = vsel %vm17546_vm11, %v18379_v19, %v1948_v34  ;;  %v4665_v59 = vrot.slane %v4664_v50, 4  ;;  %v4687_v56 = vrot.slane %v4685_v6, 4  ;;  %v4693_v55 = vrot.slane %v4691_v41, 5 }
 0x1bd   : > { %1950 = vst [vmem:[#allocation2 + $0xc0] sm:$0xf] %v1949_v17  ;;  %v4679_v25 = vrot.slane %v4678_v11, 4  ;;  %v4660_v49 = vsel %vm17984_vm0, %v4655_v33, %v4659_v42  ;;  %v4699_v14 = vshll.u32 %v4342_v36, 16  ;;  %v4705_v45 = vshll.u32 %v4343_v40, 16  ;;  %v18429_v58 = vpop.f32.mrf.mxu0 }
 0x1be   : > { %v4670_v19 = vsel %vm17984_vm0, %v4665_v59, %v4669_v9  ;;  %v4688_v37 = vor.u32 %v4687_v56, %v4683_v47  ;;  %v4709_v61 = vshrl.u32 %v4343_v40, 16  ;;  %v4715_v22 = vshll.u32 %v4344_v27, 16  ;;  %v4346_v21 = vld [vmem:[#allocation2 + $0xb8] sm:$0xf]  ;;  %v4347_v18 = vld [vmem:[#allocation2 + $0xbc] sm:$0x1] }
 0x1bf   : > { %v14300_v51 = vcombine.low %v4660_v49, %v4670_v19  ;;  %v4684_v43 = vsel %vm17984_vm0, %v4679_v25, %v4683_v47  ;;  %v4698_v42 = vrot.slane %v4696_v0, 4  ;;  %v4701_v48 = vrot.slane %v4699_v14, 5  ;;  %21762 = vst [vmem:[#allocation9_spill] sm:$0xff] %v18429_v58  ;;  %v1025_v39 = vld [vmem:[#allocation2 + $0xc4] sm:$0x2]  ;;  %v18433_v41 = vpop.f32.mrf.mxu0 }
 0x1c0   : > { %v4689_v35 = vrot.slane %v4688_v37, 4  ;;  %v4720_v12 = vshrl.u32 %v4345_v52, 16  ;;  %v4723_v2 = vshll.u32 %v4345_v52, 16  ;;  %v4707_v38 = vrot.slane %v4705_v45, 5  ;;  %v1265_v6 = vld [vmem:[#allocation2 + $0xc4] sm:$0x8] }
 0x1c1   : > { %15631 = vmatmul.mubr.bf16.gmra.mxu0 %v14300_v51  ;;  %v4711_v13 = vrot.slane %v4709_v61, 4  ;;  %v4717_v26 = vrot.slane %v4715_v22, 5  ;;  %v4702_v34 = vor.u32 %v4701_v48, %v4698_v42  ;;  %v4729_v33 = vshll.u32 %v4346_v21, 16  ;;  %v5122_v40 = vld [vmem:[#allocation2 + $0x10] sm:$0xf] }
 0x1c2   : > { %15587 = vmatmul.mubr.bf16.gmra.mxu1 %v16357_v16  ;;  %v4694_v9 = vsel %vm17984_vm0, %v4689_v35, %v4693_v55  ;;  %v4722_v50 = vrot.slane %v4720_v12, 4  ;;  %v4725_v24 = vrot.slane %v4723_v2, 5  ;;  %v4733_v11 = vshrl.u32 %v4346_v21, 16  ;;  %v18441_v55 = vpop.f32.mrf.mxu0  ;;  %v5123_v14 = vld [vmem:[#allocation2 + $0x14] sm:$0x1]  ;;  %v1787_v2 = vpop.permute.xlu0 %1786 }
 0x1c3   : > { %15590 = vmatprep.mubr.bf16.mxu1 %v16358_v15  ;;  %v14301_v62 = vcombine.low %v4684_v43, %v4694_v9  ;;  %v4712_v17 = vor.u32 %v4711_v13, %v4707_v38  ;;  %v4739_v16 = vshll.u32 %v4347_v18, 16  ;;  %v4703_v59 = vrot.slane %v4702_v34, 4  ;;  %v16518_v15 = vld [vmem:[%s16791_s29 + $0x1c] sm:$0xf]  ;;  %v4350_v12 = vld [vmem:[#allocation2 + $0xc8] sm:$0x1] }
 0x1c4   : > { %v4726_v47 = vor.u32 %v4725_v24, %v4722_v50  ;;  %v1026_v56 = vsel %vm16863_vm15, %v17834_v1, %v1025_v39  ;;  %v1266_v25 = vsel %vm16896_vm7, %v16518_v15, %v1265_v6  ;;  %v4731_v19 = vrot.slane %v4729_v33, 5  ;;  %v18443_v51 = vpop.f32.mrf.mxu0  ;;  %v4348_v52 = vld [vmem:[#allocation2 + $0xc0] sm:$0xf]  ;;  %v5121_v6 = vld [vmem:[#allocation2 + $0xc] sm:$0xe] }
 0x1c5   : > { %15634 = vmatprep.mubr.bf16.mxu0 %v14301_v62  ;;  %v4713_v49 = vrot.slane %v4712_v17, 4  ;;  %v4735_v37 = vrot.slane %v4733_v11, 4  ;;  %1027 = vst [vmem:[#allocation2 + $0xc4] sm:$0x2] %v1026_v56  ;;  %1267 = vst [vmem:[#allocation2 + $0xc4] sm:$0x8] %v1266_v25  ;;  %v4708_v43 = vsel %vm17984_vm0, %v4703_v59, %v4707_v38 }
 0x1c6   : > { %v4741_v36 = vrot.slane %v4739_v16, 5  ;;  %v4727_v27 = vrot.slane %v4726_v47, 4  ;;  %v18449_v35 = vpop.f32.mrf.mxu0  ;;  %v4744_v61 = vshrl.u32 %v4348_v52, 16  ;;  %v4747_v22 = vshll.u32 %v4348_v52, 16  ;;  %v5124_v11 = vld [vmem:[#allocation2 + $0x18] sm:$0xe] }
 0x1c7   : > { %v4718_v46 = vsel %vm17984_vm0, %v4713_v49, %v4717_v26  ;;  %v4736_v5 = vor.u32 %v4735_v37, %v4731_v19  ;;  %21763 = vst [vmem:[#allocation10_spill] sm:$0xff] %v18449_v35  ;;  %v5251_v21 = vrot.slane %v5122_v40, 5  ;;  %v5254_v26 = vrot.slane %v5123_v14, 5  ;;  %v5125_v59 = vld [vmem:[#allocation2 + $0x1c] sm:$0xf] }
 0x1c8   : > { %v14302_v0 = vcombine.low %v4708_v43, %v4718_v46  ;;  %v18451_v42 = vpop.f32.mrf.mxu0  ;;  %v4732_v48 = vsel %vm17984_vm0, %v4727_v27, %v4731_v19  ;;  %v4746_v50 = vrot.slane %v4744_v61, 4  ;;  %v4749_v24 = vrot.slane %v4747_v22, 5  ;;  %v5126_v47 = vld [vmem:[#allocation2 + $0x20] sm:$0x1]  ;;  %v18475_v52 = vld [vmem:[#allocation2 + $0x30] sm:$0xe] }
 0x1c9   : > { %v4737_v45 = vrot.slane %v4736_v5, 4  ;;  %v5253_v17 = vrot.slane %v5251_v21, 4  ;;  %v4763_v33 = vshll.u32 %v4350_v12, 16  ;;  %v14313_v49 = vrot.slane %v5121_v6, 9  ;;  %v5132_v12 = vld [vmem:[#allocation2 + $0x38] sm:$0x1] }
 0x1ca   : > { %15635 = vmatmul.mubr.bf16.gmra.mxu0 %v14302_v0  ;;  %v18457_v39 = vpop.f32.mrf.mxu0  ;;  %v4750_v8 = vor.u32 %v4749_v24, %v4746_v50  ;;  %v5258_v40 = vrot.slane %v5125_v59, 5  ;;  %v5261_v43 = vrot.slane %v5126_v47, 5  ;;  %v14315_v46 = vrot.slane %v5127_v30, 9 }
 0x1cb   : > { %v4742_v18 = vsel %vm17984_vm0, %v4737_v45, %v4741_v36  ;;  %v5255_v19 = vsel %vm18028_vm12, %v5253_v17, %v5254_v26  ;;  %v4765_v37 = vrot.slane %v4763_v33, 5  ;;  %v14314_v36 = vrot.slane %v5124_v11, 9  ;;  %v18492_v11 = vld [vmem:[#allocation2 + $0x4c] sm:$0xf] }
 0x1cc   : > { %v14303_v9 = vcombine.low %v4732_v48, %v4742_v18  ;;  %v1073_v38 = vld [vmem:[#allocation2 + $0xc4] sm:$0x2]  ;;  %v1313_v13 = vld [vmem:[#allocation2 + $0xc4] sm:$0x8]  ;;  %v18464_v16 = vpop.f32.mrf.mxu0  ;;  %v4751_v0 = vrot.slane %v4750_v8, 4  ;;  %v5252_v61 = vsel %vm18028_vm12, %v14313_v49, %v5251_v21  ;;  %v5260_v48 = vrot.slane %v5258_v40, 4 }
 0x1cd   : > { %v1074_v62 = vsel %vm16968_vm10, %v17834_v1, %v1073_v38  ;;  %v1314_v34 = vsel %vm17004_vm5, %v16518_v15, %v1313_v13  ;;  %v5128_v1 = vld [vmem:[#allocation2 + $0x28] sm:$0xf]  ;;  %v5129_v15 = vld [vmem:[#allocation2 + $0x2c] sm:$0x1]  ;;  %v18479_v18 = vld [vmem:[#allocation2 + $0x34] sm:$0xf]  ;;  %v14345_v38 = vcombine.low %v5252_v61, %v5255_v19 }
 0x1ce   : > { %15638 = vmatprep.mubr.bf16.mxu0 %v14303_v9  ;;  %1075 = vst [vmem:[#allocation2 + $0xc4] sm:$0x2] %v1074_v62  ;;  %1315 = vst [vmem:[#allocation2 + $0xc4] sm:$0x8] %v1314_v34  ;;  %v18467_v56 = vpop.f32.mrf.mxu0  ;;  %v5265_v27 = vrot.slane %v5128_v1, 5  ;;  %v5268_v14 = vrot.slane %v5129_v15, 5  ;;  %v5262_v6 = vsel %vm18028_vm12, %v5260_v48, %v5261_v43 }
 0x1cf   : > { %1951 = vst.msk [vmem:[#allocation2 + $0xc4] sm:$0xf] %vm1838_vm8, %v1787_v2  ;;  %21764 = vst [vmem:[#allocation11_spill] sm:$0xff] %v18467_v56  ;;  %v18481_v2 = vld [vmem:[#allocation2 + $0x3c] sm:$0xe]  ;;  %v14316_v33 = vrot.slane %v18475_v52, 9 }
 0x1d0   : > { %v18469_v25 = vpop.f32.mrf.mxu0  ;;  %v18485_v62 = vld [vmem:[#allocation2 + $0x40] sm:$0xf]  ;;  %v5135_v34 = vld [vmem:[#allocation2 + $0x44] sm:$0x1]  ;;  %v5267_v17 = vrot.slane %v5265_v27, 4  ;;  %v5272_v47 = vrot.slane %v18479_v18, 5 }
 0x1d1   : > { %v5275_v30 = vrot.slane %v5132_v12, 5  ;;  %v14317_v1 = vrot.slane %v18481_v2, 9  ;;  %v5279_v15 = vrot.slane %v18485_v62, 5  ;;  %v5282_v49 = vrot.slane %v5135_v34, 5  ;;  %v16369_v19 = vld [vmem:[%s21689_s2 + $0x1f0] sm:$0xff]   ;;  %v21875_v63 = vld [vmem:[#allocation10_spill] sm:$0xff] }
 0x1d2   : > { %v18473_v5 = vpop.f32.mrf.mxu0  ;;  %v5269_v8 = vsel %vm18028_vm12, %v5267_v17, %v5268_v14  ;;  %v18502_v43 = vld [vmem:[#allocation2 + $0x48] sm:$0xe]  ;;  %v18504_v52 = vld [vmem:[#allocation2 + $0x50] sm:$0x1]  ;;  %v5259_v14 = vsel %vm18028_vm12, %v14314_v36, %v5258_v40  ;;  %v21702_v48 = vrot.slane %v18492_v11, 5  ;;  %v5266_v2 = vsel %vm18028_vm12, %v14315_v46, %v5265_v27  ;;  %v16364_v40 = vld [vmem:[#allocation2 + $0x18] sm:$0xff]  }
 0x1d3   : > { %21765 = vst [vmem:[#allocation12_spill] sm:$0xff] %v18473_v5  ;;  %v18513_v18 = vld [vmem:[#allocation2 + $0x54] sm:$0xe]  ;;  %v14346_v12 = vcombine.low %v5259_v14, %v5262_v6  ;;  %v5141_v62 = vld [vmem:[#allocation2 + $0x5c] sm:$0x1]  ;;  %v14318_v46 = vrot.slane %v18502_v43, 9 }
 0x1d4   : > { %v18483_v9 = vpop.f32.mrf.mxu0  ;;  %v5289_v27 = vrot.slane %v18504_v52, 5  ;;  %v14319_v6 = vrot.slane %v18513_v18, 9  ;;  %v18537_v43 = vld [vmem:[#allocation2 + $0x60] sm:$0xe]  ;;  %v18539_v52 = vld [vmem:[#allocation2 + $0x64] sm:$0xf] }
 0x1d5   : > { %21766 = vst [vmem:[#allocation13_spill] sm:$0xff] %v18483_v9  ;;  %v18547_v18 = vld [vmem:[#allocation2 + $0x6c] sm:$0xe]  ;;  %vm8132_vm6 = vcmask 1043456   ;;  %vm8138_vm9 = vcmask 1040384  }
 0x1d6   : > { %v16361_v45 = vld [vmem:[#allocation2 + $0xc0] sm:$0xff]   ;;  %v18487_v50 = vpop.f32.mrf.mxu0  ;;  %vm21911_vm13 = vsmask.f32 7938  ;;  %vm21914_vm3 = vsmask.f32 256 }
 0x1d7   : > { %v4349_v22 = vld [vmem:[#allocation2 + $0xc4] sm:$0xf]  ;;  %15591 = vmatmul.mubr.bf16.gmra.mxu1 %v16361_v45  ;;  %21767 = vst [vmem:[#allocation14_spill] sm:$0xff] %v18487_v50  ;;  %vm19678_vm15 = vmand %vm8132_vm6, %vm21911_vm13 }
 0x1d8   : > { %v4753_v13 = vshll.u32 %v4349_v22, 16  ;;  %v4757_v26 = vshrl.u32 %v4349_v22, 16  ;;  %15658 = vmatprep.mubr.bf16.mxu1 %v14345_v38  ;;  %v18517_v38 = vld [vmem:[#allocation2 + $0x58] sm:$0xf]  ;;  %vm19691_vm7 = vmand %vm8138_vm9, %vm21914_vm3 }
 0x1d9   : > { %v5293_v17 = vrot.slane %v18517_v38, 5  ;;  %v16367_v38 = vld [vmem:[#allocation2 + $0x24] sm:$0xff]  }
 0x1da   : > { %v4755_v21 = vrot.slane %v4753_v13, 5  ;;  %v4759_v24 = vrot.slane %v4757_v26, 4 }
 0x1db   : > { %v18506_v45 = vpop.f32.mrf.mxu0 }
 0x1dc   : > { %v4760_v59 = vor.u32 %v4759_v24, %v4755_v21  ;;  %21768 = vst [vmem:[#allocation15_spill] sm:$0xff] %v18506_v45  ;;  %v4756_v61 = vsel %vm17984_vm0, %v4751_v0, %v4755_v21  ;;  %v14347_v0 = vcombine.low %v5266_v2, %v5269_v8  ;;  %v5274_v21 = vrot.slane %v5272_v47, 4  ;;  %v16377_v2 = vld [vmem:[%s21689_s2 + $0x1e0] sm:$0xff]  }
 0x1dd   : > { %v18519_v13 = vpop.f32.mrf.mxu0  ;;  %v5281_v24 = vrot.slane %v5279_v15, 4 }
 0x1de   : > { %v4761_v22 = vrot.slane %v4760_v59, 4  ;;  %21769 = vst [vmem:[#allocation16_spill] sm:$0xff] %v18519_v13  ;;  %v5296_v59 = vrot.slane %v5141_v62, 5  ;;  %v5276_v8 = vsel %vm18028_vm12, %v5274_v21, %v5275_v30  ;;  %v5273_v30 = vsel %vm18028_vm12, %v14316_v33, %v5272_v47  ;;  %v16370_v33 = vld [vmem:[%s21689_s2 + $0x230] sm:$0xff]  }
 0x1df   : > { %15659 = vmatmul.mubr.bf16.vlgmr.msra.gmra.mxu1 %v14346_v12  ;;  %v18523_v36 = vpop.f32.mrf.mxu0  ;;  %v5283_v14 = vsel %vm18028_vm12, %v5281_v24, %v5282_v49  ;;  %v18549_v12 = vld [vmem:[#allocation2 + $0x70] sm:$0xf]  ;;  %v5295_v62 = vrot.slane %v5293_v17, 4  ;;  %v21705_v49 = vrot.slane %v18539_v52, 5 }
 0x1e0   : > { %v4766_v26 = vsel %vm17984_vm0, %v4761_v22, %v4765_v37  ;;  %21770 = vst [vmem:[#allocation17_spill] sm:$0xff] %v18523_v36  ;;  %15662 = vmatprep.mubr.bf16.mxu1 %v14347_v0  ;;  %15739 = vmatpush3.bf16.msra.mxu1 %v18338_v7  ;;  %v5288_v37 = vrot.slane %v21702_v48, 4  ;;  %v16373_v7 = vld [vmem:[%s21689_s2 + $0x1e8] sm:$0xff]   ;;  %v5280_v0 = vsel %vm18028_vm12, %v14317_v1, %v5279_v15 }
 0x1e1   : > { %v14304_v34 = vcombine.low %v4756_v61, %v4766_v26  ;;  %15740 = vmatprep.subr.bf16.mxu1 %v16369_v19  ;;  %v18541_v61 = vld [vmem:[#allocation2 + $0x68] sm:$0x1]  ;;  %v18543_v22 = vpop.f32.mrf.mxu0  ;;  %v14348_v26 = vcombine.low %v5273_v30, %v5276_v8  ;;  %v18568_v47 = vrot.slane %v21705_v49, 4  ;;  %v18576_v30 = vld [vmem:[#allocation2 + $0x78] sm:$0xe]  ;;  %v5297_v21 = vsel %vm18028_vm12, %v5295_v62, %v5296_v59 }
 0x1e2   : > { %21771 = vst [vmem:[#allocation18_spill] sm:$0xff] %v18543_v22  ;;  %v5290_v49 = vsel %vm18028_vm12, %v5288_v37, %v5289_v27  ;;  %v18601_v37 = vld [vmem:[#allocation2 + $0x8c] sm:$0x1]  ;;  %v5294_v15 = vsel %vm18028_vm12, %v14319_v6, %v5293_v17  ;;  %v16385_v17 = vld [vmem:[%s21689_s2 + $0x1d0] sm:$0xff]  }
 0x1e3   : > { %15639 = vmatmul.mubr.bf16.gmra.mxu0 %v14304_v34  ;;  %v14349_v34 = vcombine.low %v5280_v0, %v5283_v14  ;;  %v5147_v14 = vld [vmem:[#allocation2 + $0x74] sm:$0x1]  ;;  %v18580_v0 = vld [vmem:[#allocation2 + $0x88] sm:$0xf] }
 0x1e4   : > { %15706 = vmatprep.mubr.bf16.mxu0 %v16364_v40  ;;  %15741 = vmatpush3.bf16.msra.mxu1 %v16369_v19  ;;  %v16381_v19 = vld [vmem:[%s21689_s2 + $0x1d8] sm:$0xff]   ;;  %v5310_v56 = vrot.slane %v5147_v14, 5  ;;  %v5324_v14 = vrot.slane %v18601_v37, 5  ;;  %v18641_v37 = vld [vmem:[#allocation2 + $0xa0] sm:$0xf] }
 0x1e5   : > { %15742 = vmatprep.subr.bf16.mxu1 %v16373_v7 }
 0x1e7   : > { %15663 = vmatmul.mubr.bf16.gmra.mxu1 %v14348_v26  ;;  %v18578_v26 = vld [vmem:[#allocation2 + $0x7c] sm:$0xf] }
 0x1e8   : > { %15666 = vmatprep.mubr.bf16.mxu1 %v14349_v34  ;;  %15743 = vmatpush3.bf16.msra.mxu1 %v16373_v7  ;;  %v18593_v7 = vld [vmem:[#allocation2 + $0x84] sm:$0xe]  ;;  %v21707_v22 = vrot.slane %v18578_v26, 5 }
 0x1e9   : > { %v18561_v24 = vpop.f32.mrf.mxu0  ;;  %15744 = vmatprep.subr.bf16.mxu1 %v16377_v2 }
 0x1ea   : > { %21772 = vst [vmem:[#allocation19_spill] sm:$0xff] %v18561_v24  ;;  %v15468_v48 = vpop.f32.mrf.mxu1 }
 0x1eb   : > { %v3194_v8 = vadd.f32 %v15468_v48, %v18368_v20  ;;  %v18582_v40 = vpop.f32.mrf.mxu0  ;;  %15707 = vmatmul.mubr.bf16.vlgmr.msra.gmra.mxu0 %v16367_v38  ;;  %v16374_v20 = vld [vmem:[%s21689_s2 + $0x228] sm:$0xff]   ;;  %v18591_v48 = vld [vmem:[#allocation2 + $0x80] sm:$0x1]  ;;  %v21774_v38 = vrot.slane %v18492_v11, 5  ;;  %v14351_v11 = vcombine.low %v5294_v15, %v5297_v21  ;;  %v18639_v21 = vld [vmem:[#allocation2 + $0x9c] sm:$0xe] }
 0x1ec   : > { %21773 = vst [vmem:[#allocation20_spill] sm:$0xff] %v18582_v40  ;;  %v3065_v1 = vpop.f32.mrf.mxu1  ;;  %15787 = vmatpush3.bf16.msra.mxu0 %v18362_v57  ;;  %15710 = vmatprep.mubr.bf16.mxu0 %v16368_v32  ;;  %v5317_v6 = vrot.slane %v18591_v48, 5 }
 0x1ed   : > { %v3192_v34 = vadd.f32 %v3065_v1, %v18374_v4  ;;  %v5287_v27 = vsel %vm18028_vm12, %v14318_v46, %v21774_v38  ;;  %v18603_v59 = vpop.f32.mrf.mxu0  ;;  %15788 = vmatprep.subr.bf16.mxu0 %v16370_v33  ;;  %v21706_v4 = vrot.slane %v18580_v0, 5  ;;  %15745 = vmatpush3.bf16.msra.mxu1 %v16377_v2  ;;  %v16371_v46 = vld [vmem:[#allocation2 + $0x3c] sm:$0xff]   ;;  %v21777_v38 = vrot.slane %v18549_v12, 5 }
 0x1ee   : > { %21775 = vst [vmem:[#allocation21_spill] sm:$0xff] %v18603_v59  ;;  %v15469_v62 = vpop.f32.mrf.mxu1  ;;  %v14350_v57 = vcombine.low %v5287_v27, %v5290_v49  ;;  %15746 = vmatprep.subr.bf16.mxu1 %v16381_v19  ;;  %v16378_v2 = vld [vmem:[%s21689_s2 + $0x220] sm:$0xff]   ;;  %v5316_v49 = vrot.slane %v21707_v22, 4  ;;  %v18628_v27 = vld [vmem:[#allocation2 + $0x90] sm:$0xe] }
 0x1ef   : > { %v3195_v32 = vadd.f32 %v15469_v62, %v18377_v29  ;;  %v18610_v1 = vpop.f32.mrf.mxu0  ;;  %v5309_v50 = vrot.slane %v21777_v38, 4  ;;  %v16372_v29 = vld [vmem:[#allocation2 + $0x48] sm:$0xff]   ;;  %v5323_v15 = vrot.slane %v21706_v4, 4  ;;  %v18632_v62 = vld [vmem:[#allocation2 + $0x98] sm:$0x1]  ;;  %v21779_v4 = vrot.slane %v18541_v61, 5 }
 0x1f0   : > { %21776 = vst [vmem:[#allocation22_spill] sm:$0xff] %v18610_v1  ;;  %15789 = vmatpush3.bf16.msra.mxu0 %v16370_v33  ;;  %15667 = vmatmul.mubr.bf16.gmra.mxu1 %v14350_v57  ;;  %v18630_v33 = vld [vmem:[#allocation2 + $0x94] sm:$0xf]  ;;  %v16389_v38 = vld [vmem:[%s21689_s2 + $0x1c8] sm:$0xff]   ;;  %v21782_v61 = vrot.slane %v18537_v43, 9  ;;  %v18672_v43 = vld [vmem:[%s21689_s2 + $0x1c0] sm:$0xff]  }
 0x1f1   : > { %15790 = vmatprep.subr.bf16.mxu0 %v16374_v20  ;;  %15670 = vmatprep.mubr.bf16.mxu1 %v14351_v11  ;;  %v5304_v22 = vsel %vm18028_vm12, %v18568_v47, %v21779_v4  ;;  %v5311_v1 = vsel %vm18028_vm12, %v5309_v50, %v5310_v56  ;;  %v21781_v11 = vrot.slane %v18539_v52, 5  ;;  %v5159_v47 = vld [vmem:[#allocation2 + $0xa4] sm:$0x1]  ;;  %v21783_v56 = vrot.slane %v18549_v12, 5 }
 0x1f2   : > { %15747 = vmatpush3.bf16.msra.mxu1 %v16381_v19  ;;  %v21784_v50 = vrot.slane %v18547_v18, 9  ;;  %v5331_v12 = vrot.slane %v18632_v62, 5  ;;  %v5335_v18 = vrot.slane %v18641_v37, 5  ;;  %v5338_v58 = vrot.slane %v5159_v47, 5  ;;  %v18697_v47 = vld [vmem:[#allocation2 + $0xb4] sm:$0xe] }
 0x1f3   : > { %15711 = vmatmul.mubr.bf16.gmra.mxu0 %v16371_v46  ;;  %15748 = vmatprep.subr.bf16.mxu1 %v16385_v17  ;;  %v5301_v46 = vsel %vm18028_vm12, %v21782_v61, %v21781_v11  ;;  %v18678_v11 = vld [vmem:[#allocation2 + $0xac] sm:$0xf]  ;;  %v5162_v61 = vld [vmem:[#allocation2 + $0xb0] sm:$0x1]  ;;  %v5318_v62 = vsel %vm18028_vm12, %v5316_v49, %v5317_v6  ;;  %v18693_v37 = vsel %vm18028_vm12, %v5323_v15, %v5324_v14  ;;  %v21787_v6 = vrot.slane %v18578_v26, 5 }
 0x1f4   : > { %v15516_v48 = vpop.f32.mrf.mxu0  ;;  %15714 = vmatprep.mubr.bf16.mxu0 %v16372_v29  ;;  %15791 = vmatpush3.bf16.msra.mxu0 %v16374_v20  ;;  %v5328_v20 = vrot.slane %v18630_v33, 5  ;;  %v14352_v29 = vcombine.low %v5301_v46, %v5304_v22  ;;  %v16375_v33 = vld [vmem:[#allocation2 + $0x54] sm:$0xff]   ;;  %v18695_v46 = vld [vmem:[#allocation2 + $0xa8] sm:$0xe]  ;;  %v5345_v53 = vrot.slane %v5162_v61, 5  ;;  %v21788_v49 = vrot.slane %v18576_v30, 9 }
 0x1f5   : > { %v18637_v35 = vadd.f32 %v15516_v48, %v3194_v8  ;;  %v16382_v8 = vld [vmem:[%s21689_s2 + $0x218] sm:$0xff]   ;;  %v5308_v48 = vsel %vm18028_vm12, %v21784_v50, %v21783_v56  ;;  %15792 = vmatprep.subr.bf16.mxu0 %v16378_v2  ;;  %v14325_v50 = vrot.slane %v18639_v21, 9  ;;  %v16386_v22 = vld [vmem:[%s21689_s2 + $0x210] sm:$0xff]   ;;  %v5337_v21 = vrot.slane %v5335_v18, 4 }
 0x1f6   : > { %v3662_v57 = vpop.f32.mrf.mxu0  ;;  %15749 = vmatpush3.bf16.msra.mxu1 %v16385_v17  ;;  %v5330_v56 = vrot.slane %v5328_v20, 4  ;;  %v16376_v17 = vld [vmem:[#allocation2 + $0x60] sm:$0xff]   ;;  %v5315_v15 = vsel %vm18028_vm12, %v21788_v49, %v21787_v6  ;;  %v21789_v14 = vrot.slane %v18580_v0, 5  ;;  %v16379_v6 = vld [vmem:[#allocation2 + $0x6c] sm:$0xff]  }
 0x1f7   : > { %21778 = vst [vmem:[#allocation23_spill] sm:$0xff] %v18637_v35  ;;  %v18653_v19 = vadd.f32 %v3662_v57, %v3192_v34  ;;  %v14324_v34 = vrot.slane %v18628_v27, 9  ;;  %v14353_v57 = vcombine.low %v5308_v48, %v5311_v1  ;;  %v18680_v27 = vpop.f32.mrf.mxu1  ;;  %v18687_v1 = vld [vmem:[#allocation2 + $0xb8] sm:$0xf]  ;;  %15750 = vmatprep.subr.bf16.mxu1 %v16389_v38  ;;  %v14354_v30 = vcombine.low %v5315_v15, %v5318_v62 }
 0x1f8   : > { %v15517_v4 = vpop.f32.mrf.mxu0  ;;  %21786 = vst [vmem:[#allocation26_spill] sm:$0xff] %v18680_v27  ;;  %15793 = vmatpush3.bf16.msra.mxu0 %v16378_v2  ;;  %v21709_v48 = vrot.slane %v18687_v1, 5  ;;  %15671 = vmatmul.mubr.bf16.gmra.mxu1 %v14352_v29  ;;  %v21790_v27 = vrot.slane %v18593_v7, 9  ;;  %v18726_v7 = vsel %vm18028_vm12, %v5330_v56, %v5331_v12  ;;  %v14327_v56 = vrot.slane %v18697_v47, 9 }
 0x1f9   : > { %21780 = vst [vmem:[#allocation24_spill] sm:$0xff] %v18653_v19  ;;  %v18674_v52 = vadd.f32 %v15517_v4, %v3195_v32  ;;  %v21708_v32 = vrot.slane %v18678_v11, 5  ;;  %v5165_v4 = vld [vmem:[#allocation2 + $0xbc] sm:$0x1]  ;;  %15794 = vmatprep.subr.bf16.mxu0 %v16382_v8  ;;  %15674 = vmatprep.mubr.bf16.mxu1 %v14353_v57  ;;  %v18721_v0 = vsel %vm18028_vm12, %v14324_v34, %v5328_v20  ;;  %v5167_v34 = vld [vmem:[#allocation2 + $0xc4] sm:$0xf] }
 0x1fa   : > { %v5322_v29 = vsel %vm18028_vm12, %v21790_v27, %v21789_v14  ;;  %v5351_v60 = vrot.slane %v21709_v48, 4  ;;  %15751 = vmatpush3.bf16.msra.mxu1 %v16389_v38  ;;  %v18716_v61 = vpop.f32.mrf.mxu0  ;;  %v18730_v38 = vsel %vm18028_vm12, %v14325_v50, %v5335_v18  ;;  %v18734_v27 = vsel %vm18028_vm12, %v5337_v21, %v5338_v58  ;;  %v5168_v20 = vld [vmem:[#allocation2 + $0xc8] sm:$0x1]  ;;  %v6166_v50 = vld [vmem:[#allocation2 + $0x18] sm:$0xf] }
 0x1fb   : > { %21785 = vst [vmem:[#allocation25_spill] sm:$0xff] %v18674_v52  ;;  %v5344_v2 = vrot.slane %v21708_v32, 4  ;;  %v5352_v32 = vrot.slane %v5165_v4, 5  ;;  %21791 = vst [vmem:[#allocation27_spill] sm:$0xff] %v18716_v61  ;;  %15715 = vmatmul.mubr.bf16.gmra.mxu0 %v16375_v33  ;;  %v14355_v26 = vcombine.low %v5322_v29, %v18693_v37  ;;  %15752 = vmatprep.subr.bf16.mxu1 %v18672_v43  ;;  %v18736_v33 = vld [vmem:[#allocation2 + $0xc0] sm:$0xe] }
 0x1fc   : > { %15718 = vmatprep.mubr.bf16.mxu0 %v16376_v17  ;;  %15795 = vmatpush3.bf16.msra.mxu0 %v16382_v8  ;;  %v14326_v8 = vrot.slane %v18695_v46, 9  ;;  %v16390_v18 = vld [vmem:[%s21689_s2 + $0x208] sm:$0xff]   ;;  %v5356_v58 = vrot.slane %v5167_v34, 5  ;;  %v6167_v37 = vld [vmem:[#allocation2 + $0x1c] sm:$0xf]  ;;  %v6247_v4 = vshrl.u32 %v6166_v50, 16  ;;  %v14356_v61 = vcombine.low %v18721_v0, %v18726_v7 }
 0x1fd   : > { %15796 = vmatprep.subr.bf16.mxu0 %v16386_v22  ;;  %v18741_v12 = vsel %vm18028_vm12, %v5344_v2, %v5345_v53  ;;  %v18749_v17 = vsel %vm18028_vm12, %v5351_v60, %v5352_v32  ;;  %v6168_v21 = vld [vmem:[#allocation2 + $0x20] sm:$0x1]  ;;  %v6250_v46 = vshll.u32 %v6166_v50, 16  ;;  %v14328_v49 = vrot.slane %v18736_v33, 9  ;;  %v18778_v0 = vld [vmem:[#allocation2 + $0x18] sm:$0xe] }
 0x1fe   : > { %v15472_v57 = vpop.f32.mrf.mxu1  ;;  %15753 = vmatpush3.bf16.msra.mxu1 %v18672_v43  ;;  %v5359_v15 = vrot.slane %v5168_v20, 5  ;;  %v6256_v14 = vshll.u32 %v6167_v37, 16  ;;  %v6260_v29 = vshrl.u32 %v6167_v37, 16  ;;  %v16394_v60 = vld [vmem:[%s21689_s2 + $0x200] sm:$0xff]   ;;  %v5358_v32 = vrot.slane %v5356_v58, 4  ;;  %v16380_v37 = vld [vmem:[#allocation2 + $0x78] sm:$0xff]  }
 0x1ff   : > { %v3198_v53 = vadd.f32 %v15472_v57, %v18400_v31  ;;  %v6249_v34 = vrot.slane %v6247_v4, 4  ;;  %v6252_v50 = vrot.slane %v6250_v46, 5  ;;  %v6266_v48 = vshll.u32 %v6168_v21, 16  ;;  %v6986_v7 = vld [vmem:[#allocation2 + $0x20] sm:$0x1] }
 0x200   : > { %v3081_v62 = vpop.f32.mrf.mxu1  ;;  %15797 = vmatpush3.bf16.msra.mxu0 %v16386_v22  ;;  %15675 = vmatmul.mubr.bf16.gmra.mxu1 %v14354_v30  ;;  %v18757_v31 = vrot.slane %v6256_v14, 5  ;;  %v6262_v57 = vrot.slane %v6260_v29, 4  ;;  %v21792_v22 = vrot.slane %v18678_v11, 5  ;;  %v18780_v11 = vld [vmem:[#allocation2 + $0x1c] sm:$0xf]  ;;  %v18798_v14 = vsel %vm18028_vm12, %v14328_v49, %v5356_v58 }
 0x201   : > { %15798 = vmatprep.subr.bf16.mxu0 %v16390_v18  ;;  %v3196_v33 = vadd.f32 %v3081_v62, %v18404_v44  ;;  %15678 = vmatprep.mubr.bf16.mxu1 %v14355_v26  ;;  %v6253_v30 = vor.u32 %v6252_v50, %v6249_v34  ;;  %v21794_v44 = vrot.slane %v18687_v1, 5  ;;  %v18802_v29 = vsel %vm18028_vm12, %v5358_v32, %v5359_v15  ;;  %v6171_v34 = vld [vmem:[#allocation2 + $0x2c] sm:$0x1]  ;;  %v16383_v15 = vld [vmem:[#allocation2 + $0x84] sm:$0xff]  }
 0x202   : > { %v15473_v2 = vpop.f32.mrf.mxu1  ;;  %v15520_v47 = vpop.f32.mrf.mxu0  ;;  %v18767_v21 = vsel %vm18028_vm12, %v14326_v8, %v21792_v22  ;;  %v6263_v26 = vor.u32 %v6262_v57, %v18757_v31  ;;  %v7117_v57 = vrot.slane %v6986_v7, 5  ;;  %v16384_v7 = vld [vmem:[#allocation2 + $0x90] sm:$0xff]   ;;  %v21803_v40 = vcombine.low %v18798_v14, %v18802_v29 }
 0x203   : > { %v3199_v20 = vadd.f32 %v15473_v2, %v18406_v23  ;;  %v18769_v4 = vadd.f32 %v15520_v47, %v3198_v53  ;;  %15719 = vmatmul.mubr.bf16.gmra.mxu0 %v16379_v6  ;;  %v18775_v23 = vsel %vm18028_vm12, %v14327_v56, %v21794_v44  ;;  %v14357_v53 = vcombine.low %v18730_v38, %v18734_v27  ;;  %v6169_v47 = vld [vmem:[#allocation2 + $0x24] sm:$0xf]  ;;  %v6170_v27 = vld [vmem:[#allocation2 + $0x28] sm:$0xf] }
 0x204   : > { %v3678_v43 = vpop.f32.mrf.mxu0  ;;  %15722 = vmatprep.mubr.bf16.mxu0 %v16380_v37  ;;  %15799 = vmatpush3.bf16.msra.mxu0 %v16390_v18  ;;  %v18792_v2 = vrot.slane %v6253_v30, 4  ;;  %v18794_v6 = vpop.f32.mrf.mxu1  ;;  %v6268_v38 = vrot.slane %v6266_v48, 5  ;;  %v6271_v50 = vshrl.u32 %v6169_v47, 16  ;;  %v14449_v18 = vrot.slane %v18778_v0, 9  ;;  %v6173_v30 = vld [vmem:[#allocation2 + $0x34] sm:$0xf] }
 0x205   : > { %21793 = vst [vmem:[#allocation28_spill] sm:$0xff] %v18769_v4  ;;  %v18782_v62 = vadd.f32 %v3678_v43, %v3196_v33  ;;  %21797 = vst [vmem:[#allocation31_spill] sm:$0xff] %v18794_v6  ;;  %15800 = vmatprep.subr.bf16.mxu0 %v16394_v60  ;;  %v7114_v43 = vrot.slane %v18780_v11, 5  ;;  %v6274_v33 = vshll.u32 %v6169_v47, 16  ;;  %v6264_v37 = vrot.slane %v6263_v26, 4 }
 0x206   : > { %v15521_v46 = vpop.f32.mrf.mxu0  ;;  %v6273_v22 = vrot.slane %v6271_v50, 4  ;;  %v6280_v58 = vshll.u32 %v6170_v27, 16  ;;  %v6284_v49 = vshrl.u32 %v6170_v27, 16  ;;  %v6259_v48 = vsel %vm17984_vm0, %v18792_v2, %v18757_v31  ;;  %v6174_v50 = vld [vmem:[#allocation2 + $0x38] sm:$0x1] }
 0x207   : > { %21795 = vst [vmem:[#allocation29_spill] sm:$0xff] %v18782_v62  ;;  %v18784_v8 = vadd.f32 %v15521_v46, %v3199_v20  ;;  %v6172_v20 = vld [vmem:[#allocation2 + $0x30] sm:$0xf]  ;;  %v7116_v32 = vrot.slane %v7114_v43, 4  ;;  %v6276_v44 = vrot.slane %v6274_v33, 5  ;;  %v6290_v0 = vshll.u32 %v6171_v34, 16 }
 0x208   : > { %v18806_v46 = vpop.f32.mrf.mxu0  ;;  %15801 = vmatpush3.bf16.msra.mxu0 %v16394_v60  ;;  %15679 = vmatmul.mubr.bf16.gmra.mxu1 %v14356_v61  ;;  %v6269_v26 = vsel %vm17984_vm0, %v6264_v37, %v6268_v38  ;;  %v6282_v47 = vrot.slane %v6280_v58, 5  ;;  %v6286_v27 = vrot.slane %v6284_v49, 4  ;;  %v6295_v56 = vshrl.u32 %v6172_v20, 16  ;;  %v6987_v34 = vld [vmem:[#allocation2 + $0x24] sm:$0xe] }
 0x209   : > { %21796 = vst [vmem:[#allocation30_spill] sm:$0xff] %v18784_v8  ;;  %21798 = vst [vmem:[#allocation32_spill] sm:$0xff] %v18806_v46  ;;  %15682 = vmatprep.mubr.bf16.mxu1 %v14357_v53  ;;  %v18818_v1 = vsel %vm18028_vm12, %v7116_v32, %v7117_v57  ;;  %v6277_v60 = vor.u32 %v6276_v44, %v6273_v22  ;;  %v6298_v31 = vshll.u32 %v6172_v20, 16  ;;  %v6304_v2 = vshll.u32 %v6173_v30, 16  ;;  %v6988_v33 = vld [vmem:[#allocation2 + $0x28] sm:$0xf] }
 0x20a   : > { %v6287_v61 = vor.u32 %v6286_v27, %v6282_v47  ;;  %v6292_v6 = vrot.slane %v6290_v0, 5  ;;  %v6297_v38 = vrot.slane %v6295_v56, 4  ;;  %v6308_v37 = vshrl.u32 %v6173_v30, 16  ;;  %v6989_v22 = vld [vmem:[#allocation2 + $0x2c] sm:$0x1] }
 0x20b   : > { %15723 = vmatmul.mubr.bf16.gmra.mxu0 %v16383_v15  ;;  %v6278_v53 = vrot.slane %v6277_v60, 4  ;;  %v6300_v49 = vrot.slane %v6298_v31, 5  ;;  %v18824_v8 = vrot.slane %v6304_v2, 5  ;;  %v6314_v57 = vshll.u32 %v6174_v50, 16  ;;  %v18826_v4 = vld [vmem:[#allocation2 + $0x30] sm:$0xe] }
 0x20c   : > { %15726 = vmatprep.mubr.bf16.mxu0 %v16384_v7  ;;  %v6288_v20 = vrot.slane %v6287_v61, 4  ;;  %v6310_v32 = vrot.slane %v6308_v37, 4  ;;  %v14450_v44 = vrot.slane %v6987_v34, 9  ;;  %v7121_v62 = vrot.slane %v6988_v33, 5  ;;  %v6175_v27 = vld [vmem:[#allocation2 + $0x3c] sm:$0xf] }
 0x20d   : > { %v18812_v11 = vpop.f32.mrf.mxu1  ;;  %v18832_v30 = vcombine.low %v6259_v48, %v6269_v26  ;;  %v18836_v0 = vsel %vm18028_vm12, %v14449_v18, %v7114_v43  ;;  %v6301_v7 = vor.u32 %v6300_v49, %v6297_v38  ;;  %v7124_v34 = vrot.slane %v6989_v22, 5  ;;  %v18845_v33 = vld [vmem:[#allocation2 + $0x34] sm:$0xf]  ;;  %v6992_v48 = vld [vmem:[#allocation2 + $0x38] sm:$0x1]  ;;  %v16387_v49 = vld [vmem:[#allocation2 + $0x9c] sm:$0xff]  }
 0x20e   : > { %v6293_v31 = vsel %vm17984_vm0, %v6288_v20, %v6292_v6  ;;  %v6311_v2 = vor.u32 %v6310_v32, %v18824_v8  ;;  %v6283_v18 = vsel %vm17984_vm0, %v6278_v53, %v6282_v47  ;;  %v18853_v61 = vrot.slane %v6314_v57, 5  ;;  %v6176_v37 = vld [vmem:[#allocation2 + $0x40] sm:$0xf]  ;;  %v6177_v32 = vld [vmem:[#allocation2 + $0x44] sm:$0x1]  ;;  %v16388_v53 = vld [vmem:[#allocation2 + $0xa8] sm:$0xff]  }
 0x20f   : > { %v18820_v46 = vpop.f32.mrf.mxu1  ;;  %v18851_v43 = vrot.slane %v6301_v7, 4  ;;  %v21799_v6 = vcombine.low %v18767_v21, %v18741_v12  ;;  %v18861_v22 = vsel %vm18028_vm12, %v14450_v44, %v7121_v62  ;;  %v7123_v20 = vrot.slane %v7121_v62, 4  ;;  %v6178_v21 = vld [vmem:[#allocation2 + $0x48] sm:$0xf] }
 0x210   : > { %v18822_v58 = vpop.f32.mrf.mxu0  ;;  %v6319_v60 = vshrl.u32 %v6175_v27, 16  ;;  %v6322_v47 = vshll.u32 %v6175_v27, 16  ;;  %v21800_v57 = vcombine.low %v18775_v23, %v18749_v17  ;;  %v18866_v7 = vcombine.low %v6283_v18, %v6293_v31  ;;  %v6179_v23 = vld [vmem:[#allocation2 + $0x4c] sm:$0xf] }
 0x211   : > { %v18838_v50 = vpop.f32.mrf.mxu1  ;;  %15683 = vmatmul.mubr.bf16.gmra.mxu1 %v21799_v6  ;;  %v6312_v38 = vrot.slane %v6311_v2, 4  ;;  %v7128_v56 = vrot.slane %v18845_v33, 5  ;;  %v7131_v12 = vrot.slane %v6992_v48, 5  ;;  %v18875_v62 = vsel %vm18028_vm12, %v7123_v20, %v7124_v34  ;;  %v6180_v20 = vld [vmem:[#allocation2 + $0x50] sm:$0x1] }
 0x212   : > { %v18828_v15 = vpop.f32.mrf.mxu0  ;;  %15686 = vmatprep.mubr.bf16.mxu1 %v21800_v57  ;;  %v6321_v27 = vrot.slane %v6319_v60, 4  ;;  %v6324_v52 = vrot.slane %v6322_v47, 5  ;;  %v6328_v17 = vshll.u32 %v6176_v37, 16  ;;  %v6307_v31 = vsel %vm17984_vm0, %v18851_v43, %v18824_v8  ;;  %v6993_v47 = vld [vmem:[#allocation2 + $0x3c] sm:$0xe] }
 0x213   : > { %v18869_v6 = vpop.f32.mrf.mxu1  ;;  %15727 = vmatmul.mubr.bf16.gmra.mxu0 %v16387_v49  ;;  %v7130_v2 = vrot.slane %v7128_v56, 4  ;;  %v6332_v33 = vshrl.u32 %v6176_v37, 16  ;;  %v6338_v48 = vshll.u32 %v6177_v32, 16  ;;  %v6317_v18 = vsel %vm17984_vm0, %v6312_v38, %v18853_v61  ;;  %v6994_v8 = vld [vmem:[#allocation2 + $0x40] sm:$0xf] }
 0x214   : > { %v18847_v26 = vpop.f32.mrf.mxu0  ;;  %21801 = vst [vmem:[#allocation33_spill] sm:$0xff] %v18869_v6  ;;  %15730 = vmatprep.mubr.bf16.mxu0 %v16388_v53  ;;  %v6325_v49 = vor.u32 %v6324_v52, %v6321_v27  ;;  %v6330_v34 = vrot.slane %v6328_v17, 5  ;;  %v6343_v60 = vshrl.u32 %v6178_v21, 16  ;;  %v6352_v6 = vshll.u32 %v6179_v23, 16  ;;  %v6995_v38 = vld [vmem:[#allocation2 + $0x44] sm:$0x1] }
 0x215   : > { %v18886_v53 = vsel %vm18028_vm12, %v7130_v2, %v7131_v12  ;;  %v6334_v57 = vrot.slane %v6332_v33, 4  ;;  %v6340_v19 = vrot.slane %v6338_v48, 5  ;;  %v6356_v52 = vshrl.u32 %v6179_v23, 16  ;;  %v6996_v12 = vld [vmem:[#allocation2 + $0x48] sm:$0xe]  ;;  %v16391_v33 = vld [vmem:[#allocation2 + $0xb4] sm:$0xff]  }
 0x216   : > { %v18871_v44 = vpop.f32.mrf.mxu0  ;;  %v6326_v32 = vrot.slane %v6325_v49, 4  ;;  %v6345_v61 = vrot.slane %v6343_v60, 4  ;;  %v18892_v35 = vrot.slane %v6352_v6, 5  ;;  %v6362_v59 = vshll.u32 %v6180_v20, 16  ;;  %v16392_v6 = vld [vmem:[#allocation2 + $0xc0] sm:$0xff]  }
 0x217   : > { %21802 = vst [vmem:[#allocation34_spill] sm:$0xff] %v18871_v44  ;;  %v6346_v44 = vshll.u32 %v6178_v21, 16  ;;  %v6335_v27 = vor.u32 %v6334_v57, %v6330_v34  ;;  %v6358_v23 = vrot.slane %v6356_v52, 4  ;;  %v14452_v49 = vrot.slane %v6993_v47, 9 }
 0x218   : > { %v7135_v60 = vrot.slane %v6994_v8, 5  ;;  %v14427_v20 = vcombine.low %v6307_v31, %v6317_v18  ;;  %v21804_v57 = vrot.slane %v18826_v4, 9  ;;  %v7138_v31 = vrot.slane %v6995_v38, 5  ;;  %v6181_v18 = vld [vmem:[#allocation2 + $0x54] sm:$0xf] }
 0x219   : > { %v6348_v17 = vrot.slane %v6346_v44, 5  ;;  %15687 = vmatmul.mubr.bf16.gmra.mxu1 %v21803_v40  ;;  %v6997_v44 = vld [vmem:[#allocation2 + $0x4c] sm:$0xf]  ;;  %v6336_v36 = vrot.slane %v6335_v27, 4  ;;  %v6998_v40 = vld [vmem:[#allocation2 + $0x50] sm:$0x1]  ;;  %v6359_v4 = vor.u32 %v6358_v23, %v18892_v35 }
 0x21a   : > { %v18888_v43 = vpop.f32.mrf.mxu1  ;;  %15754 = vmatprep.mubr.bf16.mxu1 %v18832_v30  ;;  %v18908_v24 = vsel %vm18028_vm12, %v21804_v57, %v7128_v56  ;;  %v6331_v30 = vsel %vm17984_vm0, %v6326_v32, %v6330_v34  ;;  %v6364_v8 = vrot.slane %v6362_v59, 5  ;;  %v7142_v52 = vrot.slane %v6997_v44, 5  ;;  %v6182_v27 = vld [vmem:[#allocation2 + $0x58] sm:$0xf]  ;;  %v6183_v34 = vld [vmem:[#allocation2 + $0x5c] sm:$0x1] }
 0x21b   : > { %v18890_v37 = vpop.f32.mrf.mxu0  ;;  %v6349_v14 = vor.u32 %v6348_v17, %v6345_v61  ;;  %15731 = vmatmul.mubr.bf16.gmra.mxu0 %v16391_v33  ;;  %v6341_v56 = vsel %vm17984_vm0, %v6336_v36, %v6340_v19  ;;  %v14453_v61 = vrot.slane %v6996_v12, 9  ;;  %v18923_v33 = vsel %vm18028_vm12, %v14452_v49, %v7135_v60  ;;  %v6184_v19 = vld [vmem:[#allocation2 + $0x60] sm:$0xf]  ;;  %v16395_v44 = vld [vmem:[#allocation2 + $0xcc] sm:$0xff]  }
 0x21c   : > { %v18894_v2 = vpop.f32.mrf.mxu1  ;;  %15734 = vmatprep.mubr.bf16.mxu0 %v16392_v6  ;;  %v7137_v57 = vrot.slane %v7135_v60, 4  ;;  %v7145_v47 = vrot.slane %v6998_v40, 5  ;;  %v18927_v38 = vcombine.low %v6331_v30, %v6341_v56  ;;  %v6360_v23 = vrot.slane %v6359_v4, 4  ;;  %v6185_v40 = vld [vmem:[#allocation2 + $0x64] sm:$0xf] }
 0x21d   : > { %v18896_v21 = vpop.f32.mrf.mxu0  ;;  %v6350_v17 = vrot.slane %v6349_v14, 4  ;;  %v3202_v36 = vadd.f32 %v18812_v11, %v18417_v28  ;;  %v6367_v59 = vshrl.u32 %v6181_v18, 16  ;;  %v6370_v60 = vshll.u32 %v6181_v18, 16  ;;  %v6186_v11 = vld [vmem:[#allocation2 + $0x68] sm:$0x1] }
 0x21e   : > { %v18910_v29 = vpop.f32.mrf.mxu1  ;;  %v18935_v49 = vsel %vm18028_vm12, %v7137_v57, %v7138_v31  ;;  %v6376_v6 = vshll.u32 %v6182_v27, 16  ;;  %v6380_v14 = vshrl.u32 %v6182_v27, 16  ;;  %v18939_v30 = vsel %vm18028_vm12, %v14453_v61, %v7142_v52 }
 0x21f   : > { %v18912_v48 = vpop.f32.mrf.mxu0  ;;  %v7144_v4 = vrot.slane %v7142_v52, 4  ;;  %v6369_v56 = vrot.slane %v6367_v59, 4  ;;  %v6386_v28 = vshll.u32 %v6183_v34, 16  ;;  %v6391_v13 = vshrl.u32 %v6184_v19, 16 }
 0x220   : > { %v18925_v32 = vpop.f32.mrf.mxu1  ;;  %v6378_v31 = vrot.slane %v6376_v6, 5  ;;  %v6382_v57 = vrot.slane %v6380_v14, 4  ;;  %v6394_v45 = vshll.u32 %v6184_v19, 16  ;;  %v6400_v61 = vshll.u32 %v6185_v40, 16  ;;  %v6999_v6 = vld [vmem:[#allocation2 + $0x54] sm:$0xe] }
 0x221   : > { %21805 = vst [vmem:[#allocation35_spill] sm:$0xff] %v18925_v32  ;;  %v18931_v12 = vpop.f32.mrf.mxu0  ;;  %15755 = vmatmul.mubr.bf16.vlgmr.msra.gmra.mxu1 %v18866_v7  ;;  %v6372_v32 = vrot.slane %v6370_v60, 5  ;;  %v6388_v27 = vrot.slane %v6386_v28, 5  ;;  %v6404_v59 = vshrl.u32 %v6185_v40, 16  ;;  %v6410_v7 = vshll.u32 %v6186_v11, 16 }
 0x222   : > { %21806 = vst [vmem:[#allocation36_spill] sm:$0xff] %v18931_v12  ;;  %v6365_v12 = vsel %vm17984_vm0, %v6360_v23, %v6364_v8  ;;  %15758 = vmatprep.mubr.bf16.mxu1 %v14427_v20  ;;  %v6383_v34 = vor.u32 %v6382_v57, %v6378_v31  ;;  %v21807_v8 = vcombine.low %v18836_v0, %v18818_v1  ;;  %v6393_v23 = vrot.slane %v6391_v13, 4  ;;  %v7000_v28 = vld [vmem:[#allocation2 + $0x58] sm:$0xf]  ;;  %v18969_v11 = vld [vmem:[#allocation2 + $0x60] sm:$0xe] }
 0x223   : > { %15735 = vmatmul.mubr.bf16.gmra.mxu0 %v16395_v44  ;;  %v6373_v52 = vor.u32 %v6372_v32, %v6369_v56  ;;  %v18955_v20 = vsel %vm18028_vm12, %v7144_v4, %v7145_v47  ;;  %v6396_v19 = vrot.slane %v6394_v45, 5  ;;  %v6402_v60 = vrot.slane %v6400_v61, 5  ;;  %v7001_v4 = vld [vmem:[#allocation2 + $0x5c] sm:$0x1] }
 0x224   : > { %15802 = vmatprep.mubr.bf16.mxu0 %v21807_v8  ;;  %v6355_v32 = vsel %vm17984_vm0, %v6350_v17, %v18892_v35  ;;  %v6384_v40 = vrot.slane %v6383_v34, 4  ;;  %v6406_v56 = vrot.slane %v6404_v59, 4  ;;  %v18967_v45 = vadd.f32 %v18822_v58, %v3202_v36  ;;  %v7004_v34 = vld [vmem:[#allocation2 + $0x68] sm:$0x1] }
 0x225   : > { %v6374_v44 = vrot.slane %v6373_v52, 4  ;;  %v14429_v0 = vcombine.low %v6355_v32, %v6365_v12  ;;  %v6397_v13 = vor.u32 %v6396_v19, %v6393_v23  ;;  %v6412_v12 = vrot.slane %v6410_v7, 5  ;;  %v18977_v52 = vld [vmem:[#allocation2 + $0x64] sm:$0xf]  ;;  %v6187_v7 = vld [vmem:[#allocation2 + $0x6c] sm:$0xf] }
 0x226   : > { %v18944_v18 = vpop.f32.mrf.mxu1  ;;  %v6389_v17 = vsel %vm17984_vm0, %v6384_v40, %v6388_v27  ;;  %v6407_v61 = vor.u32 %v6406_v56, %v6402_v60  ;;  %v3200_v58 = vadd.f32 %v18820_v46, %v18419_v54  ;;  %v14454_v36 = vrot.slane %v6999_v6, 9  ;;  %v6188_v6 = vld [vmem:[#allocation2 + $0x70] sm:$0xf] }
 0x227   : > { %v18946_v9 = vpop.f32.mrf.mxu0  ;;  %v6398_v59 = vrot.slane %v6397_v13, 4  ;;  %v7149_v8 = vrot.slane %v7000_v28, 5  ;;  %v6379_v23 = vsel %vm17984_vm0, %v6374_v44, %v6378_v31  ;;  %v3203_v27 = vadd.f32 %v18838_v50, %v18427_v3 }
 0x228   : > { %v18948_v5 = vpop.f32.mrf.mxu1  ;;  %v6408_v19 = vrot.slane %v6407_v61, 4  ;;  %v7152_v32 = vrot.slane %v7001_v4, 5  ;;  %v14430_v56 = vcombine.low %v6379_v23, %v6389_v17  ;;  %v14455_v13 = vrot.slane %v18969_v11, 9 }
 0x229   : > { %v18957_v14 = vpop.f32.mrf.mxu0  ;;  %15759 = vmatmul.mubr.bf16.gmra.mxu1 %v18927_v38  ;;  %v7156_v54 = vrot.slane %v18977_v52, 5  ;;  %v7159_v46 = vrot.slane %v7004_v34, 5  ;;  %v21810_v31 = vcombine.low %v18861_v22, %v18875_v62  ;;  %v6403_v3 = vsel %vm17984_vm0, %v6398_v59, %v6402_v60  ;;  %v6190_v60 = vld [vmem:[#allocation2 + $0x78] sm:$0xf]  ;;  %v6191_v34 = vld [vmem:[#allocation2 + $0x7c] sm:$0xf] }
 0x22a   : > { %v18962_v1 = vpop.f32.mrf.mxu1  ;;  %15762 = vmatprep.mubr.bf16.mxu1 %v14429_v0  ;;  %v6413_v50 = vsel %vm17984_vm0, %v6408_v19, %v6412_v12  ;;  %v7151_v44 = vrot.slane %v7149_v8, 4  ;;  %v19000_v28 = vadd.f32 %v18828_v15, %v3200_v58  ;;  %v6189_v0 = vld [vmem:[#allocation2 + $0x74] sm:$0x1]  ;;  %v21811_v4 = vcombine.low %v18908_v24, %v18886_v53 }
 0x22b   : > { %v18971_v57 = vpop.f32.mrf.mxu0  ;;  %15803 = vmatmul.mubr.bf16.vlgmr.msra.gmra.mxu0 %v21810_v31  ;;  %v19007_v11 = vsel %vm18028_vm12, %v14454_v36, %v7149_v8  ;;  %v7158_v22 = vrot.slane %v7156_v54, 4  ;;  %v6415_v62 = vshrl.u32 %v6187_v7, 16  ;;  %v6418_v17 = vshll.u32 %v6187_v7, 16  ;;  %v6192_v8 = vld [vmem:[#allocation2 + $0x80] sm:$0x1] }
 0x22c   : > { %v18986_v40 = vpop.f32.mrf.mxu1  ;;  %15806 = vmatprep.mubr.bf16.mxu0 %v21811_v4  ;;  %v14431_v61 = vcombine.low %v6403_v3, %v6413_v50  ;;  %v19011_v12 = vsel %vm18028_vm12, %v7151_v44, %v7152_v32  ;;  %v6424_v15 = vshll.u32 %v6188_v6, 16  ;;  %v6428_v52 = vshrl.u32 %v6188_v6, 16 }
 0x22d   : > { %21808 = vst [vmem:[#allocation37_spill] sm:$0xff] %v18986_v40  ;;  %v18990_v38 = vpop.f32.mrf.mxu0  ;;  %v19017_v24 = vsel %vm18028_vm12, %v7158_v22, %v7159_v46  ;;  %v6417_v53 = vrot.slane %v6415_v62, 4  ;;  %v6420_v58 = vrot.slane %v6418_v17, 5  ;;  %v6434_v36 = vshll.u32 %v6189_v0, 16 }
 0x22e   : > { %21809 = vst [vmem:[#allocation38_spill] sm:$0xff] %v18990_v38  ;;  %v6426_v19 = vrot.slane %v6424_v15, 5  ;;  %v6430_v7 = vrot.slane %v6428_v52, 4  ;;  %v6439_v31 = vshrl.u32 %v6190_v60, 16  ;;  %v6442_v32 = vshll.u32 %v6190_v60, 16 }
 0x22f   : > { %v6421_v6 = vor.u32 %v6420_v58, %v6417_v53  ;;  %v6436_v50 = vrot.slane %v6434_v36, 5  ;;  %v6448_v44 = vshll.u32 %v6191_v34, 16  ;;  %v6452_v4 = vshrl.u32 %v6191_v34, 16  ;;  %v7005_v53 = vld [vmem:[#allocation2 + $0x6c] sm:$0xe] }
 0x230   : > { %v6431_v46 = vor.u32 %v6430_v7, %v6426_v19  ;;  %v6441_v22 = vrot.slane %v6439_v31, 4  ;;  %v6444_v62 = vrot.slane %v6442_v32, 5  ;;  %v6458_v0 = vshll.u32 %v6192_v8, 16  ;;  %v7007_v7 = vld [vmem:[#allocation2 + $0x74] sm:$0x1] }
 0x231   : > { %15763 = vmatmul.mubr.bf16.gmra.mxu1 %v14430_v56  ;;  %v3206_v15 = vadd.f32 %v18888_v43, %v18433_v41  ;;  %v6422_v60 = vrot.slane %v6421_v6, 4  ;;  %v6450_v52 = vrot.slane %v6448_v44, 5  ;;  %v6454_v47 = vrot.slane %v6452_v4, 4  ;;  %v7009_v32 = vld [vmem:[#allocation2 + $0x7c] sm:$0xf] }
 0x232   : > { %v19013_v59 = vpop.f32.mrf.mxu1  ;;  %15766 = vmatprep.mubr.bf16.mxu1 %v14431_v61  ;;  %v21812_v34 = vcombine.low %v18923_v33, %v18935_v49  ;;  %v7157_v56 = vsel %vm18028_vm12, %v14455_v13, %v7156_v54  ;;  %v6432_v58 = vrot.slane %v6431_v46, 4  ;;  %v6445_v36 = vor.u32 %v6444_v62, %v6441_v22  ;;  %v7006_v61 = vld [vmem:[#allocation2 + $0x70] sm:$0xf]  ;;  %v7008_v54 = vld [vmem:[#allocation2 + $0x78] sm:$0xe] }
 0x233   : > { %v19019_v23 = vpop.f32.mrf.mxu0  ;;  %v19035_v8 = vadd.f32 %v18847_v26, %v3203_v27  ;;  %v21813_v41 = vcombine.low %v18939_v30, %v18955_v20  ;;  %v14486_v43 = vcombine.low %v19007_v11, %v19011_v12  ;;  %v14487_v33 = vcombine.low %v7157_v56, %v19017_v24  ;;  %v7010_v30 = vld [vmem:[#allocation2 + $0x80] sm:$0x1]  ;;  %v6193_v62 = vld [vmem:[#allocation2 + $0x84] sm:$0xf] }
 0x234   : > { %v19021_v3 = vpop.f32.mrf.mxu1  ;;  %15807 = vmatmul.mubr.bf16.gmra.mxu0 %v21812_v34  ;;  %v6455_v49 = vor.u32 %v6454_v47, %v6450_v52  ;;  %v6460_v13 = vrot.slane %v6458_v0, 5  ;;  %v6437_v26 = vsel %vm17984_vm0, %v6432_v58, %v6436_v50  ;;  %v6446_v27 = vrot.slane %v6445_v36, 4  ;;  %v6195_v58 = vld [vmem:[#allocation2 + $0x8c] sm:$0x1] }
 0x235   : > { %v19023_v35 = vpop.f32.mrf.mxu0  ;;  %15810 = vmatprep.mubr.bf16.mxu0 %v21813_v41  ;;  %v3204_v6 = vadd.f32 %v18894_v2, %v18441_v55  ;;  %v19050_v44 = vadd.f32 %v18890_v37, %v3206_v15  ;;  %v6427_v11 = vsel %vm17984_vm0, %v6422_v60, %v6426_v19  ;;  %v14456_v12 = vrot.slane %v7005_v53, 9  ;;  %v6194_v15 = vld [vmem:[#allocation2 + $0x88] sm:$0xf] }
 0x236   : > { %v19025_v17 = vpop.f32.mrf.mxu1  ;;  %v6456_v47 = vrot.slane %v6455_v49, 4  ;;  %v7163_v24 = vrot.slane %v7006_v61, 5  ;;  %v14432_v4 = vcombine.low %v6427_v11, %v6437_v26  ;;  %v7166_v46 = vrot.slane %v7007_v7, 5  ;;  %v6196_v7 = vld [vmem:[#allocation2 + $0x90] sm:$0xf] }
 0x237   : > { %v19037_v31 = vpop.f32.mrf.mxu0  ;;  %v14457_v22 = vrot.slane %v7008_v54, 9  ;;  %v7170_v50 = vrot.slane %v7009_v32, 5  ;;  %v6451_v55 = vsel %vm17984_vm0, %v6446_v27, %v6450_v52  ;;  %v3207_v2 = vadd.f32 %v18910_v29, %v18443_v51  ;;  %v6197_v32 = vld [vmem:[#allocation2 + $0x94] sm:$0xf]  ;;  %v6198_v11 = vld [vmem:[#allocation2 + $0x98] sm:$0x1] }
 0x238   : > { %v19052_v20 = vpop.f32.mrf.mxu1  ;;  %v6461_v37 = vsel %vm17984_vm0, %v6456_v47, %v6460_v13  ;;  %v7173_v19 = vrot.slane %v7010_v30, 5  ;;  %v7164_v53 = vsel %vm18028_vm12, %v14456_v12, %v7163_v24  ;;  %v7165_v34 = vrot.slane %v7163_v24, 4 }
 0x239   : > { %21814 = vst [vmem:[#allocation39_spill] sm:$0xff] %v19052_v20  ;;  %v19056_v0 = vpop.f32.mrf.mxu0  ;;  %15767 = vmatmul.mubr.bf16.gmra.mxu1 %v14432_v4  ;;  %v14433_v60 = vcombine.low %v6451_v55, %v6461_v37  ;;  %v19068_v56 = vsel %vm18028_vm12, %v14457_v22, %v7170_v50  ;;  %v7172_v36 = vrot.slane %v7170_v50, 4  ;;  %v19073_v61 = vadd.f32 %v18896_v21, %v3204_v6 }
 0x23a   : > { %21815 = vst [vmem:[#allocation40_spill] sm:$0xff] %v19056_v0  ;;  %v6463_v51 = vshrl.u32 %v6193_v62, 16  ;;  %v6466_v29 = vshll.u32 %v6193_v62, 16  ;;  %v7167_v41 = vsel %vm18028_vm12, %v7165_v34, %v7166_v46  ;;  %v3210_v49 = vadd.f32 %v18944_v18, %v18451_v42 }
 0x23b   : > { %15770 = vmatprep.mubr.bf16.mxu1 %v14433_v60  ;;  %v6472_v13 = vshll.u32 %v6194_v15, 16  ;;  %v6476_v54 = vshrl.u32 %v6194_v15, 16  ;;  %v7174_v21 = vsel %vm18028_vm12, %v7172_v36, %v7173_v19  ;;  %v6482_v30 = vshll.u32 %v6195_v58, 16  ;;  %v7011_v15 = vld [vmem:[#allocation2 + $0x84] sm:$0xe] }
 0x23c   : > { %15811 = vmatmul.mubr.bf16.gmra.mxu0 %v14486_v43  ;;  %v6465_v6 = vrot.slane %v6463_v51, 4  ;;  %v6468_v43 = vrot.slane %v6466_v29, 5  ;;  %v6487_v24 = vshrl.u32 %v6196_v7, 16  ;;  %v6490_v4 = vshll.u32 %v6196_v7, 16  ;;  %v7012_v60 = vld [vmem:[#allocation2 + $0x88] sm:$0xf] }
 0x23d   : > { %15814 = vmatprep.mubr.bf16.mxu0 %v14487_v33  ;;  %v6474_v47 = vrot.slane %v6472_v13, 5  ;;  %v6478_v12 = vrot.slane %v6476_v54, 4  ;;  %v6484_v22 = vrot.slane %v6482_v30, 5  ;;  %v6496_v50 = vshll.u32 %v6197_v32, 16  ;;  %v7013_v7 = vld [vmem:[#allocation2 + $0x8c] sm:$0x1] }
 0x23e   : > { %v19070_v52 = vpop.f32.mrf.mxu1  ;;  %v6469_v46 = vor.u32 %v6468_v43, %v6465_v6  ;;  %v6500_v62 = vshrl.u32 %v6197_v32, 16  ;;  %v6489_v55 = vrot.slane %v6487_v24, 4  ;;  %v6492_v37 = vrot.slane %v6490_v4, 5  ;;  %v7014_v13 = vld [vmem:[#allocation2 + $0x90] sm:$0xe] }
 0x23f   : > { %v6479_v33 = vor.u32 %v6478_v12, %v6474_v47  ;;  %v6506_v19 = vshll.u32 %v6198_v11, 16  ;;  %v14488_v58 = vcombine.low %v7164_v53, %v7167_v41  ;;  %v6498_v51 = vrot.slane %v6496_v50, 5  ;;  %v7015_v54 = vld [vmem:[#allocation2 + $0x94] sm:$0xf]  ;;  %v7016_v30 = vld [vmem:[#allocation2 + $0x98] sm:$0x1] }
 0x240   : > { %v19079_v26 = vpop.f32.mrf.mxu1  ;;  %v19081_v27 = vpop.f32.mrf.mxu0  ;;  %v6470_v36 = vrot.slane %v6469_v46, 4  ;;  %v6502_v29 = vrot.slane %v6500_v62, 4  ;;  %v6493_v6 = vor.u32 %v6492_v37, %v6489_v55  ;;  %v19092_v32 = vadd.f32 %v18912_v48, %v3207_v2  ;;  %v6199_v50 = vld [vmem:[#allocation2 + $0x9c] sm:$0xf] }
 0x241   : > { %v6480_v0 = vrot.slane %v6479_v33, 4  ;;  %v6508_v43 = vrot.slane %v6506_v19, 5  ;;  %v14489_v24 = vcombine.low %v19068_v56, %v7174_v21  ;;  %v3208_v41 = vadd.f32 %v18948_v5, %v18457_v39 }
 0x242   : > { %v19085_v42 = vpop.f32.mrf.mxu1  ;;  %v19087_v18 = vpop.f32.mrf.mxu0  ;;  %v6503_v53 = vor.u32 %v6502_v29, %v6498_v51  ;;  %v6475_v4 = vsel %vm17984_vm0, %v6470_v36, %v6474_v47  ;;  %v6494_v48 = vrot.slane %v6493_v6, 4  ;;  %v19106_v2 = vadd.f32 %v18946_v9, %v3210_v49  ;;  %v6201_v29 = vld [vmem:[#allocation2 + $0xa4] sm:$0x1] }
 0x243   : > { %v6485_v46 = vsel %vm17984_vm0, %v6480_v0, %v6484_v22  ;;  %v14458_v33 = vrot.slane %v7011_v15, 9  ;;  %v7177_v55 = vrot.slane %v7012_v60, 5  ;;  %v19112_v39 = vadd.f32 %v18962_v1, %v18464_v16  ;;  %v6200_v0 = vld [vmem:[#allocation2 + $0xa0] sm:$0xf] }
 0x244   : > { %v19089_v34 = vpop.f32.mrf.mxu0  ;;  %v19094_v12 = vpop.f32.mrf.mxu1  ;;  %15815 = vmatmul.mubr.bf16.gmra.mxu0 %v14488_v58  ;;  %v14434_v56 = vcombine.low %v6475_v4, %v6485_v46  ;;  %v6504_v21 = vrot.slane %v6503_v53, 4  ;;  %v7180_v5 = vrot.slane %v7013_v7, 5  ;;  %v14459_v47 = vrot.slane %v7014_v13, 9 }
 0x245   : > { %21816 = vst [vmem:[#allocation41_spill] sm:$0xff] %v19094_v12  ;;  %15818 = vmatprep.mubr.bf16.mxu0 %v14489_v24  ;;  %v7184_v37 = vrot.slane %v7015_v54, 5  ;;  %v6499_v49 = vsel %vm17984_vm0, %v6494_v48, %v6498_v51  ;;  %v7179_v15 = vrot.slane %v7177_v55, 4  ;;  %v7187_v60 = vrot.slane %v7016_v30, 5  ;;  %v6202_v30 = vld [vmem:[#allocation2 + $0xa8] sm:$0xf] }
 0x246   : > { %v19096_v11 = vpop.f32.mrf.mxu0  ;;  %15771 = vmatmul.mubr.bf16.gmra.mxu1 %v14434_v56  ;;  %v6509_v19 = vsel %vm17984_vm0, %v6504_v21, %v6508_v43  ;;  %v7178_v16 = vsel %vm18028_vm12, %v14458_v33, %v7177_v55  ;;  %v19133_v54 = vadd.f32 %v18957_v14, %v3208_v41  ;;  %v6511_v6 = vshrl.u32 %v6199_v50, 16  ;;  %v6203_v24 = vld [vmem:[#allocation2 + $0xac] sm:$0xf] }
 0x247   : > { %21817 = vst [vmem:[#allocation42_spill] sm:$0xff] %v19096_v11  ;;  %v14435_v58 = vcombine.low %v6499_v49, %v6509_v19  ;;  %v7185_v1 = vsel %vm18028_vm12, %v14459_v47, %v7184_v37  ;;  %v7186_v36 = vrot.slane %v7184_v37, 4  ;;  %v7181_v51 = vsel %vm18028_vm12, %v7179_v15, %v7180_v5  ;;  %v6204_v47 = vld [vmem:[#allocation2 + $0xb0] sm:$0x1] }
 0x248   : > { %v19108_v62 = vpop.f32.mrf.mxu0  ;;  %v6514_v43 = vshll.u32 %v6199_v50, 16  ;;  %v14490_v53 = vcombine.low %v7178_v16, %v7181_v51  ;;  %v6520_v46 = vshll.u32 %v6200_v0, 16  ;;  %v6524_v48 = vshrl.u32 %v6200_v0, 16  ;;  %v16396_v16 = vld [vmem:[%s21691_s4 + $0x38] sm:$0xff]  }
 0x249   : > { %15774 = vmatprep.mubr.bf16.mxu1 %v14435_v58  ;;  %v7188_v4 = vsel %vm18028_vm12, %v7186_v36, %v7187_v60  ;;  %v6513_v33 = vrot.slane %v6511_v6, 4  ;;  %v6530_v5 = vshll.u32 %v6201_v29, 16  ;;  %v6535_v50 = vshrl.u32 %v6202_v30, 16  ;;  %v7017_v6 = vld [vmem:[#allocation2 + $0x9c] sm:$0xe]  ;;  %15834 = vmatprep.subr.bf16.mxu1 %v16396_v16 }
 0x24a   : > { %v19114_v22 = vpop.f32.mrf.mxu1  ;;  %v19116_v9 = vpop.f32.mrf.mxu0  ;;  %v14491_v21 = vcombine.low %v7185_v1, %v7188_v4  ;;  %v6516_v55 = vrot.slane %v6514_v43, 5  ;;  %v6522_v14 = vrot.slane %v6520_v46, 5  ;;  %v6526_v41 = vrot.slane %v6524_v48, 4  ;;  %v7018_v43 = vld [vmem:[#allocation2 + $0xa0] sm:$0xf]  ;;  %15835 = vmatpush3.bf16.msra.mxu1 %v16396_v16 }
 0x24b   : > { %v6538_v37 = vshll.u32 %v6202_v30, 16  ;;  %v6532_v60 = vrot.slane %v6530_v5, 5  ;;  %v6544_v0 = vshll.u32 %v6203_v24, 16  ;;  %v6548_v58 = vshrl.u32 %v6203_v24, 16  ;;  %v7019_v48 = vld [vmem:[#allocation2 + $0xa4] sm:$0x1] }
 0x24c   : > { %v19126_v7 = vpop.f32.mrf.mxu1  ;;  %v19128_v13 = vpop.f32.mrf.mxu0  ;;  %15819 = vmatmul.mubr.bf16.gmra.mxu0 %v14490_v53  ;;  %v6517_v15 = vor.u32 %v6516_v55, %v6513_v33  ;;  %v6527_v1 = vor.u32 %v6526_v41, %v6522_v14  ;;  %v6537_v36 = vrot.slane %v6535_v50, 4  ;;  %v6554_v51 = vshll.u32 %v6204_v47, 16  ;;  %v7021_v33 = vld [vmem:[#allocation2 + $0xac] sm:$0xf]  ;;  %v7022_v47 = vld [vmem:[#allocation2 + $0xb0] sm:$0x1] }
 0x24d   : > { %15822 = vmatprep.mubr.bf16.mxu0 %v14491_v21  ;;  %v6540_v29 = vrot.slane %v6538_v37, 5  ;;  %v6546_v4 = vrot.slane %v6544_v0, 5  ;;  %v6550_v46 = vrot.slane %v6548_v58, 4  ;;  %v7020_v21 = vld [vmem:[#allocation2 + $0xa8] sm:$0xe]  ;;  %v3214_v24 = vadd.f32 %v19013_v59, %v18469_v25  ;;  %v21820_v58 = vld [vmem:[#allocation12_spill] sm:$0xff] }
 0x24e   : > { %v19137_v56 = vpop.f32.mrf.mxu1  ;;  %v19141_v19 = vpop.f32.mrf.mxu0  ;;  %v6518_v53 = vrot.slane %v6517_v15, 4  ;;  %v6528_v55 = vrot.slane %v6527_v1, 4  ;;  %v19152_v41 = vadd.f32 %v18971_v57, %v19112_v39  ;;  %v6556_v0 = vrot.slane %v6554_v51, 5  ;;  %v6205_v39 = vld [vmem:[#allocation2 + $0xb4] sm:$0xf] }
 0x24f   : > { %21819 = vst [vmem:[#allocation44_spill] sm:$0xff] %v19141_v19  ;;  %v6541_v5 = vor.u32 %v6540_v29, %v6537_v36  ;;  %v6551_v15 = vor.u32 %v6550_v46, %v6546_v4  ;;  %v3212_v19 = vadd.f32 %v19021_v3, %v21820_v58  ;;  %v19165_v57 = vadd.f32 %v19019_v23, %v3214_v24  ;;  %v6206_v3 = vld [vmem:[#allocation2 + $0xb8] sm:$0xf]  ;;  %v21822_v58 = vld [vmem:[#allocation13_spill] sm:$0xff] }
 0x250   : > { %v19139_v49 = vpop.f32.mrf.mxu1  ;;  %v6523_v25 = vsel %vm17984_vm0, %v6518_v53, %v6522_v14  ;;  %v6533_v59 = vsel %vm17984_vm0, %v6528_v55, %v6532_v60  ;;  %v14460_v46 = vrot.slane %v7017_v6, 9  ;;  %v7191_v11 = vrot.slane %v7018_v43, 5 }
 0x251   : > { %21818 = vst [vmem:[#allocation43_spill] sm:$0xff] %v19139_v49  ;;  %v6542_v1 = vrot.slane %v6541_v5, 4  ;;  %21821 = vst [vmem:[#allocation12_spill] sm:$0xff] %v19165_v57  ;;  %v14436_v16 = vcombine.low %v6523_v25, %v6533_v59  ;;  %v6552_v51 = vrot.slane %v6551_v15, 4  ;;  %v19173_v14 = vadd.f32 %v19025_v17, %v21822_v58  ;;  %v6207_v5 = vld [vmem:[#allocation2 + $0xbc] sm:$0x1] }
 0x252   : > { %v19146_v30 = vpop.f32.mrf.mxu1  ;;  %v7194_v53 = vrot.slane %v7019_v48, 5  ;;  %v14461_v60 = vrot.slane %v7020_v21, 9  ;;  %v7198_v55 = vrot.slane %v7021_v33, 5  ;;  %v7193_v43 = vrot.slane %v7191_v11, 4  ;;  %v6208_v59 = vld [vmem:[#allocation2 + $0xc0] sm:$0xf] }
 0x253   : > { %15775 = vmatmul.mubr.bf16.gmra.mxu1 %v14436_v16  ;;  %v6547_v25 = vsel %vm17984_vm0, %v6542_v1, %v6546_v4  ;;  %v6557_v6 = vsel %vm17984_vm0, %v6552_v51, %v6556_v0  ;;  %v7201_v15 = vrot.slane %v7022_v47, 5  ;;  %v16397_v17 = vld [vmem:[%s21691_s4 + $0x30] sm:$0xff]   ;;  %v7192_v21 = vsel %vm18028_vm12, %v14460_v46, %v7191_v11 }
 0x254   : > { %v19154_v50 = vpop.f32.mrf.mxu1  ;;  %v19156_v37 = vpop.f32.mrf.mxu0  ;;  %v14437_v48 = vcombine.low %v6547_v25, %v6557_v6  ;;  %v7199_v33 = vsel %vm18028_vm12, %v14461_v60, %v7198_v55  ;;  %v7200_v16 = vrot.slane %v7198_v55, 4  ;;  %v7195_v47 = vsel %vm18028_vm12, %v7193_v43, %v7194_v53  ;;  %v6209_v25 = vld [vmem:[#allocation2 + $0xc4] sm:$0xf]  ;;  %15836 = vmatprep.subr.bf16.mxu1 %v16397_v17  ;;  %v6210_v6 = vld [vmem:[#allocation2 + $0xc8] sm:$0x1] }
 0x255   : > { %v19197_v0 = vadd.f32 %v19023_v35, %v3212_v19  ;;  %v6559_v1 = vshrl.u32 %v6205_v39, 16  ;;  %v6562_v51 = vshll.u32 %v6205_v39, 16  ;;  %v14492_v11 = vcombine.low %v7192_v21, %v7195_v47  ;;  %15837 = vmatpush3.bf16.msra.mxu1 %v16397_v17 }
 0x256   : > { %v19167_v36 = vpop.f32.mrf.mxu1  ;;  %v19169_v29 = vpop.f32.mrf.mxu0  ;;  %15778 = vmatprep.mubr.bf16.mxu1 %v14437_v48  ;;  %v7202_v46 = vsel %vm18028_vm12, %v7200_v16, %v7201_v15  ;;  %v6568_v60 = vshll.u32 %v6206_v3, 16  ;;  %v6572_v55 = vshrl.u32 %v6206_v3, 16  ;;  %v6578_v35 = vshll.u32 %v6207_v5, 16 }
 0x257   : > { %21825 = vst [vmem:[#allocation46_spill] sm:$0xff] %v19197_v0  ;;  %v6561_v53 = vrot.slane %v6559_v1, 4  ;;  %v6564_v43 = vrot.slane %v6562_v51, 5  ;;  %15823 = vmatmul.mubr.bf16.gmra.mxu0 %v14492_v11  ;;  %v6583_v48 = vshrl.u32 %v6208_v59, 16  ;;  %v6586_v21 = vshll.u32 %v6208_v59, 16 }
 0x258   : > { %v19175_v23 = vpop.f32.mrf.mxu1  ;;  %v19177_v24 = vpop.f32.mrf.mxu0  ;;  %v6570_v39 = vrot.slane %v6568_v60, 5  ;;  %v6574_v49 = vrot.slane %v6572_v55, 4  ;;  %v6580_v3 = vrot.slane %v6578_v35, 5  ;;  %v6592_v16 = vshll.u32 %v6209_v25, 16  ;;  %v7023_v51 = vld [vmem:[#allocation2 + $0xb4] sm:$0xe] }
 0x259   : > { %21823 = vst [vmem:[#allocation13_spill] sm:$0xff] %v19175_v23  ;;  %v6565_v15 = vor.u32 %v6564_v43, %v6561_v53  ;;  %v6596_v12 = vshrl.u32 %v6209_v25, 16  ;;  %v6588_v1 = vrot.slane %v6586_v21, 5  ;;  %v6602_v5 = vshll.u32 %v6210_v6, 16  ;;  %v21827_v60 = vld [vmem:[#allocation15_spill] sm:$0xff] }
 0x25a   : > { %v19190_v58 = vpop.f32.mrf.mxu1  ;;  %v19192_v4 = vpop.f32.mrf.mxu0  ;;  %v6575_v17 = vor.u32 %v6574_v49, %v6570_v39  ;;  %v3218_v59 = vadd.f32 %v19070_v52, %v21827_v60  ;;  %v6594_v20 = vrot.slane %v6592_v16, 5  ;;  %v7025_v53 = vld [vmem:[#allocation2 + $0xbc] sm:$0x1]  ;;  %v7026_v43 = vld [vmem:[#allocation2 + $0xc0] sm:$0xe]  ;;  %v16398_v49 = vld [vmem:[%s21691_s4 + $0x28] sm:$0xff]  }
 0x25b   : > { %21824 = vst [vmem:[#allocation45_spill] sm:$0xff] %v19192_v4  ;;  %v14493_v4 = vcombine.low %v7199_v33, %v7202_v46  ;;  %v6585_v33 = vrot.slane %v6583_v48, 4  ;;  %v7024_v46 = vld [vmem:[#allocation2 + $0xb8] sm:$0xf]  ;;  %v6566_v55 = vrot.slane %v6565_v15, 4  ;;  %v6604_v21 = vrot.slane %v6602_v5, 5  ;;  %15838 = vmatprep.subr.bf16.mxu1 %v16398_v49 }
 0x25c   : > { %v19201_v23 = vpop.f32.mrf.mxu1  ;;  %v19203_v19 = vpop.f32.mrf.mxu0  ;;  %v7027_v35 = vld [vmem:[#allocation2 + $0xc4] sm:$0xf]  ;;  %v6576_v6 = vrot.slane %v6575_v17, 4  ;;  %v7028_v52 = vld [vmem:[#allocation2 + $0xc8] sm:$0x1]  ;;  %v21829_v16 = vld [vmem:[#allocation16_spill] sm:$0xff]  ;;  %15839 = vmatpush3.bf16.msra.mxu1 %v16398_v49 }
 0x25d   : > { %15826 = vmatprep.mubr.bf16.mxu0 %v14493_v4  ;;  %v6598_v4 = vrot.slane %v6596_v12, 4  ;;  %v6589_v48 = vor.u32 %v6588_v1, %v6585_v33  ;;  %v3216_v60 = vadd.f32 %v19079_v26, %v21829_v16  ;;  %v6571_v0 = vsel %vm17984_vm0, %v6566_v55, %v6570_v39 }
 0x25e   : > { %v19205_v47 = vpop.f32.mrf.mxu1  ;;  %v19207_v38 = vpop.f32.mrf.mxu0  ;;  %v6581_v17 = vsel %vm17984_vm0, %v6576_v6, %v6580_v3  ;;  %v14462_v26 = vrot.slane %v7023_v51, 9  ;;  %v7205_v16 = vrot.slane %v7024_v46, 5  ;;  %v14463_v39 = vrot.slane %v7026_v43, 9  ;;  %v21831_v3 = vld [vmem:[#allocation17_spill] sm:$0xff]  ;;  %v6212_v6 = vld [vmem:[#allocation2 + $0xd0] sm:$0xf] }
 0x25f   : > { %v6599_v12 = vor.u32 %v6598_v4, %v6594_v20  ;;  %v6590_v33 = vrot.slane %v6589_v48, 4  ;;  %v14438_v5 = vcombine.low %v6571_v0, %v6581_v17  ;;  %v7212_v55 = vrot.slane %v7027_v35, 5  ;;  %v6213_v51 = vld [vmem:[#allocation2 + $0xd4] sm:$0x1] }
 0x260   : > { %v19209_v11 = vpop.f32.mrf.mxu1  ;;  %v19213_v25 = vpop.f32.mrf.mxu0  ;;  %v7207_v49 = vrot.slane %v7205_v16, 4  ;;  %v7215_v0 = vrot.slane %v7028_v52, 5 }
 0x261   : > { %21826 = vst [vmem:[#allocation47_spill] sm:$0xff] %v19209_v11  ;;  %v19220_v11 = vadd.f32 %v19037_v31, %v19173_v14  ;;  %v19233_v31 = vadd.f32 %v19081_v27, %v3218_v59  ;;  %v6211_v14 = vld [vmem:[#allocation2 + $0xcc] sm:$0xf]  ;;  %v6600_v4 = vrot.slane %v6599_v12, 4  ;;  %15779 = vmatmul.mubr.bf16.gmra.mxu1 %v14438_v5  ;;  %v3219_v59 = vadd.f32 %v19085_v42, %v21831_v3 }
 0x262   : > { %v19222_v15 = vpop.f32.mrf.mxu1  ;;  %v19226_v40 = vpop.f32.mrf.mxu0  ;;  %v7214_v43 = vrot.slane %v7212_v55, 4  ;;  %v19256_v42 = vadd.f32 %v19087_v18, %v3216_v60  ;;  %v6607_v52 = vshrl.u32 %v6211_v14, 16  ;;  %v6610_v12 = vshll.u32 %v6211_v14, 16  ;;  %v7029_v14 = vld [vmem:[#allocation2 + $0xcc] sm:$0xe] }
 0x263   : > { %21828 = vst [vmem:[#allocation15_spill] sm:$0xff] %v19220_v11  ;;  %21830 = vst [vmem:[#allocation16_spill] sm:$0xff] %v19226_v40  ;;  %v6595_v40 = vsel %vm17984_vm0, %v6590_v33, %v6594_v20  ;;  %v7208_v11 = vrot.slane %v7025_v53, 5  ;;  %v6605_v27 = vsel %vm17984_vm0, %v6600_v4, %v6604_v21  ;;  %v7206_v20 = vsel %vm18028_vm12, %v14462_v26, %v7205_v16 }
 0x264   : > { %v19235_v1 = vpop.f32.mrf.mxu1  ;;  %v19245_v46 = vpop.f32.mrf.mxu0  ;;  %v14439_v48 = vcombine.low %v6595_v40, %v6605_v27  ;;  %v7213_v53 = vsel %vm18028_vm12, %v14463_v39, %v7212_v55  ;;  %v16399_v40 = vld [vmem:[%s21691_s4 + $0x20] sm:$0xff]   ;;  %v7216_v5 = vsel %vm18028_vm12, %v7214_v43, %v7215_v0  ;;  %v6616_v4 = vshll.u32 %v6212_v6, 16  ;;  %v21832_v27 = vld [vmem:[#allocation19_spill] sm:$0xff] }
 0x265   : > { %v7209_v21 = vsel %vm18028_vm12, %v7207_v49, %v7208_v11  ;;  %v6620_v26 = vshrl.u32 %v6212_v6, 16  ;;  %v14495_v11 = vcombine.low %v7213_v53, %v7216_v5  ;;  %v6609_v18 = vrot.slane %v6607_v52, 4  ;;  %15840 = vmatprep.subr.bf16.mxu1 %v16399_v40  ;;  %v7030_v6 = vld [vmem:[#allocation2 + $0xd0] sm:$0xf]  ;;  %v21834_v5 = vld [vmem:[#allocation21_spill] sm:$0xff] }
 0x266   : > { %v19239_v57 = vpop.f32.mrf.mxu1  ;;  %v19258_v17 = vpop.f32.mrf.mxu0  ;;  %15782 = vmatprep.mubr.bf16.mxu1 %v14439_v48  ;;  %v14494_v33 = vcombine.low %v7206_v20, %v7209_v21  ;;  %v6612_v60 = vrot.slane %v6610_v12, 5  ;;  %v6626_v39 = vshll.u32 %v6213_v51, 16  ;;  %v3222_v3 = vadd.f32 %v19114_v22, %v21832_v27  ;;  %v7031_v20 = vld [vmem:[#allocation2 + $0xd4] sm:$0x1]  ;;  %15841 = vmatpush3.bf16.msra.mxu1 %v16399_v40  ;;  %v21833_v21 = vld [vmem:[#allocation20_spill] sm:$0xff] }
 0x267   : > { %v6618_v49 = vrot.slane %v6616_v4, 5  ;;  %v6622_v48 = vrot.slane %v6620_v26, 4  ;;  %v19272_v0 = vadd.f32 %v19089_v34, %v3219_v59  ;;  %v3220_v52 = vadd.f32 %v19126_v7, %v21833_v21 }
 0x268   : > { %v19251_v35 = vpop.f32.mrf.mxu1  ;;  %v19267_v55 = vpop.f32.mrf.mxu0  ;;  %15827 = vmatmul.mubr.bf16.gmra.mxu0 %v14494_v33  ;;  %v6613_v53 = vor.u32 %v6612_v60, %v6609_v18  ;;  %v6628_v51 = vrot.slane %v6626_v39, 5  ;;  %v3223_v22 = vadd.f32 %v19137_v56, %v21834_v5  ;;  %v19281_v4 = vadd.f32 %v19108_v62, %v3222_v3  ;;  %v21835_v60 = vld [vmem:[#allocation23_spill] sm:$0xff] }
 0x269   : > { %15830 = vmatprep.mubr.bf16.mxu0 %v14495_v11  ;;  %v6623_v33 = vor.u32 %v6622_v48, %v6618_v49  ;;  %v14464_v34 = vrot.slane %v7029_v14, 9  ;;  %v7219_v27 = vrot.slane %v7030_v6, 5  ;;  %v7222_v40 = vrot.slane %v7031_v20, 5  ;;  %v21836_v48 = vld [vmem:[#allocation24_spill] sm:$0xff] }
 0x26a   : > { %v19265_v16 = vpop.f32.mrf.mxu1  ;;  %v19276_v12 = vpop.f32.mrf.mxu0  ;;  %v6614_v26 = vrot.slane %v6613_v53, 4  ;;  %v19284_v11 = vadd.f32 %v19116_v9, %v3220_v52  ;;  %v4241_v7 = vadd.f32 %v19146_v30, %v21835_v60  ;;  %v19289_v39 = vadd.f32 %v19128_v13, %v3223_v22  ;;  %v21837_v30 = vld [vmem:[#allocation25_spill] sm:$0xff] }
 0x26b   : > { %v6624_v18 = vrot.slane %v6623_v33, 4  ;;  %v4239_v56 = vadd.f32 %v19154_v50, %v21836_v48  ;;  %v7220_v9 = vsel %vm18028_vm12, %v14464_v34, %v7219_v27  ;;  %v7221_v6 = vrot.slane %v7219_v27, 4 }
 0x26c   : > { %v4160_v43 = vpop.f32.mrf.mxu1  ;;  %v6619_v3 = vsel %vm17984_vm0, %v6614_v26, %v6618_v49  ;;  %v4242_v13 = vadd.f32 %v19167_v36, %v21837_v30  ;;  %v19304_v53 = vadd.f32 %v19156_v37, %v4241_v7  ;;  %v21838_v49 = vld [vmem:[#allocation28_spill] sm:$0xff]  ;;  %v21840_v37 = vld [vmem:[#allocation30_spill] sm:$0xff] }
 0x26d   : > { %v6629_v20 = vsel %vm17984_vm0, %v6624_v18, %v6628_v51  ;;  %v7223_v33 = vsel %vm18028_vm12, %v7221_v6, %v7222_v40  ;;  %v4245_v5 = vadd.f32 %v19190_v58, %v21838_v49  ;;  %v19311_v22 = vadd.f32 %v19169_v29, %v4239_v56  ;;  %v21839_v51 = vld [vmem:[#allocation29_spill] sm:$0xff]  ;;  %v21841_v56 = vld [vmem:[#allocation12_spill] sm:$0xff] }
 0x26e   : > { %v15577_v59 = vpop.f32.mrf.mxu1  ;;  %v15624_v14 = vpop.f32.mrf.mxu0  ;;  %v14440_v52 = vcombine.low %v6619_v3, %v6629_v20  ;;  %v14496_v34 = vcombine.low %v7220_v9, %v7223_v33  ;;  %v4243_v26 = vadd.f32 %v19201_v23, %v21839_v51  ;;  %v19316_v36 = vadd.f32 %v19177_v24, %v4242_v13  ;;  %v21842_v9 = vld [vmem:[#allocation46_spill] sm:$0xff] }
 0x26f   : > { %v4246_v27 = vadd.f32 %v19205_v47, %v21840_v37  ;;  %v19321_v40 = vadd.f32 %v19203_v19, %v4245_v5  ;;  %v4249_v29 = vadd.f32 %v19222_v15, %v18967_v45  ;;  %v4247_v23 = vadd.f32 %v19235_v1, %v19000_v28 }
 0x270   : > { %v19293_v62 = vpop.f32.mrf.mxu1  ;;  %v4978_v21 = vpop.f32.mrf.mxu0  ;;  %15783 = vmatmul.mubr.bf16.gmra.mxu1 %v14440_v52  ;;  %15831 = vmatmul.mubr.bf16.gmra.mxu0 %v14496_v34  ;;  %v19326_v58 = vadd.f32 %v19207_v38, %v4243_v26  ;;  %v4250_v47 = vadd.f32 %v19239_v57, %v19035_v8  ;;  %v4253_v45 = vadd.f32 %v19265_v16, %v19050_v44  ;;  %v16400_v52 = vld [vmem:[%s21691_s4 + $0x18] sm:$0xff]  }
 0x271   : > { %v19331_v24 = vadd.f32 %v19213_v25, %v4246_v27  ;;  %v19338_v19 = vadd.f32 %v19245_v46, %v4249_v29  ;;  %v19343_v38 = vadd.f32 %v19258_v17, %v4247_v23  ;;  %v4251_v28 = vadd.f32 %v4160_v43, %v19073_v61  ;;  %15842 = vmatprep.subr.bf16.mxu1 %v16400_v52 }
 0x272   : > { %v15580_v50 = vpop.f32.mrf.mxu1  ;;  %v15625_v60 = vpop.f32.mrf.mxu0  ;;  %v19347_v25 = vadd.f32 %v19267_v55, %v4250_v47  ;;  %v4254_v15 = vadd.f32 %v15577_v59, %v19092_v32  ;;  %v19352_v57 = vadd.f32 %v15624_v14, %v4253_v45  ;;  %15843 = vmatpush3.bf16.msra.mxu1 %v16400_v52 }
 0x273   : > { %v4257_v1 = vadd.f32 %v15580_v50, %v19106_v2  ;;  %v19355_v46 = vadd.f32 %v4978_v21, %v4251_v28 }
 0x274   : > { %v4176_v18 = vpop.f32.mrf.mxu1  ;;  %v19335_v48 = vpop.f32.mrf.mxu0  ;;  %v19358_v16 = vadd.f32 %v15625_v60, %v4254_v15 }
 0x275   : > { %v4255_v44 = vadd.f32 %v4176_v18, %v19133_v54  ;;  %v21843_v54 = vld [vmem:[#allocation15_spill] sm:$0xff] }
 0x276   : > { %v15581_v7 = vpop.f32.mrf.mxu1 }
 0x277   : > { %v4258_v17 = vadd.f32 %v15581_v7, %v19152_v41  ;;  %v15628_v61 = vpop.f32.mrf.mxu0 }
 0x278   : > { %v19350_v8 = vpop.f32.mrf.mxu1  ;;  %v19361_v55 = vadd.f32 %v15628_v61, %v4257_v1  ;;  %v16403_v1 = vld [vmem:[%s21691_s4 + $0x70] sm:$0xff]   ;;  %v16405_v61 = vld [vmem:[%s21691_s4 + $0x68] sm:$0xff]  }
 0x279   : > { %v4994_v59 = vpop.f32.mrf.mxu0 }
 0x27a   : > { %v15584_v43 = vpop.f32.mrf.mxu1  ;;  %v19364_v14 = vadd.f32 %v4994_v59, %v4255_v44 }
 0x27b   : > { %v4261_v32 = vadd.f32 %v15584_v43, %v21841_v56  ;;  %v15629_v6 = vpop.f32.mrf.mxu0 }
 0x27c   : > { %v4192_v3 = vpop.f32.mrf.mxu1  ;;  %v19367_v30 = vadd.f32 %v15629_v6, %v4258_v17  ;;  %v16404_v17 = vld [vmem:[%s21691_s4 + $0x8] sm:$0xff]  }
 0x27d   : > { %v4259_v2 = vadd.f32 %v4192_v3, %v21842_v9  ;;  %v19372_v41 = vpop.f32.mrf.mxu0 }
 0x27e   : > { %v15585_v20 = vpop.f32.mrf.mxu1 }
 0x27f   : > { %v4262_v13 = vadd.f32 %v15585_v20, %v21843_v54 }
 0x280   : > { %v19370_v50 = vpop.f32.mrf.mxu1 }
 0x281   : > { %v15632_v34 = vpop.f32.mrf.mxu0 }
 0x282   : > { %v15588_v21 = vpop.f32.mrf.mxu1  ;;  %v19379_v26 = vadd.f32 %v15632_v34, %v4261_v32  ;;  %v16406_v32 = vld [vmem:[%s21691_s4 + $0x60] sm:$0xff]  }
 0x283   : > { %v4265_v33 = vadd.f32 %v15588_v21, %v19233_v31  ;;  %v5010_v27 = vpop.f32.mrf.mxu0  ;;  %v16401_v31 = vld [vmem:[%s21691_s4 + $0x10] sm:$0xff]  }
 0x284   : > { %v4208_v49 = vpop.f32.mrf.mxu1  ;;  %v19382_v18 = vadd.f32 %v5010_v27, %v4259_v2  ;;  %15844 = vmatprep.subr.bf16.mxu1 %v16401_v31 }
 0x285   : > { %v4263_v5 = vadd.f32 %v4208_v49, %v19256_v42  ;;  %v15633_v60 = vpop.f32.mrf.mxu0  ;;  %15845 = vmatpush3.bf16.msra.mxu1 %v16401_v31  ;;  %v16402_v42 = vld [vmem:[%s21691_s4 + $0x78] sm:$0xff]  }
 0x286   : > { %v15589_v51 = vpop.f32.mrf.mxu1  ;;  %v19384_v29 = vadd.f32 %v15633_v60, %v4262_v13  ;;  %15882 = vmatprep.subr.bf16.mxu0 %v16402_v42  ;;  %15846 = vmatprep.subr.bf16.mxu1 %v16404_v17 }
 0x287   : > { %v4266_v37 = vadd.f32 %v15589_v51, %v19272_v0  ;;  %v19389_v23 = vpop.f32.mrf.mxu0  ;;  %15883 = vmatpush3.bf16.msra.mxu0 %v16402_v42  ;;  %v16409_v42 = vld [vmem:[%s21691_s4 + $0x50] sm:$0xff]  }
 0x288   : > { %15884 = vmatprep.subr.bf16.mxu0 %v16403_v1  ;;  %v19403_v44 = vpop.f32.mrf.mxu1 }
 0x289   : > { %15847 = vmatpush3.bf16.msra.mxu1 %v16404_v17 }
 0x28a   : > { %v15636_v47 = vpop.f32.mrf.mxu0 }
 0x28b   : > { %v19394_v0 = vadd.f32 %v15636_v47, %v4265_v33  ;;  %15885 = vmatpush3.bf16.msra.mxu0 %v16403_v1  ;;  %v16410_v47 = vld [vmem:[#allocation2] sm:$0xff]  }
 0x28c   : > { %v5026_v7 = vpop.f32.mrf.mxu0  ;;  %15886 = vmatprep.subr.bf16.mxu0 %v16405_v61  ;;  %15850 = vmatprep.mubr.bf16.mxu1 %v16410_v47 }
 0x28d   : > { %v19396_v45 = vadd.f32 %v5026_v7, %v4263_v5  ;;  %v19455_v7 = vld [vmem:[%s21691_s4 + $0xb8] sm:$0xff]  }
 0x28e   : > { %v15637_v28 = vpop.f32.mrf.mxu0  ;;  %21844 = vst [vmem:[#allocation17_spill] sm:$0xff] %v19455_v7 }
 0x28f   : > { %v19398_v15 = vadd.f32 %v15637_v28, %v4266_v37  ;;  %15887 = vmatpush3.bf16.msra.mxu0 %v16405_v61  ;;  %v16414_v61 = vld [vmem:[%s21691_s4 + $0x48] sm:$0xff]  }
 0x290   : > { %15888 = vmatprep.subr.bf16.mxu0 %v16406_v32  ;;  %v19417_v6 = vpop.f32.mrf.mxu0 }
 0x293   : > { %15889 = vmatpush3.bf16.msra.mxu0 %v16406_v32 }
 0x297   : > { %v15592_v43 = vpop.f32.mrf.mxu1 }
 0x298   : > { %v4269_v56 = vadd.f32 %v15592_v43, %v19281_v4  ;;  %v16407_v4 = vld [vmem:[%s21691_s4] sm:$0xff]  }
 0x299   : > { %v4224_v59 = vpop.f32.mrf.mxu1  ;;  %15848 = vmatprep.subr.bf16.mxu1 %v16407_v4 }
 0x29a   : > { %v4267_v3 = vadd.f32 %v4224_v59, %v19284_v11  ;;  %15849 = vmatpush3.bf16.msra.mxu1 %v16407_v4 }
 0x29b   : > { %v15593_v9 = vpop.f32.mrf.mxu1  ;;  %15930 = vmatprep.subr.bf16.mxu1 %v19455_v7 }
 0x29c   : > { %v4270_v2 = vadd.f32 %v15593_v9, %v19289_v39  ;;  %v16408_v39 = vld [vmem:[%s21691_s4 + $0x58] sm:$0xff]  }
 0x29d   : > { %v19419_v20 = vpop.f32.mrf.mxu1  ;;  %15890 = vmatprep.subr.bf16.mxu0 %v16408_v39 }
 0x29e   : > { %15891 = vmatpush3.bf16.msra.mxu0 %v16408_v39 }
 0x29f   : > { %v19424_v54 = vpop.f32.mrf.mxu1  ;;  %15892 = vmatprep.subr.bf16.mxu0 %v16409_v42 }
 0x2a1   : > { %v19426_v21 = vpop.f32.mrf.mxu1 }
 0x2a2   : > { %15893 = vmatpush3.bf16.msra.mxu0 %v16409_v42 }
 0x2a3   : > { %v15640_v13 = vpop.f32.mrf.mxu0  ;;  %v19433_v33 = vpop.f32.mrf.mxu1  ;;  %15894 = vmatprep.subr.bf16.mxu0 %v16414_v61 }
 0x2a4   : > { %v19428_v11 = vadd.f32 %v15640_v13, %v4269_v56 }
 0x2a5   : > { %v5042_v52 = vpop.f32.mrf.mxu0  ;;  %v19437_v34 = vpop.f32.mrf.mxu1 }
 0x2a6   : > { %v19435_v49 = vadd.f32 %v5042_v52, %v4267_v3  ;;  %15895 = vmatpush3.bf16.msra.mxu0 %v16414_v61 }
 0x2a7   : > { %v15641_v5 = vpop.f32.mrf.mxu0  ;;  %v19443_v27 = vpop.f32.mrf.mxu1 }
 0x2a8   : > { %v19439_v51 = vadd.f32 %v15641_v5, %v4270_v2  ;;  %v16415_v2 = vld [vmem:[%s21691_s4 + $0x40] sm:$0xff]  }
 0x2a9   : > { %v19441_v37 = vpop.f32.mrf.mxu0  ;;  %v19447_v31 = vpop.f32.mrf.mxu1  ;;  %15896 = vmatprep.subr.bf16.mxu0 %v16415_v2 }
 0x2aa   : > { %15897 = vmatpush3.bf16.msra.mxu0 %v16415_v2 }
 0x2ab   : > { %v19445_v60 = vpop.f32.mrf.mxu0  ;;  %v15665_v1 = vpop.f32.mrf.mxu1 }
 0x2ac   : > { %v5658_v17 = vadd.f32 %v15665_v1, %v19331_v24 }
 0x2ad   : > { %v19457_v28 = vpop.f32.mrf.mxu0  ;;  %v19465_v56 = vpop.f32.mrf.mxu1 }
 0x2ae   : > { %21846 = vst [vmem:[#allocation20_spill] sm:$0xff] %v19465_v56 }
 0x2af   : > { %v19463_v43 = vpop.f32.mrf.mxu0 }
 0x2b0   : > { %21845 = vst [vmem:[#allocation19_spill] sm:$0xff] %v19463_v43  ;;  %v15668_v59 = vpop.f32.mrf.mxu1 }
 0x2b1   : > { %v19468_v32 = vpop.f32.mrf.mxu0  ;;  %v5661_v3 = vadd.f32 %v15668_v59, %v19338_v19 }
 0x2b2   : > { %21847 = vst [vmem:[#allocation21_spill] sm:$0xff] %v19468_v32  ;;  %v5556_v9 = vpop.f32.mrf.mxu1 }
 0x2b3   : > { %v19471_v24 = vpop.f32.mrf.mxu0  ;;  %v5659_v4 = vadd.f32 %v5556_v9, %v19343_v38 }
 0x2b4   : > { %21848 = vst [vmem:[#allocation23_spill] sm:$0xff] %v19471_v24  ;;  %v15669_v39 = vpop.f32.mrf.mxu1 }
 0x2b5   : > { %v19477_v13 = vpop.f32.mrf.mxu0  ;;  %v5662_v52 = vadd.f32 %v15669_v39, %v19347_v25 }
 0x2b6   : > { %21849 = vst [vmem:[#allocation24_spill] sm:$0xff] %v19477_v13  ;;  %v19480_v42 = vpop.f32.mrf.mxu1 }
 0x2b7   : > { %v15713_v5 = vpop.f32.mrf.mxu0  ;;  %21850 = vst [vmem:[#allocation25_spill] sm:$0xff] %v19480_v42 }
 0x2b8   : > { %v19482_v19 = vadd.f32 %v15713_v5, %v5658_v17  ;;  %v15672_v1 = vpop.f32.mrf.mxu1  ;;  %v8729_v5 = vld [vmem:[#allocation2] sm:$0xf] }
 0x2b9   : > { %v19484_v47 = vpop.f32.mrf.mxu0  ;;  %v5665_v61 = vadd.f32 %v15672_v1, %v19352_v57  ;;  %v8810_v57 = vshrl.u32 %v8729_v5, 16  ;;  %v8813_v1 = vshll.u32 %v8729_v5, 16 }
 0x2ba   : > { %21851 = vst [vmem:[#allocation28_spill] sm:$0xff] %v19482_v19  ;;  %21852 = vst [vmem:[#allocation29_spill] sm:$0xff] %v19484_v47  ;;  %v5572_v10 = vpop.f32.mrf.mxu1  ;;  %v8730_v19 = vld [vmem:[#allocation2 + $0x4] sm:$0xf]  ;;  %v8731_v47 = vld [vmem:[#allocation2 + $0x8] sm:$0x1] }
 0x2bb   : > { %v15716_v59 = vpop.f32.mrf.mxu0  ;;  %v5663_v9 = vadd.f32 %v5572_v10, %v19355_v46  ;;  %v8819_v10 = vshll.u32 %v8730_v19, 16  ;;  %v8823_v46 = vshrl.u32 %v8730_v19, 16 }
 0x2bc   : > { %v19487_v38 = vadd.f32 %v15716_v59, %v5661_v3  ;;  %v15673_v13 = vpop.f32.mrf.mxu1 }
 0x2bd   : > { %v6007_v7 = vpop.f32.mrf.mxu0  ;;  %v5666_v2 = vadd.f32 %v15673_v13, %v19358_v16  ;;  %v8815_v16 = vrot.slane %v8813_v1, 5  ;;  %v8825_v42 = vrot.slane %v8823_v46, 4 }
 0x2be   : > { %21853 = vst [vmem:[#allocation30_spill] sm:$0xff] %v19487_v38  ;;  %v19490_v25 = vadd.f32 %v6007_v7, %v5659_v4  ;;  %v19493_v17 = vpop.f32.mrf.mxu1  ;;  %v8829_v38 = vshll.u32 %v8731_v47, 16  ;;  %v8812_v4 = vrot.slane %v8810_v57, 4 }
 0x2bf   : > { %v15717_v39 = vpop.f32.mrf.mxu0  ;;  %21855 = vst [vmem:[#allocation46_spill] sm:$0xff] %v19493_v17  ;;  %v8821_v17 = vrot.slane %v8819_v10, 5 }
 0x2c0   : > { %21854 = vst [vmem:[#allocation12_spill] sm:$0xff] %v19490_v25  ;;  %v19495_v24 = vadd.f32 %v15717_v39, %v5662_v52  ;;  %v15676_v59 = vpop.f32.mrf.mxu1  ;;  %v8816_v39 = vor.u32 %v8815_v16, %v8812_v4  ;;  %v8831_v56 = vrot.slane %v8829_v38, 5 }
 0x2c1   : > { %v19497_v3 = vpop.f32.mrf.mxu0  ;;  %v5669_v7 = vadd.f32 %v15676_v59, %v19361_v55 }
 0x2c2   : > { %21856 = vst [vmem:[#allocation15_spill] sm:$0xff] %v19495_v24  ;;  %21857 = vst [vmem:[#allocation48_spill] sm:$0xff] %v19497_v3  ;;  %v5588_v25 = vpop.f32.mrf.mxu1  ;;  %v8826_v3 = vor.u32 %v8825_v42, %v8821_v17  ;;  %v8817_v55 = vrot.slane %v8816_v39, 4 }
 0x2c3   : > { %v15720_v13 = vpop.f32.mrf.mxu0  ;;  %v5667_v52 = vadd.f32 %v5588_v25, %v19364_v14 }
 0x2c4   : > { %v19500_v32 = vadd.f32 %v15720_v13, %v5665_v61  ;;  %v15677_v24 = vpop.f32.mrf.mxu1  ;;  %v8827_v1 = vrot.slane %v8826_v3, 4  ;;  %v8822_v61 = vsel %vm17984_vm0, %v8817_v55, %v8821_v17 }
 0x2c5   : > { %v6023_v5 = vpop.f32.mrf.mxu0  ;;  %v5670_v19 = vadd.f32 %v15677_v24, %v19367_v30 }
 0x2c6   : > { %21858 = vst [vmem:[#allocation49_spill] sm:$0xff] %v19500_v32  ;;  %v19503_v43 = vadd.f32 %v6023_v5, %v5663_v9  ;;  %v19506_v57 = vpop.f32.mrf.mxu1  ;;  %v8832_v42 = vsel %vm17984_vm0, %v8827_v1, %v8831_v56 }
 0x2c7   : > { %v15721_v47 = vpop.f32.mrf.mxu0  ;;  %v14579_v9 = vcombine.low %v8822_v61, %v8832_v42 }
 0x2c8   : > { %21859 = vst [vmem:[#allocation50_spill] sm:$0xff] %v19503_v43  ;;  %v19508_v59 = vadd.f32 %v15721_v47, %v5666_v2  ;;  %v15680_v25 = vpop.f32.mrf.mxu1 }
 0x2c9   : > { %v19512_v14 = vpop.f32.mrf.mxu0  ;;  %v5673_v38 = vadd.f32 %v15680_v25, %v19379_v26  ;;  %15898 = vmatprep.mubr.bf16.mxu0 %v14579_v9 }
 0x2ca   : > { %21860 = vst [vmem:[#allocation51_spill] sm:$0xff] %v19508_v59  ;;  %v5604_v24 = vpop.f32.mrf.mxu1 }
 0x2cb   : > { %v15724_v30 = vpop.f32.mrf.mxu0  ;;  %v5671_v3 = vadd.f32 %v5604_v24, %v19382_v18 }
 0x2cc   : > { %v19517_v10 = vadd.f32 %v15724_v30, %v5669_v7  ;;  %v15681_v46 = vpop.f32.mrf.mxu1 }
 0x2cd   : > { %v6039_v2 = vpop.f32.mrf.mxu0  ;;  %v5674_v17 = vadd.f32 %v15681_v46, %v19384_v29 }
 0x2ce   : > { %21861 = vst [vmem:[#allocation52_spill] sm:$0xff] %v19517_v10  ;;  %v19520_v4 = vadd.f32 %v6039_v2, %v5667_v52  ;;  %v19523_v13 = vpop.f32.mrf.mxu1 }
 0x2cf   : > { %v15725_v16 = vpop.f32.mrf.mxu0 }
 0x2d0   : > { %21862 = vst [vmem:[#allocation53_spill] sm:$0xff] %v19520_v4  ;;  %v19525_v56 = vadd.f32 %v15725_v16, %v5670_v19 }
 0x2d1   : > { %v19527_v26 = vpop.f32.mrf.mxu0  ;;  %v15684_v39 = vpop.f32.mrf.mxu1 }
 0x2d2   : > { %21863 = vst [vmem:[#allocation54_spill] sm:$0xff] %v19525_v56  ;;  %v5677_v7 = vadd.f32 %v15684_v39, %v19394_v0  ;;  %v21869_v39 = vld [vmem:[#allocation7_spill] sm:$0xff] }
 0x2d3   : > { %v15728_v5 = vpop.f32.mrf.mxu0  ;;  %v5620_v55 = vpop.f32.mrf.mxu1 }
 0x2d4   : > { %v19530_v18 = vadd.f32 %v15728_v5, %v5673_v38  ;;  %v5675_v47 = vadd.f32 %v5620_v55, %v19396_v45 }
 0x2d5   : > { %v6055_v52 = vpop.f32.mrf.mxu0  ;;  %v15685_v1 = vpop.f32.mrf.mxu1 }
 0x2d6   : > { %21864 = vst [vmem:[#allocation55_spill] sm:$0xff] %v19530_v18  ;;  %v19533_v61 = vadd.f32 %v6055_v52, %v5671_v3  ;;  %v5678_v29 = vadd.f32 %v15685_v1, %v19398_v15  ;;  %v21871_v1 = vld [vmem:[#allocation8_spill] sm:$0xff]  ;;  %v21882_v18 = vld [vmem:[#allocation34_spill] sm:$0xff] }
 0x2d7   : > { %v15729_v25 = vpop.f32.mrf.mxu0  ;;  %v19536_v19 = vpop.f32.mrf.mxu1 }
 0x2d8   : > { %21865 = vst [vmem:[#allocation56_spill] sm:$0xff] %v19533_v61  ;;  %v19538_v42 = vadd.f32 %v15729_v25, %v5674_v17  ;;  %v21870_v17 = vld [vmem:[#allocation26_spill] sm:$0xff] }
 0x2d9   : > { %v19540_v9 = vpop.f32.mrf.mxu0  ;;  %v15688_v0 = vpop.f32.mrf.mxu1  ;;  %v3193_v5 = vadd.f32 %v21870_v17, %v21869_v39 }
 0x2da   : > { %21866 = vst [vmem:[#allocation57_spill] sm:$0xff] %v19538_v42  ;;  %v5681_v30 = vadd.f32 %v15688_v0, %v19428_v11  ;;  %v21872_v11 = vld [vmem:[#allocation31_spill] sm:$0xff]  ;;  %v21873_v0 = vld [vmem:[#allocation9_spill] sm:$0xff]  ;;  %v21881_v42 = vld [vmem:[#allocation32_spill] sm:$0xff] }
 0x2db   : > { %v15732_v38 = vpop.f32.mrf.mxu0  ;;  %v5636_v24 = vpop.f32.mrf.mxu1  ;;  %v3197_v25 = vadd.f32 %v21872_v11, %v21871_v1  ;;  %v21883_v11 = vld [vmem:[#allocation36_spill] sm:$0xff] }
 0x2dc   : > { %v19543_v2 = vadd.f32 %v15732_v38, %v5677_v7  ;;  %v5679_v45 = vadd.f32 %v5636_v24, %v19435_v49  ;;  %v21874_v7 = vld [vmem:[#allocation33_spill] sm:$0xff]  ;;  %v21876_v49 = vld [vmem:[#allocation35_spill] sm:$0xff] }
 0x2dd   : > { %v6071_v3 = vpop.f32.mrf.mxu0  ;;  %v15689_v46 = vpop.f32.mrf.mxu1  ;;  %v3201_v38 = vadd.f32 %v21874_v7, %v21873_v0  ;;  %v3205_v24 = vadd.f32 %v21876_v49, %v21875_v63  ;;  %v3794_v61 = vadd.f32 %v21881_v42, %v3197_v25  ;;  %v21884_v0 = vld [vmem:[#allocation14_spill] sm:$0xff]  ;;  %v21885_v7 = vld [vmem:[#allocation39_spill] sm:$0xff]  ;;  %v21888_v49 = vld [vmem:[#allocation41_spill] sm:$0xff] }
 0x2de   : > { %21867 = vst [vmem:[#allocation58_spill] sm:$0xff] %v19543_v2  ;;  %v19546_v16 = vadd.f32 %v6071_v3, %v5675_v47  ;;  %v5682_v15 = vadd.f32 %v15689_v46, %v19439_v51  ;;  %v21878_v47 = vld [vmem:[#allocation27_spill] sm:$0xff]  ;;  %v21880_v46 = vld [vmem:[#allocation37_spill] sm:$0xff]  ;;  %v3213_v4 = vadd.f32 %v21885_v7, %v21884_v0  ;;  %v21886_v63 = vld [vmem:[#allocation38_spill] sm:$0xff] }
 0x2df   : > { %v15733_v55 = vpop.f32.mrf.mxu0  ;;  %v19551_v52 = vpop.f32.mrf.mxu1  ;;  %v3790_v3 = vadd.f32 %v21878_v47, %v3193_v5  ;;  %v21879_v51 = vld [vmem:[#allocation11_spill] sm:$0xff]  ;;  %v3798_v1 = vadd.f32 %v21882_v18, %v3201_v38  ;;  %v3802_v56 = vadd.f32 %v21883_v11, %v3205_v24  ;;  %v21889_v47 = vld [vmem:[#allocation22_spill] sm:$0xff]  ;;  %v21892_v42 = vld [vmem:[#allocation40_spill] sm:$0xff] }
 0x2e0   : > { %21868 = vst [vmem:[#allocation59_spill] sm:$0xff] %v19546_v16  ;;  %v19559_v2 = vadd.f32 %v15733_v55, %v5678_v29  ;;  %v3209_v16 = vadd.f32 %v21880_v46, %v21879_v51  ;;  %v21887_v55 = vld [vmem:[#allocation18_spill] sm:$0xff]  ;;  %v21891_v46 = vld [vmem:[#allocation13_spill] sm:$0xff]  ;;  %v3810_v25 = vadd.f32 %v21892_v42, %v3213_v4  ;;  %v21893_v18 = vld [vmem:[#allocation47_spill] sm:$0xff] }
 0x2e1   : > { %v19564_v39 = vpop.f32.mrf.mxu0  ;;  %v15756_v17 = vpop.f32.mrf.mxu1  ;;  %v3217_v5 = vadd.f32 %v21888_v49, %v21887_v55  ;;  %v4240_v10 = vadd.f32 %v21891_v46, %v3790_v3  ;;  %v4244_v38 = vadd.f32 %v21893_v18, %v3794_v61  ;;  %v4248_v24 = vadd.f32 %v19251_v35, %v3798_v1  ;;  %v21894_v0 = vld [vmem:[#allocation42_spill] sm:$0xff]  ;;  %v21895_v7 = vld [vmem:[#allocation44_spill] sm:$0xff]  ;;  %v21896_v55 = vld [vmem:[#allocation45_spill] sm:$0xff] }
 0x2e2   : > { %21877 = vst [vmem:[#allocation7_spill] sm:$0xff] %v19559_v2  ;;  %v3806_v29 = vadd.f32 %v21886_v63, %v3209_v16  ;;  %v21890_v2 = vld [vmem:[#allocation43_spill] sm:$0xff]  ;;  %v21897_v46 = vld [vmem:[#allocation16_spill] sm:$0xff]  ;;  %v5653_v61 = vadd.f32 %v19424_v54, %v19304_v53  ;;  %v4260_v1 = vadd.f32 %v19370_v50, %v3810_v25  ;;  %v5654_v50 = vadd.f32 %v19433_v33, %v19316_v36  ;;  %v19619_v33 = vld [vmem:[%s21690_s3] ss:$0 sm:$0xff] }
 0x2e3   : > { %v3221_v51 = vadd.f32 %v21890_v2, %v21889_v47  ;;  %v15736_v59 = vpop.f32.mrf.mxu0  ;;  %v6793_v43 = vpop.f32.mrf.mxu1  ;;  %v3814_v16 = vadd.f32 %v21894_v0, %v3217_v5  ;;  %v5058_v49 = vadd.f32 %v21896_v55, %v4240_v10  ;;  %v4252_v2 = vadd.f32 %v19293_v62, %v3802_v56 }
 0x2e4   : > { %v19580_v11 = vadd.f32 %v15736_v59, %v5681_v30  ;;  %v5062_v32 = vadd.f32 %v21897_v46, %v4244_v38  ;;  %v5066_v4 = vadd.f32 %v19276_v12, %v4248_v24  ;;  %v4256_v30 = vadd.f32 %v19350_v8, %v3806_v29  ;;  %v21904_v24 = vld [vmem:[#allocation29_spill] sm:$0xff] }
 0x2e5   : > { %v3818_v63 = vadd.f32 %v21895_v7, %v3221_v51  ;;  %v6087_v47 = vpop.f32.mrf.mxu0  ;;  %v15757_v3 = vpop.f32.mrf.mxu1  ;;  %v5070_v59 = vadd.f32 %v19335_v48, %v4252_v2  ;;  %v4264_v10 = vadd.f32 %v19403_v44, %v3814_v16  ;;  %v5651_v12 = vadd.f32 %v19426_v21, %v19311_v22  ;;  %v19630_v7 = vld [vmem:[%s21690_s3 + $0x1] ss:$0 sm:$0xff] }
 0x2e6   : > { %v19590_v35 = vadd.f32 %v6087_v47, %v5679_v45  ;;  %v6104_v51 = vadd.f32 %v19445_v60, %v5653_v61  ;;  %v5074_v54 = vadd.f32 %v19372_v41, %v4256_v30  ;;  %v5078_v48 = vadd.f32 %v19389_v23, %v4260_v1  ;;  %v21898_v23 = vld [vmem:[#allocation19_spill] sm:$0xff] }
 0x2e7   : > { %v15737_v62 = vpop.f32.mrf.mxu0  ;;  %v6796_v56 = vpop.f32.mrf.mxu1  ;;  %v4268_v5 = vadd.f32 %v19419_v20, %v3818_v63  ;;  %v5082_v8 = vadd.f32 %v19417_v6, %v4264_v10  ;;  %v5652_v29 = vadd.f32 %v19437_v34, %v5058_v49  ;;  %v6102_v22 = vadd.f32 %v19457_v28, %v5651_v12  ;;  %v21906_v49 = vld [vmem:[#allocation48_spill] sm:$0xff] }
 0x2e8   : > { %v19600_v53 = vadd.f32 %v15737_v62, %v5682_v15  ;;  %v6922_v21 = vadd.f32 %v15756_v17, %v6104_v51  ;;  %v5657_v60 = vadd.f32 %v19443_v27, %v19321_v40  ;;  %v5655_v41 = vadd.f32 %v19447_v31, %v19326_v58  ;;  %v21899_v15 = vld [vmem:[#allocation20_spill] sm:$0xff]  ;;  %v21901_v17 = vld [vmem:[#allocation25_spill] sm:$0xff]  ;;  %v21902_v27 = vld [vmem:[#allocation23_spill] sm:$0xff] }
 0x2e9   : > { %v6090_v44 = vpop.f32.mrf.mxu0  ;;  %v15760_v45 = vpop.f32.mrf.mxu1  ;;  %v5086_v20 = vadd.f32 %v19441_v37, %v4268_v5  ;;  %v6105_v6 = vadd.f32 %v21898_v23, %v5654_v50  ;;  %v5656_v42 = vadd.f32 %v21899_v15, %v5062_v32  ;;  %v21900_v37 = vld [vmem:[#allocation21_spill] sm:$0xff]  ;;  %v5660_v25 = vadd.f32 %v21901_v17, %v5066_v4  ;;  %v21903_v58 = vld [vmem:[#allocation24_spill] sm:$0xff]  ;;  %v21905_v32 = vld [vmem:[#allocation46_spill] sm:$0xff] }
 0x2ea   : > { %v6103_v28 = vadd.f32 %v21900_v37, %v5652_v29  ;;  %v6920_v18 = vadd.f32 %v6793_v43, %v6102_v22  ;;  %v6108_v38 = vadd.f32 %v21902_v27, %v5657_v60  ;;  %v6106_v31 = vadd.f32 %v21903_v58, %v5655_v41  ;;  %v21909_v37 = vld [vmem:[#allocation12_spill] sm:$0xff] }
 0x2eb   : > { %v15804_v36 = vpop.f32.mrf.mxu0  ;;  %v6809_v34 = vpop.f32.mrf.mxu1  ;;  %v6107_v0 = vadd.f32 %v21904_v24, %v5656_v42  ;;  %v5664_v16 = vadd.f32 %v21905_v32, %v5070_v59  ;;  %v19633_v2 = vadd.f32 %v21906_v49, %v5660_v25  ;;  %v6923_v43 = vadd.f32 %v15757_v3, %v6105_v6  ;;  %v21908_v42 = vld [vmem:[#allocation30_spill] sm:$0xff] }
 0x2ec   : > { %v7516_v40 = vadd.f32 %v15804_v36, %v6922_v21  ;;  %v5668_v61 = vadd.f32 %v19506_v57, %v5074_v54  ;;  %v5672_v59 = vadd.f32 %v19523_v13, %v5078_v48  ;;  %v5676_v30 = vadd.f32 %v19536_v19, %v5082_v8 }
 0x2ed   : > { %v7387_v63 = vpop.f32.mrf.mxu0  ;;  %v15761_v55 = vpop.f32.mrf.mxu1  ;;  %v19637_v4 = vadd.f32 %v19512_v14, %v5664_v16  ;;  %v6921_v62 = vadd.f32 %v6796_v56, %v6103_v28  ;;  %v5680_v13 = vadd.f32 %v19551_v52, %v5086_v20  ;;  %v6924_v22 = vadd.f32 %v6809_v34, %v6106_v31  ;;  %v21910_v31 = vld [vmem:[#allocation15_spill] sm:$0xff] }
 0x2ee   : > { %v7618_v47 = vmul.f32 %v19619_v33, %v7516_v40  ;;  %v7514_v46 = vadd.f32 %v7387_v63, %v6920_v18  ;;  %v19645_v51 = vadd.f32 %v19527_v26, %v5668_v61  ;;  %v19648_v14 = vadd.f32 %v19540_v9, %v5672_v59  ;;  %v21907_v9 = vld [vmem:[#allocation28_spill] sm:$0xff] }
 0x2ef   : > { %v15805_v1 = vpop.f32.mrf.mxu0  ;;  %v6812_v10 = vpop.f32.mrf.mxu1  ;;  %v19651_v57 = vadd.f32 %v19564_v39, %v5676_v30  ;;  %v19656_v29 = vadd.f32 %v6090_v44, %v5680_v13  ;;  %v6926_v26 = vadd.f32 %v15760_v45, %v6108_v38  ;;  %v6927_v21 = vadd.f32 %v15761_v55, %v21907_v9  ;;  %v8134_v9 = vld [vmem:[#allocation2 + $0xc] sm:$0xf] }
 0x2f0   : > { %v7654_v5 = vadd.f32 %v19630_v7, %v7618_v47  ;;  %v7616_v12 = vmul.f32 %v19619_v33, %v7514_v46  ;;  %v7517_v3 = vadd.f32 %v15805_v1, %v6923_v43  ;;  %v19661_v6 = vadd.f32 %v6812_v10, %v6107_v0 }
 0x2f1   : > { %v7390_v19 = vpop.f32.mrf.mxu0  ;;  %v15764_v54 = vpop.f32.mrf.mxu1 }
 0x2f2   : > { %v7686_v48 = vmax.f32 %v7654_v5, 0.0  ;;  %v7652_v56 = vadd.f32 %v19630_v7, %v7616_v12  ;;  %v7619_v8 = vmul.f32 %v19619_v33, %v7517_v3  ;;  %v7515_v50 = vadd.f32 %v7390_v19, %v6921_v62  ;;  %v8143_v12 = vld [vmem:[#allocation2 + $0x18] sm:$0xf] }
 0x2f3   : > { %v6825_v39 = vpop.f32.mrf.mxu1  ;;  %v19664_v36 = vadd.f32 %v15764_v54, %v21908_v42 }
 0x2f4   : > { %v15808_v60 = vpop.f32.mrf.mxu0  ;;  %v14940_v41 = vpack.c.bf16 %v7686_v48, %v7686_v48  ;;  %v7684_v23 = vmax.f32 %v7652_v56, 0.0  ;;  %v7655_v52 = vadd.f32 %v19630_v7, %v7619_v8  ;;  %v7617_v20 = vmul.f32 %v19619_v33, %v7515_v50 }
 0x2f5   : > { %v7520_v15 = vadd.f32 %v15808_v60, %v6926_v26  ;;  %v19667_v45 = vadd.f32 %v6825_v39, %v21909_v37  ;;  %v15765_v34 = vpop.f32.mrf.mxu1 }
 0x2f6   : > { %v7403_v44 = vpop.f32.mrf.mxu0  ;;  %v7830_v28 = vshrl.u32 %v14940_v41, 16  ;;  %v7833_v17 = vshll.u32 %v14940_v41, 16  ;;  %v14938_v25 = vpack.c.bf16 %v7684_v23, %v7684_v23  ;;  %v7687_v18 = vmax.f32 %v7655_v52, 0.0 }
 0x2f7   : > { %v7653_v40 = vadd.f32 %v19630_v7, %v7617_v20  ;;  %v7622_v27 = vmul.f32 %v19619_v33, %v7520_v15  ;;  %v7518_v38 = vadd.f32 %v7403_v44, %v6924_v22  ;;  %v19672_v24 = vadd.f32 %v15765_v34, %v21910_v31  ;;  %v19674_v0 = vpop.f32.mrf.mxu1  ;;  %v8147_v34 = vld [vmem:[#allocation2 + $0x20] sm:$0x1] }
 0x2f8   : > { %v15809_v58 = vpop.f32.mrf.mxu0  ;;  %v7832_v32 = vrot.slane %v7830_v28, 7  ;;  %v7813_v16 = vshrl.u32 %v14938_v25, 16  ;;  %v7816_v63 = vshll.u32 %v14938_v25, 16  ;;  %v14941_v55 = vpack.c.bf16 %v7687_v18, %v7687_v18 }
 0x2f9   : > { %v7685_v43 = vmax.f32 %v7653_v40, 0.0  ;;  %v7658_v47 = vadd.f32 %v19630_v7, %v7622_v27  ;;  %v7620_v46 = vmul.f32 %v19619_v33, %v7518_v38  ;;  %v7521_v61 = vadd.f32 %v15809_v58, %v6927_v21  ;;  %v19684_v30 = vpop.f32.mrf.mxu1 }
 0x2fa   : > { %v7406_v59 = vpop.f32.mrf.mxu0  ;;  %v7835_v1 = vor.u32 %v7833_v17, %v7832_v32  ;;  %v7836_v10 = vrot.slane %v7832_v32, 4  ;;  %v7815_v62 = vrot.slane %v7813_v16, 7  ;;  %v7838_v5 = vshrl.u32 %v14941_v55, 16  ;;  %v19707_v16 = vld [vmem:[%s21691_s4 + $0xf8] sm:$0xff]  }
 0x2fb   : > { %v7841_v3 = vshll.u32 %v14941_v55, 16  ;;  %v14939_v13 = vpack.c.bf16 %v7685_v43, %v7685_v43  ;;  %v7690_v19 = vmax.f32 %v7658_v47, 0.0  ;;  %v7656_v54 = vadd.f32 %v19630_v7, %v7620_v46  ;;  %v6841_v56 = vpop.f32.mrf.mxu1  ;;  %15978 = vmatprep.subr.bf16.mxu0 %v19707_v16 }
 0x2fc   : > { %v15812_v48 = vpop.f32.mrf.mxu0  ;;  %v8144_v8 = vsel %vm19678_vm15, %v7835_v1, %v8143_v12  ;;  %v7818_v50 = vor.u32 %v7816_v63, %v7815_v62  ;;  %v7819_v26 = vrot.slane %v7815_v62, 4  ;;  %v7840_v22 = vrot.slane %v7838_v5, 7 }
 0x2fd   : > { %8145 = vst [vmem:[#allocation2 + $0x18] sm:$0xf] %v8144_v8  ;;  %v7821_v60 = vshrl.u32 %v14939_v13, 16  ;;  %v7824_v39 = vshll.u32 %v14939_v13, 16  ;;  %v14944_v41 = vpack.c.bf16 %v7690_v19, %v7690_v19  ;;  %v7688_v23 = vmax.f32 %v7656_v54, 0.0  ;;  %v15769_v37 = vpop.f32.mrf.mxu1 }
 0x2fe   : > { %v7419_v52 = vpop.f32.mrf.mxu0  ;;  %v8135_v20 = vsel %vm19678_vm15, %v7818_v50, %v8134_v9  ;;  %v7843_v15 = vor.u32 %v7841_v3, %v7840_v22  ;;  %v7845_v42 = vrot.slane %v7840_v22, 4  ;;  %v7623_v44 = vmul.f32 %v19619_v33, %v7521_v61  ;;  %v8140_v61 = vld [vmem:[#allocation2 + $0x14] sm:$0x1]  ;;  %v8157_v54 = vld [vmem:[#allocation2 + $0x30] sm:$0xf] }
 0x2ff   : > { %8136 = vst [vmem:[#allocation2 + $0xc] sm:$0xf] %v8135_v20  ;;  %v7823_v28 = vrot.slane %v7821_v60, 7  ;;  %v7864_v17 = vshrl.u32 %v14944_v41, 16  ;;  %v7867_v25 = vshll.u32 %v14944_v41, 16  ;;  %v14942_v18 = vpack.c.bf16 %v7688_v23, %v7688_v23 }
 0x300   : > { %v15813_v40 = vpop.f32.mrf.mxu0  ;;  %v7844_v38 = vsel %vm16612_vm2, %v7836_v10, %v7843_v15  ;;  %v8148_v58 = vsel %vm19691_vm7, %v7845_v42, %v8147_v34  ;;  %v7659_v31 = vadd.f32 %v19630_v7, %v7623_v44  ;;  %v7519_v32 = vadd.f32 %v7406_v59, %v19661_v6  ;;  %v6844_v59 = vpop.f32.mrf.mxu1 }
 0x301   : > { %8146 = vst [vmem:[#allocation2 + $0x1c] sm:$0xf] %v7844_v38  ;;  %8149 = vst [vmem:[#allocation2 + $0x20] sm:$0x1] %v8148_v58  ;;  %v7826_v63 = vor.u32 %v7824_v39, %v7823_v28  ;;  %v7828_v55 = vrot.slane %v7823_v28, 4  ;;  %v7866_v43 = vrot.slane %v7864_v17, 7  ;;  %v6929_v6 = vadd.f32 %v19674_v0, %v19633_v2 }
 0x302   : > { %v7847_v47 = vshrl.u32 %v14942_v18, 16  ;;  %v7422_v46 = vpop.f32.mrf.mxu0  ;;  %v7850_v1 = vshll.u32 %v14942_v18, 16  ;;  %v7691_v10 = vmax.f32 %v7659_v31, 0.0  ;;  %v7621_v62 = vmul.f32 %v19619_v33, %v7519_v32  ;;  %v21919_v39 = vld [vmem:[#allocation50_spill] sm:$0xff] }
 0x303   : > { %v7827_v5 = vsel %vm16612_vm2, %v7819_v26, %v7826_v63  ;;  %v8141_v12 = vsel %vm19691_vm7, %v7828_v55, %v8140_v61  ;;  %v7869_v3 = vor.u32 %v7867_v25, %v7866_v43  ;;  %v7870_v13 = vrot.slane %v7866_v43, 4  ;;  %v21918_v26 = vld [vmem:[#allocation49_spill] sm:$0xff] }
 0x304   : > { %v15816_v19 = vpop.f32.mrf.mxu0  ;;  %8142 = vst [vmem:[#allocation2 + $0x14] sm:$0x1] %v8141_v12  ;;  %8137 = vst [vmem:[#allocation2 + $0x10] sm:$0xf] %v7827_v5  ;;  %v19717_v8 = vrot.slane %v7847_v47, 7  ;;  %v14945_v50 = vpack.c.bf16 %v7691_v10, %v7691_v10  ;;  %v7657_v2 = vadd.f32 %v19630_v7, %v7621_v62  ;;  %v7524_v0 = vadd.f32 %v15812_v48, %v19664_v36 }
 0x305   : > { %v8158_v22 = vsel %vm19678_vm15, %v7869_v3, %v8157_v54  ;;  %v6934_v9 = vadd.f32 %v19684_v30, %v21918_v26  ;;  %v7522_v60 = vadd.f32 %v7419_v52, %v19667_v45  ;;  %v6932_v41 = vadd.f32 %v6841_v56, %v21919_v39  ;;  %v8150_v36 = vld [vmem:[#allocation2 + $0x24] sm:$0xf]  ;;  %v21920_v52 = vld [vmem:[#allocation51_spill] sm:$0xff]  ;;  %v21921_v39 = vld [vmem:[#allocation52_spill] sm:$0xff] }
 0x306   : > { %8159 = vst [vmem:[#allocation2 + $0x30] sm:$0xf] %v8158_v22  ;;  %v7852_v23 = vor.u32 %v7850_v1, %v19717_v8  ;;  %v7853_v20 = vrot.slane %v19717_v8, 4  ;;  %v7872_v15 = vshrl.u32 %v14945_v50, 16  ;;  %v7875_v42 = vshll.u32 %v14945_v50, 16  ;;  %v15772_v44 = vpop.f32.mrf.mxu1  ;;  %v7435_v34 = vpop.f32.mrf.mxu0 }
 0x307   : > { %v7689_v48 = vmax.f32 %v7657_v2, 0.0  ;;  %v7626_v28 = vmul.f32 %v19619_v33, %v7524_v0  ;;  %v7624_v17 = vmul.f32 %v19619_v33, %v7522_v60  ;;  %v7525_v30 = vadd.f32 %v15813_v40, %v19672_v24  ;;  %v8161_v40 = vld [vmem:[#allocation2 + $0x38] sm:$0x1]  ;;  %v8154_v22 = vld [vmem:[#allocation2 + $0x2c] sm:$0x1] }
 0x308   : > { %v8151_v45 = vsel %vm19678_vm15, %v7852_v23, %v8150_v36  ;;  %v7874_v56 = vrot.slane %v7872_v15, 7  ;;  %v19735_v25 = vadd.f32 %v15769_v37, %v21920_v52  ;;  %v7523_v18 = vadd.f32 %v7422_v46, %v6929_v6  ;;  %v19737_v38 = vpop.f32.mrf.mxu1  ;;  %v19746_v37 = vpop.f32.mrf.mxu0  ;;  %v16413_v0 = vld [vmem:[#allocation2 + $0x18] sm:$0xff]  }
 0x309   : > { %8152 = vst [vmem:[#allocation2 + $0x24] sm:$0xf] %v8151_v45  ;;  %v14943_v58 = vpack.c.bf16 %v7689_v48, %v7689_v48  ;;  %v7662_v31 = vadd.f32 %v19630_v7, %v7626_v28  ;;  %v7660_v32 = vadd.f32 %v19630_v7, %v7624_v17  ;;  %v7627_v63 = vmul.f32 %v19619_v33, %v7525_v30  ;;  %v21922_v30 = vld [vmem:[#allocation17_spill] sm:$0xff] }
 0x30a   : > { %v7877_v55 = vor.u32 %v7875_v42, %v7874_v56  ;;  %v7879_v24 = vrot.slane %v7874_v56, 4  ;;  %v7625_v43 = vmul.f32 %v19619_v33, %v7523_v18  ;;  %v19744_v47 = vadd.f32 %v6844_v59, %v19637_v4  ;;  %v19754_v3 = vpop.f32.mrf.mxu1  ;;  %v16416_v59 = vld [vmem:[%s21691_s4 + $0xb0] sm:$0xff]   ;;  %v19762_v42 = vpop.f32.mrf.mxu0 }
 0x30b   : > { %v7855_v46 = vshrl.u32 %v14943_v58, 16  ;;  %v7858_v61 = vshll.u32 %v14943_v58, 16  ;;  %v7694_v1 = vmax.f32 %v7662_v31, 0.0  ;;  %v7692_v10 = vmax.f32 %v7660_v32, 0.0  ;;  %v16412_v4 = vld [vmem:[#allocation2 + $0xc] sm:$0xff]  }
 0x30c   : > { %v7878_v62 = vsel %vm16612_vm2, %v7870_v13, %v7877_v55  ;;  %v8162_v6 = vsel %vm19691_vm7, %v7879_v24, %v8161_v40  ;;  %v7663_v5 = vadd.f32 %v19630_v7, %v7627_v63  ;;  %v7661_v12 = vadd.f32 %v19630_v7, %v7625_v43  ;;  %15851 = vmatmul.mubr.bf16.vlgmr.msra.gmra.mxu1 %v16412_v4  ;;  %v19765_v52 = vpop.f32.mrf.mxu1  ;;  %v15820_v24 = vpop.f32.mrf.mxu0  ;;  %v8164_v4 = vld [vmem:[#allocation2 + $0x3c] sm:$0xf] }
 0x30d   : > { %8160 = vst [vmem:[#allocation2 + $0x34] sm:$0xf] %v7878_v62  ;;  %8163 = vst [vmem:[#allocation2 + $0x38] sm:$0x1] %v8162_v6  ;;  %v7857_v54 = vrot.slane %v7855_v46, 7  ;;  %v14948_v50 = vpack.c.bf16 %v7694_v1, %v7694_v1  ;;  %v14946_v2 = vpack.c.bf16 %v7692_v10, %v7692_v10  ;;  %v7528_v13 = vadd.f32 %v15816_v19, %v6934_v9 }
 0x30e   : > { %v7695_v26 = vmax.f32 %v7663_v5, 0.0  ;;  %v7693_v60 = vmax.f32 %v7661_v12, 0.0  ;;  %v19760_v23 = vadd.f32 %v15772_v44, %v21921_v39  ;;  %v7526_v15 = vadd.f32 %v7435_v34, %v6932_v41  ;;  %15931 = vmatpush3.bf16.msra.mxu1 %v21922_v30  ;;  %15854 = vmatprep.mubr.bf16.mxu1 %v16413_v0  ;;  %v16419_v41 = vld [vmem:[%s21691_s4 + $0xa8] sm:$0xff]   ;;  %v16422_v5 = vld [vmem:[%s21691_s4 + $0xa0] sm:$0xff]   ;;  %v8175_v39 = vld [vmem:[#allocation2 + $0x50] sm:$0x1] }
 0x30f   : > { %v7860_v36 = vor.u32 %v7858_v61, %v7857_v54  ;;  %v7862_v48 = vrot.slane %v7857_v54, 4  ;;  %v7898_v28 = vshrl.u32 %v14948_v50, 16  ;;  %v7901_v17 = vshll.u32 %v14948_v50, 16  ;;  %15932 = vmatprep.subr.bf16.mxu1 %v16416_v59  ;;  %v8171_v46 = vld [vmem:[#allocation2 + $0x48] sm:$0xf] }
 0x310   : > { %v7881_v45 = vshrl.u32 %v14946_v2, 16  ;;  %v7884_v19 = vshll.u32 %v14946_v2, 16  ;;  %v14949_v9 = vpack.c.bf16 %v7695_v26, %v7695_v26  ;;  %v14947_v56 = vpack.c.bf16 %v7693_v60, %v7693_v60  ;;  %v21923_v2 = vld [vmem:[#allocation53_spill] sm:$0xff]  ;;  %v7451_v60 = vpop.f32.mrf.mxu0 }
 0x311   : > { %v7861_v44 = vsel %vm16612_vm2, %v7853_v20, %v7860_v36  ;;  %v8155_v34 = vsel %vm19691_vm7, %v7862_v48, %v8154_v22  ;;  %v7900_v18 = vrot.slane %v7898_v28, 7  ;;  %v7630_v58 = vmul.f32 %v19619_v33, %v7528_v13 }
 0x312   : > { %8153 = vst [vmem:[#allocation2 + $0x28] sm:$0xf] %v7861_v44  ;;  %8156 = vst [vmem:[#allocation2 + $0x2c] sm:$0x1] %v8155_v34  ;;  %v7883_v31 = vrot.slane %v7881_v45, 7  ;;  %v7906_v32 = vshrl.u32 %v14949_v9, 16  ;;  %15933 = vmatpush3.bf16.msra.mxu1 %v16416_v59  ;;  %v7628_v50 = vmul.f32 %v19619_v33, %v7526_v15  ;;  %v6936_v59 = vadd.f32 %v19737_v38, %v21923_v2 }
 0x313   : > { %v7909_v63 = vshll.u32 %v14949_v9, 16  ;;  %v7889_v55 = vshrl.u32 %v14947_v56, 16  ;;  %v7903_v40 = vor.u32 %v7901_v17, %v7900_v18  ;;  %v7904_v43 = vrot.slane %v7900_v18, 4  ;;  %v15776_v6 = vpop.f32.mrf.mxu1  ;;  %15934 = vmatprep.subr.bf16.mxu1 %v16419_v41  ;;  %v8168_v45 = vld [vmem:[#allocation2 + $0x44] sm:$0x1] }
 0x314   : > { %v7892_v8 = vshll.u32 %v14947_v56, 16  ;;  %v7666_v61 = vadd.f32 %v19630_v7, %v7630_v58  ;;  %v7886_v20 = vor.u32 %v7884_v19, %v7883_v31  ;;  %v7887_v1 = vrot.slane %v7883_v31, 4  ;;  %v21924_v19 = vld [vmem:[#allocation54_spill] sm:$0xff] }
 0x315   : > { %v7908_v10 = vrot.slane %v7906_v32, 7  ;;  %v7891_v62 = vrot.slane %v7889_v55, 7  ;;  %v8172_v12 = vsel %vm19678_vm15, %v7903_v40, %v8171_v46  ;;  %v7664_v28 = vadd.f32 %v19630_v7, %v7628_v50  ;;  %v6873_v56 = vpop.f32.mrf.mxu1  ;;  %v15821_v32 = vpop.f32.mrf.mxu0  ;;  %v16425_v55 = vld [vmem:[%s21691_s4 + $0x98] sm:$0xff]   ;;  %v21925_v46 = vld [vmem:[#allocation55_spill] sm:$0xff] }
 0x316   : > { %v7698_v54 = vmax.f32 %v7666_v61, 0.0  ;;  %8173 = vst [vmem:[#allocation2 + $0x48] sm:$0xf] %v8172_v12  ;;  %v8165_v13 = vsel %vm19678_vm15, %v7886_v20, %v8164_v4  ;;  %v7529_v15 = vadd.f32 %v19746_v37, %v19735_v25  ;;  %15935 = vmatpush3.bf16.msra.mxu1 %v16419_v41  ;;  %v6939_v9 = vadd.f32 %v19754_v3, %v21924_v19 }
 0x317   : > { %v7911_v0 = vor.u32 %v7909_v63, %v7908_v10  ;;  %v7913_v22 = vrot.slane %v7908_v10, 4  ;;  %v7894_v26 = vor.u32 %v7892_v8, %v7891_v62  ;;  %8166 = vst [vmem:[#allocation2 + $0x3c] sm:$0xf] %v8165_v13  ;;  %v7896_v36 = vrot.slane %v7891_v62, 4  ;;  %15936 = vmatprep.subr.bf16.mxu1 %v16422_v5  ;;  %v16418_v63 = vld [vmem:[#allocation2 + $0x30] sm:$0xff]   ;;  %v7454_v2 = vpop.f32.mrf.mxu0 }
 0x318   : > { %v14952_v48 = vpack.c.bf16 %v7698_v54, %v7698_v54  ;;  %v7696_v44 = vmax.f32 %v7664_v28, 0.0  ;;  %v7631_v18 = vmul.f32 %v19619_v33, %v7529_v15  ;;  %v7527_v58 = vadd.f32 %v19762_v42, %v19744_v47  ;;  %v21926_v42 = vld [vmem:[#allocation56_spill] sm:$0xff] }
 0x319   : > { %v7912_v38 = vsel %vm16612_vm2, %v7904_v43, %v7911_v0  ;;  %v8176_v17 = vsel %vm19691_vm7, %v7913_v22, %v8175_v39  ;;  %v7895_v30 = vsel %vm16612_vm2, %v7887_v1, %v7894_v26  ;;  %v8169_v25 = vsel %vm19691_vm7, %v7896_v36, %v8168_v45  ;;  %v16417_v34 = vld [vmem:[#allocation2 + $0x24] sm:$0xff]   ;;  %v8178_v45 = vld [vmem:[#allocation2 + $0x54] sm:$0xf] }
 0x31a   : > { %8174 = vst [vmem:[#allocation2 + $0x4c] sm:$0xf] %v7912_v38  ;;  %8177 = vst [vmem:[#allocation2 + $0x50] sm:$0x1] %v8176_v17  ;;  %v7932_v37 = vshrl.u32 %v14952_v48, 16  ;;  %v7935_v41 = vshll.u32 %v14952_v48, 16  ;;  %v6937_v3 = vadd.f32 %v19765_v52, %v19645_v51  ;;  %v7532_v31 = vadd.f32 %v15820_v24, %v19760_v23  ;;  %15855 = vmatmul.mubr.bf16.gmra.mxu1 %v16417_v34  ;;  %v15777_v24 = vpop.f32.mrf.mxu1 }
 0x31b   : > { %8167 = vst [vmem:[#allocation2 + $0x40] sm:$0xf] %v7895_v30  ;;  %8170 = vst [vmem:[#allocation2 + $0x44] sm:$0x1] %v8169_v25  ;;  %v14950_v43 = vpack.c.bf16 %v7696_v44, %v7696_v44  ;;  %v19813_v8 = vadd.f32 %v15776_v6, %v21925_v46  ;;  %v7530_v61 = vadd.f32 %v7451_v60, %v6936_v59  ;;  %15858 = vmatprep.mubr.bf16.mxu1 %v16418_v63  ;;  %v8185_v6 = vld [vmem:[#allocation2 + $0x60] sm:$0xf] }
 0x31c   : > { %v19810_v40 = vrot.slane %v7932_v37, 7  ;;  %v7667_v47 = vadd.f32 %v19630_v7, %v7631_v18  ;;  %v7629_v51 = vmul.f32 %v19619_v33, %v7527_v58  ;;  %v7634_v23 = vmul.f32 %v19619_v33, %v7532_v31  ;;  %15937 = vmatpush3.bf16.msra.mxu1 %v16422_v5  ;;  %v16428_v59 = vld [vmem:[%s21691_s4 + $0x90] sm:$0xff]   ;;  %v21927_v22 = vld [vmem:[#allocation57_spill] sm:$0xff] }
 0x31d   : > { %v19819_v52 = vadd.f32 %v6873_v56, %v21926_v42  ;;  %v7915_v10 = vshrl.u32 %v14950_v43, 16  ;;  %v7918_v62 = vshll.u32 %v14950_v43, 16  ;;  %v7632_v50 = vmul.f32 %v19619_v33, %v7530_v61  ;;  %15938 = vmatprep.subr.bf16.mxu1 %v16425_v55 }
 0x31e   : > { %v7937_v20 = vor.u32 %v7935_v41, %v19810_v40  ;;  %v7938_v1 = vrot.slane %v19810_v40, 4  ;;  %v7699_v12 = vmax.f32 %v7667_v47, 0.0  ;;  %v7665_v4 = vadd.f32 %v19630_v7, %v7629_v51  ;;  %v16433_v41 = vld [vmem:[%s21691_s4 + $0x88] sm:$0xff]  }
 0x31f   : > { %v7670_v54 = vadd.f32 %v19630_v7, %v7634_v23  ;;  %v19831_v0 = vrot.slane %v7915_v10, 7  ;;  %v7533_v5 = vadd.f32 %v15821_v32, %v6939_v9  ;;  %v19834_v26 = vadd.f32 %v15777_v24, %v21927_v22  ;;  %v8189_v23 = vld [vmem:[#allocation2 + $0x68] sm:$0x1]  ;;  %v16438_v10 = vld [vmem:[%s21691_s4 + $0x80] sm:$0xff]  }
 0x320   : > { %v8186_v13 = vsel %vm19678_vm15, %v7937_v20, %v8185_v6  ;;  %v14953_v60 = vpack.c.bf16 %v7699_v12, %v7699_v12  ;;  %v7697_v39 = vmax.f32 %v7665_v4, 0.0  ;;  %v7668_v48 = vadd.f32 %v19630_v7, %v7632_v50  ;;  %15939 = vmatpush3.bf16.msra.mxu1 %v16425_v55  ;;  %v6876_v20 = vpop.f32.mrf.mxu1 }
 0x321   : > { %8187 = vst [vmem:[#allocation2 + $0x60] sm:$0xf] %v8186_v13  ;;  %v7702_v36 = vmax.f32 %v7670_v54, 0.0  ;;  %v7920_v15 = vor.u32 %v7918_v62, %v19831_v0  ;;  %v7921_v38 = vrot.slane %v19831_v0, 4  ;;  %v7635_v17 = vmul.f32 %v19619_v33, %v7533_v5  ;;  %v16421_v37 = vld [vmem:[#allocation2 + $0x48] sm:$0xff]   ;;  %15940 = vmatprep.subr.bf16.mxu1 %v16428_v59  ;;  %v15824_v54 = vpop.f32.mrf.mxu0 }
 0x322   : > { %v16420_v28 = vld [vmem:[#allocation2 + $0x3c] sm:$0xff]   ;;  %v7531_v30 = vadd.f32 %v7454_v2, %v6937_v3  ;;  %v7940_v19 = vshrl.u32 %v14953_v60, 16  ;;  %v7943_v9 = vshll.u32 %v14953_v60, 16  ;;  %v14951_v56 = vpack.c.bf16 %v7697_v39, %v7697_v39 }
 0x323   : > { %v14956_v25 = vpack.c.bf16 %v7702_v36, %v7702_v36  ;;  %v8179_v44 = vsel %vm19678_vm15, %v7920_v15, %v8178_v45  ;;  %v7700_v34 = vmax.f32 %v7668_v48, 0.0  ;;  %v7671_v18 = vadd.f32 %v19630_v7, %v7635_v17  ;;  %15859 = vmatmul.mubr.bf16.gmra.mxu1 %v16420_v28  ;;  %v8182_v0 = vld [vmem:[#allocation2 + $0x5c] sm:$0x1]  ;;  %v15780_v15 = vpop.f32.mrf.mxu1 }
 0x324   : > { %v7633_v58 = vmul.f32 %v19619_v33, %v7531_v30  ;;  %8180 = vst [vmem:[#allocation2 + $0x54] sm:$0xf] %v8179_v44  ;;  %v7942_v3 = vrot.slane %v7940_v19, 7  ;;  %v7923_v31 = vshrl.u32 %v14951_v56, 16  ;;  %v7926_v32 = vshll.u32 %v14951_v56, 16  ;;  %15862 = vmatprep.mubr.bf16.mxu1 %v16421_v37  ;;  %15941 = vmatpush3.bf16.msra.mxu1 %v16428_v59  ;;  %v16442_v17 = vld [vmem:[%s21691_s4 + $0x138] sm:$0xff]  }
 0x325   : > { %v7966_v63 = vshrl.u32 %v14956_v25, 16  ;;  %v7969_v55 = vshll.u32 %v14956_v25, 16  ;;  %v14954_v43 = vpack.c.bf16 %v7700_v34, %v7700_v34  ;;  %v7703_v46 = vmax.f32 %v7671_v18, 0.0  ;;  %15942 = vmatprep.subr.bf16.mxu1 %v16433_v41  ;;  %v8732_v56 = vld [vmem:[#allocation2 + $0xc] sm:$0xf] }
 0x326   : > { %v7669_v61 = vadd.f32 %v19630_v7, %v7633_v58  ;;  %v7945_v47 = vor.u32 %v7943_v9, %v7942_v3  ;;  %v7947_v51 = vrot.slane %v7942_v3, 4  ;;  %v7925_v42 = vrot.slane %v7923_v31, 7  ;;  %v7467_v9 = vpop.f32.mrf.mxu0  ;;  %v8192_v25 = vld [vmem:[#allocation2 + $0x6c] sm:$0xf]  ;;  %v8733_v18 = vld [vmem:[#allocation2 + $0x10] sm:$0xf] }
 0x327   : > { %v7968_v24 = vrot.slane %v7966_v63, 7  ;;  %v7949_v62 = vshrl.u32 %v14954_v43, 16  ;;  %v7952_v6 = vshll.u32 %v14954_v43, 16  ;;  %v14957_v12 = vpack.c.bf16 %v7703_v46, %v7703_v46 }
 0x328   : > { %v7701_v4 = vmax.f32 %v7669_v61, 0.0  ;;  %v7946_v50 = vsel %vm16612_vm2, %v7938_v1, %v7945_v47  ;;  %v8190_v2 = vsel %vm19691_vm7, %v7947_v51, %v8189_v23  ;;  %v7928_v59 = vor.u32 %v7926_v32, %v7925_v42  ;;  %15943 = vmatpush3.bf16.msra.mxu1 %v16433_v41  ;;  %v8199_v1 = vld [vmem:[#allocation2 + $0x78] sm:$0xf]  ;;  %v21928_v32 = vld [vmem:[#allocation58_spill] sm:$0xff]  ;;  %v8196_v51 = vld [vmem:[#allocation2 + $0x74] sm:$0x1] }
 0x329   : > { %v7930_v13 = vrot.slane %v7925_v42, 4  ;;  %8188 = vst [vmem:[#allocation2 + $0x64] sm:$0xf] %v7946_v50  ;;  %8191 = vst [vmem:[#allocation2 + $0x68] sm:$0x1] %v8190_v2  ;;  %v7971_v5 = vor.u32 %v7969_v55, %v7968_v24  ;;  %v7972_v22 = vrot.slane %v7968_v24, 4  ;;  %15944 = vmatprep.subr.bf16.mxu1 %v16438_v10  ;;  %v19867_v44 = vadd.f32 %v6876_v20, %v19648_v14  ;;  %v15825_v2 = vpop.f32.mrf.mxu0 }
 0x32a   : > { %v7951_v60 = vrot.slane %v7949_v62, 7  ;;  %v7974_v39 = vshrl.u32 %v14957_v12, 16  ;;  %v7929_v36 = vsel %vm16612_vm2, %v7921_v38, %v7928_v59  ;;  %v7977_v48 = vshll.u32 %v14957_v12, 16  ;;  %v8203_v55 = vld [vmem:[#allocation2 + $0x80] sm:$0x1] }
 0x32b   : > { %v8183_v40 = vsel %vm19691_vm7, %v7930_v13, %v8182_v0  ;;  %v14955_v28 = vpack.c.bf16 %v7701_v4, %v7701_v4  ;;  %8181 = vst [vmem:[#allocation2 + $0x58] sm:$0xf] %v7929_v36  ;;  %v8200_v30 = vsel %vm19678_vm15, %v7971_v5, %v8199_v1  ;;  %v7536_v34 = vadd.f32 %v15824_v54, %v19813_v8  ;;  %v8735_v59 = vld [vmem:[#allocation2 + $0x18] sm:$0xf]  ;;  %v21929_v1 = vld [vmem:[#allocation59_spill] sm:$0xff] }
 0x32c   : > { %8184 = vst [vmem:[#allocation2 + $0x5c] sm:$0x1] %v8183_v40  ;;  %v7954_v45 = vor.u32 %v7952_v6, %v7951_v60  ;;  %v7955_v19 = vrot.slane %v7951_v60, 4  ;;  %v7976_v38 = vrot.slane %v7974_v39, 7  ;;  %8201 = vst [vmem:[#allocation2 + $0x78] sm:$0xf] %v8200_v30  ;;  %v19873_v63 = vadd.f32 %v15780_v15, %v21928_v32  ;;  %15945 = vmatpush3.bf16.msra.mxu1 %v16438_v10  ;;  %v6889_v6 = vpop.f32.mrf.mxu1 }
 0x32d   : > { %v7957_v37 = vshrl.u32 %v14955_v28, 16  ;;  %v7960_v41 = vshll.u32 %v14955_v28, 16  ;;  %v7638_v46 = vmul.f32 %v19619_v33, %v7536_v34  ;;  %v7534_v14 = vadd.f32 %v7467_v9, %v19819_v52  ;;  %16026 = vmatprep.subr.bf16.mxu1 %v16442_v17  ;;  %v8734_v52 = vld [vmem:[#allocation2 + $0x14] sm:$0x1] }
 0x32e   : > { %v8193_v58 = vsel %vm19678_vm15, %v7954_v45, %v8192_v25  ;;  %v7979_v3 = vor.u32 %v7977_v48, %v7976_v38  ;;  %v7981_v31 = vrot.slane %v7976_v38, 4  ;;  %v8834_v61 = vshrl.u32 %v8732_v56, 16  ;;  %v15781_v25 = vpop.f32.mrf.mxu1 }
 0x32f   : > { %8194 = vst [vmem:[#allocation2 + $0x6c] sm:$0xf] %v8193_v58  ;;  %v7959_v43 = vrot.slane %v7957_v37, 7  ;;  %v8837_v23 = vshll.u32 %v8732_v56, 16  ;;  %v8843_v42 = vshll.u32 %v8733_v18, 16  ;;  %v7674_v10 = vadd.f32 %v19630_v7, %v7638_v46  ;;  %v7470_v37 = vpop.f32.mrf.mxu0 }
 0x330   : > { %v7980_v8 = vsel %vm16612_vm2, %v7972_v22, %v7979_v3  ;;  %v8204_v47 = vsel %vm19691_vm7, %v7981_v31, %v8203_v55  ;;  %v7636_v62 = vmul.f32 %v19619_v33, %v7534_v14  ;;  %v8836_v12 = vrot.slane %v8834_v61, 4  ;;  %v16424_v28 = vld [vmem:[#allocation2 + $0x60] sm:$0xff]   ;;  %v8736_v3 = vld [vmem:[#allocation2 + $0x1c] sm:$0xf] }
 0x331   : > { %8202 = vst [vmem:[#allocation2 + $0x7c] sm:$0xf] %v7980_v8  ;;  %8205 = vst [vmem:[#allocation2 + $0x80] sm:$0x1] %v8204_v47  ;;  %v7962_v24 = vor.u32 %v7960_v41, %v7959_v43  ;;  %v7964_v20 = vrot.slane %v7959_v43, 4  ;;  %v8839_v4 = vrot.slane %v8837_v23, 5  ;;  %v19889_v48 = vadd.f32 %v6889_v6, %v21929_v1 }
 0x332   : > { %v8845_v54 = vrot.slane %v8843_v42, 5  ;;  %v8847_v50 = vshrl.u32 %v8733_v18, 16  ;;  %v7706_v5 = vmax.f32 %v7674_v10, 0.0  ;;  %v7672_v22 = vadd.f32 %v19630_v7, %v7636_v62  ;;  %v16423_v60 = vld [vmem:[#allocation2 + $0x54] sm:$0xff]   ;;  %v8213_v47 = vld [vmem:[#allocation2 + $0x90] sm:$0xf]  ;;  %v15828_v10 = vpop.f32.mrf.mxu0 }
 0x333   : > { %v7963_v13 = vsel %vm16612_vm2, %v7955_v19, %v7962_v24  ;;  %v8197_v0 = vsel %vm19691_vm7, %v7964_v20, %v8196_v51  ;;  %v8840_v39 = vor.u32 %v8839_v4, %v8836_v12  ;;  %v8853_v40 = vshll.u32 %v8734_v52, 16  ;;  %15863 = vmatmul.mubr.bf16.gmra.mxu1 %v16423_v60  ;;  %v8737_v23 = vld [vmem:[#allocation2 + $0x20] sm:$0x1]  ;;  %v6892_v20 = vpop.f32.mrf.mxu1 }
 0x334   : > { %8195 = vst [vmem:[#allocation2 + $0x70] sm:$0xf] %v7963_v13  ;;  %8198 = vst [vmem:[#allocation2 + $0x74] sm:$0x1] %v8197_v0  ;;  %v8849_v36 = vrot.slane %v8847_v50, 4  ;;  %v14960_v15 = vpack.c.bf16 %v7706_v5, %v7706_v5  ;;  %v7704_v17 = vmax.f32 %v7672_v22, 0.0  ;;  %v7537_v30 = vadd.f32 %v15825_v2, %v19834_v26  ;;  %15866 = vmatprep.mubr.bf16.mxu1 %v16424_v28 }
 0x335   : > { %v8858_v45 = vshrl.u32 %v8735_v59, 16  ;;  %v8841_v19 = vrot.slane %v8840_v39, 4  ;;  %v8855_v9 = vrot.slane %v8853_v40, 5  ;;  %v8861_v56 = vshll.u32 %v8735_v59, 16  ;;  %v16432_v13 = vld [vmem:[%s21691_s4 + $0xf0] sm:$0xff]  }
 0x336   : > { %v8850_v38 = vor.u32 %v8849_v36, %v8845_v54  ;;  %v8000_v41 = vshrl.u32 %v14960_v15, 16  ;;  %v8003_v34 = vshll.u32 %v14960_v15, 16  ;;  %v14958_v18 = vpack.c.bf16 %v7704_v17, %v7704_v17  ;;  %v8206_v39 = vld [vmem:[#allocation2 + $0x84] sm:$0xf]  ;;  %v21931_v28 = vld [vmem:[#allocation7_spill] sm:$0xff]  ;;  %v15784_v17 = vpop.f32.mrf.mxu1 }
 0x337   : > { %v7639_v58 = vmul.f32 %v19619_v33, %v7537_v30  ;;  %v8846_v32 = vsel %vm17984_vm0, %v8841_v19, %v8845_v54  ;;  %v8860_v26 = vrot.slane %v8858_v45, 4  ;;  %v8863_v43 = vrot.slane %v8861_v56, 5  ;;  %v7483_v30 = vpop.f32.mrf.mxu0  ;;  %v8738_v45 = vld [vmem:[#allocation2 + $0x24] sm:$0xf] }
 0x338   : > { %v8851_v55 = vrot.slane %v8850_v38, 4  ;;  %v19895_v46 = vrot.slane %v8000_v41, 7  ;;  %v7983_v14 = vshrl.u32 %v14958_v18, 16  ;;  %v7986_v61 = vshll.u32 %v14958_v18, 16  ;;  %v16427_v59 = vld [vmem:[#allocation2 + $0x78] sm:$0xff]  }
 0x339   : > { %v7675_v8 = vadd.f32 %v19630_v7, %v7639_v58  ;;  %v8864_v42 = vor.u32 %v8863_v43, %v8860_v26  ;;  %v8867_v33 = vshll.u32 %v8736_v3, 16  ;;  %v8871_v24 = vshrl.u32 %v8736_v3, 16  ;;  %v16436_v58 = vld [vmem:[%s21691_s4 + $0xe8] sm:$0xff]  }
 0x33a   : > { %v8856_v51 = vsel %vm17984_vm0, %v8851_v55, %v8855_v9  ;;  %v8005_v62 = vor.u32 %v8003_v34, %v19895_v46  ;;  %v8006_v52 = vrot.slane %v19895_v46, 4  ;;  %v19902_v6 = vrot.slane %v7983_v14, 7  ;;  %v8739_v26 = vld [vmem:[#allocation2 + $0x28] sm:$0xf]  ;;  %v8217_v14 = vld [vmem:[#allocation2 + $0x98] sm:$0x1] }
 0x33b   : > { %v14580_v12 = vcombine.low %v8846_v32, %v8856_v51  ;;  %v16426_v4 = vld [vmem:[#allocation2 + $0x6c] sm:$0xff]   ;;  %v7707_v54 = vmax.f32 %v7675_v8, 0.0  ;;  %v8865_v7 = vrot.slane %v8864_v42, 4  ;;  %v8869_v50 = vrot.slane %v8867_v33, 5  ;;  %v19943_v8 = vld [vmem:[%s21690_s3 + $0x1] ss:$0 sm:$0xff] }
 0x33c   : > { %v8873_v2 = vrot.slane %v8871_v24, 4  ;;  %v8214_v0 = vsel %vm19678_vm15, %v8005_v62, %v8213_v47  ;;  %v7988_v5 = vor.u32 %v7986_v61, %v19902_v6  ;;  %v7989_v22 = vrot.slane %v19902_v6, 4  ;;  %15867 = vmatmul.mubr.bf16.gmra.mxu1 %v16426_v4  ;;  %v8740_v47 = vld [vmem:[#allocation2 + $0x2c] sm:$0x1] }
 0x33d   : > { %15899 = vmatmul.mubr.bf16.vlgmr.msra.gmra.mxu0 %v14580_v12  ;;  %v8877_v60 = vshll.u32 %v8737_v23, 16  ;;  %8215 = vst [vmem:[#allocation2 + $0x90] sm:$0xf] %v8214_v0  ;;  %v14961_v36 = vpack.c.bf16 %v7707_v54, %v7707_v54  ;;  %v8870_v40 = vsel %vm17984_vm0, %v8865_v7, %v8869_v50  ;;  %v19914_v15 = vadd.f32 %v15781_v25, %v21931_v28  ;;  %v16437_v23 = vld [vmem:[%s21691_s4 + $0xe0] sm:$0xff]   ;;  %v6905_v54 = vpop.f32.mrf.mxu1 }
 0x33e   : > { %v8874_v1 = vor.u32 %v8873_v2, %v8869_v50  ;;  %15870 = vmatprep.mubr.bf16.mxu1 %v16427_v59  ;;  %v8207_v19 = vsel %vm19678_vm15, %v7988_v5, %v8206_v39  ;;  %v7535_v9 = vadd.f32 %v7470_v37, %v19867_v44  ;;  %v19920_v56 = vadd.f32 %v6892_v20, %v19651_v57  ;;  %v19930_v44 = vld [vmem:[%s21690_s3] ss:$0 sm:$0xff] }
 0x33f   : > { %v8879_v38 = vrot.slane %v8877_v60, 5  ;;  %15979 = vmatpush3.bf16.msra.mxu0 %v19707_v16  ;;  %8208 = vst [vmem:[#allocation2 + $0x84] sm:$0xf] %v8207_v19  ;;  %v8008_v41 = vshrl.u32 %v14961_v36, 16  ;;  %v8011_v34 = vshll.u32 %v14961_v36, 16  ;;  %v7540_v18 = vadd.f32 %v15828_v10, %v19873_v63 }
 0x340   : > { %v8875_v25 = vrot.slane %v8874_v1, 4  ;;  %15980 = vmatprep.subr.bf16.mxu0 %v16432_v13  ;;  %v7637_v57 = vmul.f32 %v19930_v44, %v7535_v9  ;;  %v19934_v16 = vadd.f32 %v15784_v17, %v19580_v11  ;;  %v7538_v37 = vadd.f32 %v7483_v30, %v19889_v48  ;;  %v8741_v19 = vld [vmem:[#allocation2 + $0x30] sm:$0xf] }
 0x341   : > { %v8882_v3 = vshrl.u32 %v8738_v45, 16  ;;  %v8010_v32 = vrot.slane %v8008_v41, 7  ;;  %v7642_v55 = vmul.f32 %v19930_v44, %v7540_v18  ;;  %v8885_v43 = vshll.u32 %v8738_v45, 16 }
 0x342   : > { %v8880_v63 = vsel %vm17984_vm0, %v8875_v25, %v8879_v38  ;;  %v7673_v11 = vadd.f32 %v19943_v8, %v7637_v57  ;;  %v7640_v48 = vmul.f32 %v19930_v44, %v7538_v37  ;;  %v8891_v12 = vshll.u32 %v8739_v26, 16  ;;  %v8210_v37 = vld [vmem:[#allocation2 + $0x8c] sm:$0x1] }
 0x343   : > { %v14581_v61 = vcombine.low %v8870_v40, %v8880_v63  ;;  %v8884_v51 = vrot.slane %v8882_v3, 4  ;;  %15981 = vmatpush3.bf16.msra.mxu0 %v16432_v13  ;;  %v8013_v42 = vor.u32 %v8011_v34, %v8010_v32  ;;  %v8015_v33 = vrot.slane %v8010_v32, 4  ;;  %v15829_v13 = vpop.f32.mrf.mxu0  ;;  %v8742_v63 = vld [vmem:[#allocation2 + $0x34] sm:$0xf] }
 0x344   : > { %v7678_v24 = vadd.f32 %v19943_v8, %v7642_v55  ;;  %v8887_v20 = vrot.slane %v8885_v43, 5  ;;  %15982 = vmatprep.subr.bf16.mxu0 %v16436_v58  ;;  %v7705_v10 = vmax.f32 %v7673_v11, 0.0  ;;  %v7676_v62 = vadd.f32 %v19943_v8, %v7640_v48  ;;  %v15785_v43 = vpop.f32.mrf.mxu1 }
 0x345   : > { %15902 = vmatprep.mubr.bf16.mxu0 %v14581_v61  ;;  %v8895_v4 = vshrl.u32 %v8739_v26, 16  ;;  %v8014_v7 = vsel %vm16612_vm2, %v8006_v52, %v8013_v42  ;;  %v8218_v50 = vsel %vm19691_vm7, %v8015_v33, %v8217_v14  ;;  %v8893_v60 = vrot.slane %v8891_v12, 5  ;;  %v16440_v52 = vld [vmem:[%s21691_s4 + $0xd8] sm:$0xff]   ;;  %v7486_v25 = vpop.f32.mrf.mxu0  ;;  %v16441_v14 = vld [vmem:[%s21691_s4 + $0xd0] sm:$0xff]  }
 0x346   : > { %v7710_v2 = vmax.f32 %v7678_v24, 0.0  ;;  %v8888_v59 = vor.u32 %v8887_v20, %v8884_v51  ;;  %8216 = vst [vmem:[#allocation2 + $0x94] sm:$0xf] %v8014_v7  ;;  %8219 = vst [vmem:[#allocation2 + $0x98] sm:$0x1] %v8218_v50  ;;  %v14959_v0 = vpack.c.bf16 %v7705_v10, %v7705_v10  ;;  %v7708_v5 = vmax.f32 %v7676_v62, 0.0 }
 0x347   : > { %v8897_v39 = vrot.slane %v8895_v4, 4  ;;  %15983 = vmatpush3.bf16.msra.mxu0 %v16436_v58  ;;  %v8901_v1 = vshll.u32 %v8740_v47, 16  ;;  %v19959_v46 = vadd.f32 %v6905_v54, %v19590_v35  ;;  %v7541_v32 = vadd.f32 %v15829_v13, %v19914_v15  ;;  %v8743_v33 = vld [vmem:[#allocation2 + $0x38] sm:$0x1]  ;;  %v15832_v24 = vpop.f32.mrf.mxu0  ;;  %v8227_v62 = vld [vmem:[#allocation2 + $0xa8] sm:$0xf] }
 0x348   : > { %v14964_v36 = vpack.c.bf16 %v7710_v2, %v7710_v2  ;;  %v8889_v40 = vrot.slane %v8888_v59, 4  ;;  %15984 = vmatprep.subr.bf16.mxu0 %v16437_v23  ;;  %v7991_v28 = vshrl.u32 %v14959_v0, 16  ;;  %v7994_v17 = vshll.u32 %v14959_v0, 16  ;;  %v8220_v54 = vld [vmem:[#allocation2 + $0x9c] sm:$0xf]  ;;  %v6908_v2 = vpop.f32.mrf.mxu1  ;;  %v16443_v59 = vld [vmem:[%s21691_s4 + $0xc8] sm:$0xff]  }
 0x349   : > { %v14962_v30 = vpack.c.bf16 %v7708_v5, %v7708_v5  ;;  %v8898_v45 = vor.u32 %v8897_v39, %v8893_v60  ;;  %v8903_v34 = vrot.slane %v8901_v1, 5  ;;  %v8906_v55 = vshrl.u32 %v8741_v19, 16  ;;  %v8744_v39 = vld [vmem:[#allocation2 + $0x3c] sm:$0xf]  ;;  %v8762_v21 = vld [vmem:[#allocation2 + $0x84] sm:$0xf] }
 0x34a   : > { %v8034_v38 = vshrl.u32 %v14964_v36, 16  ;;  %v8037_v9 = vshll.u32 %v14964_v36, 16  ;;  %v8894_v41 = vsel %vm17984_vm0, %v8889_v40, %v8893_v60  ;;  %v7993_v18 = vrot.slane %v7991_v28, 7  ;;  %v7499_v28 = vpop.f32.mrf.mxu0 }
 0x34b   : > { %v8017_v35 = vshrl.u32 %v14962_v30, 16  ;;  %v8020_v58 = vshll.u32 %v14962_v30, 16  ;;  %v8899_v57 = vrot.slane %v8898_v45, 4  ;;  %15985 = vmatpush3.bf16.msra.mxu0 %v16437_v23  ;;  %v8909_v26 = vshll.u32 %v8741_v19, 16 }
 0x34c   : > { %v19966_v3 = vrot.slane %v8034_v38, 7  ;;  %15986 = vmatprep.subr.bf16.mxu0 %v16440_v52  ;;  %v7996_v61 = vor.u32 %v7994_v17, %v7993_v18  ;;  %v7998_v11 = vrot.slane %v7993_v18, 4  ;;  %v7643_v42 = vmul.f32 %v19930_v44, %v7541_v32  ;;  %v8745_v38 = vld [vmem:[#allocation2 + $0x40] sm:$0xf] }
 0x34d   : > { %v19972_v48 = vrot.slane %v8017_v35, 7  ;;  %v8904_v47 = vsel %vm17984_vm0, %v8899_v57, %v8903_v34  ;;  %v8908_v50 = vrot.slane %v8906_v55, 4  ;;  %v8915_v0 = vshll.u32 %v8742_v63, 16 }
 0x34e   : > { %v8039_v51 = vor.u32 %v8037_v9, %v19966_v3  ;;  %v8040_v15 = vrot.slane %v19966_v3, 4  ;;  %v14582_v23 = vcombine.low %v8894_v41, %v8904_v47  ;;  %v7997_v20 = vsel %vm16612_vm2, %v7989_v22, %v7996_v61 }
 0x34f   : > { %v8211_v10 = vsel %vm19691_vm7, %v7998_v11, %v8210_v37  ;;  %v8022_v12 = vor.u32 %v8020_v58, %v19972_v48  ;;  %v8023_v4 = vrot.slane %v19972_v48, 4  ;;  %15987 = vmatpush3.bf16.msra.mxu0 %v16440_v52  ;;  %8209 = vst [vmem:[#allocation2 + $0x88] sm:$0xf] %v7997_v20  ;;  %v7679_v6 = vadd.f32 %v19943_v8, %v7643_v42 }
 0x350   : > { %8212 = vst [vmem:[#allocation2 + $0x8c] sm:$0x1] %v8211_v10  ;;  %v8228_v7 = vsel %vm19678_vm15, %v8039_v51, %v8227_v62  ;;  %15903 = vmatmul.mubr.bf16.gmra.mxu0 %v14582_v23  ;;  %v8911_v22 = vrot.slane %v8909_v26, 5  ;;  %15988 = vmatprep.subr.bf16.mxu0 %v16441_v14  ;;  %v8919_v5 = vshrl.u32 %v8742_v63, 16  ;;  %v8925_v60 = vshll.u32 %v8743_v33, 16 }
 0x351   : > { %8229 = vst [vmem:[#allocation2 + $0xa8] sm:$0xf] %v8228_v7  ;;  %v8221_v13 = vsel %vm19678_vm15, %v8022_v12, %v8220_v54  ;;  %v7711_v36 = vmax.f32 %v7679_v6, 0.0  ;;  %v19996_v1 = vadd.f32 %v15785_v43, %v19600_v53  ;;  %v7539_v52 = vadd.f32 %v7486_v25, %v19920_v56  ;;  %v16445_v53 = vld [vmem:[%s21691_s4 + $0xc0] sm:$0xff]   ;;  %v8231_v62 = vld [vmem:[#allocation2 + $0xb0] sm:$0x1] }
 0x352   : > { %8222 = vst [vmem:[#allocation2 + $0x9c] sm:$0xf] %v8221_v13  ;;  %v8912_v40 = vor.u32 %v8911_v22, %v8908_v50  ;;  %v8917_v17 = vrot.slane %v8915_v0, 5  ;;  %v8921_v30 = vrot.slane %v8919_v5, 4  ;;  %v8927_v45 = vrot.slane %v8925_v60, 5  ;;  %v15833_v13 = vpop.f32.mrf.mxu0 }
 0x353   : > { %v20000_v19 = vadd.f32 %v6908_v2, %v19656_v29  ;;  %15989 = vmatpush3.bf16.msra.mxu0 %v16441_v14  ;;  %v14965_v9 = vpack.c.bf16 %v7711_v36, %v7711_v36  ;;  %v7641_v34 = vmul.f32 %v19930_v44, %v7539_v52  ;;  %v7544_v18 = vadd.f32 %v15832_v24, %v19934_v16  ;;  %v20014_v16 = vld [vmem:[%s21691_s4 + $0x178] sm:$0xff]   ;;  %v16430_v14 = vld [vmem:[#allocation2 + $0x90] sm:$0xff]   ;;  %v20022_v7 = vld [vmem:[#allocation2 + $0x48] sm:$0xf] }
 0x354   : > { %v8913_v41 = vrot.slane %v8912_v40, 4  ;;  %15990 = vmatprep.subr.bf16.mxu0 %v16443_v59  ;;  %v8922_v56 = vor.u32 %v8921_v30, %v8917_v17  ;;  %v7542_v25 = vadd.f32 %v7499_v28, %v19959_v46  ;;  %v8930_v35 = vshrl.u32 %v8744_v39, 16  ;;  %v8746_v22 = vld [vmem:[#allocation2 + $0x44] sm:$0x1] }
 0x355   : > { %v8933_v58 = vshll.u32 %v8744_v39, 16  ;;  %v8042_v29 = vshrl.u32 %v14965_v9, 16  ;;  %v8045_v57 = vshll.u32 %v14965_v9, 16  ;;  %v7677_v32 = vadd.f32 %v19943_v8, %v7641_v34 }
 0x356   : > { %v8918_v37 = vsel %vm17984_vm0, %v8913_v41, %v8917_v17  ;;  %v8923_v63 = vrot.slane %v8922_v56, 4  ;;  %v7646_v55 = vmul.f32 %v19930_v44, %v7544_v18  ;;  %v7644_v26 = vmul.f32 %v19930_v44, %v7542_v25  ;;  %v16429_v43 = vld [vmem:[#allocation2 + $0x84] sm:$0xff]  }
 0x357   : > { %v8932_v46 = vrot.slane %v8930_v35, 4  ;;  %15991 = vmatpush3.bf16.msra.mxu0 %v16443_v59  ;;  %v8044_v61 = vrot.slane %v8042_v29, 7  ;;  %v7709_v11 = vmax.f32 %v7677_v32, 0.0  ;;  %v8935_v47 = vrot.slane %v8933_v58, 5  ;;  %15871 = vmatmul.mubr.bf16.gmra.mxu1 %v16429_v43 }
 0x358   : > { %v8939_v51 = vshll.u32 %v8745_v38, 16  ;;  %15992 = vmatprep.subr.bf16.mxu0 %v16445_v53  ;;  %v8928_v23 = vsel %vm17984_vm0, %v8923_v63, %v8927_v45  ;;  %v7682_v42 = vadd.f32 %v19943_v8, %v7646_v55  ;;  %v7680_v33 = vadd.f32 %v19943_v8, %v7644_v26  ;;  %15874 = vmatprep.mubr.bf16.mxu1 %v16430_v14  ;;  %v8234_v63 = vld [vmem:[#allocation2 + $0xb4] sm:$0xf]  ;;  %v8241_v14 = vld [vmem:[#allocation2 + $0xc0] sm:$0xf] }
 0x359   : > { %v8943_v24 = vshrl.u32 %v8745_v38, 16  ;;  %v8047_v20 = vor.u32 %v8045_v57, %v8044_v61  ;;  %v8049_v10 = vrot.slane %v8044_v61, 4  ;;  %v14583_v12 = vcombine.low %v8918_v37, %v8928_v23  ;;  %v8748_v57 = vld [vmem:[#allocation2 + $0x4c] sm:$0xf] }
 0x35a   : > { %v14963_v54 = vpack.c.bf16 %v7709_v11, %v7709_v11  ;;  %v7714_v6 = vmax.f32 %v7682_v42, 0.0  ;;  %v7712_v50 = vmax.f32 %v7680_v33, 0.0  ;;  %v8936_v2 = vor.u32 %v8935_v47, %v8932_v46  ;;  %v8749_v11 = vld [vmem:[#allocation2 + $0x50] sm:$0x1]  ;;  %v7502_v42 = vpop.f32.mrf.mxu0  ;;  %v8750_v33 = vld [vmem:[#allocation2 + $0x54] sm:$0xf] }
 0x35b   : > { %v8941_v59 = vrot.slane %v8939_v51, 5  ;;  %15993 = vmatpush3.bf16.msra.mxu0 %v16445_v53  ;;  %v8048_v0 = vsel %vm16612_vm2, %v8040_v15, %v8047_v20  ;;  %v8232_v5 = vsel %vm19691_vm7, %v8049_v10, %v8231_v62  ;;  %15906 = vmatprep.mubr.bf16.mxu0 %v14583_v12  ;;  %v8945_v28 = vrot.slane %v8943_v24, 4  ;;  %v8224_v53 = vld [vmem:[#allocation2 + $0xa4] sm:$0x1]  ;;  %v8751_v12 = vld [vmem:[#allocation2 + $0x58] sm:$0xf] }
 0x35c   : > { %v8025_v60 = vshrl.u32 %v14963_v54, 16  ;;  %v8028_v39 = vshll.u32 %v14963_v54, 16  ;;  %16074 = vmatprep.subr.bf16.mxu0 %v20014_v16  ;;  %8230 = vst [vmem:[#allocation2 + $0xac] sm:$0xf] %v8048_v0  ;;  %8233 = vst [vmem:[#allocation2 + $0xb0] sm:$0x1] %v8232_v5  ;;  %v14968_v36 = vpack.c.bf16 %v7714_v6, %v7714_v6  ;;  %v14966_v40 = vpack.c.bf16 %v7712_v50, %v7712_v50 }
 0x35d   : > { %v8937_v52 = vrot.slane %v8936_v2, 4  ;;  %v8949_v30 = vshll.u32 %v8746_v22, 16  ;;  %v7545_v3 = vadd.f32 %v15833_v13, %v19996_v1  ;;  %v8954_v15 = vshrl.u32 %v20022_v7, 16 }
 0x35e   : > { %v8027_v17 = vrot.slane %v8025_v60, 7  ;;  %v8068_v45 = vshrl.u32 %v14968_v36, 16  ;;  %v8071_v38 = vshll.u32 %v14968_v36, 16  ;;  %v8051_v9 = vshrl.u32 %v14966_v40, 16 }
 0x35f   : > { %v8054_v41 = vshll.u32 %v14966_v40, 16  ;;  %v8942_v56 = vsel %vm17984_vm0, %v8937_v52, %v8941_v59  ;;  %v8946_v25 = vor.u32 %v8945_v28, %v8941_v59  ;;  %v8951_v29 = vrot.slane %v8949_v30, 5  ;;  %v8752_v40 = vld [vmem:[#allocation2 + $0x5c] sm:$0x1] }
 0x360   : > { %v8030_v34 = vor.u32 %v8028_v39, %v8027_v17  ;;  %v8032_v18 = vrot.slane %v8027_v17, 4  ;;  %v20035_v35 = vrot.slane %v8068_v45, 7  ;;  %v20037_v58 = vrot.slane %v8051_v9, 7  ;;  %v8753_v17 = vld [vmem:[#allocation2 + $0x60] sm:$0xf] }
 0x361   : > { %v7647_v1 = vmul.f32 %v19930_v44, %v7545_v3  ;;  %v8947_v55 = vrot.slane %v8946_v25, 4  ;;  %v8956_v26 = vrot.slane %v8954_v15, 4  ;;  %v8957_v51 = vshll.u32 %v20022_v7, 16 }
 0x362   : > { %v8031_v37 = vsel %vm16612_vm2, %v8023_v4, %v8030_v34  ;;  %v8225_v32 = vsel %vm19691_vm7, %v8032_v18, %v8224_v53  ;;  %v8073_v46 = vor.u32 %v8071_v38, %v20035_v35  ;;  %v8074_v43 = vrot.slane %v20035_v35, 4 }
 0x363   : > { %8223 = vst [vmem:[#allocation2 + $0xa0] sm:$0xf] %v8031_v37  ;;  %8226 = vst [vmem:[#allocation2 + $0xa4] sm:$0x1] %v8225_v32  ;;  %v8056_v61 = vor.u32 %v8054_v41, %v20037_v58  ;;  %v8057_v48 = vrot.slane %v20037_v58, 4  ;;  %v8952_v4 = vsel %vm17984_vm0, %v8947_v55, %v8951_v29  ;;  %v7683_v47 = vadd.f32 %v19943_v8, %v7647_v1  ;;  %v16435_v29 = vld [vmem:[#allocation2 + $0xa8] sm:$0xff]  }
 0x364   : > { %v8963_v23 = vshll.u32 %v8748_v57, 16  ;;  %v8242_v24 = vsel %vm19678_vm15, %v8073_v46, %v8241_v14  ;;  %v14584_v10 = vcombine.low %v8942_v56, %v8952_v4  ;;  %v8967_v62 = vshrl.u32 %v8748_v57, 16  ;;  %v8245_v55 = vld [vmem:[#allocation2 + $0xc8] sm:$0x1] }
 0x365   : > { %v8235_v20 = vsel %vm19678_vm15, %v8056_v61, %v8234_v63  ;;  %8243 = vst [vmem:[#allocation2 + $0xc0] sm:$0xf] %v8242_v24  ;;  %v7715_v54 = vmax.f32 %v7683_v47, 0.0  ;;  %v8959_v6 = vrot.slane %v8957_v51, 5  ;;  %v8973_v22 = vshll.u32 %v8749_v11, 16 }
 0x366   : > { %8236 = vst [vmem:[#allocation2 + $0xb4] sm:$0xf] %v8235_v20  ;;  %v8965_v50 = vrot.slane %v8963_v23, 5  ;;  %15907 = vmatmul.mubr.bf16.gmra.mxu0 %v14584_v10  ;;  %v8969_v7 = vrot.slane %v8967_v62, 4  ;;  %v7543_v2 = vadd.f32 %v7502_v42, %v20000_v19  ;;  %v8978_v59 = vshrl.u32 %v8750_v33, 16 }
 0x367   : > { %v8981_v13 = vshll.u32 %v8750_v33, 16  ;;  %v14969_v0 = vpack.c.bf16 %v7715_v54, %v7715_v54  ;;  %v8960_v5 = vor.u32 %v8959_v6, %v8956_v26  ;;  %v8975_v60 = vrot.slane %v8973_v22, 5  ;;  %v8755_v14 = vld [vmem:[#allocation2 + $0x68] sm:$0x1]  ;;  %v8756_v51 = vld [vmem:[#allocation2 + $0x6c] sm:$0xf] }
 0x368   : > { %v8987_v49 = vshll.u32 %v8751_v12, 16  ;;  %v8970_v39 = vor.u32 %v8969_v7, %v8965_v50  ;;  %v7645_v36 = vmul.f32 %v19930_v44, %v7543_v2  ;;  %v8980_v52 = vrot.slane %v8978_v59, 4  ;;  %v8754_v44 = vld [vmem:[#allocation2 + $0x64] sm:$0xf]  ;;  %v8757_v22 = vld [vmem:[#allocation2 + $0x70] sm:$0xf] }
 0x369   : > { %v8983_v28 = vrot.slane %v8981_v13, 5  ;;  %v8076_v30 = vshrl.u32 %v14969_v0, 16  ;;  %v8079_v3 = vshll.u32 %v14969_v0, 16  ;;  %v8961_v15 = vrot.slane %v8960_v5, 4  ;;  %v8758_v59 = vld [vmem:[#allocation2 + $0x74] sm:$0x1] }
 0x36a   : > { %v8989_v45 = vrot.slane %v8987_v49, 5  ;;  %v8971_v38 = vrot.slane %v8970_v39, 4  ;;  %v7681_v19 = vadd.f32 %v19943_v8, %v7645_v36  ;;  %v8991_v41 = vshrl.u32 %v8751_v12, 16  ;;  %v16434_v34 = vld [vmem:[#allocation2 + $0x9c] sm:$0xff]  }
 0x36b   : > { %v8984_v9 = vor.u32 %v8983_v28, %v8980_v52  ;;  %v8078_v18 = vrot.slane %v8076_v30, 7  ;;  %v8966_v53 = vsel %vm17984_vm0, %v8961_v15, %v8965_v50  ;;  %v8997_v56 = vshll.u32 %v8752_v40, 16  ;;  %15875 = vmatmul.mubr.bf16.gmra.mxu1 %v16434_v34  ;;  %v8238_v40 = vld [vmem:[#allocation2 + $0xbc] sm:$0x1] }
 0x36c   : > { %v9002_v25 = vshrl.u32 %v8753_v17, 16  ;;  %v8976_v1 = vsel %vm17984_vm0, %v8971_v38, %v8975_v60  ;;  %v7713_v57 = vmax.f32 %v7681_v19, 0.0  ;;  %v8993_v32 = vrot.slane %v8991_v41, 4  ;;  %15878 = vmatprep.mubr.bf16.mxu1 %v16435_v29  ;;  %v8760_v34 = vld [vmem:[#allocation2 + $0x7c] sm:$0xf] }
 0x36d   : > { %v8985_v37 = vrot.slane %v8984_v9, 4  ;;  %v8081_v63 = vor.u32 %v8079_v3, %v8078_v18  ;;  %v8083_v8 = vrot.slane %v8078_v18, 4  ;;  %v14585_v26 = vcombine.low %v8966_v53, %v8976_v1  ;;  %v8761_v18 = vld [vmem:[#allocation2 + $0x80] sm:$0x1] }
 0x36e   : > { %v8999_v46 = vrot.slane %v8997_v56, 5  ;;  %v14967_v61 = vpack.c.bf16 %v7713_v57, %v7713_v57  ;;  %v8994_v4 = vor.u32 %v8993_v32, %v8989_v45  ;;  %v9004_v47 = vrot.slane %v9002_v25, 4 }
 0x36f   : > { %v8990_v11 = vsel %vm17984_vm0, %v8985_v37, %v8989_v45  ;;  %v8082_v23 = vsel %vm16612_vm2, %v8074_v43, %v8081_v63  ;;  %v8246_v42 = vsel %vm19691_vm7, %v8083_v8, %v8245_v55  ;;  %15910 = vmatprep.mubr.bf16.mxu0 %v14585_v26  ;;  %v9005_v33 = vshll.u32 %v8753_v17, 16  ;;  %v8759_v45 = vld [vmem:[#allocation2 + $0x78] sm:$0xf]  ;;  %v8763_v63 = vld [vmem:[#allocation2 + $0x88] sm:$0xf] }
 0x370   : > { %v9011_v24 = vshll.u32 %v8754_v44, 16  ;;  %8247 = vst [vmem:[#allocation2 + $0xc8] sm:$0x1] %v8246_v42  ;;  %8244 = vst [vmem:[#allocation2 + $0xc4] sm:$0xf] %v8082_v23  ;;  %v8059_v20 = vshrl.u32 %v14967_v61, 16 }
 0x371   : > { %v8062_v10 = vshll.u32 %v14967_v61, 16  ;;  %v8995_v62 = vrot.slane %v8994_v4, 4  ;;  %v9015_v12 = vshrl.u32 %v8754_v44, 16  ;;  %v9007_v54 = vrot.slane %v9005_v33, 5  ;;  %v8764_v42 = vld [vmem:[#allocation2 + $0x8c] sm:$0x1] }
 0x372   : > { %v9013_v6 = vrot.slane %v9011_v24, 5  ;;  %v9021_v50 = vshll.u32 %v8755_v14, 16  ;;  %v9026_v35 = vshrl.u32 %v8756_v51, 16  ;;  %v8061_v7 = vrot.slane %v8059_v20, 7 }
 0x373   : > { %v9000_v43 = vsel %vm17984_vm0, %v8995_v62, %v8999_v46  ;;  %v9017_v2 = vrot.slane %v9015_v12, 4  ;;  %v9029_v13 = vshll.u32 %v8756_v51, 16  ;;  %v9008_v5 = vor.u32 %v9007_v54, %v9004_v47  ;;  %v8765_v47 = vld [vmem:[#allocation2 + $0x90] sm:$0xf]  ;;  %v8766_v54 = vld [vmem:[#allocation2 + $0x94] sm:$0xf] }
 0x374   : > { %v14586_v0 = vcombine.low %v8990_v11, %v9000_v43  ;;  %v9023_v60 = vrot.slane %v9021_v50, 5  ;;  %v9028_v49 = vrot.slane %v9026_v35, 4  ;;  %v8064_v39 = vor.u32 %v8062_v10, %v8061_v7 }
 0x375   : > { %v8066_v36 = vrot.slane %v8061_v7, 4  ;;  %v9018_v52 = vor.u32 %v9017_v2, %v9013_v6  ;;  %v9031_v28 = vrot.slane %v9029_v13, 5  ;;  %v9009_v17 = vrot.slane %v9008_v5, 4 }
 0x376   : > { %15911 = vmatmul.mubr.bf16.gmra.mxu0 %v14586_v0  ;;  %v9035_v30 = vshll.u32 %v8757_v22, 16  ;;  %v9039_v3 = vshrl.u32 %v8757_v22, 16  ;;  %v9045_v15 = vshll.u32 %v8758_v59, 16  ;;  %v8065_v38 = vsel %vm16612_vm2, %v8057_v48, %v8064_v39 }
 0x377   : > { %v8239_v19 = vsel %vm19691_vm7, %v8066_v36, %v8238_v40  ;;  %v9019_v9 = vrot.slane %v9018_v52, 4  ;;  %v9032_v41 = vor.u32 %v9031_v28, %v9028_v49  ;;  %8237 = vst [vmem:[#allocation2 + $0xb8] sm:$0xf] %v8065_v38  ;;  %v9014_v53 = vsel %vm17984_vm0, %v9009_v17, %v9013_v6  ;;  %v8768_v36 = vld [vmem:[#allocation2 + $0x9c] sm:$0xf] }
 0x378   : > { %8240 = vst [vmem:[#allocation2 + $0xbc] sm:$0x1] %v8239_v19  ;;  %v9037_v56 = vrot.slane %v9035_v30, 5  ;;  %v9041_v44 = vrot.slane %v9039_v3, 4  ;;  %v9047_v25 = vrot.slane %v9045_v15, 5  ;;  %v9050_v48 = vshrl.u32 %v8759_v45, 16 }
 0x379   : > { %v9024_v58 = vsel %vm17984_vm0, %v9019_v9, %v9023_v60  ;;  %v9033_v27 = vrot.slane %v9032_v41, 4  ;;  %v9053_v29 = vshll.u32 %v8759_v45, 16  ;;  %v9059_v37 = vshll.u32 %v8760_v34, 16  ;;  %v8767_v60 = vld [vmem:[#allocation2 + $0x98] sm:$0x1] }
 0x37a   : > { %v14587_v1 = vcombine.low %v9014_v53, %v9024_v58  ;;  %v9042_v57 = vor.u32 %v9041_v44, %v9037_v56  ;;  %v9063_v32 = vshrl.u32 %v8760_v34, 16  ;;  %v9052_v55 = vrot.slane %v9050_v48, 4  ;;  %v8769_v30 = vld [vmem:[#allocation2 + $0xa0] sm:$0xf]  ;;  %v8771_v58 = vld [vmem:[#allocation2 + $0xa8] sm:$0xf] }
 0x37b   : > { %v9038_v8 = vsel %vm17984_vm0, %v9033_v27, %v9037_v56  ;;  %v9055_v26 = vrot.slane %v9053_v29, 5  ;;  %v9069_v46 = vshll.u32 %v8761_v18, 16  ;;  %v9061_v61 = vrot.slane %v9059_v37, 5  ;;  %v8770_v56 = vld [vmem:[#allocation2 + $0xa4] sm:$0x1] }
 0x37c   : > { %15914 = vmatprep.mubr.bf16.mxu0 %v14587_v1  ;;  %v9043_v14 = vrot.slane %v9042_v57, 4  ;;  %v9065_v11 = vrot.slane %v9063_v32, 4  ;;  %v9074_v4 = vshrl.u32 %v8762_v21, 16  ;;  %v9077_v33 = vshll.u32 %v8762_v21, 16  ;;  %v8772_v1 = vld [vmem:[#allocation2 + $0xac] sm:$0xf] }
 0x37d   : > { %v9056_v51 = vor.u32 %v9055_v26, %v9052_v55  ;;  %v9071_v23 = vrot.slane %v9069_v46, 5  ;;  %v9083_v24 = vshll.u32 %v8763_v63, 16  ;;  %v9087_v12 = vshrl.u32 %v8763_v63, 16 }
 0x37e   : > { %v9048_v20 = vsel %vm17984_vm0, %v9043_v14, %v9047_v25  ;;  %v9066_v10 = vor.u32 %v9065_v11, %v9061_v61  ;;  %v9076_v62 = vrot.slane %v9074_v4, 4  ;;  %v9079_v22 = vrot.slane %v9077_v33, 5  ;;  %v16439_v7 = vld [vmem:[#allocation2 + $0xb4] sm:$0xff]   ;;  %v8773_v11 = vld [vmem:[#allocation2 + $0xb0] sm:$0x1] }
 0x37f   : > { %v14588_v6 = vcombine.low %v9038_v8, %v9048_v20  ;;  %v9057_v50 = vrot.slane %v9056_v51, 4  ;;  %v9085_v35 = vrot.slane %v9083_v24, 5  ;;  %v9089_v2 = vrot.slane %v9087_v12, 4  ;;  %15879 = vmatmul.mubr.bf16.gmra.mxu1 %v16439_v7  ;;  %v9547_v51 = vld [vmem:[#allocation2] sm:$0xe] }
 0x380   : > { %v9067_v43 = vrot.slane %v9066_v10, 4  ;;  %v9093_v59 = vshll.u32 %v8764_v42, 16  ;;  %v9098_v13 = vshrl.u32 %v8765_v47, 16  ;;  %v9080_v5 = vor.u32 %v9079_v22, %v9076_v62  ;;  %v9548_v20 = vld [vmem:[#allocation2 + $0x4] sm:$0xf] }
 0x381   : > { %15915 = vmatmul.mubr.bf16.gmra.mxu0 %v14588_v6  ;;  %v9062_v0 = vsel %vm17984_vm0, %v9057_v50, %v9061_v61  ;;  %v9101_v49 = vshll.u32 %v8765_v47, 16  ;;  %v9107_v39 = vshll.u32 %v8766_v54, 16  ;;  %v9090_v52 = vor.u32 %v9089_v2, %v9085_v35  ;;  %v9549_v6 = vld [vmem:[#allocation2 + $0x8] sm:$0x1]  ;;  %v9551_v2 = vld [vmem:[#allocation2 + $0x10] sm:$0xf] }
 0x382   : > { %v9072_v40 = vsel %vm17984_vm0, %v9067_v43, %v9071_v23  ;;  %v9095_v28 = vrot.slane %v9093_v59, 5  ;;  %v9100_v17 = vrot.slane %v9098_v13, 4  ;;  %v9081_v15 = vrot.slane %v9080_v5, 4  ;;  %v9550_v43 = vld [vmem:[#allocation2 + $0xc] sm:$0xe] }
 0x383   : > { %v14589_v3 = vcombine.low %v9062_v0, %v9072_v40  ;;  %v9103_v45 = vrot.slane %v9101_v49, 5  ;;  %v9109_v38 = vrot.slane %v9107_v39, 5  ;;  %v9091_v19 = vrot.slane %v9090_v52, 4 }
 0x384   : > { %v9111_v9 = vshrl.u32 %v8766_v54, 16  ;;  %v9117_v41 = vshll.u32 %v8767_v60, 16  ;;  %v9122_v34 = vshrl.u32 %v8768_v36, 16  ;;  %v9086_v18 = vsel %vm17984_vm0, %v9081_v15, %v9085_v35  ;;  %v9552_v60 = vld [vmem:[#allocation2 + $0x14] sm:$0x1] }
 0x385   : > { %15918 = vmatprep.mubr.bf16.mxu0 %v14589_v3  ;;  %v9104_v53 = vor.u32 %v9103_v45, %v9100_v17  ;;  %v9125_v44 = vshll.u32 %v8768_v36, 16  ;;  %v9131_v25 = vshll.u32 %v8769_v30, 16  ;;  %v9096_v27 = vsel %vm17984_vm0, %v9091_v19, %v9095_v28  ;;  %v8774_v3 = vld [vmem:[#allocation2 + $0xb4] sm:$0xf] }
 0x386   : > { %v9113_v48 = vrot.slane %v9111_v9, 4  ;;  %v9119_v29 = vrot.slane %v9117_v41, 5  ;;  %v9124_v21 = vrot.slane %v9122_v34, 4  ;;  %v14590_v57 = vcombine.low %v9086_v18, %v9096_v27  ;;  %v8775_v41 = vld [vmem:[#allocation2 + $0xb8] sm:$0xf] }
 0x387   : > { %v9105_v37 = vrot.slane %v9104_v53, 4  ;;  %v9127_v32 = vrot.slane %v9125_v44, 5  ;;  %v9133_v63 = vrot.slane %v9131_v25, 5  ;;  %v9135_v55 = vshrl.u32 %v8769_v30, 16 }
 0x388   : > { %v9114_v8 = vor.u32 %v9113_v48, %v9109_v38  ;;  %v9141_v26 = vshll.u32 %v8770_v56, 16  ;;  %v9146_v46 = vshrl.u32 %v8771_v58, 16  ;;  %v9149_v4 = vshll.u32 %v8771_v58, 16  ;;  %v8776_v58 = vld [vmem:[#allocation2 + $0xbc] sm:$0x1] }
 0x389   : > { %15919 = vmatmul.mubr.bf16.gmra.mxu0 %v14590_v57  ;;  %v9110_v14 = vsel %vm17984_vm0, %v9105_v37, %v9109_v38  ;;  %v9128_v61 = vor.u32 %v9127_v32, %v9124_v21  ;;  %v9155_v47 = vshll.u32 %v8772_v1, 16  ;;  %v9137_v42 = vrot.slane %v9135_v55, 4  ;;  %v9553_v37 = vld [vmem:[#allocation2 + $0x18] sm:$0xe]  ;;  %v9554_v32 = vld [vmem:[#allocation2 + $0x1c] sm:$0xf] }
 0x38a   : > { %v9115_v23 = vrot.slane %v9114_v8, 4  ;;  %v9143_v33 = vrot.slane %v9141_v26, 5  ;;  %v9148_v24 = vrot.slane %v9146_v46, 4  ;;  %v9151_v62 = vrot.slane %v9149_v4, 5  ;;  %v9555_v46 = vld [vmem:[#allocation2 + $0x20] sm:$0x1] }
 0x38b   : > { %v9129_v10 = vrot.slane %v9128_v61, 4  ;;  %v9157_v12 = vrot.slane %v9155_v47, 5  ;;  %v9159_v54 = vshrl.u32 %v8772_v1, 16  ;;  %v9138_v22 = vor.u32 %v9137_v42, %v9133_v63 }
 0x38c   : > { %v9120_v50 = vsel %vm17984_vm0, %v9115_v23, %v9119_v29  ;;  %v9165_v35 = vshll.u32 %v8773_v11, 16  ;;  %v14603_v7 = vrot.slane %v9547_v51, 9  ;;  %v9152_v0 = vor.u32 %v9151_v62, %v9148_v24  ;;  %v16446_v51 = vld [vmem:[%s21691_s4 + $0x130] sm:$0xff]   ;;  %v9556_v23 = vld [vmem:[#allocation2 + $0x24] sm:$0xe] }
 0x38d   : > { %v14591_v59 = vcombine.low %v9110_v14, %v9120_v50  ;;  %v9134_v13 = vsel %vm17984_vm0, %v9129_v10, %v9133_v63  ;;  %v9161_v5 = vrot.slane %v9159_v54, 4  ;;  %v9139_v49 = vrot.slane %v9138_v22, 4  ;;  %v9557_v14 = vld [vmem:[#allocation2 + $0x28] sm:$0xf]  ;;  %v9558_v24 = vld [vmem:[#allocation2 + $0x2c] sm:$0x1] }
 0x38e   : > { %v9167_v39 = vrot.slane %v9165_v35, 5  ;;  %v9677_v36 = vrot.slane %v9548_v20, 5  ;;  %v9680_v40 = vrot.slane %v9549_v6, 5  ;;  %v9153_v52 = vrot.slane %v9152_v0, 4  ;;  %v9560_v54 = vld [vmem:[#allocation2 + $0x34] sm:$0xf] }
 0x38f   : > { %15922 = vmatprep.mubr.bf16.mxu0 %v14591_v59  ;;  %v9162_v28 = vor.u32 %v9161_v5, %v9157_v12  ;;  %v14604_v17 = vrot.slane %v9550_v43, 9  ;;  %v9684_v30 = vrot.slane %v9551_v2, 5  ;;  %v9144_v15 = vsel %vm17984_vm0, %v9139_v49, %v9143_v33  ;;  %v9561_v6 = vld [vmem:[#allocation2 + $0x38] sm:$0x1]  ;;  %v16449_v50 = vld [vmem:[%s21691_s4 + $0x128] sm:$0xff]  }
 0x390   : > { %v9678_v38 = vsel %vm18028_vm12, %v14603_v7, %v9677_v36  ;;  %v9679_v19 = vrot.slane %v9677_v36, 4  ;;  %v9687_v9 = vrot.slane %v9552_v60, 5  ;;  %v14592_v34 = vcombine.low %v9134_v13, %v9144_v15  ;;  %v16521_v22 = vld [vmem:[%s21691_s4 + $0x138] sm:$0xff]   ;;  %v9563_v13 = vld [vmem:[#allocation2 + $0x40] sm:$0xf] }
 0x391   : > { %v9158_v18 = vsel %vm17984_vm0, %v9153_v52, %v9157_v12  ;;  %v9163_v53 = vrot.slane %v9162_v28, 4  ;;  %v9685_v56 = vsel %vm18028_vm12, %v14604_v17, %v9684_v30  ;;  %v9686_v25 = vrot.slane %v9684_v30, 4  ;;  %v9559_v12 = vld [vmem:[#allocation2 + $0x30] sm:$0xe]  ;;  %v9562_v59 = vld [vmem:[#allocation2 + $0x3c] sm:$0xe] }
 0x392   : > { %v9681_v44 = vsel %vm18028_vm12, %v9679_v19, %v9680_v40  ;;  %v9170_v27 = vshrl.u32 %v8774_v3, 16  ;;  %v9173_v48 = vshll.u32 %v8774_v3, 16  ;;  %15923 = vmatmul.mubr.bf16.gmra.mxu0 %v14592_v34  ;;  %v9179_v1 = vshll.u32 %v8775_v41, 16  ;;  %v9565_v17 = vld [vmem:[#allocation2 + $0x48] sm:$0xe] }
 0x393   : > { %v9168_v29 = vsel %vm17984_vm0, %v9163_v53, %v9167_v39  ;;  %v14635_v21 = vcombine.low %v9678_v38, %v9681_v44  ;;  %v9183_v57 = vshrl.u32 %v8775_v41, 16  ;;  %v9688_v8 = vsel %vm18028_vm12, %v9686_v25, %v9687_v9  ;;  %v9564_v39 = vld [vmem:[#allocation2 + $0x44] sm:$0x1]  ;;  %v9566_v30 = vld [vmem:[#allocation2 + $0x4c] sm:$0xf] }
 0x394   : > { %v14593_v63 = vcombine.low %v9158_v18, %v9168_v29  ;;  %v9172_v55 = vrot.slane %v9170_v27, 4  ;;  %v9175_v26 = vrot.slane %v9173_v48, 5  ;;  %v14636_v61 = vcombine.low %v9685_v56, %v9688_v8  ;;  %v9567_v9 = vld [vmem:[#allocation2 + $0x50] sm:$0x1]  ;;  %v9568_v41 = vld [vmem:[#allocation2 + $0x54] sm:$0xe] }
 0x395   : > { %15946 = vmatprep.mubr.bf16.mxu1 %v14635_v21  ;;  %v9181_v11 = vrot.slane %v9179_v1, 5  ;;  %v9185_v4 = vrot.slane %v9183_v57, 4  ;;  %v9189_v47 = vshll.u32 %v8776_v58, 16  ;;  %v9691_v33 = vrot.slane %v9554_v32, 5  ;;  %v9569_v34 = vld [vmem:[#allocation2 + $0x58] sm:$0xf] }
 0x396   : > { %15926 = vmatprep.mubr.bf16.mxu0 %v14593_v63  ;;  %v9176_v42 = vor.u32 %v9175_v26, %v9172_v55  ;;  %15947 = vmatmul.mubr.bf16.vlgmr.msra.gmra.mxu1 %v14636_v61  ;;  %v14605_v10 = vrot.slane %v9553_v37, 9  ;;  %v9698_v62 = vrot.slane %v9557_v14, 5  ;;  %v9694_v43 = vrot.slane %v9555_v46, 5  ;;  %v16444_v53 = vld [vmem:[#allocation2 + $0xc] sm:$0xff]   ;;  %v9570_v58 = vld [vmem:[#allocation2 + $0x5c] sm:$0x1] }
 0x397   : > { %v9186_v20 = vor.u32 %v9185_v4, %v9181_v11  ;;  %16027 = vmatpush3.bf16.msra.mxu1 %v16521_v22  ;;  %v9693_v7 = vrot.slane %v9691_v33, 4  ;;  %v14606_v2 = vrot.slane %v9556_v23, 9  ;;  %v9191_v5 = vrot.slane %v9189_v47, 5  ;;  %v16452_v1 = vld [vmem:[%s21691_s4 + $0x120] sm:$0xff]   ;;  %v9573_v26 = vld [vmem:[#allocation2 + $0x68] sm:$0x1] }
 0x398   : > { %v9177_v35 = vrot.slane %v9176_v42, 4  ;;  %16028 = vmatprep.subr.bf16.mxu1 %v16446_v51  ;;  %v9700_v60 = vrot.slane %v9698_v62, 4  ;;  %v9701_v49 = vrot.slane %v9558_v24, 5  ;;  %v9692_v36 = vsel %vm18028_vm12, %v14605_v10, %v9691_v33  ;;  %v9571_v57 = vld [vmem:[#allocation2 + $0x60] sm:$0xe]  ;;  %v16447_v22 = vld [vmem:[#allocation2 + $0x18] sm:$0xff]  }
 0x399   : > { %v9187_v0 = vrot.slane %v9186_v20, 4  ;;  %v9695_v40 = vsel %vm18028_vm12, %v9693_v7, %v9694_v43  ;;  %v9699_v52 = vsel %vm18028_vm12, %v14606_v2, %v9698_v62  ;;  %v9705_v28 = vrot.slane %v9560_v54, 5  ;;  %v9572_v37 = vld [vmem:[#allocation2 + $0x64] sm:$0xf]  ;;  %v20145_v46 = vld [vmem:[#allocation2 + $0x6c] sm:$0xe] }
 0x39a   : > { %v9182_v3 = vsel %vm17984_vm0, %v9177_v35, %v9181_v11  ;;  %v14637_v38 = vcombine.low %v9692_v36, %v9695_v40  ;;  %v9702_v19 = vsel %vm18028_vm12, %v9700_v60, %v9701_v49  ;;  %v14607_v56 = vrot.slane %v9559_v12, 9  ;;  %v9575_v47 = vld [vmem:[#allocation2 + $0x70] sm:$0xf]  ;;  %v9576_v24 = vld [vmem:[#allocation2 + $0x74] sm:$0x1]  ;;  %v16455_v54 = vld [vmem:[%s21691_s4 + $0x118] sm:$0xff]  }
 0x39b   : > { %v9192_v15 = vsel %vm17984_vm0, %v9187_v0, %v9191_v5  ;;  %16029 = vmatpush3.bf16.msra.mxu1 %v16446_v51  ;;  %v9707_v44 = vrot.slane %v9705_v28, 4  ;;  %v9708_v25 = vrot.slane %v9561_v6, 5  ;;  %v14638_v27 = vcombine.low %v9699_v52, %v9702_v19  ;;  %v9577_v6 = vld [vmem:[#allocation2 + $0x78] sm:$0xe]  ;;  %v16448_v0 = vld [vmem:[#allocation2 + $0x24] sm:$0xff]   ;;  %v16458_v36 = vld [vmem:[%s21691_s4 + $0x110] sm:$0xff]  }
 0x39c   : > { %v14594_v18 = vcombine.low %v9182_v3, %v9192_v15  ;;  %15950 = vmatprep.mubr.bf16.mxu1 %v14637_v38  ;;  %16030 = vmatprep.subr.bf16.mxu1 %v16449_v50  ;;  %v14608_v48 = vrot.slane %v9562_v59, 9  ;;  %v9712_v29 = vrot.slane %v9563_v13, 5  ;;  %v9719_v21 = vrot.slane %v9566_v30, 5  ;;  %v9579_v59 = vld [vmem:[#allocation2 + $0x80] sm:$0x1]  ;;  %v16462_v38 = vld [vmem:[%s21691_s4 + $0x170] sm:$0xff]  }
 0x39d   : > { %v9706_v32 = vsel %vm18028_vm12, %v14607_v56, %v9705_v28  ;;  %v9709_v63 = vsel %vm18028_vm12, %v9707_v44, %v9708_v25  ;;  %v9715_v8 = vrot.slane %v9564_v39, 5  ;;  %v9726_v55 = vrot.slane %v9569_v34, 5  ;;  %v9581_v13 = vld [vmem:[#allocation2 + $0x88] sm:$0xf]  ;;  %v9580_v40 = vld [vmem:[#allocation2 + $0x84] sm:$0xe] }
 0x39e   : > { %15927 = vmatmul.mubr.bf16.gmra.mxu0 %v14594_v18  ;;  %15951 = vmatmul.mubr.bf16.gmra.mxu1 %v14638_v27  ;;  %v14639_v14 = vcombine.low %v9706_v32, %v9709_v63  ;;  %v9714_v61 = vrot.slane %v9712_v29, 4  ;;  %v14609_v11 = vrot.slane %v9565_v17, 9  ;;  %v9722_v4 = vrot.slane %v9567_v9, 5  ;;  %v9582_v3 = vld [vmem:[#allocation2 + $0x8c] sm:$0x1] }
 0x39f   : > { %15994 = vmatprep.mubr.bf16.mxu0 %v16444_v53  ;;  %16031 = vmatpush3.bf16.msra.mxu1 %v16449_v50  ;;  %v9721_v51 = vrot.slane %v9719_v21, 4  ;;  %v14610_v23 = vrot.slane %v9568_v41, 9  ;;  %v9728_v42 = vrot.slane %v9726_v55, 4  ;;  %v9729_v33 = vrot.slane %v9570_v58, 5  ;;  %v9578_v50 = vld [vmem:[#allocation2 + $0x7c] sm:$0xf] }
 0x3a0   : > { %15954 = vmatprep.mubr.bf16.mxu1 %v14639_v14  ;;  %v9713_v20 = vsel %vm18028_vm12, %v14608_v48, %v9712_v29  ;;  %v9716_v10 = vsel %vm18028_vm12, %v9714_v61, %v9715_v8  ;;  %v9720_v62 = vsel %vm18028_vm12, %v14609_v11, %v9719_v21  ;;  %16032 = vmatprep.subr.bf16.mxu1 %v16452_v1  ;;  %v9733_v12 = vrot.slane %v9572_v37, 5  ;;  %v9583_v15 = vld [vmem:[#allocation2 + $0x90] sm:$0xe]  ;;  %v9584_v18 = vld [vmem:[#allocation2 + $0x94] sm:$0xf] }
 0x3a1   : > { %v9723_v35 = vsel %vm18028_vm12, %v9721_v51, %v9722_v4  ;;  %v20160_v7 = vsel %vm18028_vm12, %v14610_v23, %v9726_v55  ;;  %v20164_v43 = vsel %vm18028_vm12, %v9728_v42, %v9729_v33  ;;  %v14611_v2 = vrot.slane %v9571_v57, 9  ;;  %v9585_v53 = vld [vmem:[#allocation2 + $0x98] sm:$0x1]  ;;  %v9586_v27 = vld [vmem:[#allocation2 + $0x9c] sm:$0xe] }
 0x3a2   : > { %v14640_v5 = vcombine.low %v9713_v20, %v9716_v10  ;;  %v9735_v60 = vrot.slane %v9733_v12, 4  ;;  %v9736_v49 = vrot.slane %v9573_v26, 5  ;;  %v14612_v39 = vrot.slane %v20145_v46, 9  ;;  %v9589_v57 = vld [vmem:[#allocation2 + $0xa8] sm:$0xe] }
 0x3a3   : > { %v14641_v52 = vcombine.low %v9720_v62, %v9723_v35  ;;  %v14642_v28 = vcombine.low %v20160_v7, %v20164_v43  ;;  %16033 = vmatpush3.bf16.msra.mxu1 %v16452_v1  ;;  %v9740_v17 = vrot.slane %v9575_v47, 5  ;;  %v9747_v30 = vrot.slane %v9578_v50, 5  ;;  %v9590_v37 = vld [vmem:[#allocation2 + $0xac] sm:$0xf]  ;;  %v9587_v26 = vld [vmem:[#allocation2 + $0xa0] sm:$0xf] }
 0x3a4   : > { %v20177_v19 = vsel %vm18028_vm12, %v14611_v2, %v9733_v12  ;;  %v20181_v9 = vsel %vm18028_vm12, %v9735_v60, %v9736_v49  ;;  %16034 = vmatprep.subr.bf16.mxu1 %v16455_v54  ;;  %v9743_v41 = vrot.slane %v9576_v24, 5  ;;  %v9754_v34 = vrot.slane %v9581_v13, 5  ;;  %v20197_v46 = vld [vmem:[#allocation2 + $0xb0] sm:$0x1]  ;;  %v16463_v47 = vld [vmem:[%s21691_s4 + $0x108] sm:$0xff]   ;;  %v16468_v35 = vld [vmem:[%s21691_s4 + $0x100] sm:$0xff]  }
 0x3a5   : > { %v9742_v56 = vrot.slane %v9740_v17, 4  ;;  %v14613_v44 = vrot.slane %v9577_v6, 9  ;;  %v9750_v25 = vrot.slane %v9579_v59, 5  ;;  %v14614_v58 = vrot.slane %v9580_v40, 9  ;;  %v9588_v51 = vld [vmem:[#allocation2 + $0xa4] sm:$0x1] }
 0x3a6   : > { %15995 = vmatmul.mubr.bf16.vlgmr.msra.gmra.mxu0 %v16447_v22  ;;  %15955 = vmatmul.mubr.bf16.gmra.mxu1 %v14640_v5  ;;  %v14643_v48 = vcombine.low %v20177_v19, %v20181_v9  ;;  %v9749_v29 = vrot.slane %v9747_v30, 4  ;;  %v9756_v21 = vrot.slane %v9754_v34, 4  ;;  %v9757_v1 = vrot.slane %v9582_v3, 5  ;;  %v9593_v23 = vld [vmem:[#allocation2 + $0xb8] sm:$0xf]  ;;  %v16465_v10 = vld [vmem:[%s21691_s4 + $0x168] sm:$0xff]  }
 0x3a7   : > { %15998 = vmatprep.mubr.bf16.mxu0 %v16448_v0  ;;  %15958 = vmatprep.mubr.bf16.mxu1 %v14641_v52  ;;  %v20187_v32 = vsel %vm18028_vm12, %v14612_v39, %v9740_v17  ;;  %v20191_v63 = vsel %vm18028_vm12, %v9742_v56, %v9743_v41  ;;  %v20195_v8 = vsel %vm18028_vm12, %v14613_v44, %v9747_v30  ;;  %v9761_v55 = vrot.slane %v9584_v18, 5  ;;  %v9592_v62 = vld [vmem:[#allocation2 + $0xb4] sm:$0xe]  ;;  %v10591_v5 = vld [vmem:[#allocation2 + $0xc] sm:$0xf] }
 0x3a8   : > { %16035 = vmatpush3.bf16.msra.mxu1 %v16455_v54  ;;  %v20201_v14 = vsel %vm18028_vm12, %v9749_v29, %v9750_v25  ;;  %v20205_v61 = vsel %vm18028_vm12, %v14614_v58, %v9754_v34  ;;  %v20209_v11 = vsel %vm18028_vm12, %v9756_v21, %v9757_v1  ;;  %v14615_v4 = vrot.slane %v9583_v15, 9  ;;  %16075 = vmatpush3.bf16.msra.mxu0 %v20014_v16  ;;  %v16450_v12 = vld [vmem:[#allocation2 + $0x30] sm:$0xff]   ;;  %v16451_v16 = vld [vmem:[#allocation2 + $0x3c] sm:$0xff]   ;;  %v10594_v44 = vld [vmem:[#allocation2 + $0x18] sm:$0xf] }
 0x3a9   : > { %16036 = vmatprep.subr.bf16.mxu1 %v16458_v36  ;;  %v14644_v42 = vcombine.low %v20187_v32, %v20191_v63  ;;  %v9763_v33 = vrot.slane %v9761_v55, 4  ;;  %v9764_v24 = vrot.slane %v9585_v53, 5  ;;  %16076 = vmatprep.subr.bf16.mxu0 %v16462_v38  ;;  %v14616_v20 = vrot.slane %v9586_v27, 9  ;;  %v10592_v60 = vld [vmem:[#allocation2 + $0x10] sm:$0xf]  ;;  %v20275_v21 = vld [vmem:[%s21691_s4 + $0x1b8] sm:$0xff]  }
 0x3aa   : > { %v14645_v54 = vcombine.low %v20195_v8, %v20201_v14  ;;  %v14646_v6 = vcombine.low %v20205_v61, %v20209_v11  ;;  %v9768_v50 = vrot.slane %v9587_v26, 5  ;;  %v9775_v22 = vrot.slane %v9590_v37, 5  ;;  %v9594_v52 = vld [vmem:[#allocation2 + $0xbc] sm:$0x1]  ;;  %v10593_v41 = vld [vmem:[#allocation2 + $0x14] sm:$0x1] }
 0x3ab   : > { %v20229_v2 = vsel %vm18028_vm12, %v14615_v4, %v9761_v55  ;;  %v20233_v59 = vsel %vm18028_vm12, %v9763_v33, %v9764_v24  ;;  %v14617_v13 = vrot.slane %v9589_v57, 9  ;;  %v9782_v0 = vrot.slane %v9593_v23, 5  ;;  %v10596_v55 = vld [vmem:[#allocation2 + $0x20] sm:$0x1]  ;;  %v10597_v23 = vld [vmem:[#allocation2 + $0x24] sm:$0xf] }
 0x3ac   : > { %16037 = vmatpush3.bf16.msra.mxu1 %v16458_v36  ;;  %16077 = vmatpush3.bf16.msra.mxu0 %v16462_v38  ;;  %v9770_v49 = vrot.slane %v9768_v50, 4  ;;  %v9771_v39 = vrot.slane %v9588_v51, 5  ;;  %v9778_v40 = vrot.slane %v20197_v46, 5  ;;  %v14618_v36 = vrot.slane %v9592_v62, 9  ;;  %v16467_v38 = vld [vmem:[%s21691_s4 + $0x160] sm:$0xff]   ;;  %v16453_v33 = vld [vmem:[#allocation2 + $0x48] sm:$0xff]  }
 0x3ad   : > { %16038 = vmatprep.subr.bf16.mxu1 %v16463_v47  ;;  %v14647_v17 = vcombine.low %v20229_v2, %v20233_v59  ;;  %v20240_v30 = vsel %vm18028_vm12, %v14616_v20, %v9768_v50  ;;  %v20244_v3 = vsel %vm18028_vm12, %v14617_v13, %v9775_v22  ;;  %v9777_v15 = vrot.slane %v9775_v22, 4  ;;  %16078 = vmatprep.subr.bf16.mxu0 %v16465_v10  ;;  %v11412_v11 = vld [vmem:[#allocation2 + $0x18] sm:$0xe] }
 0x3ae   : > { %15999 = vmatmul.mubr.bf16.gmra.mxu0 %v16450_v12  ;;  %15959 = vmatmul.mubr.bf16.gmra.mxu1 %v14642_v28  ;;  %v20254_v34 = vsel %vm18028_vm12, %v9770_v49, %v9771_v39  ;;  %v10672_v18 = vshrl.u32 %v10591_v5, 16  ;;  %v10675_v53 = vshll.u32 %v10591_v5, 16  ;;  %v10681_v56 = vshll.u32 %v10592_v60, 16  ;;  %v10595_v28 = vld [vmem:[#allocation2 + $0x1c] sm:$0xf] }
 0x3af   : > { %16002 = vmatprep.mubr.bf16.mxu0 %v16451_v16  ;;  %15962 = vmatprep.mubr.bf16.mxu1 %v14643_v48  ;;  %v20261_v25 = vsel %vm18028_vm12, %v14618_v36, %v9782_v0  ;;  %v9784_v58 = vrot.slane %v9782_v0, 4  ;;  %v9785_v7 = vrot.slane %v9594_v52, 5  ;;  %v10685_v43 = vshrl.u32 %v10592_v60, 16  ;;  %v16470_v48 = vld [vmem:[%s21691_s4 + $0x158] sm:$0xff]   ;;  %v10598_v12 = vld [vmem:[#allocation2 + $0x28] sm:$0xf] }
 0x3b0   : > { %16039 = vmatpush3.bf16.msra.mxu1 %v16463_v47  ;;  %v14648_v27 = vcombine.low %v20240_v30, %v20254_v34  ;;  %v20267_v29 = vsel %vm18028_vm12, %v9777_v15, %v9778_v40  ;;  %16079 = vmatpush3.bf16.msra.mxu0 %v16465_v10  ;;  %v10674_v19 = vrot.slane %v10672_v18, 4  ;;  %v10677_v9 = vrot.slane %v10675_v53, 5  ;;  %v16454_v16 = vld [vmem:[#allocation2 + $0x54] sm:$0xff]   ;;  %v10599_v15 = vld [vmem:[#allocation2 + $0x2c] sm:$0x1] }
 0x3b1   : > { %16040 = vmatprep.subr.bf16.mxu1 %v16468_v35  ;;  %16080 = vmatprep.subr.bf16.mxu0 %v16467_v38  ;;  %v10683_v1 = vrot.slane %v10681_v56, 5  ;;  %v10687_v57 = vrot.slane %v10685_v43, 4  ;;  %v10691_v37 = vshll.u32 %v10593_v41, 16  ;;  %v10696_v26 = vshrl.u32 %v10594_v44, 16 }
 0x3b2   : > { %v10678_v46 = vor.u32 %v10677_v9, %v10674_v19  ;;  %v10699_v4 = vshll.u32 %v10594_v44, 16  ;;  %v10705_v47 = vshll.u32 %v10595_v28, 16  ;;  %v10709_v51 = vshrl.u32 %v10595_v28, 16  ;;  %v11410_v44 = vld [vmem:[#allocation2 + $0x10] sm:$0xf]  ;;  %v16475_v28 = vld [vmem:[%s21691_s4 + $0x148] sm:$0xff]  }
 0x3b3   : > { %v20279_v24 = vsel %vm18028_vm12, %v9784_v58, %v9785_v7  ;;  %v10688_v20 = vor.u32 %v10687_v57, %v10683_v1  ;;  %v10693_v10 = vrot.slane %v10691_v37, 5  ;;  %v10698_v62 = vrot.slane %v10696_v26, 4  ;;  %v11409_v7 = vld [vmem:[#allocation2 + $0xc] sm:$0xe]  ;;  %v11411_v19 = vld [vmem:[#allocation2 + $0x14] sm:$0x1] }
 0x3b4   : > { %16041 = vmatpush3.bf16.msra.mxu1 %v16468_v35  ;;  %16081 = vmatpush3.bf16.msra.mxu0 %v16467_v38  ;;  %v10701_v50 = vrot.slane %v10699_v4, 5  ;;  %v10707_v22 = vrot.slane %v10705_v47, 5  ;;  %v10711_v13 = vrot.slane %v10709_v51, 4  ;;  %v10715_v0 = vshll.u32 %v10596_v55, 16  ;;  %v16472_v35 = vld [vmem:[%s21691_s4 + $0x150] sm:$0xff]  }
 0x3b5   : > { %16122 = vmatprep.subr.bf16.mxu1 %v20275_v21  ;;  %v10679_v5 = vrot.slane %v10678_v46, 4  ;;  %v10689_v60 = vrot.slane %v10688_v20, 4  ;;  %16082 = vmatprep.subr.bf16.mxu0 %v16470_v48  ;;  %v10720_v49 = vshrl.u32 %v10597_v23, 16  ;;  %v10723_v39 = vshll.u32 %v10597_v23, 16  ;;  %v10600_v9 = vld [vmem:[#allocation2 + $0x30] sm:$0xf] }
 0x3b6   : > { %16003 = vmatmul.mubr.bf16.gmra.mxu0 %v16453_v33  ;;  %15963 = vmatmul.mubr.bf16.gmra.mxu1 %v14644_v42  ;;  %v14649_v40 = vcombine.low %v20244_v3, %v20267_v29  ;;  %v10702_v52 = vor.u32 %v10701_v50, %v10698_v62  ;;  %v10712_v36 = vor.u32 %v10711_v13, %v10707_v22  ;;  %v10729_v38 = vshll.u32 %v10598_v12, 16  ;;  %v16457_v57 = vld [vmem:[#allocation2 + $0x6c] sm:$0xff]   ;;  %v10601_v4 = vld [vmem:[#allocation2 + $0x34] sm:$0xf]  ;;  %v10602_v33 = vld [vmem:[#allocation2 + $0x38] sm:$0x1] }
 0x3b7   : > { %16006 = vmatprep.mubr.bf16.mxu0 %v16454_v16  ;;  %15966 = vmatprep.mubr.bf16.mxu1 %v14645_v54  ;;  %v10694_v41 = vsel %vm17984_vm0, %v10689_v60, %v10693_v10  ;;  %v10722_v18 = vrot.slane %v10720_v49, 4  ;;  %v10725_v53 = vrot.slane %v10723_v39, 5  ;;  %v10733_v56 = vshrl.u32 %v10598_v12, 16  ;;  %v10603_v20 = vld [vmem:[#allocation2 + $0x3c] sm:$0xf] }
 0x3b8   : > { %16083 = vmatpush3.bf16.msra.mxu0 %v16470_v48  ;;  %v10703_v32 = vrot.slane %v10702_v52, 4  ;;  %v10713_v63 = vrot.slane %v10712_v36, 4  ;;  %v10717_v42 = vrot.slane %v10715_v0, 5  ;;  %v20295_v58 = vrot.slane %v10729_v38, 5  ;;  %v16456_v48 = vld [vmem:[#allocation2 + $0x60] sm:$0xff]  }
 0x3b9   : > { %v14650_v43 = vcombine.low %v20261_v25, %v20279_v24  ;;  %v10684_v8 = vsel %vm17984_vm0, %v10679_v5, %v10683_v1  ;;  %16084 = vmatprep.subr.bf16.mxu0 %v16472_v35  ;;  %v10726_v14 = vor.u32 %v10725_v53, %v10722_v18  ;;  %v10735_v54 = vrot.slane %v10733_v56, 4  ;;  %v10604_v50 = vld [vmem:[#allocation2 + $0x40] sm:$0xf]  ;;  %v10605_v49 = vld [vmem:[#allocation2 + $0x44] sm:$0x1]  ;;  %v16459_v53 = vld [vmem:[#allocation2 + $0x78] sm:$0xff]  }
 0x3ba   : > { %v20304_v37 = vcombine.low %v10684_v8, %v10694_v41  ;;  %v10718_v55 = vsel %vm17984_vm0, %v10713_v63, %v10717_v42  ;;  %v10739_v26 = vshll.u32 %v10599_v15, 16  ;;  %v11539_v46 = vrot.slane %v11410_v44, 5  ;;  %v11413_v18 = vld [vmem:[#allocation2 + $0x1c] sm:$0xf]  ;;  %v11414_v42 = vld [vmem:[#allocation2 + $0x20] sm:$0x1] }
 0x3bb   : > { %v10708_v1 = vsel %vm17984_vm0, %v10703_v32, %v10707_v22  ;;  %v20310_v47 = vrot.slane %v10726_v14, 4  ;;  %v10736_v51 = vor.u32 %v10735_v54, %v20295_v58  ;;  %v14739_v23 = vrot.slane %v11409_v7, 9  ;;  %v16476_v22 = vld [vmem:[%s21691_s4 + $0x140] sm:$0xff]  }
 0x3bc   : > { %16085 = vmatpush3.bf16.msra.mxu0 %v16472_v35  ;;  %v11541_v10 = vrot.slane %v11539_v46, 4  ;;  %v11542_v62 = vrot.slane %v11411_v19, 5  ;;  %v10744_v12 = vshrl.u32 %v10600_v9, 16  ;;  %v10747_v16 = vshll.u32 %v10600_v9, 16 }
 0x3bd   : > { %v20313_v13 = vcombine.low %v10708_v1, %v10718_v55  ;;  %v10737_v0 = vrot.slane %v10736_v51, 4  ;;  %16086 = vmatprep.subr.bf16.mxu0 %v16475_v28  ;;  %v10753_v5 = vshll.u32 %v10601_v4, 16  ;;  %v10757_v60 = vshrl.u32 %v10601_v4, 16  ;;  %v11416_v55 = vld [vmem:[#allocation2 + $0x28] sm:$0xf] }
 0x3be   : > { %16007 = vmatmul.mubr.bf16.gmra.mxu0 %v16456_v48  ;;  %15967 = vmatmul.mubr.bf16.gmra.mxu1 %v14646_v6  ;;  %v10741_v35 = vrot.slane %v10739_v26, 5  ;;  %v10746_v39 = vrot.slane %v10744_v12, 4  ;;  %v10749_v52 = vrot.slane %v10747_v16, 5  ;;  %v10763_v36 = vshll.u32 %v10602_v33, 16  ;;  %v16461_v26 = vld [vmem:[#allocation2 + $0x84] sm:$0xff]  }
 0x3bf   : > { %16010 = vmatprep.mubr.bf16.mxu0 %v16457_v57  ;;  %15970 = vmatprep.mubr.bf16.mxu1 %v14647_v17  ;;  %v10732_v15 = vsel %vm17984_vm0, %v20310_v47, %v20295_v58  ;;  %v20330_v38 = vsel %vm18028_vm12, %v14739_v23, %v11539_v46  ;;  %v10755_v41 = vrot.slane %v10753_v5, 5  ;;  %v10759_v61 = vrot.slane %v10757_v60, 4  ;;  %v20341_v58 = vld [vmem:[%s21691_s4 + $0x1f8] sm:$0xff]   ;;  %v11417_v51 = vld [vmem:[#allocation2 + $0x2c] sm:$0x1] }
 0x3c0   : > { %v10742_v6 = vsel %vm17984_vm0, %v10737_v0, %v10741_v35  ;;  %16087 = vmatpush3.bf16.msra.mxu0 %v16475_v28  ;;  %v20336_v2 = vsel %vm18028_vm12, %v11541_v10, %v11542_v62  ;;  %v10750_v59 = vor.u32 %v10749_v52, %v10746_v39  ;;  %v10768_v17 = vshrl.u32 %v10603_v20, 16  ;;  %v11415_v28 = vld [vmem:[#allocation2 + $0x24] sm:$0xe]  ;;  %v10606_v23 = vld [vmem:[#allocation2 + $0x48] sm:$0xf] }
 0x3c1   : > { %16088 = vmatprep.subr.bf16.mxu0 %v16476_v22  ;;  %v10760_v56 = vor.u32 %v10759_v61, %v10755_v41  ;;  %v10771_v44 = vshll.u32 %v10603_v20, 16  ;;  %v10777_v32 = vshll.u32 %v10604_v50, 16  ;;  %v10781_v63 = vshrl.u32 %v10604_v50, 16  ;;  %v10607_v12 = vld [vmem:[#allocation2 + $0x4c] sm:$0xf] }
 0x3c2   : > { %v10751_v7 = vrot.slane %v10750_v59, 4  ;;  %v10765_v8 = vrot.slane %v10763_v36, 5  ;;  %v10770_v14 = vrot.slane %v10768_v17, 4  ;;  %v10787_v54 = vshll.u32 %v10605_v49, 16  ;;  %v10609_v36 = vld [vmem:[#allocation2 + $0x54] sm:$0xf] }
 0x3c3   : > { %v10761_v19 = vrot.slane %v10760_v56, 4  ;;  %v10773_v9 = vrot.slane %v10771_v44, 5  ;;  %v20343_v48 = vrot.slane %v10777_v32, 5  ;;  %v10783_v57 = vrot.slane %v10781_v63, 4  ;;  %v10611_v17 = vld [vmem:[#allocation2 + $0x5c] sm:$0x1] }
 0x3c4   : > { %v14771_v46 = vcombine.low %v20330_v38, %v20336_v2  ;;  %16089 = vmatpush3.bf16.msra.mxu0 %v16476_v22  ;;  %v20347_v4 = vrot.slane %v10787_v54, 5  ;;  %v14740_v1 = vrot.slane %v11412_v11, 9  ;;  %v11546_v47 = vrot.slane %v11413_v18, 5  ;;  %v11419_v18 = vld [vmem:[#allocation2 + $0x34] sm:$0xf] }
 0x3c5   : > { %v10766_v33 = vsel %vm17984_vm0, %v10761_v19, %v10765_v8  ;;  %v10774_v20 = vor.u32 %v10773_v9, %v10770_v14  ;;  %v10784_v10 = vor.u32 %v10783_v57, %v20343_v48  ;;  %v11549_v62 = vrot.slane %v11414_v42, 5  ;;  %16170 = vmatprep.subr.bf16.mxu0 %v20341_v58  ;;  %v11418_v42 = vld [vmem:[#allocation2 + $0x30] sm:$0xe]  ;;  %v11420_v19 = vld [vmem:[#allocation2 + $0x38] sm:$0x1] }
 0x3c6   : > { %16011 = vmatmul.mubr.bf16.gmra.mxu0 %v16459_v53  ;;  %15971 = vmatmul.mubr.bf16.gmra.mxu1 %v14648_v27  ;;  %v20356_v16 = vcombine.low %v10732_v15, %v10742_v6  ;;  %v10756_v50 = vsel %vm17984_vm0, %v10751_v7, %v10755_v41  ;;  %v11548_v0 = vrot.slane %v11546_v47, 4  ;;  %v11553_v22 = vrot.slane %v11416_v55, 5  ;;  %v10608_v27 = vld [vmem:[#allocation2 + $0x50] sm:$0x1]  ;;  %v10610_v41 = vld [vmem:[#allocation2 + $0x58] sm:$0xf] }
 0x3c7   : > { %16014 = vmatprep.mubr.bf16.mxu0 %v16461_v26  ;;  %15974 = vmatprep.mubr.bf16.mxu1 %v14649_v40  ;;  %v10775_v5 = vrot.slane %v10774_v20, 4  ;;  %v10785_v60 = vrot.slane %v10784_v10, 4  ;;  %v14741_v49 = vrot.slane %v11415_v28, 9  ;;  %v10792_v35 = vshrl.u32 %v10606_v23, 16  ;;  %v16464_v53 = vld [vmem:[#allocation2 + $0x90] sm:$0xff]   ;;  %v16466_v7 = vld [vmem:[#allocation2 + $0x9c] sm:$0xff]  }
 0x3c8   : > { %v20363_v39 = vcombine.low %v10756_v50, %v10766_v33  ;;  %v20367_v30 = vsel %vm18028_vm12, %v14740_v1, %v11546_v47  ;;  %v20371_v34 = vsel %vm18028_vm12, %v11548_v0, %v11549_v62  ;;  %v10795_v52 = vshll.u32 %v10606_v23, 16  ;;  %v11421_v10 = vld [vmem:[#allocation2 + $0x3c] sm:$0xe]  ;;  %v11422_v62 = vld [vmem:[#allocation2 + $0x40] sm:$0xf] }
 0x3c9   : > { %v20375_v3 = vsel %vm18028_vm12, %v14741_v49, %v11553_v22  ;;  %v11555_v29 = vrot.slane %v11553_v22, 4  ;;  %v11556_v40 = vrot.slane %v11417_v51, 5  ;;  %v10794_v15 = vrot.slane %v10792_v35, 4  ;;  %v10612_v0 = vld [vmem:[#allocation2 + $0x60] sm:$0xf]  ;;  %v16469_v22 = vld [vmem:[#allocation2 + $0xa8] sm:$0xff]  }
 0x3ca   : > { %v10780_v61 = vsel %vm17984_vm0, %v10775_v5, %v20343_v48  ;;  %v10790_v11 = vsel %vm17984_vm0, %v10785_v60, %v20347_v4  ;;  %v10797_v6 = vrot.slane %v10795_v52, 5  ;;  %v10801_v59 = vshll.u32 %v10607_v12, 16  ;;  %v10613_v35 = vld [vmem:[#allocation2 + $0x64] sm:$0xf]  ;;  %v16477_v52 = vld [vmem:[%s21691_s4 + $0x1b0] sm:$0xff]  }
 0x3cb   : > { %v14772_v56 = vcombine.low %v20367_v30, %v20371_v34  ;;  %v10805_v44 = vshrl.u32 %v10607_v12, 16  ;;  %v10811_v32 = vshll.u32 %v10608_v27, 16  ;;  %v10816_v63 = vshrl.u32 %v10609_v36, 16  ;;  %v16471_v27 = vld [vmem:[#allocation2 + $0xb4] sm:$0xff]   ;;  %v11432_v34 = vld [vmem:[#allocation2 + $0x68] sm:$0x1] }
 0x3cc   : > { %v10798_v8 = vor.u32 %v10797_v6, %v10794_v15  ;;  %v10803_v14 = vrot.slane %v10801_v59, 5  ;;  %v10819_v54 = vshll.u32 %v10609_v36, 16  ;;  %v10825_v28 = vshll.u32 %v10610_v41, 16 }
 0x3cd   : > { %v20387_v9 = vsel %vm18028_vm12, %v11555_v29, %v11556_v40  ;;  %v10807_v48 = vrot.slane %v10805_v44, 4  ;;  %v10818_v57 = vrot.slane %v10816_v63, 4  ;;  %v10829_v55 = vshrl.u32 %v10610_v41, 16  ;;  %v10615_v41 = vld [vmem:[#allocation2 + $0x6c] sm:$0xf] }
 0x3ce   : > { %16015 = vmatmul.mubr.bf16.gmra.mxu0 %v16464_v53  ;;  %15975 = vmatmul.mubr.bf16.gmra.mxu1 %v14650_v43  ;;  %v10799_v26 = vrot.slane %v10798_v8, 4  ;;  %v10821_v4 = vrot.slane %v10819_v54, 5  ;;  %v20392_v1 = vrot.slane %v10825_v28, 5  ;;  %v10835_v47 = vshll.u32 %v10611_v17, 16  ;;  %v11423_v43 = vld [vmem:[#allocation2 + $0x44] sm:$0x1] }
 0x3cf   : > { %16018 = vmatprep.mubr.bf16.mxu0 %v16466_v7  ;;  %16042 = vmatprep.mubr.bf16.mxu1 %v20304_v37  ;;  %v20395_v51 = vcombine.low %v10780_v61, %v10790_v11  ;;  %v10808_v23 = vor.u32 %v10807_v48, %v10803_v14  ;;  %v10831_v33 = vrot.slane %v10829_v55, 4  ;;  %v11560_v20 = vrot.slane %v11419_v18, 5  ;;  %v10616_v48 = vld [vmem:[#allocation2 + $0x70] sm:$0xf] }
 0x3d0   : > { %v14773_v12 = vcombine.low %v20375_v3, %v20387_v9  ;;  %v10813_v50 = vrot.slane %v10811_v32, 5  ;;  %v10822_v25 = vor.u32 %v10821_v4, %v10818_v57  ;;  %v14742_v24 = vrot.slane %v11418_v42, 9  ;;  %v10614_v42 = vld [vmem:[#allocation2 + $0x68] sm:$0x1]  ;;  %v20427_v57 = vpop.f32.mrf.mxu1 }
 0x3d1   : > { %v10809_v5 = vrot.slane %v10808_v23, 4  ;;  %v10832_v60 = vor.u32 %v10831_v33, %v20392_v1  ;;  %v11562_v37 = vrot.slane %v11560_v20, 4  ;;  %v11563_v49 = vrot.slane %v11420_v19, 5 }
 0x3d2   : > { %v10804_v36 = vsel %vm17984_vm0, %v10799_v26, %v10803_v14  ;;  %v10823_v29 = vrot.slane %v10822_v25, 4  ;;  %v10837_v40 = vrot.slane %v10835_v47, 5  ;;  %v11567_v15 = vrot.slane %v11422_v62, 5  ;;  %v10617_v26 = vld [vmem:[#allocation2 + $0x74] sm:$0x1]  ;;  %v16478_v47 = vld [vmem:[%s21691_s4 + $0x1a8] sm:$0xff]  }
 0x3d3   : > { %v10814_v61 = vsel %vm17984_vm0, %v10809_v5, %v10813_v50  ;;  %v10833_v11 = vrot.slane %v10832_v60, 4  ;;  %v20409_v6 = vsel %vm18028_vm12, %v11562_v37, %v11563_v49  ;;  %v10840_v59 = vshrl.u32 %v10612_v0, 16  ;;  %v11424_v5 = vld [vmem:[#allocation2 + $0x48] sm:$0xe]  ;;  %v11426_v60 = vld [vmem:[#allocation2 + $0x50] sm:$0x1]  ;;  %v20442_v37 = vpop.f32.mrf.mxu1 }
 0x3d4   : > { %v20411_v17 = vcombine.low %v10804_v36, %v10814_v61  ;;  %v20415_v18 = vsel %vm18028_vm12, %v14742_v24, %v11560_v20  ;;  %v14743_v53 = vrot.slane %v11421_v10, 9  ;;  %v11570_v44 = vrot.slane %v11423_v43, 5  ;;  %v16474_v49 = vld [vmem:[#allocation2 + $0xc0] sm:$0xff]  }
 0x3d5   : > { %v10828_v32 = vsel %vm17984_vm0, %v10823_v29, %v20392_v1  ;;  %v11569_v63 = vrot.slane %v11567_v15, 4  ;;  %v10842_v7 = vrot.slane %v10840_v59, 4  ;;  %v10843_v8 = vshll.u32 %v10612_v0, 16 }
 0x3d6   : > { %16019 = vmatmul.mubr.bf16.gmra.mxu0 %v16469_v22  ;;  %16043 = vmatmul.mubr.bf16.vlgmr.msra.gmra.mxu1 %v20313_v13  ;;  %v14774_v14 = vcombine.low %v20415_v18, %v20409_v6  ;;  %v20425_v54 = vsel %vm18028_vm12, %v14743_v53, %v11567_v15  ;;  %v10849_v28 = vshll.u32 %v10613_v35, 16  ;;  %v10853_v19 = vshrl.u32 %v10613_v35, 16  ;;  %v11427_v53 = vld [vmem:[#allocation2 + $0x54] sm:$0xe] }
 0x3d7   : > { %16022 = vmatprep.mubr.bf16.mxu0 %v16471_v27  ;;  %16123 = vmatpush3.bf16.msra.mxu1 %v20275_v21  ;;  %v10838_v55 = vsel %vm17984_vm0, %v10833_v11, %v10837_v40  ;;  %v10845_v13 = vrot.slane %v10843_v8, 5  ;;  %v10864_v4 = vshrl.u32 %v10615_v41, 16  ;;  %v10867_v1 = vshll.u32 %v10615_v41, 16  ;;  %v11428_v40 = vld [vmem:[#allocation2 + $0x58] sm:$0xf]  ;;  %v16479_v41 = vld [vmem:[%s21691_s4 + $0x1a0] sm:$0xff]  }
 0x3d8   : > { %16046 = vmatprep.mubr.bf16.mxu1 %v20356_v16  ;;  %16124 = vmatprep.subr.bf16.mxu1 %v16477_v52  ;;  %v20438_v23 = vsel %vm18028_vm12, %v11569_v63, %v11570_v44  ;;  %v10851_v33 = vrot.slane %v10849_v28, 5  ;;  %v10855_v21 = vrot.slane %v10853_v19, 4  ;;  %v10859_v20 = vshll.u32 %v10614_v42, 16  ;;  %v11425_v16 = vld [vmem:[#allocation2 + $0x4c] sm:$0xf] }
 0x3d9   : > { %v10846_v10 = vor.u32 %v10845_v13, %v10842_v7  ;;  %v10866_v62 = vrot.slane %v10864_v4, 4  ;;  %v10869_v50 = vrot.slane %v10867_v1, 5  ;;  %v10873_v25 = vshll.u32 %v10616_v48, 16  ;;  %v11429_v42 = vld [vmem:[#allocation2 + $0x5c] sm:$0x1]  ;;  %v20458_v13 = vpop.f32.mrf.mxu1 }
 0x3da   : > { %v20440_v24 = vcombine.low %v10828_v32, %v10838_v55  ;;  %v10856_v43 = vor.u32 %v10855_v21, %v10851_v33  ;;  %v10877_v0 = vshrl.u32 %v10616_v48, 16  ;;  %v10883_v22 = vshll.u32 %v10617_v26, 16  ;;  %v10618_v48 = vld [vmem:[#allocation2 + $0x78] sm:$0xf]  ;;  %v10619_v55 = vld [vmem:[#allocation2 + $0x7c] sm:$0xf] }
 0x3db   : > { %16125 = vmatpush3.bf16.msra.mxu1 %v16477_v52  ;;  %v10847_v35 = vrot.slane %v10846_v10, 4  ;;  %v10870_v27 = vor.u32 %v10869_v50, %v10866_v62  ;;  %v20444_v36 = vrot.slane %v10873_v25, 5  ;;  %v11574_v29 = vrot.slane %v11425_v16, 5  ;;  %v10621_v26 = vld [vmem:[#allocation2 + $0x84] sm:$0xf] }
 0x3dc   : > { %16126 = vmatprep.subr.bf16.mxu1 %v16478_v47  ;;  %v14775_v15 = vcombine.low %v20425_v54, %v20438_v23  ;;  %v10857_v61 = vrot.slane %v10856_v43, 4  ;;  %v10861_v11 = vrot.slane %v10859_v20, 5  ;;  %v10879_v59 = vrot.slane %v10877_v0, 4  ;;  %v10622_v0 = vld [vmem:[#allocation2 + $0x88] sm:$0xf] }
 0x3dd   : > { %v10885_v52 = vrot.slane %v10883_v22, 5  ;;  %v14744_v44 = vrot.slane %v11424_v5, 9  ;;  %v11576_v32 = vrot.slane %v11574_v29, 4  ;;  %v11577_v63 = vrot.slane %v11426_v60, 5  ;;  %v20485_v5 = vpop.f32.mrf.mxu1 }
 0x3de   : > { %16023 = vmatmul.mubr.bf16.gmra.mxu0 %v16474_v49  ;;  %16047 = vmatmul.mubr.bf16.gmra.mxu1 %v20363_v39  ;;  %v10862_v7 = vsel %vm17984_vm0, %v10857_v61, %v10861_v11  ;;  %v10871_v8 = vrot.slane %v10870_v27, 4  ;;  %v10880_v28 = vor.u32 %v10879_v59, %v20444_v36  ;;  %v11581_v19 = vrot.slane %v11428_v40, 5 }
 0x3df   : > { %16090 = vmatprep.mubr.bf16.mxu0 %v14771_v46  ;;  %16050 = vmatprep.mubr.bf16.mxu1 %v20395_v51  ;;  %v10852_v38 = vsel %vm17984_vm0, %v10847_v35, %v10851_v33  ;;  %v20465_v2 = vsel %vm18028_vm12, %v14744_v44, %v11574_v29  ;;  %v20469_v46 = vsel %vm18028_vm12, %v11576_v32, %v11577_v63  ;;  %v14745_v39 = vrot.slane %v11427_v53, 9  ;;  %v10620_v33 = vld [vmem:[#allocation2 + $0x80] sm:$0x1]  ;;  %v11431_v29 = vld [vmem:[#allocation2 + $0x64] sm:$0xf] }
 0x3e0   : > { %16127 = vmatpush3.bf16.msra.mxu1 %v16478_v47  ;;  %v20471_v4 = vcombine.low %v10852_v38, %v10862_v7  ;;  %v10881_v1 = vrot.slane %v10880_v28, 4  ;;  %v11583_v21 = vrot.slane %v11581_v19, 4  ;;  %v11584_v51 = vrot.slane %v11429_v42, 5  ;;  %v16480_v47 = vld [vmem:[%s21691_s4 + $0x198] sm:$0xff]   ;;  %v11430_v63 = vld [vmem:[#allocation2 + $0x60] sm:$0xe] }
 0x3e1   : > { %16128 = vmatprep.subr.bf16.mxu1 %v16479_v41  ;;  %v10888_v20 = vshrl.u32 %v10618_v48, 16  ;;  %v10891_v16 = vshll.u32 %v10618_v48, 16  ;;  %v10897_v10 = vshll.u32 %v10619_v55, 16  ;;  %v10901_v62 = vshrl.u32 %v10619_v55, 16  ;;  %v16483_v42 = vld [vmem:[%s21691_s4 + $0x1f0] sm:$0xff]   ;;  %v20511_v28 = vld [vmem:[%s21691_s4 + $0x188] sm:$0xff]  }
 0x3e2   : > { %v10876_v50 = vsel %vm17984_vm0, %v10871_v8, %v20444_v36  ;;  %v14776_v25 = vcombine.low %v20465_v2, %v20469_v46  ;;  %v20483_v43 = vsel %vm18028_vm12, %v14745_v39, %v11581_v19  ;;  %v10912_v22 = vshrl.u32 %v10621_v26, 16  ;;  %v10623_v36 = vld [vmem:[#allocation2 + $0x8c] sm:$0x1]  ;;  %v20513_v19 = vpop.f32.mrf.mxu1 }
 0x3e3   : > { %v10886_v60 = vsel %vm17984_vm0, %v10881_v1, %v10885_v52  ;;  %v20491_v49 = vsel %vm18028_vm12, %v11583_v21, %v11584_v51  ;;  %v10890_v35 = vrot.slane %v10888_v20, 4  ;;  %v10893_v27 = vrot.slane %v10891_v16, 5  ;;  %v11433_v1 = vld [vmem:[#allocation2 + $0x6c] sm:$0xe]  ;;  %v10624_v20 = vld [vmem:[#allocation2 + $0x90] sm:$0xf] }
 0x3e4   : > { %16129 = vmatpush3.bf16.msra.mxu1 %v16479_v41  ;;  %v10899_v40 = vrot.slane %v10897_v10, 5  ;;  %v10903_v61 = vrot.slane %v10901_v62, 4  ;;  %v10907_v11 = vshll.u32 %v10620_v33, 16  ;;  %v10914_v59 = vrot.slane %v10912_v22, 4  ;;  %v16481_v41 = vld [vmem:[%s21691_s4 + $0x190] sm:$0xff]   ;;  %v16485_v16 = vld [vmem:[%s21691_s4 + $0x1e8] sm:$0xff]   ;;  %v20533_v22 = vpop.f32.mrf.mxu1 }
 0x3e5   : > { %16130 = vmatprep.subr.bf16.mxu1 %v16480_v47  ;;  %v10894_v53 = vor.u32 %v10893_v27, %v10890_v35  ;;  %v10915_v52 = vshll.u32 %v10621_v26, 16  ;;  %v10921_v44 = vshll.u32 %v10622_v0, 16  ;;  %v10925_v32 = vshrl.u32 %v10622_v0, 16  ;;  %v11435_v33 = vld [vmem:[#allocation2 + $0x74] sm:$0x1] }
 0x3e6   : > { %16091 = vmatmul.mubr.bf16.vlgmr.msra.gmra.mxu0 %v14772_v56  ;;  %16051 = vmatmul.mubr.bf16.gmra.mxu1 %v20411_v17  ;;  %v20506_v7 = vcombine.low %v10876_v50, %v10886_v60  ;;  %v10904_v8 = vor.u32 %v10903_v61, %v10899_v40  ;;  %v10931_v30 = vshll.u32 %v10623_v36, 16  ;;  %v11588_v56 = vrot.slane %v11431_v29, 5  ;;  %v11434_v17 = vld [vmem:[#allocation2 + $0x70] sm:$0xf]  ;;  %v10625_v0 = vld [vmem:[#allocation2 + $0x94] sm:$0xf] }
 0x3e7   : > { %16094 = vmatprep.mubr.bf16.mxu0 %v14773_v12  ;;  %16054 = vmatprep.mubr.bf16.mxu1 %v20440_v24  ;;  %v10895_v48 = vrot.slane %v10894_v53, 4  ;;  %v10917_v3 = vrot.slane %v10915_v52, 5  ;;  %v20516_v9 = vrot.slane %v10921_v44, 5  ;;  %v10927_v12 = vrot.slane %v10925_v32, 4  ;;  %v10626_v29 = vld [vmem:[#allocation2 + $0x98] sm:$0x1] }
 0x3e8   : > { %16131 = vmatpush3.bf16.msra.mxu1 %v16480_v47  ;;  %v10905_v55 = vrot.slane %v10904_v8, 4  ;;  %v10909_v38 = vrot.slane %v10907_v11, 5  ;;  %v14746_v39 = vrot.slane %v11430_v63, 9  ;;  %v11590_v26 = vrot.slane %v11588_v56, 4  ;;  %16171 = vmatpush3.bf16.msra.mxu0 %v20341_v58  ;;  %v10627_v52 = vld [vmem:[#allocation2 + $0x9c] sm:$0xf] }
 0x3e9   : > { %16132 = vmatprep.subr.bf16.mxu1 %v16481_v41  ;;  %v14777_v21 = vcombine.low %v20483_v43, %v20491_v49  ;;  %v10918_v51 = vor.u32 %v10917_v3, %v10914_v59  ;;  %v10928_v24 = vor.u32 %v10927_v12, %v20516_v9  ;;  %v11591_v47 = vrot.slane %v11432_v34, 5  ;;  %16172 = vmatprep.subr.bf16.mxu0 %v16483_v42  ;;  %v10628_v8 = vld [vmem:[#allocation2 + $0xa0] sm:$0xf]  ;;  %v10629_v34 = vld [vmem:[#allocation2 + $0xa4] sm:$0x1] }
 0x3ea   : > { %v10910_v10 = vsel %vm17984_vm0, %v10905_v55, %v10909_v38  ;;  %v20527_v62 = vrot.slane %v10931_v30, 5  ;;  %v20531_v58 = vsel %vm18028_vm12, %v14746_v39, %v11588_v56  ;;  %v11595_v50 = vrot.slane %v11434_v17, 5  ;;  %v20566_v56 = vpop.f32.mrf.mxu1  ;;  %v16489_v55 = vld [vmem:[%s21691_s4 + $0x1d8] sm:$0xff]  }
 0x3eb   : > { %v10900_v60 = vsel %vm17984_vm0, %v10895_v48, %v10899_v40  ;;  %v10929_v35 = vrot.slane %v10928_v24, 4  ;;  %v20539_v27 = vsel %vm18028_vm12, %v11590_v26, %v11591_v47  ;;  %v14747_v36 = vrot.slane %v11433_v1, 9  ;;  %v16487_v40 = vld [vmem:[%s21691_s4 + $0x180] sm:$0xff]   ;;  %v11436_v1 = vld [vmem:[#allocation2 + $0x78] sm:$0xe] }
 0x3ec   : > { %16133 = vmatpush3.bf16.msra.mxu1 %v16481_v41  ;;  %v20541_v61 = vcombine.low %v10900_v60, %v10910_v10  ;;  %v11597_v11 = vrot.slane %v11595_v50, 4  ;;  %v11598_v59 = vrot.slane %v11435_v33, 5  ;;  %v10936_v53 = vshrl.u32 %v10624_v20, 16  ;;  %16173 = vmatpush3.bf16.msra.mxu0 %v16483_v42  ;;  %v16486_v42 = vld [vmem:[%s21691_s4 + $0x1e0] sm:$0xff]   ;;  %v20587_v10 = vpop.f32.mrf.mxu1 }
 0x3ed   : > { %16134 = vmatprep.subr.bf16.mxu1 %v20511_v28  ;;  %v10919_v44 = vrot.slane %v10918_v51, 4  ;;  %v14778_v41 = vcombine.low %v20531_v58, %v20539_v27  ;;  %v10939_v32 = vshll.u32 %v10624_v20, 16  ;;  %v10945_v63 = vshll.u32 %v10625_v0, 16  ;;  %16174 = vmatprep.subr.bf16.mxu0 %v16485_v16  ;;  %v11437_v51 = vld [vmem:[#allocation2 + $0x7c] sm:$0xf] }
 0x3ee   : > { %16095 = vmatmul.mubr.bf16.gmra.mxu0 %v14774_v14  ;;  %16055 = vmatmul.mubr.bf16.gmra.mxu1 %v20471_v4  ;;  %v10934_v6 = vsel %vm17984_vm0, %v10929_v35, %v20527_v62  ;;  %v20564_v18 = vsel %vm18028_vm12, %v14747_v36, %v11595_v50  ;;  %v10938_v14 = vrot.slane %v10936_v53, 4  ;;  %v10949_v30 = vshrl.u32 %v10625_v0, 16  ;;  %v11438_v60 = vld [vmem:[#allocation2 + $0x80] sm:$0x1]  ;;  %v11439_v35 = vld [vmem:[#allocation2 + $0x84] sm:$0xe] }
 0x3ef   : > { %16098 = vmatprep.mubr.bf16.mxu0 %v14775_v15  ;;  %16058 = vmatprep.mubr.bf16.mxu1 %v20506_v7  ;;  %v20571_v54 = vsel %vm18028_vm12, %v11597_v11, %v11598_v59  ;;  %v10941_v23 = vrot.slane %v10939_v32, 5  ;;  %v10947_v15 = vrot.slane %v10945_v63, 5  ;;  %v10955_v4 = vshll.u32 %v10626_v29, 16  ;;  %v20580_v7 = vld [vmem:[%s21691_s4 + $0x238] sm:$0xff]   ;;  %v11441_v53 = vld [vmem:[#allocation2 + $0x8c] sm:$0x1] }
 0x3f0   : > { %16135 = vmatpush3.bf16.msra.mxu1 %v20511_v28  ;;  %v10951_v48 = vrot.slane %v10949_v30, 4  ;;  %v10960_v3 = vshrl.u32 %v10627_v52, 16  ;;  %v10963_v12 = vshll.u32 %v10627_v52, 16  ;;  %v10969_v17 = vshll.u32 %v10628_v8, 16  ;;  %16175 = vmatpush3.bf16.msra.mxu0 %v16485_v16  ;;  %v11440_v16 = vld [vmem:[#allocation2 + $0x88] sm:$0xf] }
 0x3f1   : > { %16136 = vmatprep.subr.bf16.mxu1 %v16487_v40  ;;  %v10924_v38 = vsel %vm17984_vm0, %v10919_v44, %v20516_v9  ;;  %v10942_v28 = vor.u32 %v10941_v23, %v10938_v14  ;;  %v10973_v39 = vshrl.u32 %v10628_v8, 16  ;;  %v10979_v26 = vshll.u32 %v10629_v34, 16  ;;  %16176 = vmatprep.subr.bf16.mxu0 %v16486_v42  ;;  %v10630_v8 = vld [vmem:[#allocation2 + $0xa8] sm:$0xf]  ;;  %v20605_v14 = vpop.f32.mrf.mxu1  ;;  %v11446_v58 = vld [vmem:[#allocation2 + $0xa0] sm:$0xf] }
 0x3f2   : > { %v10952_v24 = vor.u32 %v10951_v48, %v10947_v15  ;;  %v10962_v47 = vrot.slane %v10960_v3, 4  ;;  %v10965_v33 = vrot.slane %v10963_v12, 5  ;;  %v20585_v20 = vrot.slane %v10969_v17, 5  ;;  %v10633_v3 = vld [vmem:[#allocation2 + $0xb4] sm:$0xf] }
 0x3f3   : > { %v14725_v62 = vcombine.low %v10924_v38, %v10934_v6  ;;  %v14779_v50 = vcombine.low %v20564_v18, %v20571_v54  ;;  %v10943_v0 = vrot.slane %v10942_v28, 4  ;;  %v10975_v9 = vrot.slane %v10973_v39, 4  ;;  %v10631_v6 = vld [vmem:[#allocation2 + $0xac] sm:$0xf]  ;;  %v10634_v28 = vld [vmem:[#allocation2 + $0xb8] sm:$0xf] }
 0x3f4   : > { %16137 = vmatpush3.bf16.msra.mxu1 %v16487_v40  ;;  %v10953_v36 = vrot.slane %v10952_v24, 4  ;;  %v10957_v29 = vrot.slane %v10955_v4, 5  ;;  %v10966_v11 = vor.u32 %v10965_v33, %v10962_v47  ;;  %v11602_v59 = vrot.slane %v11437_v51, 5  ;;  %16177 = vmatpush3.bf16.msra.mxu0 %v16486_v42  ;;  %v16490_v40 = vld [vmem:[%s21691_s4 + $0x1d0] sm:$0xff]   ;;  %v16494_v39 = vld [vmem:[%s21691_s4 + $0x1c8] sm:$0xff]   ;;  %v20629_v47 = vpop.f32.mrf.mxu1 }
 0x3f5   : > { %16218 = vmatprep.subr.bf16.mxu1 %v20580_v7  ;;  %v10976_v52 = vor.u32 %v10975_v9, %v20585_v20  ;;  %v10981_v44 = vrot.slane %v10979_v26, 5  ;;  %v14748_v32 = vrot.slane %v11436_v1, 9  ;;  %v11609_v63 = vrot.slane %v11440_v16, 5  ;;  %16178 = vmatprep.subr.bf16.mxu0 %v16489_v55  ;;  %v10635_v24 = vld [vmem:[#allocation2 + $0xbc] sm:$0x1] }
 0x3f6   : > { %16099 = vmatmul.mubr.bf16.gmra.mxu0 %v14776_v25  ;;  %16059 = vmatmul.mubr.bf16.gmra.mxu1 %v20541_v61  ;;  %v10958_v2 = vsel %vm17984_vm0, %v10953_v36, %v10957_v29  ;;  %v10967_v46 = vrot.slane %v10966_v11, 4  ;;  %v11604_v25 = vrot.slane %v11602_v59, 4  ;;  %v14749_v42 = vrot.slane %v11439_v35, 9  ;;  %v10632_v61 = vld [vmem:[#allocation2 + $0xb0] sm:$0x1]  ;;  %v16495_v36 = vld [vmem:[%s21691_s4 + $0x1c0] sm:$0xff]   ;;  %v20648_v27 = vpop.f32.mrf.mxu1 }
 0x3f7   : > { %16102 = vmatprep.mubr.bf16.mxu0 %v14777_v21  ;;  %16062 = vmatprep.mubr.bf16.mxu1 %v14725_v62  ;;  %v10948_v30 = vsel %vm17984_vm0, %v10943_v0, %v10947_v15  ;;  %v10977_v34 = vrot.slane %v10976_v52, 4  ;;  %v11605_v23 = vrot.slane %v11438_v60, 5  ;;  %v11611_v4 = vrot.slane %v11609_v63, 4  ;;  %v20641_v52 = vld [vmem:[#allocation2 + $0x90] sm:$0xe] }
 0x3f8   : > { %v14726_v43 = vcombine.low %v10948_v30, %v10958_v2  ;;  %v20611_v49 = vsel %vm18028_vm12, %v14748_v32, %v11602_v59  ;;  %v20615_v21 = vsel %vm18028_vm12, %v14749_v42, %v11609_v63  ;;  %v10984_v48 = vshrl.u32 %v10630_v8, 16  ;;  %16179 = vmatpush3.bf16.msra.mxu0 %v16489_v55  ;;  %v11444_v42 = vld [vmem:[#allocation2 + $0x98] sm:$0x1]  ;;  %v11445_v18 = vld [vmem:[#allocation2 + $0x9c] sm:$0xe] }
 0x3f9   : > { %v10972_v15 = vsel %vm17984_vm0, %v10967_v46, %v20585_v20  ;;  %v11612_v12 = vrot.slane %v11441_v53, 5  ;;  %v10987_v17 = vshll.u32 %v10630_v8, 16  ;;  %v10993_v38 = vshll.u32 %v10631_v6, 16  ;;  %16180 = vmatprep.subr.bf16.mxu0 %v16490_v40 }
 0x3fa   : > { %v10982_v26 = vsel %vm17984_vm0, %v10977_v34, %v10981_v44  ;;  %v20627_v1 = vsel %vm18028_vm12, %v11604_v25, %v11605_v23  ;;  %v10986_v55 = vrot.slane %v10984_v48, 4  ;;  %v10997_v51 = vshrl.u32 %v10631_v6, 16  ;;  %v20643_v44 = vld [vmem:[#allocation2 + $0x94] sm:$0xf]  ;;  %v11447_v34 = vld [vmem:[#allocation2 + $0xa4] sm:$0x1] }
 0x3fb   : > { %v20633_v33 = vsel %vm18028_vm12, %v11611_v4, %v11612_v12  ;;  %v10989_v20 = vrot.slane %v10987_v17, 5  ;;  %v10995_v16 = vrot.slane %v10993_v38, 5  ;;  %v11003_v62 = vshll.u32 %v10632_v61, 16  ;;  %v10637_v12 = vld [vmem:[#allocation2 + $0xc4] sm:$0xf]  ;;  %v20658_v17 = vpop.f32.mrf.mxu1 }
 0x3fc   : > { %v10999_v0 = vrot.slane %v10997_v51, 4  ;;  %v11008_v9 = vshrl.u32 %v10633_v3, 16  ;;  %v11011_v60 = vshll.u32 %v10633_v3, 16  ;;  %v11017_v35 = vshll.u32 %v10634_v28, 16  ;;  %16181 = vmatpush3.bf16.msra.mxu0 %v16490_v40 }
 0x3fd   : > { %v14727_v29 = vcombine.low %v10972_v15, %v10982_v26  ;;  %v10990_v11 = vor.u32 %v10989_v20, %v10986_v55  ;;  %v11021_v59 = vshrl.u32 %v10634_v28, 16  ;;  %v11027_v53 = vshll.u32 %v10635_v24, 16  ;;  %16182 = vmatprep.subr.bf16.mxu0 %v16494_v39  ;;  %v10638_v24 = vld [vmem:[#allocation2 + $0xc8] sm:$0x1] }
 0x3fe   : > { %16103 = vmatmul.mubr.bf16.gmra.mxu0 %v14778_v41  ;;  %16063 = vmatmul.mubr.bf16.gmra.mxu1 %v14726_v43  ;;  %v11000_v32 = vor.u32 %v10999_v0, %v10995_v16  ;;  %v11010_v63 = vrot.slane %v11008_v9, 4  ;;  %v11013_v8 = vrot.slane %v11011_v60, 5  ;;  %v11019_v40 = vrot.slane %v11017_v35, 5  ;;  %v11449_v9 = vld [vmem:[#allocation2 + $0xac] sm:$0xf] }
 0x3ff   : > { %16106 = vmatprep.mubr.bf16.mxu0 %v14779_v50  ;;  %16066 = vmatprep.mubr.bf16.mxu1 %v14727_v29  ;;  %v14780_v41 = vcombine.low %v20611_v49, %v20627_v1  ;;  %v14781_v2 = vcombine.low %v20615_v21, %v20633_v33  ;;  %v10991_v46 = vrot.slane %v10990_v11, 4  ;;  %v11023_v25 = vrot.slane %v11021_v59, 4  ;;  %v10636_v49 = vld [vmem:[#allocation2 + $0xc0] sm:$0xf]  ;;  %v11448_v59 = vld [vmem:[#allocation2 + $0xa8] sm:$0xe] }
 0x400   : > { %v11001_v54 = vrot.slane %v11000_v32, 4  ;;  %v11005_v50 = vrot.slane %v11003_v62, 5  ;;  %v11014_v6 = vor.u32 %v11013_v8, %v11010_v63  ;;  %v11616_v30 = vrot.slane %v20643_v44, 5  ;;  %16183 = vmatpush3.bf16.msra.mxu0 %v16494_v39  ;;  %v11450_v8 = vld [vmem:[#allocation2 + $0xb0] sm:$0x1] }
 0x401   : > { %v11024_v23 = vor.u32 %v11023_v25, %v11019_v40  ;;  %v11029_v4 = vrot.slane %v11027_v53, 5  ;;  %v14750_v43 = vrot.slane %v20641_v52, 9  ;;  %v11623_v61 = vrot.slane %v11446_v58, 5  ;;  %16184 = vmatprep.subr.bf16.mxu0 %v16495_v36  ;;  %v15900_v53 = vpop.f32.mrf.mxu0  ;;  %v20670_v52 = vpop.f32.mrf.mxu1  ;;  %v11453_v25 = vld [vmem:[#allocation2 + $0xbc] sm:$0x1] }
 0x402   : > { %v11006_v21 = vsel %vm17984_vm0, %v11001_v54, %v11005_v50  ;;  %v11015_v48 = vrot.slane %v11014_v6, 4  ;;  %v11618_v3 = vrot.slane %v11616_v30, 4  ;;  %v11619_v15 = vrot.slane %v11444_v42, 5  ;;  %v20676_v6 = vld [vmem:[#allocation2 + $0xc0] sm:$0xe] }
 0x403   : > { %v10996_v38 = vsel %vm17984_vm0, %v10991_v46, %v10995_v16  ;;  %v11025_v28 = vrot.slane %v11024_v23, 4  ;;  %v14751_v39 = vrot.slane %v11445_v18, 9  ;;  %v11625_v26 = vrot.slane %v11623_v61, 4  ;;  %v11451_v46 = vld [vmem:[#allocation2 + $0xb4] sm:$0xe] }
 0x404   : > { %v14728_v1 = vcombine.low %v10996_v38, %v11006_v21  ;;  %v11020_v55 = vsel %vm17984_vm0, %v11015_v48, %v11019_v40  ;;  %v11626_v51 = vrot.slane %v11447_v34, 5  ;;  %v11032_v33 = vshrl.u32 %v10636_v49, 16  ;;  %16185 = vmatpush3.bf16.msra.mxu0 %v16495_v36  ;;  %v11452_v36 = vld [vmem:[#allocation2 + $0xb8] sm:$0xf]  ;;  %v20678_v34 = vld [vmem:[#allocation2 + $0xc4] sm:$0xf] }
 0x405   : > { %v11030_v20 = vsel %vm17984_vm0, %v11025_v28, %v11029_v4  ;;  %v11620_v62 = vsel %vm18028_vm12, %v11618_v3, %v11619_v15  ;;  %v11035_v0 = vshll.u32 %v10636_v49, 16  ;;  %v11041_v16 = vshll.u32 %v10637_v12, 16 }
 0x406   : > { %16107 = vmatmul.mubr.bf16.gmra.mxu0 %v14780_v41  ;;  %16067 = vmatmul.mubr.bf16.gmra.mxu1 %v14728_v1  ;;  %v14729_v60 = vcombine.low %v11020_v55, %v11030_v20  ;;  %v11627_v35 = vsel %vm18028_vm12, %v11625_v26, %v11626_v51  ;;  %v11034_v29 = vrot.slane %v11032_v33, 4  ;;  %v11045_v11 = vshrl.u32 %v10637_v12, 16  ;;  %v12454_v1 = vld [vmem:[#allocation2 + $0x1c] sm:$0xf] }
 0x407   : > { %16110 = vmatprep.mubr.bf16.mxu0 %v14781_v2  ;;  %v11037_v44 = vrot.slane %v11035_v0, 5  ;;  %v11043_v32 = vrot.slane %v11041_v16, 5  ;;  %v11051_v63 = vshll.u32 %v10638_v24, 16  ;;  %v11617_v40 = vsel %vm18028_vm12, %v14750_v43, %v11616_v30  ;;  %v12453_v30 = vld [vmem:[#allocation2 + $0x18] sm:$0xf]  ;;  %v20680_v43 = vpop.f32.mrf.mxu0 }
 0x408   : > { %16070 = vmatprep.mubr.bf16.mxu1 %v14729_v60  ;;  %v11624_v58 = vsel %vm18028_vm12, %v14751_v39, %v11623_v61  ;;  %v11047_v41 = vrot.slane %v11045_v11, 4  ;;  %v11630_v2 = vrot.slane %v11449_v9, 5  ;;  %v14782_v42 = vcombine.low %v11617_v40, %v11620_v62  ;;  %v20682_v61 = vpop.f32.mrf.mxu1  ;;  %v11456_v24 = vld [vmem:[#allocation2 + $0xc8] sm:$0x1]  ;;  %v12455_v60 = vld [vmem:[#allocation2 + $0x20] sm:$0x1] }
 0x409   : > { %v14783_v18 = vcombine.low %v11624_v58, %v11627_v35  ;;  %v11038_v54 = vor.u32 %v11037_v44, %v11034_v29  ;;  %v11637_v50 = vrot.slane %v11452_v36, 5  ;;  %v14752_v4 = vrot.slane %v11448_v59, 9  ;;  %v12456_v35 = vld [vmem:[#allocation2 + $0x24] sm:$0xf]  ;;  %v20700_v29 = vpop.f32.mrf.mxu0  ;;  %v16488_v40 = vld [vmem:[#allocation2 + $0x18] sm:$0xff]  }
 0x40a   : > { %v11048_v23 = vor.u32 %v11047_v41, %v11043_v32  ;;  %v11632_v49 = vrot.slane %v11630_v2, 4  ;;  %v11633_v21 = vrot.slane %v11450_v8, 5  ;;  %v11053_v3 = vrot.slane %v11051_v63, 5  ;;  %v20702_v11 = vpop.f32.mrf.mxu1 }
 0x40b   : > { %v11039_v48 = vrot.slane %v11038_v54, 4  ;;  %v14753_v15 = vrot.slane %v11451_v46, 9  ;;  %v11639_v12 = vrot.slane %v11637_v50, 4  ;;  %v11631_v28 = vsel %vm18028_vm12, %v14752_v4, %v11630_v2  ;;  %v12459_v54 = vld [vmem:[#allocation2 + $0x30] sm:$0xf] }
 0x40c   : > { %v11049_v38 = vrot.slane %v11048_v23, 4  ;;  %v11640_v39 = vrot.slane %v11453_v25, 5  ;;  %v11644_v26 = vrot.slane %v20678_v34, 5  ;;  %v11634_v55 = vsel %vm18028_vm12, %v11632_v49, %v11633_v21  ;;  %v20707_v21 = vpop.f32.mrf.mxu0 }
 0x40d   : > { %v11638_v51 = vsel %vm18028_vm12, %v14753_v15, %v11637_v50  ;;  %v14754_v33 = vrot.slane %v20676_v6, 9  ;;  %v12534_v20 = vshrl.u32 %v12453_v30, 16  ;;  %v11044_v62 = vsel %vm17984_vm0, %v11039_v48, %v11043_v32  ;;  %v12457_v32 = vld [vmem:[#allocation2 + $0x28] sm:$0xf]  ;;  %v12460_v15 = vld [vmem:[#allocation2 + $0x34] sm:$0xf] }
 0x40e   : > { %16111 = vmatmul.mubr.bf16.gmra.mxu0 %v14782_v42  ;;  %v11054_v0 = vsel %vm17984_vm0, %v11049_v38, %v11053_v3  ;;  %v11641_v16 = vsel %vm18028_vm12, %v11639_v12, %v11640_v39  ;;  %v11646_v9 = vrot.slane %v11644_v26, 4  ;;  %v12537_v44 = vshll.u32 %v12453_v30, 16  ;;  %v20709_v30 = vpop.f32.mrf.mxu1  ;;  %v12458_v38 = vld [vmem:[#allocation2 + $0x2c] sm:$0x1] }
 0x40f   : > { %16114 = vmatprep.mubr.bf16.mxu0 %v14783_v18  ;;  %v14730_v59 = vcombine.low %v11044_v62, %v11054_v0  ;;  %v12536_v36 = vrot.slane %v12534_v20, 4  ;;  %v12543_v63 = vshll.u32 %v12454_v1, 16  ;;  %v14784_v8 = vcombine.low %v11631_v28, %v11634_v55 }
 0x410   : > { %v11647_v58 = vrot.slane %v11456_v24, 5  ;;  %v12547_v41 = vshrl.u32 %v12454_v1, 16  ;;  %v20705_v2 = vadd.f32 %v15900_v53, %v20427_v57  ;;  %v12539_v46 = vrot.slane %v12537_v44, 5  ;;  %v16496_v44 = vld [vmem:[%s21691_s4 + $0x230] sm:$0xff]  }
 0x411   : > { %16071 = vmatmul.mubr.bf16.gmra.mxu1 %v14730_v59  ;;  %v12545_v25 = vrot.slane %v12543_v63, 5  ;;  %v12553_v42 = vshll.u32 %v12455_v60, 16  ;;  %v12558_v18 = vshrl.u32 %v12456_v35, 16  ;;  %v14785_v50 = vcombine.low %v11638_v51, %v11641_v16  ;;  %v12461_v16 = vld [vmem:[#allocation2 + $0x38] sm:$0x1]  ;;  %v20715_v59 = vpop.f32.mrf.mxu1 }
 0x412   : > { %16138 = vmatprep.mubr.bf16.mxu1 %v16488_v40  ;;  %v12549_v23 = vrot.slane %v12547_v41, 4  ;;  %v12561_v4 = vshll.u32 %v12456_v35, 16  ;;  %v12567_v49 = vshll.u32 %v12457_v32, 16  ;;  %v11648_v48 = vsel %vm18028_vm12, %v11646_v9, %v11647_v58  ;;  %v15904_v35 = vpop.f32.mrf.mxu0  ;;  %v16493_v58 = vld [vmem:[#allocation2 + $0x30] sm:$0xff]  }
 0x413   : > { %v12540_v57 = vor.u32 %v12539_v46, %v12536_v36  ;;  %v12560_v53 = vrot.slane %v12558_v18, 4  ;;  %v12571_v3 = vshrl.u32 %v12457_v32, 16  ;;  %v12582_v1 = vshrl.u32 %v12459_v54, 16  ;;  %v16492_v36 = vld [vmem:[#allocation2 + $0x24] sm:$0xff]   ;;  %v20736_v34 = vpop.f32.mrf.mxu1 }
 0x414   : > { %v12550_v12 = vor.u32 %v12549_v23, %v12545_v25  ;;  %v12563_v28 = vrot.slane %v12561_v4, 5  ;;  %v20713_v39 = vrot.slane %v12567_v49, 5  ;;  %v12555_v51 = vrot.slane %v12553_v42, 5  ;;  %v12462_v23 = vld [vmem:[#allocation2 + $0x3c] sm:$0xf] }
 0x415   : > { %v12541_v55 = vrot.slane %v12540_v57, 4  ;;  %v12573_v24 = vrot.slane %v12571_v3, 4  ;;  %v12585_v20 = vshll.u32 %v12459_v54, 16  ;;  %v12584_v9 = vrot.slane %v12582_v1, 4  ;;  %v20734_v3 = vpop.f32.mrf.mxu0  ;;  %v16497_v1 = vld [vmem:[#allocation2 + $0x3c] sm:$0xff]  }
 0x416   : > { %16115 = vmatmul.mubr.bf16.gmra.mxu0 %v14784_v8  ;;  %v12551_v62 = vrot.slane %v12550_v12, 4  ;;  %v12564_v0 = vor.u32 %v12563_v28, %v12560_v53  ;;  %v12591_v60 = vshll.u32 %v12460_v15, 16  ;;  %v12577_v32 = vshll.u32 %v12458_v38, 16  ;;  %v12463_v53 = vld [vmem:[#allocation2 + $0x40] sm:$0xf] }
 0x417   : > { %16118 = vmatprep.mubr.bf16.mxu0 %v14785_v50  ;;  %v12574_v63 = vor.u32 %v12573_v24, %v20713_v39  ;;  %v12587_v8 = vrot.slane %v12585_v20, 5  ;;  %v12595_v40 = vshrl.u32 %v12460_v15, 16  ;;  %v11645_v18 = vsel %vm18028_vm12, %v14754_v33, %v11644_v26  ;;  %v12464_v24 = vld [vmem:[#allocation2 + $0x44] sm:$0x1] }
 0x418   : > { %v12556_v41 = vsel %vm17984_vm0, %v12551_v62, %v12555_v51  ;;  %v12565_v46 = vrot.slane %v12564_v0, 4  ;;  %v20723_v42 = vrot.slane %v12591_v60, 5  ;;  %v12601_v50 = vshll.u32 %v12461_v16, 16  ;;  %v12466_v60 = vld [vmem:[#allocation2 + $0x4c] sm:$0xf] }
 0x419   : > { %16139 = vmatmul.mubr.bf16.vlgmr.msra.gmra.mxu1 %v16492_v36  ;;  %v12597_v54 = vrot.slane %v12595_v40, 4  ;;  %v14786_v4 = vcombine.low %v11645_v18, %v11648_v48  ;;  %v12546_v49 = vsel %vm17984_vm0, %v12541_v55, %v12545_v25  ;;  %v12588_v57 = vor.u32 %v12587_v8, %v12584_v9  ;;  %v12465_v48 = vld [vmem:[#allocation2 + $0x48] sm:$0xf]  ;;  %v12467_v8 = vld [vmem:[#allocation2 + $0x50] sm:$0x1] }
 0x41a   : > { %16219 = vmatpush3.bf16.msra.mxu1 %v20580_v7  ;;  %16142 = vmatprep.mubr.bf16.mxu1 %v16493_v58  ;;  %v14851_v6 = vcombine.low %v12546_v49, %v12556_v41  ;;  %v12575_v15 = vrot.slane %v12574_v63, 4  ;;  %v12579_v26 = vrot.slane %v12577_v32, 5  ;;  %v16499_v7 = vld [vmem:[%s21691_s4 + $0x228] sm:$0xff]   ;;  %v12570_v25 = vsel %vm17984_vm0, %v12565_v46, %v20713_v39  ;;  %v20748_v39 = vpop.f32.mrf.mxu0 }
 0x41b   : > { %16220 = vmatprep.subr.bf16.mxu1 %v16496_v44  ;;  %v12598_v33 = vor.u32 %v12597_v54, %v20723_v42  ;;  %v20746_v12 = vadd.f32 %v15904_v35, %v20513_v19  ;;  %v12606_v38 = vshrl.u32 %v12462_v23, 16  ;;  %v12609_v28 = vshll.u32 %v12462_v23, 16  ;;  %v20750_v19 = vpop.f32.mrf.mxu1  ;;  %v16498_v58 = vld [vmem:[#allocation2 + $0x48] sm:$0xff]  }
 0x41c   : > { %v12603_v51 = vrot.slane %v12601_v50, 5  ;;  %v12615_v20 = vshll.u32 %v12463_v53, 16  ;;  %v12619_v62 = vshrl.u32 %v12463_v53, 16  ;;  %v12589_v0 = vrot.slane %v12588_v57, 4  ;;  %21933 = vst [vmem:[#allocation26_spill] sm:$0xff] %v20750_v19 }
 0x41d   : > { %v12599_v55 = vrot.slane %v12598_v33, 4  ;;  %v12608_v16 = vrot.slane %v12606_v38, 4  ;;  %v12611_v9 = vrot.slane %v12609_v28, 5  ;;  %v12630_v36 = vshrl.u32 %v12465_v48, 16  ;;  %v12468_v57 = vld [vmem:[#allocation2 + $0x54] sm:$0xf]  ;;  %v20765_v33 = vpop.f32.mrf.mxu0 }
 0x41e   : > { %16119 = vmatmul.mubr.bf16.gmra.mxu0 %v14786_v4  ;;  %16221 = vmatpush3.bf16.msra.mxu1 %v16496_v44  ;;  %v12580_v35 = vsel %vm17984_vm0, %v12575_v15, %v12579_v26  ;;  %v20754_v63 = vrot.slane %v12615_v20, 5  ;;  %v12621_v32 = vrot.slane %v12619_v62, 4  ;;  %v12633_v40 = vshll.u32 %v12465_v48, 16  ;;  %v16502_v44 = vld [vmem:[%s21691_s4 + $0x220] sm:$0xff]   ;;  %v20767_v48 = vpop.f32.mrf.mxu1 }
 0x41f   : > { %16186 = vmatprep.mubr.bf16.mxu0 %v14851_v6  ;;  %16222 = vmatprep.subr.bf16.mxu1 %v16499_v7  ;;  %v12604_v41 = vsel %vm17984_vm0, %v12599_v55, %v12603_v51  ;;  %v12612_v46 = vor.u32 %v12611_v9, %v12608_v16  ;;  %v12625_v18 = vshll.u32 %v12464_v24, 16  ;;  %v12632_v54 = vrot.slane %v12630_v36, 4  ;;  %21934 = vst [vmem:[#allocation8_spill] sm:$0xff] %v20767_v48  ;;  %v12469_v51 = vld [vmem:[#allocation2 + $0x58] sm:$0xf] }
 0x420   : > { %v12622_v50 = vor.u32 %v12621_v32, %v20754_v63  ;;  %v12635_v23 = vrot.slane %v12633_v40, 5  ;;  %v12639_v4 = vshll.u32 %v12466_v60, 16  ;;  %v12643_v49 = vshrl.u32 %v12466_v60, 16  ;;  %v12471_v9 = vld [vmem:[#allocation2 + $0x60] sm:$0xf] }
 0x421   : > { %16143 = vmatmul.mubr.bf16.gmra.mxu1 %v16497_v1  ;;  %v14852_v53 = vcombine.low %v12570_v25, %v12580_v35  ;;  %v12594_v6 = vsel %vm17984_vm0, %v12589_v0, %v20723_v42  ;;  %v12613_v15 = vrot.slane %v12612_v46, 4  ;;  %v12649_v26 = vshll.u32 %v12467_v8, 16  ;;  %v16505_v25 = vld [vmem:[%s21691_s4 + $0x218] sm:$0xff]   ;;  %v12472_v40 = vld [vmem:[#allocation2 + $0x64] sm:$0xf] }
 0x422   : > { %16146 = vmatprep.mubr.bf16.mxu1 %v16498_v58  ;;  %16223 = vmatpush3.bf16.msra.mxu1 %v16499_v7  ;;  %v12623_v38 = vrot.slane %v12622_v50, 4  ;;  %v12636_v28 = vor.u32 %v12635_v23, %v12632_v54  ;;  %v12641_v1 = vrot.slane %v12639_v4, 5  ;;  %v12645_v55 = vrot.slane %v12643_v49, 4  ;;  %v12470_v0 = vld [vmem:[#allocation2 + $0x5c] sm:$0x1]  ;;  %v20777_v58 = vpop.f32.mrf.mxu1  ;;  %v16501_v50 = vld [vmem:[#allocation2 + $0x60] sm:$0xff]  }
 0x423   : > { %16224 = vmatprep.subr.bf16.mxu1 %v16502_v44  ;;  %v14853_v24 = vcombine.low %v12594_v6, %v12604_v41  ;;  %v12654_v20 = vshrl.u32 %v12468_v57, 16  ;;  %v12618_v42 = vsel %vm17984_vm0, %v12613_v15, %v20754_v63  ;;  %v12627_v7 = vrot.slane %v12625_v18, 5  ;;  %v16500_v41 = vld [vmem:[#allocation2 + $0x54] sm:$0xff]   ;;  %v12473_v15 = vld [vmem:[#allocation2 + $0x68] sm:$0x1] }
 0x424   : > { %v12646_v62 = vor.u32 %v12645_v55, %v12641_v1  ;;  %v12657_v16 = vshll.u32 %v12468_v57, 16  ;;  %v12637_v60 = vrot.slane %v12636_v28, 4  ;;  %v12663_v32 = vshll.u32 %v12469_v51, 16 }
 0x425   : > { %v12656_v35 = vrot.slane %v12654_v20, 4  ;;  %v12667_v8 = vshrl.u32 %v12469_v51, 16  ;;  %v12628_v63 = vsel %vm17984_vm0, %v12623_v38, %v12627_v7  ;;  %v12651_v18 = vrot.slane %v12649_v26, 5  ;;  %v12474_v7 = vld [vmem:[#allocation2 + $0x6c] sm:$0xf] }
 0x426   : > { %16187 = vmatmul.mubr.bf16.vlgmr.msra.gmra.mxu0 %v14852_v53  ;;  %16225 = vmatpush3.bf16.msra.mxu1 %v16502_v44  ;;  %v20775_v36 = vpop.f32.mrf.mxu0  ;;  %v12647_v46 = vrot.slane %v12646_v62, 4  ;;  %v12659_v54 = vrot.slane %v12657_v16, 5  ;;  %v16508_v44 = vld [vmem:[%s21691_s4 + $0x210] sm:$0xff]   ;;  %v12665_v23 = vrot.slane %v12663_v32, 5  ;;  %v12673_v49 = vshll.u32 %v12470_v0, 16  ;;  %v20790_v62 = vpop.f32.mrf.mxu1 }
 0x427   : > { %16190 = vmatprep.mubr.bf16.mxu0 %v14853_v24  ;;  %16226 = vmatprep.subr.bf16.mxu1 %v16505_v25  ;;  %v12669_v4 = vrot.slane %v12667_v8, 4  ;;  %v12678_v57 = vshrl.u32 %v12471_v9, 16  ;;  %v12681_v38 = vshll.u32 %v12471_v9, 16  ;;  %v12687_v28 = vshll.u32 %v12472_v40, 16  ;;  %v16511_v9 = vld [vmem:[%s21691_s4 + $0x208] sm:$0xff]  }
 0x428   : > { %v12652_v53 = vsel %vm17984_vm0, %v12647_v46, %v12651_v18  ;;  %v12660_v6 = vor.u32 %v12659_v54, %v12656_v35  ;;  %v20786_v26 = vpop.f32.mrf.mxu0  ;;  %v14854_v55 = vcombine.low %v12618_v42, %v12628_v63  ;;  %v12642_v51 = vsel %vm17984_vm0, %v12637_v60, %v12641_v1  ;;  %v12475_v1 = vld [vmem:[#allocation2 + $0x70] sm:$0xf]  ;;  %v12476_v54 = vld [vmem:[#allocation2 + $0x74] sm:$0x1] }
 0x429   : > { %16147 = vmatmul.mubr.bf16.gmra.mxu1 %v16500_v41  ;;  %v12670_v24 = vor.u32 %v12669_v4, %v12665_v23  ;;  %v12680_v20 = vrot.slane %v12678_v57, 4  ;;  %v12683_v16 = vrot.slane %v12681_v38, 5  ;;  %v12689_v32 = vrot.slane %v12687_v28, 5 }
 0x42a   : > { %16150 = vmatprep.mubr.bf16.mxu1 %v16501_v50  ;;  %16227 = vmatpush3.bf16.msra.mxu1 %v16505_v25  ;;  %v12661_v0 = vrot.slane %v12660_v6, 4  ;;  %v12691_v35 = vshrl.u32 %v12472_v40, 16  ;;  %v14855_v8 = vcombine.low %v12642_v51, %v12652_v53  ;;  %v12675_v41 = vrot.slane %v12673_v49, 5  ;;  %v20797_v18 = vpop.f32.mrf.mxu0  ;;  %v12477_v53 = vld [vmem:[#allocation2 + $0x78] sm:$0xf]  ;;  %v20801_v49 = vpop.f32.mrf.mxu1  ;;  %v16503_v6 = vld [vmem:[#allocation2 + $0x6c] sm:$0xff]  }
 0x42b   : > { %16228 = vmatprep.subr.bf16.mxu1 %v16508_v44  ;;  %v12671_v42 = vrot.slane %v12670_v24, 4  ;;  %v12697_v63 = vshll.u32 %v12473_v15, 16  ;;  %v12684_v60 = vor.u32 %v12683_v16, %v12680_v20  ;;  %v12702_v4 = vshrl.u32 %v12474_v7, 16  ;;  %v16504_v15 = vld [vmem:[#allocation2 + $0x78] sm:$0xff]   ;;  %v16514_v51 = vld [vmem:[%s21691_s4 + $0x200] sm:$0xff]  }
 0x42c   : > { %v12666_v25 = vsel %vm17984_vm0, %v12661_v0, %v12665_v23  ;;  %v12693_v46 = vrot.slane %v12691_v35, 4  ;;  %v12705_v57 = vshll.u32 %v12474_v7, 16  ;;  %v12715_v0 = vshrl.u32 %v12475_v1, 16  ;;  %v12478_v7 = vld [vmem:[#allocation2 + $0x7c] sm:$0xf] }
 0x42d   : > { %v12676_v40 = vsel %vm17984_vm0, %v12671_v42, %v12675_v41  ;;  %v12699_v50 = vrot.slane %v12697_v63, 5  ;;  %v12685_v23 = vrot.slane %v12684_v60, 4  ;;  %v12704_v24 = vrot.slane %v12702_v4, 4  ;;  %v12479_v41 = vld [vmem:[#allocation2 + $0x80] sm:$0x1] }
 0x42e   : > { %16191 = vmatmul.mubr.bf16.gmra.mxu0 %v14854_v55  ;;  %16229 = vmatpush3.bf16.msra.mxu1 %v16508_v44  ;;  %v14856_v38 = vcombine.low %v12666_v25, %v12676_v40  ;;  %v12694_v28 = vor.u32 %v12693_v46, %v12689_v32  ;;  %v12711_v55 = vshll.u32 %v12475_v1, 16  ;;  %v12707_v20 = vrot.slane %v12705_v57, 5  ;;  %v12480_v4 = vld [vmem:[#allocation2 + $0x84] sm:$0xf]  ;;  %v20810_v57 = vpop.f32.mrf.mxu1 }
 0x42f   : > { %16194 = vmatprep.mubr.bf16.mxu0 %v14855_v8  ;;  %16230 = vmatprep.subr.bf16.mxu1 %v16511_v9  ;;  %v12721_v16 = vshll.u32 %v12476_v54, 16  ;;  %v12690_v44 = vsel %vm17984_vm0, %v12685_v23, %v12689_v32  ;;  %v20808_v8 = vpop.f32.mrf.mxu0  ;;  %v12726_v63 = vshrl.u32 %v12477_v53, 16  ;;  %v12717_v60 = vrot.slane %v12715_v0, 4  ;;  %v12481_v0 = vld [vmem:[#allocation2 + $0x88] sm:$0xf] }
 0x430   : > { %v12695_v35 = vrot.slane %v12694_v28, 4  ;;  %v12713_v42 = vrot.slane %v12711_v55, 5  ;;  %v12708_v25 = vor.u32 %v12707_v20, %v12704_v24  ;;  %v12729_v40 = vshll.u32 %v12477_v53, 16 }
 0x431   : > { %16151 = vmatmul.mubr.bf16.gmra.mxu1 %v16503_v6  ;;  %v12723_v46 = vrot.slane %v12721_v16, 5  ;;  %v12728_v54 = vrot.slane %v12726_v63, 4  ;;  %v12735_v32 = vshll.u32 %v12478_v7, 16  ;;  %v12739_v6 = vshrl.u32 %v12478_v7, 16  ;;  %v16506_v63 = vld [vmem:[#allocation2 + $0x84] sm:$0xff]  }
 0x432   : > { %16154 = vmatprep.mubr.bf16.mxu1 %v16504_v15  ;;  %16231 = vmatpush3.bf16.msra.mxu1 %v16511_v9  ;;  %v12700_v1 = vsel %vm17984_vm0, %v12695_v35, %v12699_v50  ;;  %v12709_v28 = vrot.slane %v12708_v25, 4  ;;  %v12718_v55 = vor.u32 %v12717_v60, %v12713_v42  ;;  %v12731_v48 = vrot.slane %v12729_v40, 5  ;;  %v12482_v40 = vld [vmem:[#allocation2 + $0x8c] sm:$0x1] }
 0x433   : > { %16232 = vmatprep.subr.bf16.mxu1 %v16514_v51  ;;  %v14857_v23 = vcombine.low %v12690_v44, %v12700_v1  ;;  %v12737_v24 = vrot.slane %v12735_v32, 5  ;;  %v12741_v20 = vrot.slane %v12739_v6, 4  ;;  %v12745_v53 = vshll.u32 %v12479_v41, 16  ;;  %v20819_v44 = vpop.f32.mrf.mxu1  ;;  %v16507_v32 = vld [vmem:[#allocation2 + $0x90] sm:$0xff]  }
 0x434   : > { %v12750_v16 = vshrl.u32 %v12480_v4, 16  ;;  %v12714_v50 = vsel %vm17984_vm0, %v12709_v28, %v12713_v42  ;;  %v12719_v7 = vrot.slane %v12718_v55, 4  ;;  %v12732_v35 = vor.u32 %v12731_v48, %v12728_v54  ;;  %v12483_v48 = vld [vmem:[#allocation2 + $0x90] sm:$0xf] }
 0x435   : > { %v12747_v25 = vrot.slane %v12745_v53, 5  ;;  %v12753_v1 = vshll.u32 %v12480_v4, 16  ;;  %v12759_v42 = vshll.u32 %v12481_v0, 16  ;;  %v12769_v53 = vshll.u32 %v12482_v40, 16 }
 0x436   : > { %16195 = vmatmul.mubr.bf16.gmra.mxu0 %v14856_v38  ;;  %v15912_v15 = vpop.f32.mrf.mxu0  ;;  %16233 = vmatpush3.bf16.msra.mxu1 %v16514_v51  ;;  %v12742_v38 = vor.u32 %v12741_v20, %v12737_v24  ;;  %v12752_v41 = vrot.slane %v12750_v16, 4  ;;  %v12733_v6 = vrot.slane %v12732_v35, 4  ;;  %v12484_v16 = vld [vmem:[#allocation2 + $0x94] sm:$0xf]  ;;  %v12777_v40 = vshll.u32 %v12483_v48, 16 }
 0x437   : > { %16198 = vmatprep.mubr.bf16.mxu0 %v14857_v23  ;;  %v20815_v9 = vadd.f32 %v15912_v15, %v20670_v52  ;;  %v12724_v52 = vsel %vm17984_vm0, %v12719_v7, %v12723_v46  ;;  %v12755_v55 = vrot.slane %v12753_v1, 5  ;;  %v12763_v15 = vshrl.u32 %v12481_v0, 16 }
 0x438   : > { %v9404_v60 = vpop.f32.mrf.mxu0  ;;  %v14858_v54 = vcombine.low %v12714_v50, %v12724_v52  ;;  %v12743_v51 = vrot.slane %v12742_v38, 4  ;;  %v12738_v4 = vsel %vm17984_vm0, %v12733_v6, %v12737_v24  ;;  %v12761_v46 = vrot.slane %v12759_v42, 5  ;;  %v12486_v38 = vld [vmem:[#allocation2 + $0x9c] sm:$0xf]  ;;  %v12487_v42 = vld [vmem:[#allocation2 + $0xa0] sm:$0xf] }
 0x439   : > { %v20824_v23 = vadd.f32 %v9404_v60, %v20682_v61  ;;  %16155 = vmatmul.mubr.bf16.gmra.mxu1 %v16506_v63  ;;  %v20831_v61 = vpop.f32.mrf.mxu1  ;;  %v12756_v50 = vor.u32 %v12755_v55, %v12752_v41  ;;  %v12765_v35 = vrot.slane %v12763_v15, 4  ;;  %v12774_v63 = vshrl.u32 %v12483_v48, 16  ;;  %v12485_v41 = vld [vmem:[#allocation2 + $0x98] sm:$0x1] }
 0x43a   : > { %v15913_v28 = vpop.f32.mrf.mxu0  ;;  %16158 = vmatprep.mubr.bf16.mxu1 %v16507_v32  ;;  %v12748_v7 = vsel %vm17984_vm0, %v12743_v51, %v12747_v25  ;;  %v20837_v0 = vadd.f32 %v20680_v43, %v20442_v37  ;;  %v20847_v1 = vadd.f32 %v20707_v21, %v20485_v5  ;;  %v12783_v52 = vshll.u32 %v12484_v16, 16  ;;  %v16509_v51 = vld [vmem:[#allocation2 + $0x9c] sm:$0xff]   ;;  %v16510_v21 = vld [vmem:[#allocation2 + $0xa8] sm:$0xff]  }
 0x43b   : > { %v20829_v20 = vadd.f32 %v15913_v28, %v20702_v11  ;;  %v20841_v11 = vadd.f32 %v20700_v29, %v20458_v13  ;;  %v14859_v24 = vcombine.low %v12738_v4, %v12748_v7  ;;  %v12766_v25 = vor.u32 %v12765_v35, %v12761_v46  ;;  %v20849_v29 = vpop.f32.mrf.mxu1  ;;  %v12488_v35 = vld [vmem:[#allocation2 + $0xa4] sm:$0x1] }
 0x43c   : > { %v20843_v60 = vpop.f32.mrf.mxu0  ;;  %v12776_v32 = vrot.slane %v12774_v63, 4  ;;  %v12757_v37 = vrot.slane %v12756_v50, 4  ;;  %v12779_v43 = vrot.slane %v12777_v40, 5  ;;  %v12787_v6 = vshrl.u32 %v12484_v16, 16  ;;  %v12489_v40 = vld [vmem:[#allocation2 + $0xa8] sm:$0xf] }
 0x43d   : > { %v12798_v13 = vshrl.u32 %v12486_v38, 16  ;;  %v12767_v28 = vrot.slane %v12766_v25, 4  ;;  %v12771_v48 = vrot.slane %v12769_v53, 5  ;;  %v12785_v55 = vrot.slane %v12783_v52, 5 }
 0x43e   : > { %16199 = vmatmul.mubr.bf16.gmra.mxu0 %v14858_v54  ;;  %v12801_v15 = vshll.u32 %v12486_v38, 16  ;;  %v12780_v54 = vor.u32 %v12779_v43, %v12776_v32  ;;  %v12789_v4 = vrot.slane %v12787_v6, 4  ;;  %v12793_v7 = vshll.u32 %v12485_v41, 16  ;;  %v20863_v43 = vpop.f32.mrf.mxu1 }
 0x43f   : > { %16202 = vmatprep.mubr.bf16.mxu0 %v14859_v24  ;;  %v12800_v63 = vrot.slane %v12798_v13, 4  ;;  %v20855_v16 = vadd.f32 %v20734_v3, %v20533_v22  ;;  %v12772_v50 = vsel %vm17984_vm0, %v12767_v28, %v12771_v48  ;;  %v12807_v53 = vshll.u32 %v12487_v42, 16 }
 0x440   : > { %v12803_v24 = vrot.slane %v12801_v15, 5  ;;  %v12762_v38 = vsel %vm17984_vm0, %v12757_v37, %v12761_v46  ;;  %v12781_v25 = vrot.slane %v12780_v54, 4  ;;  %v12790_v32 = vor.u32 %v12789_v4, %v12785_v55  ;;  %v12491_v54 = vld [vmem:[#allocation2 + $0xb0] sm:$0x1] }
 0x441   : > { %v20851_v5 = vpop.f32.mrf.mxu0  ;;  %16159 = vmatmul.mubr.bf16.gmra.mxu1 %v16509_v51  ;;  %v12811_v52 = vshrl.u32 %v12487_v42, 16  ;;  %v14860_v22 = vcombine.low %v12762_v38, %v12772_v50  ;;  %v12809_v6 = vrot.slane %v12807_v53, 5  ;;  %v12817_v13 = vshll.u32 %v12488_v35, 16  ;;  %v12490_v51 = vld [vmem:[#allocation2 + $0xac] sm:$0xf]  ;;  %v20877_v53 = vpop.f32.mrf.mxu1 }
 0x442   : > { %16162 = vmatprep.mubr.bf16.mxu1 %v16510_v21  ;;  %v12804_v3 = vor.u32 %v12803_v24, %v12800_v63  ;;  %v12791_v28 = vrot.slane %v12790_v32, 4  ;;  %v12795_v48 = vrot.slane %v12793_v7, 5  ;;  %v12822_v19 = vshrl.u32 %v12489_v40, 16  ;;  %v12492_v38 = vld [vmem:[#allocation2 + $0xb4] sm:$0xf] }
 0x443   : > { %v20861_v41 = vpop.f32.mrf.mxu0  ;;  %v12813_v21 = vrot.slane %v12811_v52, 4  ;;  %v20869_v46 = vadd.f32 %v20748_v39, %v20566_v56  ;;  %v12786_v37 = vsel %vm17984_vm0, %v12781_v25, %v12785_v55  ;;  %v12825_v4 = vshll.u32 %v12489_v40, 16  ;;  %v16512_v39 = vld [vmem:[#allocation2 + $0xb4] sm:$0xff]  }
 0x444   : > { %21935 = vst [vmem:[#allocation31_spill] sm:$0xff] %v20861_v41  ;;  %v12805_v42 = vrot.slane %v12804_v3, 4  ;;  %v12796_v35 = vsel %vm17984_vm0, %v12791_v28, %v12795_v48  ;;  %v12824_v50 = vrot.slane %v12822_v19, 4  ;;  %v12831_v24 = vshll.u32 %v12490_v51, 16  ;;  %v12493_v52 = vld [vmem:[#allocation2 + $0xb8] sm:$0xf] }
 0x445   : > { %v20865_v15 = vpop.f32.mrf.mxu0  ;;  %v12814_v7 = vor.u32 %v12813_v21, %v12809_v6  ;;  %v14861_v56 = vcombine.low %v12786_v37, %v12796_v35  ;;  %v12819_v55 = vrot.slane %v12817_v13, 5  ;;  %v12827_v25 = vrot.slane %v12825_v4, 5  ;;  %v12494_v37 = vld [vmem:[#allocation2 + $0xbc] sm:$0x1] }
 0x446   : > { %21936 = vst [vmem:[#allocation9_spill] sm:$0xff] %v20865_v15  ;;  %16203 = vmatmul.mubr.bf16.gmra.mxu0 %v14860_v22  ;;  %v12810_v32 = vsel %vm17984_vm0, %v12805_v42, %v12809_v6  ;;  %v16513_v22 = vld [vmem:[#allocation2 + $0xc0] sm:$0xff]   ;;  %v12833_v28 = vrot.slane %v12831_v24, 5  ;;  %v12835_v48 = vshrl.u32 %v12490_v51, 16  ;;  %v12846_v35 = vshrl.u32 %v12492_v38, 16  ;;  %v20886_v51 = vpop.f32.mrf.mxu1 }
 0x447   : > { %v20875_v63 = vpop.f32.mrf.mxu0  ;;  %v12815_v3 = vrot.slane %v12814_v7, 4  ;;  %16206 = vmatprep.mubr.bf16.mxu0 %v14861_v56  ;;  %v12828_v21 = vor.u32 %v12827_v25, %v12824_v50  ;;  %v12849_v15 = vshll.u32 %v12492_v38, 16  ;;  %v12855_v7 = vshll.u32 %v12493_v52, 16  ;;  %v13271_v24 = vld [vmem:[#allocation2 + $0x18] sm:$0xe] }
 0x448   : > { %21937 = vst [vmem:[#allocation33_spill] sm:$0xff] %v20875_v63  ;;  %v12841_v63 = vshll.u32 %v12491_v54, 16  ;;  %v12837_v13 = vrot.slane %v12835_v48, 4  ;;  %v12848_v50 = vrot.slane %v12846_v35, 4  ;;  %v13273_v25 = vld [vmem:[#allocation2 + $0x20] sm:$0x1]  ;;  %v20896_v41 = vpop.f32.mrf.mxu1 }
 0x449   : > { %v15920_v40 = vpop.f32.mrf.mxu0  ;;  %16163 = vmatmul.mubr.bf16.gmra.mxu1 %v16512_v39  ;;  %v12820_v6 = vsel %vm17984_vm0, %v12815_v3, %v12819_v55  ;;  %v12829_v56 = vrot.slane %v12828_v21, 4  ;;  %v13272_v39 = vld [vmem:[#allocation2 + $0x1c] sm:$0xf]  ;;  %v12859_v55 = vshrl.u32 %v12493_v52, 16  ;;  %v12495_v3 = vld [vmem:[#allocation2 + $0xc0] sm:$0xf] }
 0x44a   : > { %v20882_v19 = vadd.f32 %v15920_v40, %v20777_v58  ;;  %16166 = vmatprep.mubr.bf16.mxu1 %v16513_v22  ;;  %v12843_v42 = vrot.slane %v12841_v63, 5  ;;  %v14862_v54 = vcombine.low %v12810_v32, %v12820_v6  ;;  %v12838_v38 = vor.u32 %v12837_v13, %v12833_v28  ;;  %v16515_v32 = vld [vmem:[#allocation2 + $0xcc] sm:$0xff]  }
 0x44b   : > { %v9436_v4 = vpop.f32.mrf.mxu0  ;;  %v12851_v22 = vrot.slane %v12849_v15, 5  ;;  %v12834_v63 = vsel %vm17984_vm0, %v12829_v56, %v12833_v28  ;;  %v12865_v21 = vshll.u32 %v12494_v37, 16  ;;  %v13401_v13 = vrot.slane %v13272_v39, 5 }
 0x44c   : > { %21938 = vst [vmem:[#allocation10_spill] sm:$0xff] %v20882_v19  ;;  %v20889_v58 = vadd.f32 %v9436_v4, %v20790_v62  ;;  %v12857_v19 = vrot.slane %v12855_v7, 5  ;;  %v14875_v62 = vrot.slane %v13271_v24, 9  ;;  %v12839_v6 = vrot.slane %v12838_v38, 4 }
 0x44d   : > { %v15921_v40 = vpop.f32.mrf.mxu0  ;;  %v12852_v4 = vor.u32 %v12851_v22, %v12848_v50  ;;  %v12867_v52 = vrot.slane %v12865_v21, 5  ;;  %v13404_v7 = vrot.slane %v13273_v25, 5  ;;  %v12870_v28 = vshrl.u32 %v12495_v3, 16  ;;  %v12497_v50 = vld [vmem:[#allocation2 + $0xc8] sm:$0x1] }
 0x44e   : > { %21939 = vst [vmem:[#allocation35_spill] sm:$0xff] %v20889_v58  ;;  %16207 = vmatmul.mubr.bf16.gmra.mxu0 %v14862_v54  ;;  %v20894_v48 = vadd.f32 %v15921_v40, %v20801_v49  ;;  %v12861_v58 = vrot.slane %v12859_v55, 4  ;;  %v12496_v54 = vld [vmem:[#allocation2 + $0xc4] sm:$0xf]  ;;  %v12844_v49 = vsel %vm17984_vm0, %v12839_v6, %v12843_v42  ;;  %v13402_v24 = vsel %vm18028_vm12, %v14875_v62, %v13401_v13  ;;  %v13276_v6 = vld [vmem:[#allocation2 + $0x2c] sm:$0x1] }
 0x44f   : > { %v9439_v35 = vpop.f32.mrf.mxu0  ;;  %v12853_v56 = vrot.slane %v12852_v4, 4  ;;  %v14863_v38 = vcombine.low %v12834_v63, %v12844_v49  ;;  %v13403_v39 = vrot.slane %v13401_v13, 4  ;;  %v12872_v40 = vrot.slane %v12870_v28, 4  ;;  %v13274_v42 = vld [vmem:[#allocation2 + $0x24] sm:$0xe] }
 0x450   : > { %21940 = vst [vmem:[#allocation27_spill] sm:$0xff] %v20894_v48  ;;  %v20899_v15 = vadd.f32 %v9439_v35, %v20810_v57  ;;  %v12862_v37 = vor.u32 %v12861_v58, %v12857_v19  ;;  %v12873_v22 = vshll.u32 %v12495_v3, 16  ;;  %v12879_v21 = vshll.u32 %v12496_v54, 16  ;;  %v13275_v3 = vld [vmem:[#allocation2 + $0x28] sm:$0xf] }
 0x451   : > { %16167 = vmatmul.mubr.bf16.gmra.mxu1 %v16515_v32  ;;  %v12858_v25 = vsel %vm17984_vm0, %v12853_v56, %v12857_v19  ;;  %v12883_v35 = vshrl.u32 %v12496_v54, 16  ;;  %16210 = vmatprep.mubr.bf16.mxu0 %v14863_v38  ;;  %v13405_v63 = vsel %vm18028_vm12, %v13403_v39, %v13404_v7  ;;  %v12889_v62 = vshll.u32 %v12497_v50, 16  ;;  %v12498_v49 = vld [vmem:[#allocation2 + $0xcc] sm:$0xf]  ;;  %v12499_v48 = vld [vmem:[#allocation2 + $0xd0] sm:$0xf] }
 0x452   : > { %21941 = vst [vmem:[#allocation11_spill] sm:$0xff] %v20899_v15  ;;  %v15924_v57 = vpop.f32.mrf.mxu0  ;;  %v12863_v55 = vrot.slane %v12862_v37, 4  ;;  %v20907_v15 = vpop.f32.mrf.mxu1  ;;  %v12875_v32 = vrot.slane %v12873_v22, 5  ;;  %v14907_v4 = vcombine.low %v13402_v24, %v13405_v63  ;;  %v12881_v13 = vrot.slane %v12879_v21, 5  ;;  %v12500_v63 = vld [vmem:[#allocation2 + $0xd4] sm:$0x1] }
 0x453   : > { %v20910_v58 = vadd.f32 %v15924_v57, %v20819_v44  ;;  %v12885_v54 = vrot.slane %v12883_v35, 4  ;;  %v12891_v38 = vrot.slane %v12889_v62, 5  ;;  %v14876_v22 = vrot.slane %v13274_v42, 9 }
 0x454   : > { %v12868_v19 = vsel %vm17984_vm0, %v12863_v55, %v12867_v52  ;;  %v9452_v28 = vpop.f32.mrf.mxu0  ;;  %v12876_v37 = vor.u32 %v12875_v32, %v12872_v40  ;;  %16234 = vmatprep.mubr.bf16.mxu1 %v14907_v4  ;;  %v13408_v57 = vrot.slane %v13275_v3, 5  ;;  %v12894_v40 = vshrl.u32 %v12498_v49, 16 }
 0x455   : > { %21942 = vst [vmem:[#allocation37_spill] sm:$0xff] %v20910_v58  ;;  %v14864_v56 = vcombine.low %v12858_v25, %v12868_v19  ;;  %v20917_v44 = vadd.f32 %v9452_v28, %v20831_v61  ;;  %v12886_v7 = vor.u32 %v12885_v54, %v12881_v13  ;;  %v13411_v58 = vrot.slane %v13276_v6, 5 }
 0x456   : > { %v15925_v39 = vpop.f32.mrf.mxu0  ;;  %v15948_v50 = vpop.f32.mrf.mxu1  ;;  %v12877_v52 = vrot.slane %v12876_v37, 4  ;;  %v13409_v21 = vsel %vm18028_vm12, %v14876_v22, %v13408_v57  ;;  %v13410_v35 = vrot.slane %v13408_v57, 4  ;;  %v12897_v42 = vshll.u32 %v12498_v49, 16  ;;  %v13279_v57 = vld [vmem:[#allocation2 + $0x38] sm:$0x1] }
 0x457   : > { %16211 = vmatmul.mubr.bf16.gmra.mxu0 %v14864_v56  ;;  %v20920_v24 = vadd.f32 %v15925_v39, %v20849_v29  ;;  %v20923_v25 = vadd.f32 %v15948_v50, %v20705_v2  ;;  %v12887_v55 = vrot.slane %v12886_v7, 4  ;;  %v12896_v29 = vrot.slane %v12894_v40, 4  ;;  %v13278_v2 = vld [vmem:[#allocation2 + $0x34] sm:$0xf]  ;;  %v13277_v56 = vld [vmem:[#allocation2 + $0x30] sm:$0xe] }
 0x458   : > { %v9455_v61 = vpop.f32.mrf.mxu0  ;;  %v9950_v32 = vpop.f32.mrf.mxu1  ;;  %v12882_v62 = vsel %vm17984_vm0, %v12877_v52, %v12881_v13  ;;  %v12903_v6 = vshll.u32 %v12499_v48, 16  ;;  %v13412_v4 = vsel %vm18028_vm12, %v13410_v35, %v13411_v58  ;;  %v12899_v54 = vrot.slane %v12897_v42, 5 }
 0x459   : > { %v20930_v3 = vadd.f32 %v9455_v61, %v20863_v43  ;;  %v12892_v19 = vsel %vm17984_vm0, %v12887_v55, %v12891_v38  ;;  %v12907_v28 = vshrl.u32 %v12499_v48, 16  ;;  %v14908_v7 = vcombine.low %v13409_v21, %v13412_v4 }
 0x45a   : > { %v15949_v49 = vpop.f32.mrf.mxu1  ;;  %v14865_v37 = vcombine.low %v12882_v62, %v12892_v19  ;;  %v12905_v39 = vrot.slane %v12903_v6, 5  ;;  %v12913_v13 = vshll.u32 %v12500_v63, 16  ;;  %v9488_v43 = vadd.f32 %v20765_v33, %v20587_v10  ;;  %v13281_v10 = vld [vmem:[#allocation2 + $0x40] sm:$0xf] }
 0x45b   : > { %v12900_v50 = vor.u32 %v12899_v54, %v12896_v29  ;;  %v12909_v22 = vrot.slane %v12907_v28, 4  ;;  %v13415_v52 = vrot.slane %v13278_v2, 5  ;;  %v20940_v38 = vadd.f32 %v20775_v36, %v20605_v14  ;;  %16235 = vmatmul.mubr.bf16.vlgmr.msra.gmra.mxu1 %v14908_v7  ;;  %v13280_v14 = vld [vmem:[#allocation2 + $0x3c] sm:$0xe]  ;;  %v13284_v36 = vld [vmem:[#allocation2 + $0x4c] sm:$0xf] }
 0x45c   : > { %v9953_v40 = vpop.f32.mrf.mxu1  ;;  %16214 = vmatprep.mubr.bf16.mxu0 %v14865_v37  ;;  %v14877_v58 = vrot.slane %v13277_v56, 9  ;;  %v20943_v55 = vadd.f32 %v9950_v32, %v20837_v0  ;;  %v20946_v61 = vadd.f32 %v15949_v49, %v20841_v11  ;;  %v12915_v63 = vrot.slane %v12913_v13, 5  ;;  %v13282_v11 = vld [vmem:[#allocation2 + $0x44] sm:$0x1]  ;;  %v13283_v54 = vld [vmem:[#allocation2 + $0x48] sm:$0xe] }
 0x45d   : > { %v12901_v21 = vrot.slane %v12900_v50, 4  ;;  %v12910_v35 = vor.u32 %v12909_v22, %v12905_v39  ;;  %v13417_v62 = vrot.slane %v13415_v52, 4  ;;  %v13418_v29 = vrot.slane %v13279_v57, 5  ;;  %v13285_v37 = vld [vmem:[#allocation2 + $0x50] sm:$0x1] }
 0x45e   : > { %v15928_v48 = vpop.f32.mrf.mxu0  ;;  %v15952_v42 = vpop.f32.mrf.mxu1  ;;  %v20952_v2 = vadd.f32 %v9953_v40, %v20847_v1  ;;  %v13422_v4 = vrot.slane %v13281_v10, 5  ;;  %v13416_v56 = vsel %vm18028_vm12, %v14877_v58, %v13415_v52  ;;  %v13429_v7 = vrot.slane %v13284_v36, 5  ;;  %v13287_v57 = vld [vmem:[#allocation2 + $0x58] sm:$0xf] }
 0x45f   : > { %v20949_v33 = vadd.f32 %v15928_v48, %v20877_v53  ;;  %v20955_v0 = vadd.f32 %v15952_v42, %v20746_v12  ;;  %v12906_v53 = vsel %vm17984_vm0, %v12901_v21, %v12905_v39  ;;  %v12911_v32 = vrot.slane %v12910_v35, 4 }
 0x460   : > { %v9468_v6 = vpop.f32.mrf.mxu0  ;;  %v9966_v28 = vpop.f32.mrf.mxu1  ;;  %v13419_v1 = vsel %vm18028_vm12, %v13417_v62, %v13418_v29  ;;  %v14878_v12 = vrot.slane %v13280_v14, 9  ;;  %v13425_v50 = vrot.slane %v13282_v11, 5  ;;  %v13424_v52 = vrot.slane %v13422_v4, 4  ;;  %v13290_v29 = vld [vmem:[#allocation2 + $0x64] sm:$0xf] }
 0x461   : > { %v20960_v19 = vadd.f32 %v9468_v6, %v20886_v51  ;;  %v12916_v39 = vsel %vm17984_vm0, %v12911_v32, %v12915_v63  ;;  %v14909_v13 = vcombine.low %v13416_v56, %v13419_v1  ;;  %v14879_v58 = vrot.slane %v13283_v54, 9  ;;  %v13288_v32 = vld [vmem:[#allocation2 + $0x5c] sm:$0x1]  ;;  %v13291_v1 = vld [vmem:[#allocation2 + $0x68] sm:$0x1] }
 0x462   : > { %v15929_v49 = vpop.f32.mrf.mxu0  ;;  %v15953_v22 = vpop.f32.mrf.mxu1  ;;  %v14866_v40 = vcombine.low %v12906_v53, %v12916_v39  ;;  %v13431_v10 = vrot.slane %v13429_v7, 4  ;;  %v13432_v35 = vrot.slane %v13285_v37, 5  ;;  %v20975_v31 = vadd.f32 %v9966_v28, %v20855_v16 }
 0x463   : > { %v20969_v51 = vadd.f32 %v15929_v49, %v20896_v41  ;;  %16238 = vmatprep.mubr.bf16.mxu1 %v14909_v13  ;;  %v20978_v63 = vadd.f32 %v15953_v22, %v20869_v46  ;;  %v13423_v42 = vsel %vm18028_vm12, %v14878_v12, %v13422_v4  ;;  %v13426_v14 = vsel %vm18028_vm12, %v13424_v52, %v13425_v50  ;;  %v13286_v49 = vld [vmem:[#allocation2 + $0x54] sm:$0xe]  ;;  %v13289_v13 = vld [vmem:[#allocation2 + $0x60] sm:$0xe]  ;;  %v21007_v50 = vld [vmem:[#allocation2 + $0x7c] sm:$0xf] }
 0x464   : > { %v9471_v48 = vpop.f32.mrf.mxu0  ;;  %v9969_v41 = vpop.f32.mrf.mxu1  ;;  %16215 = vmatmul.mubr.bf16.gmra.mxu0 %v14866_v40  ;;  %v14910_v6 = vcombine.low %v13423_v42, %v13426_v14  ;;  %v13430_v46 = vsel %vm18028_vm12, %v14879_v58, %v13429_v7  ;;  %v13433_v11 = vsel %vm18028_vm12, %v13431_v10, %v13432_v35  ;;  %v9491_v4 = vadd.f32 %v20786_v26, %v20629_v47  ;;  %v21001_v7 = vld [vmem:[#allocation2 + $0x70] sm:$0xf] }
 0x465   : > { %v20972_v21 = vadd.f32 %v9471_v48, %v20907_v15  ;;  %v20984_v62 = vadd.f32 %v9969_v41, %v9488_v43  ;;  %v13436_v15 = vrot.slane %v13287_v57, 5  ;;  %v14911_v54 = vcombine.low %v13430_v46, %v13433_v11  ;;  %v13294_v11 = vld [vmem:[#allocation2 + $0x74] sm:$0x1] }
 0x466   : > { %v15996_v36 = vpop.f32.mrf.mxu0  ;;  %v15956_v53 = vpop.f32.mrf.mxu1  ;;  %16239 = vmatmul.mubr.bf16.gmra.mxu1 %v14910_v6  ;;  %v13443_v12 = vrot.slane %v13290_v29, 5  ;;  %v9494_v39 = vadd.f32 %v20797_v18, %v20648_v27  ;;  %v13439_v26 = vrot.slane %v13288_v32, 5  ;;  %v13446_v40 = vrot.slane %v13291_v1, 5 }
 0x467   : > { %v20987_v16 = vadd.f32 %v15996_v36, %v20923_v25  ;;  %v20996_v28 = vadd.f32 %v15956_v53, %v20940_v38  ;;  %v13438_v56 = vrot.slane %v13436_v15, 4  ;;  %16242 = vmatprep.mubr.bf16.mxu1 %v14911_v54  ;;  %v14880_v58 = vrot.slane %v13286_v49, 9  ;;  %v21040_v49 = vld [vmem:[#allocation2 + $0x88] sm:$0xf] }
 0x468   : > { %v10400_v43 = vpop.f32.mrf.mxu0  ;;  %v9982_v37 = vpop.f32.mrf.mxu1  ;;  %v13445_v57 = vrot.slane %v13443_v12, 4  ;;  %v13450_v10 = vrot.slane %v21001_v7, 5  ;;  %v14881_v41 = vrot.slane %v13289_v13, 9  ;;  %v13295_v7 = vld [vmem:[#allocation2 + $0x78] sm:$0xe] }
 0x469   : > { %v20999_v25 = vadd.f32 %v10400_v43, %v20943_v55  ;;  %v21005_v38 = vadd.f32 %v9982_v37, %v9491_v4  ;;  %v9492_v55 = vadd.f32 %v20808_v8, %v20658_v17  ;;  %v13440_v27 = vsel %vm18028_vm12, %v13438_v56, %v13439_v26  ;;  %v13297_v43 = vld [vmem:[#allocation2 + $0x80] sm:$0x1]  ;;  %v13292_v56 = vld [vmem:[#allocation2 + $0x6c] sm:$0xe] }
 0x46a   : > { %v15997_v47 = vpop.f32.mrf.mxu0  ;;  %v15957_v48 = vpop.f32.mrf.mxu1  ;;  %v13447_v17 = vsel %vm18028_vm12, %v13445_v57, %v13446_v40  ;;  %v13437_v42 = vsel %vm18028_vm12, %v14880_v58, %v13436_v15  ;;  %v13452_v54 = vrot.slane %v13450_v10, 4  ;;  %v13453_v37 = vrot.slane %v13294_v11, 5  ;;  %v13303_v11 = vld [vmem:[#allocation2 + $0x98] sm:$0x1] }
 0x46b   : > { %v21012_v22 = vadd.f32 %v15997_v47, %v20946_v61  ;;  %v21016_v18 = vadd.f32 %v15957_v48, %v9494_v39  ;;  %v13457_v61 = vrot.slane %v21007_v50, 5  ;;  %v14912_v29 = vcombine.low %v13437_v42, %v13440_v27 }
 0x46c   : > { %v10403_v52 = vpop.f32.mrf.mxu0  ;;  %v9985_v8 = vpop.f32.mrf.mxu1  ;;  %v9496_v47 = vadd.f32 %v20843_v60, %v20709_v30  ;;  %v13460_v26 = vrot.slane %v13297_v43, 5  ;;  %v13454_v57 = vsel %vm18028_vm12, %v13452_v54, %v13453_v37  ;;  %v9501_v58 = vadd.f32 %v20851_v5, %v20715_v59  ;;  %v13305_v43 = vld [vmem:[#allocation2 + $0xa0] sm:$0xf]  ;;  %v13308_v37 = vld [vmem:[#allocation2 + $0xac] sm:$0xf] }
 0x46d   : > { %v21020_v35 = vadd.f32 %v10403_v52, %v20952_v2  ;;  %v21027_v36 = vadd.f32 %v9985_v8, %v9492_v55  ;;  %v13444_v2 = vsel %vm18028_vm12, %v14881_v41, %v13443_v12  ;;  %v13459_v1 = vrot.slane %v13457_v61, 4 }
 0x46e   : > { %v16000_v14 = vpop.f32.mrf.mxu0  ;;  %v15960_v46 = vpop.f32.mrf.mxu1  ;;  %v14913_v53 = vcombine.low %v13444_v2, %v13447_v17  ;;  %16243 = vmatmul.mubr.bf16.gmra.mxu1 %v14912_v29  ;;  %v14882_v55 = vrot.slane %v13292_v56, 9  ;;  %v14883_v52 = vrot.slane %v13295_v7, 9  ;;  %v21943_v29 = vld [vmem:[#allocation31_spill] sm:$0xff]  ;;  %v21945_v56 = vld [vmem:[#allocation9_spill] sm:$0xff]  ;;  %v21946_v7 = vld [vmem:[#allocation8_spill] sm:$0xff] }
 0x46f   : > { %v21030_v6 = vadd.f32 %v16000_v14, %v20955_v0  ;;  %v21035_v4 = vadd.f32 %v15960_v46, %v20815_v9  ;;  %v21045_v9 = vld [vmem:[#allocation2 + $0x94] sm:$0xf]  ;;  %v13461_v30 = vsel %vm18028_vm12, %v13459_v1, %v13460_v26  ;;  %v13300_v14 = vld [vmem:[#allocation2 + $0x8c] sm:$0x1]  ;;  %v9499_v2 = vadd.f32 %v21943_v29, %v20736_v34 }
 0x470   : > { %v10416_v32 = vpop.f32.mrf.mxu0  ;;  %v9998_v0 = vpop.f32.mrf.mxu1  ;;  %16246 = vmatprep.mubr.bf16.mxu1 %v14913_v53  ;;  %v13451_v27 = vsel %vm18028_vm12, %v14882_v55, %v13450_v10  ;;  %v13458_v8 = vsel %vm18028_vm12, %v14883_v52, %v13457_v61  ;;  %v21944_v61 = vld [vmem:[#allocation26_spill] sm:$0xff]  ;;  %v13467_v34 = vrot.slane %v13300_v14, 5  ;;  %v13474_v26 = vrot.slane %v13303_v11, 5 }
 0x471   : > { %v21038_v15 = vadd.f32 %v10416_v32, %v20975_v31  ;;  %v21043_v39 = vadd.f32 %v9998_v0, %v20824_v23  ;;  %v13464_v23 = vrot.slane %v21040_v49, 5  ;;  %v14914_v17 = vcombine.low %v13451_v27, %v13454_v57  ;;  %v13301_v49 = vld [vmem:[#allocation2 + $0x90] sm:$0xe]  ;;  %v21948_v11 = vld [vmem:[#allocation10_spill] sm:$0xff] }
 0x472   : > { %v16001_v12 = vpop.f32.mrf.mxu0  ;;  %v15961_v13 = vpop.f32.mrf.mxu1  ;;  %v14915_v46 = vcombine.low %v13458_v8, %v13461_v30  ;;  %v9502_v1 = vadd.f32 %v21945_v56, %v21944_v61  ;;  %v13478_v30 = vrot.slane %v13305_v43, 5  ;;  %v13304_v43 = vld [vmem:[#allocation2 + $0x9c] sm:$0xe]  ;;  %v13311_v56 = vld [vmem:[#allocation2 + $0xb8] sm:$0xf] }
 0x473   : > { %v21050_v31 = vadd.f32 %v16001_v12, %v20978_v63  ;;  %v21055_v40 = vadd.f32 %v15961_v13, %v20829_v20  ;;  %v13471_v63 = vrot.slane %v21045_v9, 5  ;;  %v13466_v10 = vrot.slane %v13464_v23, 4  ;;  %v21947_v9 = vld [vmem:[#allocation33_spill] sm:$0xff] }
 0x474   : > { %v10419_v50 = vpop.f32.mrf.mxu0  ;;  %v10001_v60 = vpop.f32.mrf.mxu1 }
 0x475   : > { %v21059_v48 = vadd.f32 %v10419_v50, %v20984_v62  ;;  %v21068_v41 = vadd.f32 %v10001_v60, %v9496_v47  ;;  %v13473_v32 = vrot.slane %v13471_v63, 4  ;;  %v9500_v47 = vadd.f32 %v21947_v9, %v21946_v7 }
 0x476   : > { %v16004_v20 = vpop.f32.mrf.mxu0  ;;  %v15964_v42 = vpop.f32.mrf.mxu1  ;;  %16247 = vmatmul.mubr.bf16.gmra.mxu1 %v14914_v17  ;;  %v13468_v57 = vsel %vm18028_vm12, %v13466_v10, %v13467_v34  ;;  %v21949_v34 = vld [vmem:[#allocation35_spill] sm:$0xff] }
 0x477   : > { %v21071_v62 = vadd.f32 %v16004_v20, %v20996_v28  ;;  %v21077_v5 = vadd.f32 %v15964_v42, %v9501_v58  ;;  %v13298_v28 = vld [vmem:[#allocation2 + $0x84] sm:$0xe]  ;;  %16250 = vmatprep.mubr.bf16.mxu1 %v14915_v46  ;;  %v14885_v58 = vrot.slane %v13301_v49, 9  ;;  %v13475_v27 = vsel %vm18028_vm12, %v13473_v32, %v13474_v26  ;;  %v13306_v46 = vld [vmem:[#allocation2 + $0xa4] sm:$0x1] }
 0x478   : > { %v10432_v59 = vpop.f32.mrf.mxu0  ;;  %v10014_v54 = vpop.f32.mrf.mxu1  ;;  %v14884_v55 = vrot.slane %v13298_v28, 9  ;;  %v13480_v32 = vrot.slane %v13478_v30, 4 }
 0x479   : > { %v21080_v53 = vadd.f32 %v10432_v59, %v21005_v38  ;;  %v21084_v12 = vadd.f32 %v10014_v54, %v9499_v2  ;;  %v13309_v54 = vld [vmem:[#allocation2 + $0xb0] sm:$0x1] }
 0x47a   : > { %v16005_v0 = vpop.f32.mrf.mxu0  ;;  %v15965_v13 = vpop.f32.mrf.mxu1  ;;  %v13465_v17 = vsel %vm18028_vm12, %v14884_v55, %v13464_v23  ;;  %v13488_v9 = vrot.slane %v13309_v54, 5 }
 0x47b   : > { %v21089_v38 = vadd.f32 %v16005_v0, %v21016_v18  ;;  %v21093_v52 = vadd.f32 %v15965_v13, %v9502_v1  ;;  %v13485_v18 = vrot.slane %v13308_v37, 5  ;;  %v14916_v14 = vcombine.low %v13465_v17, %v13468_v57  ;;  %v13307_v0 = vld [vmem:[#allocation2 + $0xa8] sm:$0xe]  ;;  %v13314_v37 = vld [vmem:[#allocation2 + $0xc4] sm:$0xf] }
 0x47c   : > { %v10435_v50 = vpop.f32.mrf.mxu0  ;;  %v10017_v20 = vpop.f32.mrf.mxu1  ;;  %v13492_v57 = vrot.slane %v13311_v56, 5  ;;  %v13499_v17 = vrot.slane %v13314_v37, 5  ;;  %v13310_v56 = vld [vmem:[#allocation2 + $0xb4] sm:$0xe] }
 0x47d   : > { %v21096_v60 = vadd.f32 %v10435_v50, %v21027_v36  ;;  %v21102_v42 = vadd.f32 %v10017_v20, %v9500_v47  ;;  %v13472_v36 = vsel %vm18028_vm12, %v14885_v58, %v13471_v63  ;;  %v13487_v61 = vrot.slane %v13485_v18, 4  ;;  %v21950_v50 = vld [vmem:[#allocation27_spill] sm:$0xff] }
 0x47e   : > { %v16008_v8 = vpop.f32.mrf.mxu0  ;;  %v15968_v2 = vpop.f32.mrf.mxu1  ;;  %v14917_v59 = vcombine.low %v13472_v36, %v13475_v27  ;;  %16251 = vmatmul.mubr.bf16.gmra.mxu1 %v14916_v14  ;;  %v13481_v63 = vrot.slane %v13306_v46, 5  ;;  %v14887_v27 = vrot.slane %v13307_v0, 9  ;;  %v21951_v36 = vld [vmem:[#allocation11_spill] sm:$0xff]  ;;  %v13501_v0 = vrot.slane %v13499_v17, 4 }
 0x47f   : > { %v21105_v29 = vadd.f32 %v16008_v8, %v21035_v4  ;;  %v21110_v28 = vadd.f32 %v15968_v2, %v21948_v11  ;;  %v13489_v20 = vsel %vm18028_vm12, %v13487_v61, %v13488_v9  ;;  %v13312_v11 = vld [vmem:[#allocation2 + $0xbc] sm:$0x1]  ;;  %v21952_v61 = vld [vmem:[#allocation37_spill] sm:$0xff] }
 0x480   : > { %v10448_v10 = vpop.f32.mrf.mxu0  ;;  %v10030_v4 = vpop.f32.mrf.mxu1  ;;  %16254 = vmatprep.mubr.bf16.mxu1 %v14917_v59  ;;  %v13482_v13 = vsel %vm18028_vm12, %v13480_v32, %v13481_v63  ;;  %v13317_v32 = vld [vmem:[#allocation2 + $0xd0] sm:$0xf]  ;;  %v13495_v37 = vrot.slane %v13312_v11, 5 }
 0x481   : > { %v21113_v23 = vadd.f32 %v10448_v10, %v21043_v39  ;;  %v21116_v49 = vadd.f32 %v10030_v4, %v21949_v34  ;;  %v14886_v39 = vrot.slane %v13304_v43, 9 }
 0x482   : > { %v16009_v1 = vpop.f32.mrf.mxu0  ;;  %v15969_v47 = vpop.f32.mrf.mxu1 }
 0x483   : > { %v21119_v7 = vadd.f32 %v16009_v1, %v21055_v40  ;;  %v21124_v55 = vadd.f32 %v15969_v47, %v21950_v50  ;;  %v13479_v8 = vsel %vm18028_vm12, %v14886_v39, %v13478_v30  ;;  %v13494_v1 = vrot.slane %v13492_v57, 4  ;;  %v13315_v30 = vld [vmem:[#allocation2 + $0xc8] sm:$0x1] }
 0x484   : > { %v10451_v26 = vpop.f32.mrf.mxu0  ;;  %v10033_v40 = vpop.f32.mrf.mxu1  ;;  %v14918_v46 = vcombine.low %v13479_v8, %v13482_v13  ;;  %v13506_v47 = vrot.slane %v13317_v32, 5  ;;  %v14888_v39 = vrot.slane %v13310_v56, 9  ;;  %v13502_v13 = vrot.slane %v13315_v30, 5 }
 0x485   : > { %v21127_v58 = vadd.f32 %v10451_v26, %v21068_v41  ;;  %v10098_v2 = vadd.f32 %v10033_v40, %v21951_v36  ;;  %v13486_v41 = vsel %vm18028_vm12, %v14887_v27, %v13485_v18  ;;  %v13313_v18 = vld [vmem:[#allocation2 + $0xc0] sm:$0xe]  ;;  %v13316_v27 = vld [vmem:[#allocation2 + $0xcc] sm:$0xe] }
 0x486   : > { %v16012_v14 = vpop.f32.mrf.mxu0  ;;  %v15972_v10 = vpop.f32.mrf.mxu1  ;;  %v14919_v54 = vcombine.low %v13486_v41, %v13489_v20  ;;  %16255 = vmatmul.mubr.bf16.gmra.mxu1 %v14918_v46  ;;  %v13318_v20 = vld [vmem:[#allocation2 + $0xd4] sm:$0x1]  ;;  %v14889_v36 = vrot.slane %v13313_v18, 9  ;;  %v14890_v11 = vrot.slane %v13316_v27, 9  ;;  %v13508_v32 = vrot.slane %v13506_v47, 4 }
 0x487   : > { %v21135_v59 = vadd.f32 %v16012_v14, %v21077_v5  ;;  %v10103_v4 = vadd.f32 %v15972_v10, %v21952_v61 }
 0x488   : > { %v10464_v43 = vpop.f32.mrf.mxu0  ;;  %v10046_v5 = vpop.f32.mrf.mxu1  ;;  %16258 = vmatprep.mubr.bf16.mxu1 %v14919_v54  ;;  %v13509_v54 = vrot.slane %v13318_v20, 5 }
 0x489   : > { %v21141_v63 = vadd.f32 %v10464_v43, %v21084_v12  ;;  %v10101_v9 = vadd.f32 %v10046_v5, %v20917_v44  ;;  %v13496_v12 = vsel %vm18028_vm12, %v13494_v1, %v13495_v37  ;;  %v13493_v44 = vsel %vm18028_vm12, %v14888_v39, %v13492_v57 }
 0x48a   : > { %v16013_v34 = vpop.f32.mrf.mxu0  ;;  %v15973_v50 = vpop.f32.mrf.mxu1  ;;  %v14920_v43 = vcombine.low %v13493_v44, %v13496_v12  ;;  %v13507_v5 = vsel %vm18028_vm12, %v14890_v11, %v13506_v47 }
 0x48b   : > { %v21145_v26 = vadd.f32 %v16013_v34, %v21093_v52  ;;  %v10104_v8 = vadd.f32 %v15973_v50, %v20920_v24  ;;  %v13503_v52 = vsel %vm18028_vm12, %v13501_v0, %v13502_v13 }
 0x48c   : > { %v10467_v40 = vpop.f32.mrf.mxu0  ;;  %v10049_v46 = vpop.f32.mrf.mxu1 }
 0x48d   : > { %v21151_v14 = vadd.f32 %v10467_v40, %v21102_v42  ;;  %v10102_v10 = vadd.f32 %v10049_v46, %v20930_v3  ;;  %v13500_v42 = vsel %vm18028_vm12, %v14889_v36, %v13499_v17 }
 0x48e   : > { %v16016_v41 = vpop.f32.mrf.mxu0  ;;  %v15976_v61 = vpop.f32.mrf.mxu1  ;;  %v14921_v57 = vcombine.low %v13500_v42, %v13503_v52  ;;  %16259 = vmatmul.mubr.bf16.gmra.mxu1 %v14920_v43 }
 0x48f   : > { %v21159_v24 = vadd.f32 %v16016_v41, %v21110_v28  ;;  %v10107_v1 = vadd.f32 %v15976_v61, %v20949_v33  ;;  %v13510_v28 = vsel %vm18028_vm12, %v13508_v32, %v13509_v54 }
 0x490   : > { %v10480_v56 = vpop.f32.mrf.mxu0  ;;  %v10062_v3 = vpop.f32.mrf.mxu1  ;;  %16262 = vmatprep.mubr.bf16.mxu1 %v14921_v57  ;;  %v14922_v39 = vcombine.low %v13507_v5, %v13510_v28 }
 0x491   : > { %v21165_v30 = vadd.f32 %v10480_v56, %v21116_v49  ;;  %v10105_v17 = vadd.f32 %v10062_v3, %v20960_v19 }
 0x492   : > { %v16017_v0 = vpop.f32.mrf.mxu0  ;;  %v15977_v37 = vpop.f32.mrf.mxu1 }
 0x493   : > { %v21173_v34 = vadd.f32 %v16017_v0, %v21124_v55  ;;  %v10108_v18 = vadd.f32 %v15977_v37, %v20969_v51 }
 0x494   : > { %v10483_v33 = vpop.f32.mrf.mxu0  ;;  %v10065_v13 = vpop.f32.mrf.mxu1 }
 0x495   : > { %v21176_v49 = vadd.f32 %v10483_v33, %v10098_v2  ;;  %v10106_v27 = vadd.f32 %v10065_v13, %v20972_v21 }
 0x496   : > { %v16020_v50 = vpop.f32.mrf.mxu0  ;;  %v16044_v45 = vpop.f32.mrf.mxu1  ;;  %16263 = vmatmul.mubr.bf16.gmra.mxu1 %v14922_v39 }
 0x497   : > { %v21179_v47 = vadd.f32 %v16020_v50, %v10103_v4  ;;  %v21182_v19 = vadd.f32 %v16044_v45, %v20987_v16 }
 0x498   : > { %v10496_v20 = vpop.f32.mrf.mxu0  ;;  %v11218_v40 = vpop.f32.mrf.mxu1 }
 0x499   : > { %v21184_v55 = vadd.f32 %v10496_v20, %v10101_v9  ;;  %v21187_v51 = vadd.f32 %v11218_v40, %v20999_v25 }
 0x49a   : > { %v16021_v12 = vpop.f32.mrf.mxu0  ;;  %v16045_v44 = vpop.f32.mrf.mxu1 }
 0x49b   : > { %v21189_v2 = vadd.f32 %v16021_v12, %v10104_v8  ;;  %v21192_v21 = vadd.f32 %v16045_v44, %v21012_v22 }
 0x49c   : > { %v10499_v36 = vpop.f32.mrf.mxu0  ;;  %v11221_v52 = vpop.f32.mrf.mxu1 }
 0x49d   : > { %v21194_v4 = vadd.f32 %v10499_v36, %v10102_v10  ;;  %v21197_v46 = vadd.f32 %v11221_v52, %v21020_v35 }
 0x49e   : > { %v16024_v16 = vpop.f32.mrf.mxu0  ;;  %v16048_v41 = vpop.f32.mrf.mxu1 }
 0x49f   : > { %v21199_v9 = vadd.f32 %v16024_v16, %v10107_v1  ;;  %v21202_v25 = vadd.f32 %v16048_v41, %v21030_v6 }
 0x4a0   : > { %v10512_v11 = vpop.f32.mrf.mxu0  ;;  %v11234_v32 = vpop.f32.mrf.mxu1 }
 0x4a1   : > { %v21204_v8 = vadd.f32 %v10512_v11, %v10105_v17  ;;  %v21207_v22 = vadd.f32 %v11234_v32, %v21038_v15 }
 0x4a2   : > { %v16025_v54 = vpop.f32.mrf.mxu0  ;;  %v16049_v43 = vpop.f32.mrf.mxu1 }
 0x4a3   : > { %v21209_v10 = vadd.f32 %v16025_v54, %v10108_v18  ;;  %v21212_v35 = vadd.f32 %v16049_v43, %v21050_v31 }
 0x4a4   : > { %v10515_v42 = vpop.f32.mrf.mxu0  ;;  %v11237_v57 = vpop.f32.mrf.mxu1 }
 0x4a5   : > { %v21214_v61 = vadd.f32 %v10515_v42, %v10106_v27  ;;  %v21219_v6 = vadd.f32 %v11237_v57, %v21059_v48 }
 0x4a6   : > { %v21216_v56 = vpop.f32.mrf.mxu0  ;;  %v16052_v1 = vpop.f32.mrf.mxu1 }
 0x4a7   : > { %v21224_v15 = vadd.f32 %v16052_v1, %v21071_v62 }
 0x4a8   : > { %v21221_v3 = vpop.f32.mrf.mxu0  ;;  %v11250_v0 = vpop.f32.mrf.mxu1 }
 0x4a9   : > { %v21229_v31 = vadd.f32 %v11250_v0, %v21080_v53 }
 0x4aa   : > { %v21226_v5 = vpop.f32.mrf.mxu0  ;;  %v16053_v28 = vpop.f32.mrf.mxu1 }
 0x4ab   : > { %v21234_v37 = vadd.f32 %v16053_v28, %v21089_v38 }
 0x4ac   : > { %v21231_v17 = vpop.f32.mrf.mxu0  ;;  %v11253_v48 = vpop.f32.mrf.mxu1 }
 0x4ad   : > { %v21239_v18 = vadd.f32 %v11253_v48, %v21096_v60 }
 0x4ae   : > { %v21236_v33 = vpop.f32.mrf.mxu0  ;;  %v16056_v62 = vpop.f32.mrf.mxu1 }
 0x4af   : > { %v21244_v13 = vadd.f32 %v16056_v62, %v21105_v29 }
 0x4b0   : > { %v21241_v39 = vpop.f32.mrf.mxu0  ;;  %v11266_v53 = vpop.f32.mrf.mxu1 }
 0x4b1   : > { %v21249_v27 = vadd.f32 %v11266_v53, %v21113_v23 }
 0x4b2   : > { %v21246_v50 = vpop.f32.mrf.mxu0  ;;  %v16057_v38 = vpop.f32.mrf.mxu1 }
 0x4b3   : > { %v21254_v20 = vadd.f32 %v16057_v38, %v21119_v7 }
 0x4b4   : > { %v21251_v45 = vpop.f32.mrf.mxu0  ;;  %v11269_v60 = vpop.f32.mrf.mxu1 }
 0x4b5   : > { %v21259_v12 = vadd.f32 %v11269_v60, %v21127_v58 }
 0x4b6   : > { %v21256_v40 = vpop.f32.mrf.mxu0  ;;  %v16060_v29 = vpop.f32.mrf.mxu1 }
 0x4b7   : > { %21953 = vst [vmem:[#allocation32_spill] sm:$0xff] %v21259_v12  ;;  %v21264_v36 = vadd.f32 %v16060_v29, %v21135_v59 }
 0x4b8   : > { %v21261_v44 = vpop.f32.mrf.mxu0  ;;  %v11282_v23 = vpop.f32.mrf.mxu1 }
 0x4b9   : > { %21954 = vst [vmem:[#allocation34_spill] sm:$0xff] %v21264_v36  ;;  %v21269_v16 = vadd.f32 %v11282_v23, %v21141_v63 }
 0x4ba   : > { %v21266_v52 = vpop.f32.mrf.mxu0  ;;  %v16061_v7 = vpop.f32.mrf.mxu1 }
 0x4bb   : > { %21955 = vst [vmem:[#allocation36_spill] sm:$0xff] %v21269_v16  ;;  %v21274_v11 = vadd.f32 %v16061_v7, %v21145_v26 }
 0x4bc   : > { %v21271_v41 = vpop.f32.mrf.mxu0  ;;  %v11285_v58 = vpop.f32.mrf.mxu1 }
 0x4bd   : > { %21956 = vst [vmem:[#allocation14_spill] sm:$0xff] %v21274_v11  ;;  %v21279_v54 = vadd.f32 %v11285_v58, %v21151_v14 }
 0x4be   : > { %v21276_v32 = vpop.f32.mrf.mxu0  ;;  %v16064_v59 = vpop.f32.mrf.mxu1 }
 0x4bf   : > { %21957 = vst [vmem:[#allocation39_spill] sm:$0xff] %v21279_v54  ;;  %v21284_v42 = vadd.f32 %v16064_v59, %v21159_v24 }
 0x4c0   : > { %v21281_v43 = vpop.f32.mrf.mxu0  ;;  %v11298_v63 = vpop.f32.mrf.mxu1 }
 0x4c1   : > { %21958 = vst [vmem:[#allocation38_spill] sm:$0xff] %v21284_v42  ;;  %v21289_v1 = vadd.f32 %v11298_v63, %v21165_v30 }
 0x4c2   : > { %v21286_v57 = vpop.f32.mrf.mxu0  ;;  %v16065_v26 = vpop.f32.mrf.mxu1 }
 0x4c3   : > { %21959 = vst [vmem:[#allocation18_spill] sm:$0xff] %v21286_v57  ;;  %21960 = vst [vmem:[#allocation41_spill] sm:$0xff] %v21289_v1  ;;  %v21294_v28 = vadd.f32 %v16065_v26, %v21173_v34 }
 0x4c4   : > { %v21291_v0 = vpop.f32.mrf.mxu0  ;;  %v11301_v14 = vpop.f32.mrf.mxu1 }
 0x4c5   : > { %21961 = vst [vmem:[#allocation22_spill] sm:$0xff] %v21291_v0  ;;  %21962 = vst [vmem:[#allocation43_spill] sm:$0xff] %v21294_v28  ;;  %v21299_v62 = vadd.f32 %v11301_v14, %v21176_v49 }
 0x4c6   : > { %v21296_v48 = vpop.f32.mrf.mxu0  ;;  %v16068_v24 = vpop.f32.mrf.mxu1 }
 0x4c7   : > { %21963 = vst [vmem:[#allocation13_spill] sm:$0xff] %v21296_v48  ;;  %21964 = vst [vmem:[#allocation40_spill] sm:$0xff] %v21299_v62  ;;  %v21304_v38 = vadd.f32 %v16068_v24, %v21179_v47 }
 0x4c8   : > { %v21301_v53 = vpop.f32.mrf.mxu0  ;;  %v11314_v30 = vpop.f32.mrf.mxu1 }
 0x4c9   : > { %21965 = vst [vmem:[#allocation47_spill] sm:$0xff] %v21301_v53  ;;  %21966 = vst [vmem:[#allocation42_spill] sm:$0xff] %v21304_v38  ;;  %v21309_v29 = vadd.f32 %v11314_v30, %v21184_v55 }
 0x4ca   : > { %v21306_v60 = vpop.f32.mrf.mxu0  ;;  %v16069_v34 = vpop.f32.mrf.mxu1 }
 0x4cb   : > { %21967 = vst [vmem:[#allocation44_spill] sm:$0xff] %v21306_v60  ;;  %21968 = vst [vmem:[#allocation45_spill] sm:$0xff] %v21309_v29  ;;  %v21314_v7 = vadd.f32 %v16069_v34, %v21189_v2 }
 0x4cc   : > { %v21311_v23 = vpop.f32.mrf.mxu0  ;;  %v11317_v49 = vpop.f32.mrf.mxu1 }
 0x4cd   : > { %21969 = vst [vmem:[#allocation16_spill] sm:$0xff] %v21311_v23  ;;  %21970 = vst [vmem:[#allocation19_spill] sm:$0xff] %v21314_v7  ;;  %v21319_v59 = vadd.f32 %v11317_v49, %v21194_v4 }
 0x4ce   : > { %v21316_v58 = vpop.f32.mrf.mxu0 }
 0x4cf   : > { %21971 = vst [vmem:[#allocation20_spill] sm:$0xff] %v21316_v58  ;;  %21972 = vst [vmem:[#allocation21_spill] sm:$0xff] %v21319_v59 }
 0x4d0   : > { %v21321_v47 = vpop.f32.mrf.mxu0 }
 0x4d1   : > { %21973 = vst [vmem:[#allocation25_spill] sm:$0xff] %v21321_v47  ;;  %v16072_v26 = vpop.f32.mrf.mxu1 }
 0x4d2   : > { %v21323_v63 = vpop.f32.mrf.mxu0  ;;  %v21326_v55 = vadd.f32 %v16072_v26, %v21199_v9 }
 0x4d3   : > { %21974 = vst [vmem:[#allocation23_spill] sm:$0xff] %v21323_v63  ;;  %v11330_v24 = vpop.f32.mrf.mxu1 }
 0x4d4   : > { %21975 = vst [vmem:[#allocation24_spill] sm:$0xff] %v21326_v55  ;;  %v21328_v14 = vpop.f32.mrf.mxu0  ;;  %v21331_v2 = vadd.f32 %v11330_v24, %v21204_v8 }
 0x4d5   : > { %21976 = vst [vmem:[#allocation29_spill] sm:$0xff] %v21328_v14  ;;  %v16073_v34 = vpop.f32.mrf.mxu1 }
 0x4d6   : > { %21977 = vst [vmem:[#allocation46_spill] sm:$0xff] %v21331_v2  ;;  %v21333_v30 = vpop.f32.mrf.mxu0  ;;  %v21336_v4 = vadd.f32 %v16073_v34, %v21209_v10 }
 0x4d7   : > { %21978 = vst [vmem:[#allocation48_spill] sm:$0xff] %v21333_v30  ;;  %v11333_v59 = vpop.f32.mrf.mxu1 }
 0x4d8   : > { %21979 = vst [vmem:[#allocation28_spill] sm:$0xff] %v21336_v4  ;;  %v21338_v49 = vpop.f32.mrf.mxu0  ;;  %v21341_v7 = vadd.f32 %v11333_v59, %v21214_v61 }
 0x4d9   : > { %21980 = vst [vmem:[#allocation30_spill] sm:$0xff] %v21338_v49  ;;  %v16140_v26 = vpop.f32.mrf.mxu1 }
 0x4da   : > { %21981 = vst [vmem:[#allocation12_spill] sm:$0xff] %v21341_v7  ;;  %v21343_v9 = vpop.f32.mrf.mxu0 }
 0x4db   : > { %21982 = vst [vmem:[#allocation15_spill] sm:$0xff] %v21343_v9  ;;  %v12262_v29 = vpop.f32.mrf.mxu1 }
 0x4dc   : > { %v21345_v55 = vpop.f32.mrf.mxu0 }
 0x4dd   : > { %21983 = vst [vmem:[#allocation4_spill] sm:$0xff] %v21345_v55  ;;  %v16141_v24 = vpop.f32.mrf.mxu1 }
 0x4de   : > { %v21347_v8 = vpop.f32.mrf.mxu0 }
 0x4df   : > { %21984 = vst [vmem:[#allocation49_spill] sm:$0xff] %v21347_v8  ;;  %v12265_v30 = vpop.f32.mrf.mxu1 }
 0x4e0   : > { %v21349_v2 = vpop.f32.mrf.mxu0 }
 0x4e1   : > { %21985 = vst [vmem:[#allocation50_spill] sm:$0xff] %v21349_v2  ;;  %v21353_v34 = vpop.f32.mrf.mxu1 }
 0x4e2   : > { %v21351_v10 = vpop.f32.mrf.mxu0 }
 0x4e3   : > { %21986 = vst [vmem:[#allocation51_spill] sm:$0xff] %v21351_v10  ;;  %v21357_v61 = vpop.f32.mrf.mxu1 }
 0x4e4   : > { %v21355_v4 = vpop.f32.mrf.mxu0 }
 0x4e5   : > { %21987 = vst [vmem:[#allocation52_spill] sm:$0xff] %v21355_v4  ;;  %v21359_v7 = vpop.f32.mrf.mxu1 }
 0x4e6   : > { %v16188_v59 = vpop.f32.mrf.mxu0 }
 0x4e7   : > { %v21361_v55 = vpop.f32.mrf.mxu1 }
 0x4e8   : > { %v13080_v9 = vpop.f32.mrf.mxu0 }
 0x4e9   : > { %v21363_v8 = vpop.f32.mrf.mxu1 }
 0x4ea   : > { %v16189_v49 = vpop.f32.mrf.mxu0 }
 0x4eb   : > { %v21365_v2 = vpop.f32.mrf.mxu1 }
 0x4ec   : > { %v13083_v38 = vpop.f32.mrf.mxu0 }
 0x4ed   : > { %v21369_v10 = vpop.f32.mrf.mxu1 }
 0x4ee   : > { %v21367_v14 = vpop.f32.mrf.mxu0 }
 0x4ef   : > { %v21371_v62 = vpop.f32.mrf.mxu1 }
 0x4f0   : > { %v21373_v4 = vpop.f32.mrf.mxu0 }
 0x4f1   : > { %v21375_v63 = vpop.f32.mrf.mxu1 }
 0x4f2   : > { %v21379_v47 = vpop.f32.mrf.mxu0 }
 0x4f3   : > { %v21377_v28 = vpop.f32.mrf.mxu1 }
 0x4f4   : > { %21988 = vst [vmem:[#allocation17_spill] sm:$0xff] %v21377_v28  ;;  %v21385_v42 = vpop.f32.mrf.mxu0 }
 0x4f5   : > { %v21381_v1 = vpop.f32.mrf.mxu1 }
 0x4f6   : > { %21989 = vst [vmem:[#allocation53_spill] sm:$0xff] %v21381_v1  ;;  %v21391_v60 = vpop.f32.mrf.mxu0 }
 0x4f7   : > { %v21383_v58 = vpop.f32.mrf.mxu1 }
 0x4f8   : > { %21990 = vst [vmem:[#allocation54_spill] sm:$0xff] %v21383_v58  ;;  %v21397_v16 = vpop.f32.mrf.mxu0 }
 0x4f9   : > { %v21387_v23 = vpop.f32.mrf.mxu1 }
 0x4fa   : > { %21991 = vst [vmem:[#allocation55_spill] sm:$0xff] %v21387_v23  ;;  %v21403_v1 = vpop.f32.mrf.mxu0 }
 0x4fb   : > { %v21389_v54 = vpop.f32.mrf.mxu1 }
 0x4fc   : > { %21992 = vst [vmem:[#allocation56_spill] sm:$0xff] %v21389_v54  ;;  %v21409_v23 = vpop.f32.mrf.mxu0 }
 0x4fd   : > { %v21393_v11 = vpop.f32.mrf.mxu1 }
 0x4fe   : > { %21993 = vst [vmem:[#allocation57_spill] sm:$0xff] %v21393_v11  ;;  %v21415_v11 = vpop.f32.mrf.mxu0 }
 0x4ff   : > { %v21395_v53 = vpop.f32.mrf.mxu1  ;;  %22001 = vst [vmem:[#allocation9_spill] sm:$0xff] %v21415_v11 }
 0x500   : > { %21994 = vst [vmem:[#allocation58_spill] sm:$0xff] %v21395_v53 }
 0x501   : > { %v21399_v48 = vpop.f32.mrf.mxu1 }
 0x502   : > { %21995 = vst [vmem:[#allocation59_spill] sm:$0xff] %v21399_v48  ;;  %v21421_v48 = vpop.f32.mrf.mxu0 }
 0x503   : > { %v21401_v36 = vpop.f32.mrf.mxu1  ;;  %22004 = vst [vmem:[#allocation10_spill] sm:$0xff] %v21421_v48 }
 0x504   : > { %21996 = vst [vmem:[#allocation5_spill] sm:$0xff] %v21401_v36 }
 0x505   : > { %v21405_v58 = vpop.f32.mrf.mxu1 }
 0x506   : > { %21997 = vst [vmem:[#allocation7_spill] sm:$0xff] %v21405_v58  ;;  %v21427_v58 = vpop.f32.mrf.mxu0 }
 0x507   : > { %v21407_v0 = vpop.f32.mrf.mxu1  ;;  %22007 = vst [vmem:[#allocation11_spill] sm:$0xff] %v21427_v58 }
 0x508   : > { %21998 = vst [vmem:[#allocation6_spill] sm:$0xff] %v21407_v0 }
 0x509   : > { %v21411_v54 = vpop.f32.mrf.mxu1 }
 0x50a   : > { %21999 = vst [vmem:[#allocation31_spill] sm:$0xff] %v21411_v54  ;;  %v11941_v54 = vadd.f32 %v21216_v56, %v21182_v19  ;;  %v21446_v19 = vld [vmem:[%s21692_s5] ss:$0 sm:$0xff]  ;;  %v11940_v56 = vadd.f32 %v21231_v17, %v21197_v46 }
 0x50b   : > { %v21413_v12 = vpop.f32.mrf.mxu1 }
 0x50c   : > { %22000 = vst [vmem:[#allocation26_spill] sm:$0xff] %v21413_v12  ;;  %v21433_v12 = vpop.f32.mrf.mxu0 }
 0x50d   : > { %v21417_v53 = vpop.f32.mrf.mxu1 }
 0x50e   : > { %22002 = vst [vmem:[#allocation8_spill] sm:$0xff] %v21417_v53  ;;  %v12391_v53 = vadd.f32 %v16140_v26, %v11941_v54  ;;  %v21441_v58 = vpop.f32.mrf.mxu0  ;;  %v12390_v54 = vadd.f32 %v12265_v30, %v11940_v56 }
 0x50f   : > { %v21419_v28 = vpop.f32.mrf.mxu1  ;;  %22010 = vst [vmem:[#allocation61_spill] sm:$0xff] %v21441_v58 }
 0x510   : > { %22003 = vst [vmem:[#allocation33_spill] sm:$0xff] %v21419_v28  ;;  %v11939_v28 = vadd.f32 %v21221_v3, %v21187_v51  ;;  %v13209_v48 = vadd.f32 %v16188_v59, %v12391_v53  ;;  %v21457_v26 = vpop.f32.mrf.mxu0  ;;  %v13208_v58 = vadd.f32 %v13083_v38, %v12390_v54 }
 0x511   : > { %v21423_v36 = vpop.f32.mrf.mxu1 }
 0x512   : > { %22005 = vst [vmem:[#allocation35_spill] sm:$0xff] %v21423_v36  ;;  %v11942_v36 = vadd.f32 %v21226_v5, %v21192_v21  ;;  %v21453_v21 = vld [vmem:[%s21692_s5 + $0x1] ss:$0 sm:$0xff] }
 0x513   : > { %v21425_v57 = vpop.f32.mrf.mxu1 }
 0x514   : > { %22006 = vst [vmem:[#allocation27_spill] sm:$0xff] %v21425_v57  ;;  %v12389_v57 = vadd.f32 %v12262_v29, %v11939_v28 }
 0x515   : > { %v21429_v0 = vpop.f32.mrf.mxu1 }
 0x516   : > { %22008 = vst [vmem:[#allocation37_spill] sm:$0xff] %v21429_v0  ;;  %v13207_v51 = vadd.f32 %v13080_v9, %v12389_v57  ;;  %v11945_v57 = vadd.f32 %v21236_v33, %v21202_v25  ;;  %v21473_v25 = vpop.f32.mrf.mxu0 }
 0x517   : > { %v21435_v11 = vpop.f32.mrf.mxu1 }
 0x518   : > { %22009 = vst [vmem:[#allocation60_spill] sm:$0xff] %v21435_v11  ;;  %v12392_v11 = vadd.f32 %v16141_v24, %v11942_v36  ;;  %v12395_v9 = vadd.f32 %v21353_v34, %v11945_v57 }
 0x51a   : > { %v13210_v28 = vadd.f32 %v16189_v49, %v12392_v11  ;;  %v11943_v49 = vadd.f32 %v21241_v39, %v21207_v22 }
 0x51b   : > { %v16236_v0 = vpop.f32.mrf.mxu1 }
 0x51c   : > { %v13803_v3 = vadd.f32 %v16236_v0, %v13209_v48 }
 0x51d   : > { %v13674_v5 = vpop.f32.mrf.mxu1 }
 0x51e   : > { %v13905_v53 = vmul.f32 %v21446_v19, %v13803_v3  ;;  %v13801_v29 = vadd.f32 %v13674_v5, %v13207_v51  ;;  %v11946_v51 = vadd.f32 %v21246_v50, %v21212_v35  ;;  %v12393_v3 = vadd.f32 %v21357_v61, %v11943_v49 }
 0x51f   : > { %v16237_v59 = vpop.f32.mrf.mxu1  ;;  %v11944_v5 = vadd.f32 %v21251_v45, %v21219_v6  ;;  %v11949_v50 = vadd.f32 %v21256_v40, %v21224_v15  ;;  %v11947_v45 = vadd.f32 %v21261_v44, %v21229_v31 }
 0x520   : > { %v13941_v46 = vadd.f32 %v21453_v21, %v13905_v53  ;;  %v13903_v17 = vmul.f32 %v21446_v19, %v13801_v29  ;;  %v13804_v36 = vadd.f32 %v16237_v59, %v13210_v28  ;;  %v12396_v54 = vadd.f32 %v21359_v7, %v11946_v51  ;;  %v21488_v53 = vpop.f32.mrf.mxu0 }
 0x521   : > { %v13677_v11 = vpop.f32.mrf.mxu1  ;;  %v13211_v28 = vadd.f32 %v21373_v4, %v12393_v3  ;;  %v12394_v29 = vadd.f32 %v21361_v55, %v11944_v5  ;;  %v12399_v7 = vadd.f32 %v21363_v8, %v11949_v50  ;;  %v12397_v57 = vadd.f32 %v21365_v2, %v11947_v45  ;;  %v22011_v5 = vld [vmem:[#allocation18_spill] sm:$0xff] }
 0x522   : > { %v13973_v0 = vmax.f32 %v13941_v46, 0.0  ;;  %v13939_v48 = vadd.f32 %v21453_v21, %v13903_v17  ;;  %v13906_v38 = vmul.f32 %v21446_v19, %v13804_v36  ;;  %v13802_v30 = vadd.f32 %v13677_v11, %v13208_v58  ;;  %v21501_v15 = vpop.f32.mrf.mxu0 }
 0x523   : > { %v13213_v58 = vadd.f32 %v21367_v14, %v12395_v9  ;;  %v13214_v59 = vadd.f32 %v21379_v47, %v12396_v54  ;;  %v13212_v17 = vadd.f32 %v21385_v42, %v12394_v29  ;;  %v11950_v36 = vadd.f32 %v21266_v52, %v21234_v37  ;;  %v22014_v29 = vld [vmem:[#allocation32_spill] sm:$0xff] }
 0x524   : > { %14005 = vst [vmem:[%s21466_s17 + $0x10] sm:$0xff] %v13973_v0  ;;  %v13971_v33 = vmax.f32 %v13939_v48, 0.0  ;;  %v13942_v24 = vadd.f32 %v21453_v21, %v13906_v38  ;;  %v13904_v56 = vmul.f32 %v21446_v19, %v13802_v30  ;;  %v13217_v31 = vadd.f32 %v21391_v60, %v12399_v7  ;;  %v21515_v52 = vpop.f32.mrf.mxu0  ;;  %v22017_v7 = vld [vmem:[#allocation10_spill] sm:$0xff] }
 0x525   : > { %v11948_v48 = vadd.f32 %v21271_v41, %v21239_v18  ;;  %v12400_v38 = vadd.f32 %v21369_v10, %v11950_v36  ;;  %v13215_v30 = vadd.f32 %v21397_v16, %v12397_v57  ;;  %v11951_v3 = vadd.f32 %v21281_v43, %v21249_v27  ;;  %v22013_v43 = vld [vmem:[#allocation9_spill] sm:$0xff]  ;;  %v22018_v57 = vld [vmem:[#allocation34_spill] sm:$0xff] }
 0x526   : > { %14003 = vst [vmem:[%s21466_s17] sm:$0xff] %v13971_v33  ;;  %v13974_v22 = vmax.f32 %v13942_v24, 0.0  ;;  %v13940_v39 = vadd.f32 %v21453_v21, %v13904_v56  ;;  %v16240_v34 = vpop.f32.mrf.mxu1  ;;  %v11953_v33 = vadd.f32 %v21276_v32, %v21244_v13  ;;  %v11954_v54 = vadd.f32 %v22011_v5, %v21254_v20 }
 0x527   : > { %v13807_v35 = vadd.f32 %v16240_v34, %v13213_v58  ;;  %v12398_v18 = vadd.f32 %v21371_v62, %v11948_v48  ;;  %v13218_v41 = vadd.f32 %v21403_v1, %v12400_v38  ;;  %v21531_v62 = vpop.f32.mrf.mxu0 }
 0x528   : > { %14006 = vst [vmem:[%s21466_s17 + $0x18] sm:$0xff] %v13974_v22  ;;  %v13972_v14 = vmax.f32 %v13940_v39, 0.0  ;;  %v13690_v61 = vpop.f32.mrf.mxu1  ;;  %v12403_v58 = vadd.f32 %v21375_v63, %v11953_v33  ;;  %v22024_v33 = vld [vmem:[#allocation55_spill] sm:$0xff] }
 0x529   : > { %v13909_v46 = vmul.f32 %v21446_v19, %v13807_v35  ;;  %v13805_v6 = vadd.f32 %v13690_v61, %v13211_v28  ;;  %v13216_v13 = vadd.f32 %v21409_v23, %v12398_v18  ;;  %v22012_v28 = vld [vmem:[#allocation17_spill] sm:$0xff] }
 0x52a   : > { %14004 = vst [vmem:[%s21466_s17 + $0x8] sm:$0xff] %v13972_v14  ;;  %v16241_v4 = vpop.f32.mrf.mxu1  ;;  %v12401_v27 = vadd.f32 %v22012_v28, %v11951_v3  ;;  %v13221_v63 = vadd.f32 %v22013_v43, %v12403_v58  ;;  %v22025_v58 = vld [vmem:[#allocation14_spill] sm:$0xff]  ;;  %v22029_v43 = vld [vmem:[#allocation39_spill] sm:$0xff] }
 0x52b   : > { %v13945_v40 = vadd.f32 %v21453_v21, %v13909_v46  ;;  %v13907_v55 = vmul.f32 %v21446_v19, %v13805_v6  ;;  %v13808_v47 = vadd.f32 %v16241_v4, %v13214_v59  ;;  %v22015_v59 = vld [vmem:[#allocation22_spill] sm:$0xff]  ;;  %v22016_v6 = vld [vmem:[#allocation53_spill] sm:$0xff] }
 0x52c   : > { %v13693_v44 = vpop.f32.mrf.mxu1  ;;  %v11952_v46 = vadd.f32 %v22015_v59, %v22014_v29  ;;  %v12404_v45 = vadd.f32 %v22016_v6, %v11954_v54  ;;  %v13219_v20 = vadd.f32 %v22017_v7, %v12401_v27  ;;  %v22032_v7 = vld [vmem:[#allocation38_spill] sm:$0xff] }
 0x52d   : > { %v13977_v8 = vmax.f32 %v13945_v40, 0.0  ;;  %v13943_v11 = vadd.f32 %v21453_v21, %v13907_v55  ;;  %v13910_v42 = vmul.f32 %v21446_v19, %v13808_v47  ;;  %v13806_v0 = vadd.f32 %v13693_v44, %v13212_v17  ;;  %v21547_v17 = vpop.f32.mrf.mxu0 }
 0x52e   : > { %v16244_v37 = vpop.f32.mrf.mxu1 }
 0x52f   : > { %14009 = vst [vmem:[%s21466_s17 + $0x30] sm:$0xff] %v13977_v8  ;;  %v13975_v60 = vmax.f32 %v13943_v11, 0.0  ;;  %v13946_v2 = vadd.f32 %v21453_v21, %v13910_v42  ;;  %v13908_v49 = vmul.f32 %v21446_v19, %v13806_v0  ;;  %v13811_v9 = vadd.f32 %v16244_v37, %v13217_v31  ;;  %v22019_v31 = vld [vmem:[#allocation13_spill] sm:$0xff]  ;;  %v22020_v8 = vld [vmem:[#allocation54_spill] sm:$0xff]  ;;  %v22021_v42 = vld [vmem:[#allocation11_spill] sm:$0xff] }
 0x530   : > { %v13706_v10 = vpop.f32.mrf.mxu1  ;;  %v11957_v44 = vadd.f32 %v22019_v31, %v22018_v57  ;;  %v12402_v11 = vadd.f32 %v22020_v8, %v11952_v46  ;;  %v13222_v0 = vadd.f32 %v22021_v42, %v12404_v45  ;;  %v22035_v8 = vld [vmem:[#allocation41_spill] sm:$0xff] }
 0x531   : > { %14007 = vst [vmem:[%s21466_s17 + $0x20] sm:$0xff] %v13975_v60  ;;  %v13978_v16 = vmax.f32 %v13946_v2, 0.0  ;;  %v13944_v24 = vadd.f32 %v21453_v21, %v13908_v49  ;;  %v13913_v56 = vmul.f32 %v21446_v19, %v13811_v9  ;;  %v13809_v51 = vadd.f32 %v13706_v10, %v13215_v30  ;;  %v22022_v2 = vld [vmem:[#allocation36_spill] sm:$0xff]  ;;  %v22023_v49 = vld [vmem:[#allocation47_spill] sm:$0xff] }
 0x532   : > { %v16245_v32 = vpop.f32.mrf.mxu1  ;;  %v11955_v9 = vadd.f32 %v22023_v49, %v22022_v2  ;;  %v12407_v18 = vadd.f32 %v22024_v33, %v11957_v44  ;;  %v22039_v33 = vld [vmem:[#allocation23_spill] sm:$0xff] }
 0x533   : > { %14010 = vst [vmem:[%s21466_s17 + $0x38] sm:$0xff] %v13978_v16  ;;  %v13976_v1 = vmax.f32 %v13944_v24, 0.0  ;;  %v13949_v22 = vadd.f32 %v21453_v21, %v13913_v56  ;;  %v13911_v39 = vmul.f32 %v21446_v19, %v13809_v51  ;;  %v13812_v34 = vadd.f32 %v16245_v32, %v13218_v41  ;;  %v21563_v16 = vpop.f32.mrf.mxu0 }
 0x534   : > { %v13709_v35 = vpop.f32.mrf.mxu1  ;;  %v13220_v41 = vadd.f32 %v21433_v12, %v12402_v11  ;;  %v22036_v11 = vld [vmem:[#allocation25_spill] sm:$0xff] }
 0x535   : > { %14008 = vst [vmem:[%s21466_s17 + $0x28] sm:$0xff] %v13976_v1  ;;  %v13981_v23 = vmax.f32 %v13949_v22, 0.0  ;;  %v13947_v50 = vadd.f32 %v21453_v21, %v13911_v39  ;;  %v13914_v14 = vmul.f32 %v21446_v19, %v13812_v34  ;;  %v13810_v61 = vadd.f32 %v13709_v35, %v13216_v13  ;;  %v22026_v13 = vld [vmem:[#allocation44_spill] sm:$0xff]  ;;  %v22028_v39 = vld [vmem:[#allocation61_spill] sm:$0xff]  ;;  %v21579_v29 = vpop.f32.mrf.mxu0 }
 0x536   : > { %v16248_v4 = vpop.f32.mrf.mxu1  ;;  %v11958_v32 = vadd.f32 %v22026_v13, %v22025_v58  ;;  %v22027_v1 = vld [vmem:[#allocation56_spill] sm:$0xff]  ;;  %v13225_v34 = vadd.f32 %v22028_v39, %v12407_v18  ;;  %v11959_v42 = vadd.f32 %v22036_v11, %v22035_v8  ;;  %v22051_v8 = vld [vmem:[#allocation15_spill] sm:$0xff] }
 0x537   : > { %14013 = vst [vmem:[%s21466_s17 + $0x50] sm:$0xff] %v13981_v23  ;;  %v13979_v40 = vmax.f32 %v13947_v50, 0.0  ;;  %v13950_v55 = vadd.f32 %v21453_v21, %v13914_v14  ;;  %v13912_v47 = vmul.f32 %v21446_v19, %v13810_v61  ;;  %v13815_v36 = vadd.f32 %v16248_v4, %v13221_v63  ;;  %v22030_v63 = vld [vmem:[#allocation16_spill] sm:$0xff]  ;;  %v22031_v23 = vld [vmem:[#allocation57_spill] sm:$0xff] }
 0x538   : > { %v13722_v48 = vpop.f32.mrf.mxu1  ;;  %v12405_v22 = vadd.f32 %v22027_v1, %v11955_v9  ;;  %v11956_v35 = vadd.f32 %v22030_v63, %v22029_v43  ;;  %v12408_v50 = vadd.f32 %v22031_v23, %v11958_v32  ;;  %v22038_v9 = vld [vmem:[#allocation43_spill] sm:$0xff]  ;;  %v22041_v13 = vld [vmem:[#allocation40_spill] sm:$0xff]  ;;  %v22042_v32 = vld [vmem:[#allocation29_spill] sm:$0xff] }
 0x539   : > { %14011 = vst [vmem:[%s21466_s17 + $0x40] sm:$0xff] %v13979_v40  ;;  %v13982_v38 = vmax.f32 %v13950_v55, 0.0  ;;  %v13948_v30 = vadd.f32 %v21453_v21, %v13912_v47  ;;  %v13917_v37 = vmul.f32 %v21446_v19, %v13815_v36  ;;  %v13813_v60 = vadd.f32 %v13722_v48, %v13219_v20  ;;  %v22033_v20 = vld [vmem:[#allocation20_spill] sm:$0xff]  ;;  %v22034_v40 = vld [vmem:[#allocation58_spill] sm:$0xff] }
 0x53a   : > { %v16249_v10 = vpop.f32.mrf.mxu1  ;;  %v13223_v14 = vadd.f32 %v21457_v26, %v12405_v22  ;;  %v11961_v4 = vadd.f32 %v22033_v20, %v22032_v7  ;;  %v12406_v55 = vadd.f32 %v22034_v40, %v11956_v35  ;;  %v13226_v47 = vadd.f32 %v21473_v25, %v12408_v50  ;;  %v22043_v22 = vld [vmem:[#allocation7_spill] sm:$0xff]  ;;  %v22044_v43 = vld [vmem:[#allocation42_spill] sm:$0xff]  ;;  %v22045_v63 = vld [vmem:[#allocation48_spill] sm:$0xff] }
 0x53b   : > { %14014 = vst [vmem:[%s21466_s17 + $0x58] sm:$0xff] %v13982_v38  ;;  %v13980_v24 = vmax.f32 %v13948_v30, 0.0  ;;  %v13953_v56 = vadd.f32 %v21453_v21, %v13917_v37  ;;  %v13915_v51 = vmul.f32 %v21446_v19, %v13813_v60  ;;  %v13816_v3 = vadd.f32 %v16249_v10, %v13222_v0  ;;  %v22037_v0 = vld [vmem:[#allocation59_spill] sm:$0xff]  ;;  %v21595_v37 = vpop.f32.mrf.mxu0  ;;  %v22046_v23 = vld [vmem:[#allocation6_spill] sm:$0xff] }
 0x53c   : > { %v13725_v5 = vpop.f32.mrf.mxu1  ;;  %v12411_v48 = vadd.f32 %v22037_v0, %v11961_v4  ;;  %v13224_v38 = vadd.f32 %v21488_v53, %v12406_v55  ;;  %v11962_v18 = vadd.f32 %v22039_v33, %v22038_v9  ;;  %v11960_v1 = vadd.f32 %v22042_v32, %v22041_v13  ;;  %v22048_v7 = vld [vmem:[#allocation30_spill] sm:$0xff]  ;;  %v22049_v4 = vld [vmem:[#allocation31_spill] sm:$0xff]  ;;  %v22055_v33 = vld [vmem:[#allocation8_spill] sm:$0xff] }
 0x53d   : > { %14012 = vst [vmem:[%s21466_s17 + $0x48] sm:$0xff] %v13980_v24  ;;  %v13985_v12 = vmax.f32 %v13953_v56, 0.0  ;;  %v13951_v54 = vadd.f32 %v21453_v21, %v13915_v51  ;;  %v13918_v28 = vmul.f32 %v21446_v19, %v13816_v3  ;;  %v13814_v27 = vadd.f32 %v13725_v5, %v13220_v41  ;;  %v22040_v41 = vld [vmem:[#allocation5_spill] sm:$0xff] }
 0x53e   : > { %v16252_v61 = vpop.f32.mrf.mxu1  ;;  %v12409_v10 = vadd.f32 %v22040_v41, %v11959_v42  ;;  %v13229_v24 = vadd.f32 %v21501_v15, %v12411_v48  ;;  %v12412_v39 = vadd.f32 %v22043_v22, %v11962_v18  ;;  %v11965_v35 = vadd.f32 %v22045_v63, %v22044_v43  ;;  %v22052_v42 = vld [vmem:[#allocation26_spill] sm:$0xff]  ;;  %v22058_v32 = vld [vmem:[#allocation33_spill] sm:$0xff]  ;;  %v22061_v43 = vld [vmem:[#allocation35_spill] sm:$0xff] }
 0x53f   : > { %14017 = vst [vmem:[%s21466_s17 + $0x70] sm:$0xff] %v13985_v12  ;;  %v13983_v59 = vmax.f32 %v13951_v54, 0.0  ;;  %v13954_v46 = vadd.f32 %v21453_v21, %v13918_v28  ;;  %v13916_v6 = vmul.f32 %v21446_v19, %v13814_v27  ;;  %v13819_v45 = vadd.f32 %v16252_v61, %v13225_v34  ;;  %v13179_v12 = vpop.f32.mrf.mxu0 }
 0x540   : > { %v13738_v36 = vpop.f32.mrf.mxu1  ;;  %v13227_v34 = vadd.f32 %v21515_v52, %v12409_v10  ;;  %v12410_v50 = vadd.f32 %v22046_v23, %v11960_v1  ;;  %v12415_v40 = vadd.f32 %v22049_v4, %v11965_v35 }
 0x541   : > { %14015 = vst [vmem:[%s21466_s17 + $0x60] sm:$0xff] %v13983_v59  ;;  %v13986_v26 = vmax.f32 %v13954_v46, 0.0  ;;  %v13952_v57 = vadd.f32 %v21453_v21, %v13916_v6  ;;  %v13921_v31 = vmul.f32 %v21446_v19, %v13819_v45  ;;  %v13817_v44 = vadd.f32 %v13738_v36, %v13223_v14  ;;  %v22047_v45 = vld [vmem:[#allocation45_spill] sm:$0xff]  ;;  %v16216_v36 = vpop.f32.mrf.mxu0 }
 0x542   : > { %v16253_v30 = vpop.f32.mrf.mxu1  ;;  %v13230_v14 = vadd.f32 %v21531_v62, %v12412_v39  ;;  %v11963_v20 = vadd.f32 %v22048_v7, %v22047_v45  ;;  %v13228_v55 = vadd.f32 %v21547_v17, %v12410_v50  ;;  %v13233_v48 = vadd.f32 %v21563_v16, %v12415_v40  ;;  %v22064_v45 = vld [vmem:[#allocation27_spill] sm:$0xff] }
 0x543   : > { %14018 = vst [vmem:[%s21466_s17 + $0x78] sm:$0xff] %v13986_v26  ;;  %v13984_v25 = vmax.f32 %v13952_v57, 0.0  ;;  %v13957_v60 = vadd.f32 %v21453_v21, %v13921_v31  ;;  %v13919_v2 = vmul.f32 %v21446_v19, %v13817_v44  ;;  %v13820_v49 = vadd.f32 %v16253_v30, %v13226_v47  ;;  %v22050_v44 = vld [vmem:[#allocation19_spill] sm:$0xff] }
 0x544   : > { %v13741_v56 = vpop.f32.mrf.mxu1  ;;  %v11966_v11 = vadd.f32 %v22051_v8, %v22050_v44  ;;  %v12413_v0 = vadd.f32 %v22052_v42, %v11963_v20 }
 0x545   : > { %14016 = vst [vmem:[%s21466_s17 + $0x68] sm:$0xff] %v13984_v25  ;;  %v13989_v53 = vmax.f32 %v13957_v60, 0.0  ;;  %v13955_v51 = vadd.f32 %v21453_v21, %v13919_v2  ;;  %v13922_v3 = vmul.f32 %v21446_v19, %v13820_v49  ;;  %v13818_v58 = vadd.f32 %v13741_v56, %v13224_v38  ;;  %v22053_v2 = vld [vmem:[#allocation21_spill] sm:$0xff]  ;;  %v22054_v49 = vld [vmem:[#allocation4_spill] sm:$0xff] }
 0x546   : > { %v16256_v5 = vpop.f32.mrf.mxu1  ;;  %v11964_v9 = vadd.f32 %v22054_v49, %v22053_v2  ;;  %v12416_v18 = vadd.f32 %v22055_v33, %v11966_v11  ;;  %v13231_v41 = vadd.f32 %v21579_v29, %v12413_v0 }
 0x547   : > { %14021 = vst [vmem:[%s21466_s17 + $0x90] sm:$0xff] %v13989_v53  ;;  %v13987_v15 = vmax.f32 %v13955_v51, 0.0  ;;  %v13958_v54 = vadd.f32 %v21453_v21, %v13922_v3  ;;  %v13920_v28 = vmul.f32 %v21446_v19, %v13818_v58  ;;  %v13823_v27 = vadd.f32 %v16256_v5, %v13229_v24  ;;  %v13192_v24 = vpop.f32.mrf.mxu0  ;;  %v22056_v3 = vld [vmem:[#allocation24_spill] sm:$0xff]  ;;  %v22057_v58 = vld [vmem:[#allocation49_spill] sm:$0xff] }
 0x548   : > { %v13754_v61 = vpop.f32.mrf.mxu1  ;;  %v11969_v13 = vadd.f32 %v22057_v58, %v22056_v3  ;;  %v12414_v1 = vadd.f32 %v22058_v32, %v11964_v9  ;;  %v13234_v22 = vadd.f32 %v21595_v37, %v12416_v18 }
 0x549   : > { %14019 = vst [vmem:[%s21466_s17 + $0x80] sm:$0xff] %v13987_v15  ;;  %v13990_v52 = vmax.f32 %v13958_v54, 0.0  ;;  %v13956_v59 = vadd.f32 %v21453_v21, %v13920_v28  ;;  %v13925_v46 = vmul.f32 %v21446_v19, %v13823_v27  ;;  %v13821_v6 = vadd.f32 %v13754_v61, %v13227_v34  ;;  %v22059_v54 = vld [vmem:[#allocation46_spill] sm:$0xff]  ;;  %v16217_v50 = vpop.f32.mrf.mxu0 }
 0x54a   : > { %v16257_v47 = vpop.f32.mrf.mxu1  ;;  %v22060_v28 = vld [vmem:[#allocation50_spill] sm:$0xff]  ;;  %v12419_v63 = vadd.f32 %v22061_v43, %v11969_v13  ;;  %v13232_v35 = vadd.f32 %v13179_v12, %v12414_v1 }
 0x54b   : > { %14022 = vst [vmem:[%s21466_s17 + $0x98] sm:$0xff] %v13990_v52  ;;  %v13988_v62 = vmax.f32 %v13956_v59, 0.0  ;;  %v13961_v26 = vadd.f32 %v21453_v21, %v13925_v46  ;;  %v13923_v57 = vmul.f32 %v21446_v19, %v13821_v6  ;;  %v13824_v31 = vadd.f32 %v16257_v47, %v13230_v14  ;;  %v22062_v59 = vld [vmem:[#allocation28_spill] sm:$0xff]  ;;  %v22063_v46 = vld [vmem:[#allocation51_spill] sm:$0xff]  ;;  %v13195_v42 = vpop.f32.mrf.mxu0 }
 0x54c   : > { %v13757_v38 = vpop.f32.mrf.mxu1  ;;  %v11967_v27 = vadd.f32 %v22060_v28, %v22059_v54  ;;  %v11970_v6 = vadd.f32 %v22063_v46, %v22062_v59  ;;  %v13237_v20 = vadd.f32 %v16216_v36, %v12419_v63 }
 0x54d   : > { %14020 = vst [vmem:[%s21466_s17 + $0x88] sm:$0xff] %v13988_v62  ;;  %v13993_v17 = vmax.f32 %v13961_v26, 0.0  ;;  %v13959_v30 = vadd.f32 %v21453_v21, %v13923_v57  ;;  %v13926_v25 = vmul.f32 %v21446_v19, %v13824_v31  ;;  %v13822_v60 = vadd.f32 %v13757_v38, %v13228_v55  ;;  %v22065_v62 = vld [vmem:[#allocation12_spill] sm:$0xff]  ;;  %v22067_v31 = vld [vmem:[#allocation37_spill] sm:$0xff] }
 0x54e   : > { %v16260_v10 = vpop.f32.mrf.mxu1  ;;  %v12417_v7 = vadd.f32 %v22064_v45, %v11967_v27  ;;  %v22066_v26 = vld [vmem:[#allocation52_spill] sm:$0xff]  ;;  %v12420_v44 = vadd.f32 %v22067_v31, %v11970_v6 }
 0x54f   : > { %14025 = vst [vmem:[%s21466_s17 + $0xb0] sm:$0xff] %v13993_v17  ;;  %v13991_v16 = vmax.f32 %v13959_v30, 0.0  ;;  %v13962_v56 = vadd.f32 %v21453_v21, %v13926_v25  ;;  %v13924_v53 = vmul.f32 %v21446_v19, %v13822_v60  ;;  %v13827_v51 = vadd.f32 %v16260_v10, %v13233_v48  ;;  %v22068_v17 = vld [vmem:[#allocation60_spill] sm:$0xff] }
 0x550   : > { %v13770_v39 = vpop.f32.mrf.mxu1  ;;  %v11968_v57 = vadd.f32 %v22066_v26, %v22065_v62  ;;  %v13235_v8 = vadd.f32 %v13192_v24, %v12417_v7  ;;  %v13238_v25 = vadd.f32 %v16217_v50, %v12420_v44 }
 0x551   : > { %14023 = vst [vmem:[%s21466_s17 + $0xa0] sm:$0xff] %v13991_v16  ;;  %v13994_v29 = vmax.f32 %v13962_v56, 0.0  ;;  %v13960_v34 = vadd.f32 %v21453_v21, %v13924_v53  ;;  %v13929_v5 = vmul.f32 %v21446_v19, %v13827_v51  ;;  %v13825_v15 = vadd.f32 %v13770_v39, %v13231_v41 }
 0x552   : > { %v16261_v23 = vpop.f32.mrf.mxu1  ;;  %v12418_v30 = vadd.f32 %v22068_v17, %v11968_v57 }
 0x553   : > { %14026 = vst [vmem:[%s21466_s17 + $0xb8] sm:$0xff] %v13994_v29  ;;  %v13992_v14 = vmax.f32 %v13960_v34, 0.0  ;;  %v13965_v37 = vadd.f32 %v21453_v21, %v13929_v5  ;;  %v13927_v61 = vmul.f32 %v21446_v19, %v13825_v15  ;;  %v13828_v52 = vadd.f32 %v16261_v23, %v13234_v22 }
 0x554   : > { %v13773_v4 = vpop.f32.mrf.mxu1  ;;  %v13236_v18 = vadd.f32 %v13195_v42, %v12418_v30 }
 0x555   : > { %14024 = vst [vmem:[%s21466_s17 + $0xa8] sm:$0xff] %v13992_v14  ;;  %v13997_v40 = vmax.f32 %v13965_v37, 0.0  ;;  %v13963_v12 = vadd.f32 %v21453_v21, %v13927_v61  ;;  %v13930_v55 = vmul.f32 %v21446_v19, %v13828_v52  ;;  %v13826_v47 = vadd.f32 %v13773_v4, %v13232_v35 }
 0x556   : > { %v16264_v11 = vpop.f32.mrf.mxu1 }
 0x557   : > { %14029 = vst [vmem:[%s21466_s17 + $0xd0] sm:$0xff] %v13997_v40  ;;  %v13995_v36 = vmax.f32 %v13963_v12, 0.0  ;;  %v13966_v0 = vadd.f32 %v21453_v21, %v13930_v55  ;;  %v13928_v48 = vmul.f32 %v21446_v19, %v13826_v47  ;;  %v13831_v38 = vadd.f32 %v16264_v11, %v13237_v20 }
 0x558   : > { %v13786_v60 = vpop.f32.mrf.mxu1 }
 0x559   : > { %14027 = vst [vmem:[%s21466_s17 + $0xc0] sm:$0xff] %v13995_v36  ;;  %v13998_v2 = vmax.f32 %v13966_v0, 0.0  ;;  %v13964_v49 = vadd.f32 %v21453_v21, %v13928_v48  ;;  %v13933_v9 = vmul.f32 %v21446_v19, %v13831_v38  ;;  %v13829_v33 = vadd.f32 %v13786_v60, %v13235_v8 }
 0x55a   : > { %v16265_v41 = vpop.f32.mrf.mxu1 }
 0x55b   : > { %14030 = vst [vmem:[%s21466_s17 + $0xd8] sm:$0xff] %v13998_v2  ;;  %v13996_v10 = vmax.f32 %v13964_v49, 0.0  ;;  %v13969_v24 = vadd.f32 %v21453_v21, %v13933_v9  ;;  %v13931_v16 = vmul.f32 %v21446_v19, %v13829_v33  ;;  %v13832_v56 = vadd.f32 %v16265_v41, %v13238_v25 }
 0x55c   : > { %v13789_v53 = vpop.f32.mrf.mxu1 }
 0x55d   : > { %14028 = vst [vmem:[%s21466_s17 + $0xc8] sm:$0xff] %v13996_v10  ;;  %v14001_v51 = vmax.f32 %v13969_v24, 0.0  ;;  %v13967_v3 = vadd.f32 %v21453_v21, %v13931_v16  ;;  %v13934_v58 = vmul.f32 %v21446_v19, %v13832_v56  ;;  %v13830_v13 = vadd.f32 %v13789_v53, %v13236_v18 }
 0x55f   : > { %14033 = vst [vmem:[%s21466_s17 + $0xf0] sm:$0xff] %v14001_v51  ;;  %v13999_v32 = vmax.f32 %v13967_v3, 0.0  ;;  %v13970_v1 = vadd.f32 %v21453_v21, %v13934_v58  ;;  %v13932_v22 = vmul.f32 %v21446_v19, %v13830_v13 }
 0x561   : > { %14031 = vst [vmem:[%s21466_s17 + $0xe0] sm:$0xff] %v13999_v32  ;;  %v14002_v39 = vmax.f32 %v13970_v1, 0.0  ;;  %v13968_v29 = vadd.f32 %v21453_v21, %v13932_v22 }
 0x563   : > { %14034 = vst [vmem:[%s21466_s17 + $0xf8] sm:$0xff] %v14002_v39  ;;  %v14000_v34 = vmax.f32 %v13968_v29, 0.0 }
 0x565   : > { %14032 = vst [vmem:[%s21466_s17 + $0xe8] sm:$0xff] %v14000_v34 }
 0x566 PF: > { %s16_s21 = sadd.s32 1, %s16528_s21  }
 0x567   : > { %p13_p4 = scmp.ge.s32.totalorder %s16_s21, 4  }
 0x569   :  { %15 = sbr.rel (!%p13_p4) target bundleno = 1 (0x1), region = 95 }

</bundles_post_ra>
